<compile_context>
chip_gen: v5e
topology: v5e:2x2
jax: 0.10.0
libtpu: 0.0.40
codegen_flags: <defaults>
</compile_context>

<pallas_src>
import functools

import jax
import jax.numpy as jnp
from jax.experimental import pallas as pl
from jax.experimental.pallas import tpu as pltpu


# ----------------------------------------------------------------------------
# Fused TransBottleneck kernel (one batch image per grid step)
# ----------------------------------------------------------------------------
def _transbottleneck_kernel(x_ref, m_ref, w1_ref, b1_ref, w2_ref, b2_ref,
                            w3_ref, b3_ref, o_ref, *, H, W):
    N = H * W
    x = x_ref[0]                                      # (N, Cin) f32, channels on lanes

    # ---- conv1 (1x1) + bn1 + relu: one MXU matmul over channels.
    #      BN scale already folded into w1; bias + ReLU fused as epilogue. ----
    t = jnp.dot(x, w1_ref[...], preferred_element_type=jnp.float32)
    t = jnp.maximum(t + b1_ref[...], 0.0)

    def shift_rows(v, off):
        # out[i] = v[(i + off) % N] for a static Python offset (row rotation).
        off = off % N
        if off == 0:
            return v
        return jnp.concatenate([v[off:], v[:off]], axis=0)

    def conv3x3(inp, w_flat):
        # 3x3 "same" conv as a single im2col matmul: build (N, 9*C) columns from
        # 9 row-shifted copies of the flattened feature map, zeroing taps that
        # fall outside the image with precomputed (N,1) masks, then one fat
        # MXU matmul with contraction width 9*C.
        patches = []
        for dy in range(3):
            for dx in range(3):
                if dy == 1 and dx == 1:               # centre tap: no shift, no mask
                    patches.append(inp)
                    continue
                off = (dy - 1) * W + (dx - 1)
                tap = dy * 3 + dx
                patches.append(shift_rows(inp, off) * m_ref[tap])
        cols = jnp.concatenate(patches, axis=1)       # (N, 9*C)
        return jnp.dot(cols, w_flat, preferred_element_type=jnp.float32)

    # ---- conv2 (3x3, pad 1) + bn2 + relu ----
    t = jnp.maximum(conv3x3(t, w2_ref[...]) + b2_ref[...], 0.0)

    # ---- conv3 (3x3, pad 1) + bn3 + identity residual + relu ----
    t = conv3x3(t, w3_ref[...]) + b3_ref[...]
    o_ref[0] = jnp.maximum(t + x, 0.0).astype(o_ref.dtype)


def _make_tap_masks(H, W):
    """(9, H*W, 1) f32 validity masks: mask[dy*3+dx, n] = 1 iff the 3x3 tap
    (dy-1, dx-1) of flattened output position n lies inside the image."""
    h = jnp.arange(H)[:, None]
    w = jnp.arange(W)[None, :]
    masks = []
    for dy in range(3):
        for dx in range(3):
            valid = ((h + dy - 1 >= 0) & (h + dy - 1 < H) &
                     (w + dx - 1 >= 0) & (w + dx - 1 < W))
            masks.append(valid.reshape(H * W, 1))
    return jnp.stack(masks, 0).astype(jnp.float32)


# ----------------------------------------------------------------------------
# Module wrapper
# ----------------------------------------------------------------------------
class TransBottleneckPallas:
    """TransBottleneck forward (stride=1, upsample=None) with inference-mode BN."""

    def __init__(self, inplanes, planes, *, key, eps=1e-5):
        assert inplanes == planes, "identity-residual path requires inplanes == planes"
        self.inplanes, self.planes, self.eps = inplanes, planes, eps
        k1, k2, k3 = jax.random.split(key, 3)

        def xavier_uniform(k, shape):
            # nn.init.xavier_uniform_ for conv weight (out, in, kh, kw)
            fan_out = shape[0] * shape[2] * shape[3]
            fan_in = shape[1] * shape[2] * shape[3]
            limit = (6.0 / (fan_in + fan_out)) ** 0.5
            return jax.random.uniform(k, shape, jnp.float32, -limit, limit)

        # PyTorch-layout conv weights (kept for the pure-JAX reference).
        self.w1_oihw = xavier_uniform(k1, (planes, inplanes, 1, 1))
        self.w2_oihw = xavier_uniform(k2, (planes, planes, 3, 3))
        self.w3_oihw = xavier_uniform(k3, (planes, planes, 3, 3))

        # BatchNorm params exactly as the PyTorch module initialises them
        # (weight=1, bias=0) with default running stats (mean=0, var=1).
        ones = jnp.ones((planes,), jnp.float32)
        zeros = jnp.zeros((planes,), jnp.float32)
        self.bn1 = (ones, zeros, zeros, ones)   # (gamma, beta, running_mean, running_var)
        self.bn2 = (ones, zeros, zeros, ones)
        self.bn3 = (ones, zeros, zeros, ones)

        # ---- fold inference-mode BN into the conv weights / a per-channel bias ----
        def fold(w_oihw, bn):
            g, b, m, v = bn
            scale = g / jnp.sqrt(v + eps)                       # (Co,)
            bias = b - m * scale                                # (Co,)
            # (Co,Ci,kh,kw) -> (kh,kw,Ci,Co); BN scale folded into the Co axis.
            w = jnp.transpose(w_oihw, (2, 3, 1, 0)) * scale
            return w, bias.reshape(1, -1)

        w1f, self.b1 = fold(self.w1_oihw, self.bn1)
        self.w1f = w1f.reshape(inplanes, planes)                # (Ci, Co)
        w2f, self.b2 = fold(self.w2_oihw, self.bn2)
        self.w2f = w2f.reshape(9 * planes, planes)              # (9*Cp, Cp), (dy,dx,ci)-major
        w3f, self.b3 = fold(self.w3_oihw, self.bn3)
        self.w3f = w3f.reshape(9 * planes, planes)

    def __call__(self, x_nchw):
        B, C, H, W = x_nchw.shape
        assert C == self.inplanes
        Cp = self.planes
        N = H * W

        # NCHW -> (B, N, C): channels-last so channels sit on the lane dim.
        x = jnp.transpose(x_nchw, (0, 2, 3, 1)).reshape(B, N, C)
        masks = _make_tap_masks(H, W)                           # (9, N, 1)

        kern = functools.partial(_transbottleneck_kernel, H=H, W=W)
        out = pl.pallas_call(
            kern,
            out_shape=jax.ShapeDtypeStruct((B, N, Cp), jnp.float32),
            grid=(B,),
            in_specs=[
                pl.BlockSpec((1, N, C), lambda b: (b, 0, 0)),          # x (per image)
                pl.BlockSpec((9, N, 1), lambda b: (0, 0, 0)),          # tap masks
                pl.BlockSpec((C, Cp), lambda b: (0, 0)),               # w1 (BN-folded)
                pl.BlockSpec((1, Cp), lambda b: (0, 0)),               # b1
                pl.BlockSpec((9 * Cp, Cp), lambda b: (0, 0)),          # w2 (BN-folded, im2col)
                pl.BlockSpec((1, Cp), lambda b: (0, 0)),               # b2
                pl.BlockSpec((9 * Cp, Cp), lambda b: (0, 0)),          # w3 (BN-folded, im2col)
                pl.BlockSpec((1, Cp), lambda b: (0, 0)),               # b3
            ],
            out_specs=pl.BlockSpec((1, N, Cp), lambda b: (b, 0, 0)),
            compiler_params=pltpu.CompilerParams(
                dimension_semantics=("parallel",),       # shards batch across v7x's 2 TCs
                vmem_limit_bytes=32 * 1024 * 1024,
            ),
        )(x, masks, self.w1f, self.b1, self.w2f, self.b2, self.w3f, self.b3)

        # (B, N, Cp) -> NCHW
        return jnp.transpose(out.reshape(B, H, W, Cp), (0, 3, 1, 2))


# ----------------------------------------------------------------------------
# Pure-JAX reference mirroring the PyTorch forward (inference-mode BN)
# ----------------------------------------------------------------------------
def reference_forward(mod: TransBottleneckPallas, x):
    eps = mod.eps
    dn = ('NCHW', 'OIHW', 'NCHW')
    hi = jax.lax.Precision.HIGHEST

    def bn(y, params):
        g, b, m, v = params
        inv = g / jnp.sqrt(v + eps)
        return y * inv[None, :, None, None] + (b - m * inv)[None, :, None, None]

    out = jax.lax.conv_general_dilated(x, mod.w1_oihw, (1, 1), 'VALID',
                                       dimension_numbers=dn, precision=hi)
    out = jax.nn.relu(bn(out, mod.bn1))
    out = jax.lax.conv_general_dilated(out, mod.w2_oihw, (1, 1), [(1, 1), (1, 1)],
                                       dimension_numbers=dn, precision=hi)
    out = jax.nn.relu(bn(out, mod.bn2))
    out = jax.lax.conv_general_dilated(out, mod.w3_oihw, (1, 1), [(1, 1), (1, 1)],
                                       dimension_numbers=dn, precision=hi)
    out = bn(out, mod.bn3)
    out = out + x                      # identity residual (upsample=None, stride=1)
    return jax.nn.relu(out)


if __name__ == "__main__":
    key = jax.random.PRNGKey(0)
    k_param, k_input = jax.random.split(key)

    # Small shapes consistent with the module (identity-residual path).
    B, planes, H, W = 2, 32, 16, 16
    mod = TransBottleneckPallas(planes, planes, key=k_param)
    x = jax.random.normal(k_input, (B, planes, H, W), dtype=jnp.float32)

    out = jax.block_until_ready(mod(x))
    ref = jax.block_until_ready(reference_forward(mod, x))

    assert out.shape == (B, planes, H, W), out.shape
    assert jnp.allclose(out, ref, atol=1e-3, rtol=1e-3), (
        "mismatch vs reference, max |diff| = %e" % float(jnp.max(jnp.abs(out - ref))))

    print("KERNEL_OK")
</pallas_src>

<mosaic_0001>
module attributes {stable_mosaic.version = 11 : i64} {
  func.func @_transbottleneck_kernel(%arg0: i32, %arg1: memref<1x256x32xf32, #tpu.memory_space<vmem>>, %arg2: memref<9x256x1xf32, #tpu.memory_space<vmem>>, %arg3: memref<32x32xf32, #tpu.memory_space<vmem>>, %arg4: memref<1x32xf32, #tpu.memory_space<vmem>>, %arg5: memref<288x32xf32, #tpu.memory_space<vmem>>, %arg6: memref<1x32xf32, #tpu.memory_space<vmem>>, %arg7: memref<288x32xf32, #tpu.memory_space<vmem>>, %arg8: memref<1x32xf32, #tpu.memory_space<vmem>>, %arg9: memref<1x256x32xf32, #tpu.memory_space<vmem>>) attributes {dimension_semantics = [#tpu.dimension_semantics<parallel>], iteration_bounds = array<i64: 2>, scalar_prefetch = 0 : i64, scratch_operands = 0 : i64, tpu.core_type = #tpu.core_type<tc>, window_params = [{transform_indices = @transform_0, window_bounds = array<i64: 1, 256, 32>}, {pipeline_mode = #tpu.pipeline_mode<synchronous>, transform_indices = @transform_1, window_bounds = array<i64: 9, 256, 1>}, {pipeline_mode = #tpu.pipeline_mode<synchronous>, transform_indices = @transform_2, window_bounds = array<i64: 32, 32>}, {pipeline_mode = #tpu.pipeline_mode<synchronous>, transform_indices = @transform_3, window_bounds = array<i64: 1, 32>}, {pipeline_mode = #tpu.pipeline_mode<synchronous>, transform_indices = @transform_4, window_bounds = array<i64: 288, 32>}, {pipeline_mode = #tpu.pipeline_mode<synchronous>, transform_indices = @transform_5, window_bounds = array<i64: 1, 32>}, {pipeline_mode = #tpu.pipeline_mode<synchronous>, transform_indices = @transform_6, window_bounds = array<i64: 288, 32>}, {pipeline_mode = #tpu.pipeline_mode<synchronous>, transform_indices = @transform_7, window_bounds = array<i64: 1, 32>}, {transform_indices = @transform_8, window_bounds = array<i64: 1, 256, 32>}]} {
    %c0 = arith.constant 0 : index
    %c0_0 = arith.constant 0 : index
    %c0_1 = arith.constant 0 : index
    %0 = vector.load %arg1[%c0, %c0_0, %c0_1] : memref<1x256x32xf32, #tpu.memory_space<vmem>>, vector<1x256x32xf32>
    %1 = vector.shape_cast %0 : vector<1x256x32xf32> to vector<256x32xf32>
    %c0_2 = arith.constant 0 : index
    %c0_3 = arith.constant 0 : index
    %2 = vector.load %arg3[%c0_2, %c0_3] : memref<32x32xf32, #tpu.memory_space<vmem>>, vector<32x32xf32>
    %cst = arith.constant dense<0.000000e+00> : vector<256x32xf32>
    %3 = tpu.matmul %1, %2, %cst {dimension_numbers = #tpu.dot_dimension_numbers<[1], [0], [0], [1], [0, 0, 1, 1], [], []>} : vector<256x32xf32>, vector<32x32xf32>, vector<256x32xf32> -> vector<256x32xf32>
    %c0_4 = arith.constant 0 : index
    %c0_5 = arith.constant 0 : index
    %4 = vector.load %arg4[%c0_4, %c0_5] : memref<1x32xf32, #tpu.memory_space<vmem>>, vector<1x32xf32>
    %5 = vector.broadcast %4 : vector<1x32xf32> to vector<256x32xf32>
    %6 = arith.addf %3, %5 : vector<256x32xf32>
    %cst_6 = arith.constant 0.000000e+00 : f32
    %7 = vector.broadcast %cst_6 : f32 to vector<256x32xf32>
    %8 = arith.maximumf %6, %7 : vector<256x32xf32>
    %c0_7 = arith.constant 0 : index
    %c0_8 = arith.constant 0 : index
    %9 = vector.load %arg5[%c0_7, %c0_8] : memref<288x32xf32, #tpu.memory_space<vmem>>, vector<288x32xf32>
    %10 = vector.extract_strided_slice %8 {offsets = [239, 0], sizes = [17, 32], strides = [1, 1]} : vector<256x32xf32> to vector<17x32xf32>
    %11 = vector.extract_strided_slice %8 {offsets = [0, 0], sizes = [239, 32], strides = [1, 1]} : vector<256x32xf32> to vector<239x32xf32>
    %12 = tpu.concatenate %10, %11 in 0 : vector<17x32xf32>, vector<239x32xf32> -> vector<256x32xf32>
    %c0_9 = arith.constant 0 : index
    %c0_10 = arith.constant 0 : index
    %c0_11 = arith.constant 0 : index
    %13 = vector.load %arg2[%c0_9, %c0_10, %c0_11] : memref<9x256x1xf32, #tpu.memory_space<vmem>>, vector<1x256x1xf32>
    %14 = vector.shape_cast %13 : vector<1x256x1xf32> to vector<256x1xf32>
    %15 = vector.broadcast %14 : vector<256x1xf32> to vector<256x32xf32>
    %16 = arith.mulf %12, %15 : vector<256x32xf32>
    %17 = vector.extract_strided_slice %8 {offsets = [240, 0], sizes = [16, 32], strides = [1, 1]} : vector<256x32xf32> to vector<16x32xf32>
    %18 = vector.extract_strided_slice %8 {offsets = [0, 0], sizes = [240, 32], strides = [1, 1]} : vector<256x32xf32> to vector<240x32xf32>
    %19 = tpu.concatenate %17, %18 in 0 : vector<16x32xf32>, vector<240x32xf32> -> vector<256x32xf32>
    %c1 = arith.constant 1 : index
    %c0_12 = arith.constant 0 : index
    %c0_13 = arith.constant 0 : index
    %20 = vector.load %arg2[%c1, %c0_12, %c0_13] : memref<9x256x1xf32, #tpu.memory_space<vmem>>, vector<1x256x1xf32>
    %21 = vector.shape_cast %20 : vector<1x256x1xf32> to vector<256x1xf32>
    %22 = vector.broadcast %21 : vector<256x1xf32> to vector<256x32xf32>
    %23 = arith.mulf %19, %22 : vector<256x32xf32>
    %24 = vector.extract_strided_slice %8 {offsets = [241, 0], sizes = [15, 32], strides = [1, 1]} : vector<256x32xf32> to vector<15x32xf32>
    %25 = vector.extract_strided_slice %8 {offsets = [0, 0], sizes = [241, 32], strides = [1, 1]} : vector<256x32xf32> to vector<241x32xf32>
    %26 = tpu.concatenate %24, %25 in 0 : vector<15x32xf32>, vector<241x32xf32> -> vector<256x32xf32>
    %c2 = arith.constant 2 : index
    %c0_14 = arith.constant 0 : index
    %c0_15 = arith.constant 0 : index
    %27 = vector.load %arg2[%c2, %c0_14, %c0_15] : memref<9x256x1xf32, #tpu.memory_space<vmem>>, vector<1x256x1xf32>
    %28 = vector.shape_cast %27 : vector<1x256x1xf32> to vector<256x1xf32>
    %29 = vector.broadcast %28 : vector<256x1xf32> to vector<256x32xf32>
    %30 = arith.mulf %26, %29 : vector<256x32xf32>
    %31 = vector.extract_strided_slice %8 {offsets = [255, 0], sizes = [1, 32], strides = [1, 1]} : vector<256x32xf32> to vector<1x32xf32>
    %32 = vector.extract_strided_slice %8 {offsets = [0, 0], sizes = [255, 32], strides = [1, 1]} : vector<256x32xf32> to vector<255x32xf32>
    %33 = tpu.concatenate %31, %32 in 0 : vector<1x32xf32>, vector<255x32xf32> -> vector<256x32xf32>
    %c3 = arith.constant 3 : index
    %c0_16 = arith.constant 0 : index
    %c0_17 = arith.constant 0 : index
    %34 = vector.load %arg2[%c3, %c0_16, %c0_17] : memref<9x256x1xf32, #tpu.memory_space<vmem>>, vector<1x256x1xf32>
    %35 = vector.shape_cast %34 : vector<1x256x1xf32> to vector<256x1xf32>
    %36 = vector.broadcast %35 : vector<256x1xf32> to vector<256x32xf32>
    %37 = arith.mulf %33, %36 : vector<256x32xf32>
    %38 = vector.extract_strided_slice %8 {offsets = [1, 0], sizes = [255, 32], strides = [1, 1]} : vector<256x32xf32> to vector<255x32xf32>
    %39 = vector.extract_strided_slice %8 {offsets = [0, 0], sizes = [1, 32], strides = [1, 1]} : vector<256x32xf32> to vector<1x32xf32>
    %40 = tpu.concatenate %38, %39 in 0 : vector<255x32xf32>, vector<1x32xf32> -> vector<256x32xf32>
    %c5 = arith.constant 5 : index
    %c0_18 = arith.constant 0 : index
    %c0_19 = arith.constant 0 : index
    %41 = vector.load %arg2[%c5, %c0_18, %c0_19] : memref<9x256x1xf32, #tpu.memory_space<vmem>>, vector<1x256x1xf32>
    %42 = vector.shape_cast %41 : vector<1x256x1xf32> to vector<256x1xf32>
    %43 = vector.broadcast %42 : vector<256x1xf32> to vector<256x32xf32>
    %44 = arith.mulf %40, %43 : vector<256x32xf32>
    %45 = vector.extract_strided_slice %8 {offsets = [15, 0], sizes = [241, 32], strides = [1, 1]} : vector<256x32xf32> to vector<241x32xf32>
    %46 = vector.extract_strided_slice %8 {offsets = [0, 0], sizes = [15, 32], strides = [1, 1]} : vector<256x32xf32> to vector<15x32xf32>
    %47 = tpu.concatenate %45, %46 in 0 : vector<241x32xf32>, vector<15x32xf32> -> vector<256x32xf32>
    %c6 = arith.constant 6 : index
    %c0_20 = arith.constant 0 : index
    %c0_21 = arith.constant 0 : index
    %48 = vector.load %arg2[%c6, %c0_20, %c0_21] : memref<9x256x1xf32, #tpu.memory_space<vmem>>, vector<1x256x1xf32>
    %49 = vector.shape_cast %48 : vector<1x256x1xf32> to vector<256x1xf32>
    %50 = vector.broadcast %49 : vector<256x1xf32> to vector<256x32xf32>
    %51 = arith.mulf %47, %50 : vector<256x32xf32>
    %52 = vector.extract_strided_slice %8 {offsets = [16, 0], sizes = [240, 32], strides = [1, 1]} : vector<256x32xf32> to vector<240x32xf32>
    %53 = vector.extract_strided_slice %8 {offsets = [0, 0], sizes = [16, 32], strides = [1, 1]} : vector<256x32xf32> to vector<16x32xf32>
    %54 = tpu.concatenate %52, %53 in 0 : vector<240x32xf32>, vector<16x32xf32> -> vector<256x32xf32>
    %c7 = arith.constant 7 : index
    %c0_22 = arith.constant 0 : index
    %c0_23 = arith.constant 0 : index
    %55 = vector.load %arg2[%c7, %c0_22, %c0_23] : memref<9x256x1xf32, #tpu.memory_space<vmem>>, vector<1x256x1xf32>
    %56 = vector.shape_cast %55 : vector<1x256x1xf32> to vector<256x1xf32>
    %57 = vector.broadcast %56 : vector<256x1xf32> to vector<256x32xf32>
    %58 = arith.mulf %54, %57 : vector<256x32xf32>
    %59 = vector.extract_strided_slice %8 {offsets = [17, 0], sizes = [239, 32], strides = [1, 1]} : vector<256x32xf32> to vector<239x32xf32>
    %60 = vector.extract_strided_slice %8 {offsets = [0, 0], sizes = [17, 32], strides = [1, 1]} : vector<256x32xf32> to vector<17x32xf32>
    %61 = tpu.concatenate %59, %60 in 0 : vector<239x32xf32>, vector<17x32xf32> -> vector<256x32xf32>
    %c8 = arith.constant 8 : index
    %c0_24 = arith.constant 0 : index
    %c0_25 = arith.constant 0 : index
    %62 = vector.load %arg2[%c8, %c0_24, %c0_25] : memref<9x256x1xf32, #tpu.memory_space<vmem>>, vector<1x256x1xf32>
    %63 = vector.shape_cast %62 : vector<1x256x1xf32> to vector<256x1xf32>
    %64 = vector.broadcast %63 : vector<256x1xf32> to vector<256x32xf32>
    %65 = arith.mulf %61, %64 : vector<256x32xf32>
    %66 = tpu.concatenate %16, %23, %30, %37, %8, %44, %51, %58, %65 in 1 : vector<256x32xf32>, vector<256x32xf32>, vector<256x32xf32>, vector<256x32xf32>, vector<256x32xf32>, vector<256x32xf32>, vector<256x32xf32>, vector<256x32xf32>, vector<256x32xf32> -> vector<256x288xf32>
    %cst_26 = arith.constant dense<0.000000e+00> : vector<256x32xf32>
    %67 = tpu.matmul %66, %9, %cst_26 {dimension_numbers = #tpu.dot_dimension_numbers<[1], [0], [0], [1], [0, 0, 1, 1], [], []>} : vector<256x288xf32>, vector<288x32xf32>, vector<256x32xf32> -> vector<256x32xf32>
    %c0_27 = arith.constant 0 : index
    %c0_28 = arith.constant 0 : index
    %68 = vector.load %arg6[%c0_27, %c0_28] : memref<1x32xf32, #tpu.memory_space<vmem>>, vector<1x32xf32>
    %69 = vector.broadcast %68 : vector<1x32xf32> to vector<256x32xf32>
    %70 = arith.addf %67, %69 : vector<256x32xf32>
    %cst_29 = arith.constant 0.000000e+00 : f32
    %71 = vector.broadcast %cst_29 : f32 to vector<256x32xf32>
    %72 = arith.maximumf %70, %71 : vector<256x32xf32>
    %c0_30 = arith.constant 0 : index
    %c0_31 = arith.constant 0 : index
    %73 = vector.load %arg7[%c0_30, %c0_31] : memref<288x32xf32, #tpu.memory_space<vmem>>, vector<288x32xf32>
    %74 = vector.extract_strided_slice %72 {offsets = [239, 0], sizes = [17, 32], strides = [1, 1]} : vector<256x32xf32> to vector<17x32xf32>
    %75 = vector.extract_strided_slice %72 {offsets = [0, 0], sizes = [239, 32], strides = [1, 1]} : vector<256x32xf32> to vector<239x32xf32>
    %76 = tpu.concatenate %74, %75 in 0 : vector<17x32xf32>, vector<239x32xf32> -> vector<256x32xf32>
    %c0_32 = arith.constant 0 : index
    %c0_33 = arith.constant 0 : index
    %c0_34 = arith.constant 0 : index
    %77 = vector.load %arg2[%c0_32, %c0_33, %c0_34] : memref<9x256x1xf32, #tpu.memory_space<vmem>>, vector<1x256x1xf32>
    %78 = vector.shape_cast %77 : vector<1x256x1xf32> to vector<256x1xf32>
    %79 = vector.broadcast %78 : vector<256x1xf32> to vector<256x32xf32>
    %80 = arith.mulf %76, %79 : vector<256x32xf32>
    %81 = vector.extract_strided_slice %72 {offsets = [240, 0], sizes = [16, 32], strides = [1, 1]} : vector<256x32xf32> to vector<16x32xf32>
    %82 = vector.extract_strided_slice %72 {offsets = [0, 0], sizes = [240, 32], strides = [1, 1]} : vector<256x32xf32> to vector<240x32xf32>
    %83 = tpu.concatenate %81, %82 in 0 : vector<16x32xf32>, vector<240x32xf32> -> vector<256x32xf32>
    %c1_35 = arith.constant 1 : index
    %c0_36 = arith.constant 0 : index
    %c0_37 = arith.constant 0 : index
    %84 = vector.load %arg2[%c1_35, %c0_36, %c0_37] : memref<9x256x1xf32, #tpu.memory_space<vmem>>, vector<1x256x1xf32>
    %85 = vector.shape_cast %84 : vector<1x256x1xf32> to vector<256x1xf32>
    %86 = vector.broadcast %85 : vector<256x1xf32> to vector<256x32xf32>
    %87 = arith.mulf %83, %86 : vector<256x32xf32>
    %88 = vector.extract_strided_slice %72 {offsets = [241, 0], sizes = [15, 32], strides = [1, 1]} : vector<256x32xf32> to vector<15x32xf32>
    %89 = vector.extract_strided_slice %72 {offsets = [0, 0], sizes = [241, 32], strides = [1, 1]} : vector<256x32xf32> to vector<241x32xf32>
    %90 = tpu.concatenate %88, %89 in 0 : vector<15x32xf32>, vector<241x32xf32> -> vector<256x32xf32>
    %c2_38 = arith.constant 2 : index
    %c0_39 = arith.constant 0 : index
    %c0_40 = arith.constant 0 : index
    %91 = vector.load %arg2[%c2_38, %c0_39, %c0_40] : memref<9x256x1xf32, #tpu.memory_space<vmem>>, vector<1x256x1xf32>
    %92 = vector.shape_cast %91 : vector<1x256x1xf32> to vector<256x1xf32>
    %93 = vector.broadcast %92 : vector<256x1xf32> to vector<256x32xf32>
    %94 = arith.mulf %90, %93 : vector<256x32xf32>
    %95 = vector.extract_strided_slice %72 {offsets = [255, 0], sizes = [1, 32], strides = [1, 1]} : vector<256x32xf32> to vector<1x32xf32>
    %96 = vector.extract_strided_slice %72 {offsets = [0, 0], sizes = [255, 32], strides = [1, 1]} : vector<256x32xf32> to vector<255x32xf32>
    %97 = tpu.concatenate %95, %96 in 0 : vector<1x32xf32>, vector<255x32xf32> -> vector<256x32xf32>
    %c3_41 = arith.constant 3 : index
    %c0_42 = arith.constant 0 : index
    %c0_43 = arith.constant 0 : index
    %98 = vector.load %arg2[%c3_41, %c0_42, %c0_43] : memref<9x256x1xf32, #tpu.memory_space<vmem>>, vector<1x256x1xf32>
    %99 = vector.shape_cast %98 : vector<1x256x1xf32> to vector<256x1xf32>
    %100 = vector.broadcast %99 : vector<256x1xf32> to vector<256x32xf32>
    %101 = arith.mulf %97, %100 : vector<256x32xf32>
    %102 = vector.extract_strided_slice %72 {offsets = [1, 0], sizes = [255, 32], strides = [1, 1]} : vector<256x32xf32> to vector<255x32xf32>
    %103 = vector.extract_strided_slice %72 {offsets = [0, 0], sizes = [1, 32], strides = [1, 1]} : vector<256x32xf32> to vector<1x32xf32>
    %104 = tpu.concatenate %102, %103 in 0 : vector<255x32xf32>, vector<1x32xf32> -> vector<256x32xf32>
    %c5_44 = arith.constant 5 : index
    %c0_45 = arith.constant 0 : index
    %c0_46 = arith.constant 0 : index
    %105 = vector.load %arg2[%c5_44, %c0_45, %c0_46] : memref<9x256x1xf32, #tpu.memory_space<vmem>>, vector<1x256x1xf32>
    %106 = vector.shape_cast %105 : vector<1x256x1xf32> to vector<256x1xf32>
    %107 = vector.broadcast %106 : vector<256x1xf32> to vector<256x32xf32>
    %108 = arith.mulf %104, %107 : vector<256x32xf32>
    %109 = vector.extract_strided_slice %72 {offsets = [15, 0], sizes = [241, 32], strides = [1, 1]} : vector<256x32xf32> to vector<241x32xf32>
    %110 = vector.extract_strided_slice %72 {offsets = [0, 0], sizes = [15, 32], strides = [1, 1]} : vector<256x32xf32> to vector<15x32xf32>
    %111 = tpu.concatenate %109, %110 in 0 : vector<241x32xf32>, vector<15x32xf32> -> vector<256x32xf32>
    %c6_47 = arith.constant 6 : index
    %c0_48 = arith.constant 0 : index
    %c0_49 = arith.constant 0 : index
    %112 = vector.load %arg2[%c6_47, %c0_48, %c0_49] : memref<9x256x1xf32, #tpu.memory_space<vmem>>, vector<1x256x1xf32>
    %113 = vector.shape_cast %112 : vector<1x256x1xf32> to vector<256x1xf32>
    %114 = vector.broadcast %113 : vector<256x1xf32> to vector<256x32xf32>
    %115 = arith.mulf %111, %114 : vector<256x32xf32>
    %116 = vector.extract_strided_slice %72 {offsets = [16, 0], sizes = [240, 32], strides = [1, 1]} : vector<256x32xf32> to vector<240x32xf32>
    %117 = vector.extract_strided_slice %72 {offsets = [0, 0], sizes = [16, 32], strides = [1, 1]} : vector<256x32xf32> to vector<16x32xf32>
    %118 = tpu.concatenate %116, %117 in 0 : vector<240x32xf32>, vector<16x32xf32> -> vector<256x32xf32>
    %c7_50 = arith.constant 7 : index
    %c0_51 = arith.constant 0 : index
    %c0_52 = arith.constant 0 : index
    %119 = vector.load %arg2[%c7_50, %c0_51, %c0_52] : memref<9x256x1xf32, #tpu.memory_space<vmem>>, vector<1x256x1xf32>
    %120 = vector.shape_cast %119 : vector<1x256x1xf32> to vector<256x1xf32>
    %121 = vector.broadcast %120 : vector<256x1xf32> to vector<256x32xf32>
    %122 = arith.mulf %118, %121 : vector<256x32xf32>
    %123 = vector.extract_strided_slice %72 {offsets = [17, 0], sizes = [239, 32], strides = [1, 1]} : vector<256x32xf32> to vector<239x32xf32>
    %124 = vector.extract_strided_slice %72 {offsets = [0, 0], sizes = [17, 32], strides = [1, 1]} : vector<256x32xf32> to vector<17x32xf32>
    %125 = tpu.concatenate %123, %124 in 0 : vector<239x32xf32>, vector<17x32xf32> -> vector<256x32xf32>
    %c8_53 = arith.constant 8 : index
    %c0_54 = arith.constant 0 : index
    %c0_55 = arith.constant 0 : index
    %126 = vector.load %arg2[%c8_53, %c0_54, %c0_55] : memref<9x256x1xf32, #tpu.memory_space<vmem>>, vector<1x256x1xf32>
    %127 = vector.shape_cast %126 : vector<1x256x1xf32> to vector<256x1xf32>
    %128 = vector.broadcast %127 : vector<256x1xf32> to vector<256x32xf32>
    %129 = arith.mulf %125, %128 : vector<256x32xf32>
    %130 = tpu.concatenate %80, %87, %94, %101, %72, %108, %115, %122, %129 in 1 : vector<256x32xf32>, vector<256x32xf32>, vector<256x32xf32>, vector<256x32xf32>, vector<256x32xf32>, vector<256x32xf32>, vector<256x32xf32>, vector<256x32xf32>, vector<256x32xf32> -> vector<256x288xf32>
    %cst_56 = arith.constant dense<0.000000e+00> : vector<256x32xf32>
    %131 = tpu.matmul %130, %73, %cst_56 {dimension_numbers = #tpu.dot_dimension_numbers<[1], [0], [0], [1], [0, 0, 1, 1], [], []>} : vector<256x288xf32>, vector<288x32xf32>, vector<256x32xf32> -> vector<256x32xf32>
    %c0_57 = arith.constant 0 : index
    %c0_58 = arith.constant 0 : index
    %132 = vector.load %arg8[%c0_57, %c0_58] : memref<1x32xf32, #tpu.memory_space<vmem>>, vector<1x32xf32>
    %133 = vector.broadcast %132 : vector<1x32xf32> to vector<256x32xf32>
    %134 = arith.addf %131, %133 : vector<256x32xf32>
    %135 = arith.addf %134, %1 : vector<256x32xf32>
    %cst_59 = arith.constant 0.000000e+00 : f32
    %136 = vector.broadcast %cst_59 : f32 to vector<256x32xf32>
    %137 = arith.maximumf %135, %136 : vector<256x32xf32>
    %c0_60 = arith.constant 0 : index
    %c0_61 = arith.constant 0 : index
    %c0_62 = arith.constant 0 : index
    %138 = vector.load %arg9[%c0_60, %c0_61, %c0_62] : memref<1x256x32xf32, #tpu.memory_space<vmem>>, vector<1x256x32xf32>
    %139 = vector.shape_cast %138 : vector<1x256x32xf32> to vector<256x32xf32>
    %140 = vector.shape_cast %137 : vector<256x32xf32> to vector<1x256x32xf32>
    tpu.vector_store %arg9[%c0_60, %c0_61, %c0_62], %140 {strides = array<i32>} : memref<1x256x32xf32, #tpu.memory_space<vmem>>, vector<1x256x32xf32>,
    return
  }
  func.func @transform_0(%arg0: i32) -> (i32, i32, i32) {
    %c0_i32 = arith.constant 0 : i32
    %c0_i32_0 = arith.constant 0 : i32
    %c0_i32_1 = arith.constant 0 : i32
    return %arg0, %c0_i32, %c0_i32_0 : i32, i32, i32
  }
  func.func @transform_1(%arg0: i32) -> (i32, i32, i32) {
    %c0_i32 = arith.constant 0 : i32
    %c0_i32_0 = arith.constant 0 : i32
    %c0_i32_1 = arith.constant 0 : i32
    %c0_i32_2 = arith.constant 0 : i32
    return %c0_i32, %c0_i32_0, %c0_i32_1 : i32, i32, i32
  }
  func.func @transform_2(%arg0: i32) -> (i32, i32) {
    %c0_i32 = arith.constant 0 : i32
    %c0_i32_0 = arith.constant 0 : i32
    %c0_i32_1 = arith.constant 0 : i32
    return %c0_i32, %c0_i32_0 : i32, i32
  }
  func.func @transform_3(%arg0: i32) -> (i32, i32) {
    %c0_i32 = arith.constant 0 : i32
    %c0_i32_0 = arith.constant 0 : i32
    %c0_i32_1 = arith.constant 0 : i32
    return %c0_i32, %c0_i32_0 : i32, i32
  }
  func.func @transform_4(%arg0: i32) -> (i32, i32) {
    %c0_i32 = arith.constant 0 : i32
    %c0_i32_0 = arith.constant 0 : i32
    %c0_i32_1 = arith.constant 0 : i32
    return %c0_i32, %c0_i32_0 : i32, i32
  }
  func.func @transform_5(%arg0: i32) -> (i32, i32) {
    %c0_i32 = arith.constant 0 : i32
    %c0_i32_0 = arith.constant 0 : i32
    %c0_i32_1 = arith.constant 0 : i32
    return %c0_i32, %c0_i32_0 : i32, i32
  }
  func.func @transform_6(%arg0: i32) -> (i32, i32) {
    %c0_i32 = arith.constant 0 : i32
    %c0_i32_0 = arith.constant 0 : i32
    %c0_i32_1 = arith.constant 0 : i32
    return %c0_i32, %c0_i32_0 : i32, i32
  }
  func.func @transform_7(%arg0: i32) -> (i32, i32) {
    %c0_i32 = arith.constant 0 : i32
    %c0_i32_0 = arith.constant 0 : i32
    %c0_i32_1 = arith.constant 0 : i32
    return %c0_i32, %c0_i32_0 : i32, i32
  }
  func.func @transform_8(%arg0: i32) -> (i32, i32, i32) {
    %c0_i32 = arith.constant 0 : i32
    %c0_i32_0 = arith.constant 0 : i32
    %c0_i32_1 = arith.constant 0 : i32
    return %arg0, %c0_i32, %c0_i32_0 : i32, i32, i32
  }
}

</mosaic_0001>

<bundles_post_ra>
// kernel: tpu_custom_call.1
= control target key start
LH: loop header
LB: loop body
LE: loop exit
PB: predicated region body
PF: predicated region fallthrough
CT: control target
= control target key end

     0   :  { %s7579_s27 = smov 0   ;;  %s12752_s0 = inlined_call_operand.vmem [shape: f32[2,256,32], index: 0, kind: input, shape index: {}]   ;;  %s12753_s1 = inlined_call_operand.vmem [shape: f32[9,256,1], index: 1, kind: input, shape index: {}]   ;;  %s12754_s2 = inlined_call_operand.vmem [shape: f32[32,32], index: 2, kind: input, shape index: {}]   ;;  %s12755_s3 = inlined_call_operand.vmem [shape: f32[1,32], index: 3, kind: input, shape index: {}]   ;;  %s12756_s4 = inlined_call_operand.vmem [shape: f32[288,32], index: 4, kind: input, shape index: {}]   ;;  %s12757_s5 = inlined_call_operand.vmem [shape: f32[1,32], index: 5, kind: input, shape index: {}]   ;;  %s12758_s6 = inlined_call_operand.vmem [shape: f32[288,32], index: 6, kind: input, shape index: {}]   ;;  %s12759_s7 = inlined_call_operand.vmem [shape: f32[1,32], index: 7, kind: input, shape index: {}]   ;;  %s12760_s8 = inlined_call_operand.vmem [shape: f32[2,256,32], index: 8, kind: output, shape index: {}]  }
   0x1 LB: > { %s6152_s28 = sadd.s32 4294967295, %s7528_s27   ;;  %p6156_p0 = scmp.ge.s32.totalorder %s7528_s27, 1  ;;  %s7528_s27 = sphi %s7579_s27, %s18_s27  }
   0x2   : > { %p262_p1 = scmp.lt.s32.totalorder %s7528_s27, 3 }
   0x4   : > { %p263_p2 = pnand %p6156_p0, %p262_p1 }
   0x6   : > { %266 = sbr.rel (%p263_p2) target bundleno = 1974 (0x7b6), region = 52 }
   0xb   : > { %v341_v0 = vld [vmem:[%s12754_s2 + $0x18] sm:$0xff]  ;;  %v758_v1 = vld [vmem:[%s12753_s1 + $0x20] sm:$0xff]  ;;  %p296_p3 = scmp.lt.s32.totalorder %s6152_s28, 1  ;;  %v7530_v2 = vmov 0   ;;  %v756_v3 = vld [vmem:[%s12753_s1 + $0x10] sm:$0xff]  ;;  %vm346_vm0 = vcmask 261120  }
   0xc   : > { %6527 = vset.pattern.permute.xlu2 %v7530_v2  ;;  %6526 = vset.pattern.permute.xlu1 %v7530_v2  ;;  %v754_v4 = vld [vmem:[%s12753_s1] sm:$0xff]  ;;  %v340_v5 = vld [vmem:[%s12754_s2 + $0x10] sm:$0xff]  ;;  %v339_v6 = vld [vmem:[%s12754_s2 + $0x8] sm:$0xff]  ;;  %s7531_s9 = smov 32   ;;  %vm1203_vm1 = vcmask 1046528   ;;  %s7532_s18 = smov 64  }
   0xd   : > { %6525 = vset.pattern.permute.xlu0 %v7530_v2  ;;  %455 = vmatpush.msra.mxu0 %v341_v0  ;;  %s14390_s28 = smov (!%p296_p3, %s6152_s28), 1  ;;  %v338_v7 = vld [vmem:[%s12754_s2] sm:$0xff]  ;;  %v759_v10 = vld [vmem:[%s12753_s1 + $0x28] sm:$0xff]  ;;  %v757_v11 = vld [vmem:[%s12753_s1 + $0x18] sm:$0xff]  ;;  %vm627_vm2 = vcmask 1040384   ;;  %s7533_s20 = smov 96  }
   0xe   : > { %6485 = vmatpush.msra.mxu2 %v341_v0  ;;  %808 = vperm.xlu2 %6527, %v758_v1   ;;  %s6483_s19 = sshll.u32 %s14390_s28, 8  ;;  %v755_v12 = vld [vmem:[%s12753_s1 + $0x8] sm:$0xff]  ;;  %v762_v15 = vld [vmem:[%s12753_s1 + $0x40] sm:$0xff]  ;;  %v761_v16 = vld [vmem:[%s12753_s1 + $0x38] sm:$0xff]  ;;  %vm3451_vm3 = vcmask 523264   ;;  %vm3484_vm4 = vcmask 785408  }
   0xf   : > { %798 = vperm.xlu1 %6526, %v756_v3   ;;  %788 = vperm.xlu0 %6525, %v754_v4   ;;  %s7613_s22 = scalar_lea.vmem %s12752_s0, %s6483_s19  ;;  %v760_v17 = vld [vmem:[%s12753_s1 + $0x30] sm:$0xff]  ;;  %v765_v20 = vld [vmem:[%s12753_s1 + $0x58] sm:$0xff]  ;;  %v763_v22 = vld [vmem:[%s12753_s1 + $0x48] sm:$0xff]  ;;  %s12470_s15 = scalar_lea.vmem %s12760_s8, %s6483_s19 }
  0x10   : > { %456 = vmatpush.msra.mxu0 %v340_v5  ;;  %6486 = vmatpush.msra.mxu2 %v340_v5  ;;  %v306_v8 = vld [vmem:[%s7613_s22] sm:$0xff]  ;;  %v331_v9 = vld [vmem:[%s7613_s22 + $0xc8] sm:$0xff]  ;;  %v332_v14 = vld [vmem:[%s7613_s22 + $0xd0] sm:$0xff] }
  0x11   : > { %v307_v13 = vld [vmem:[%s7613_s22 + $0x8] sm:$0xff]  ;;  %v308_v18 = vld [vmem:[%s7613_s22 + $0x10] sm:$0xff]  ;;  %v333_v19 = vld [vmem:[%s7613_s22 + $0xd8] sm:$0xff] }
  0x12   : > { %457 = vmatpush.msra.mxu0 %v339_v6  ;;  %6487 = vmatpush.msra.mxu2 %v339_v6  ;;  %v764_v21 = vld [vmem:[%s12753_s1 + $0x50] sm:$0xff]  ;;  %v309_v23 = vld [vmem:[%s7613_s22 + $0x18] sm:$0xff]  ;;  %v334_v24 = vld [vmem:[%s7613_s22 + $0xe0] sm:$0xff] }
  0x13   : > { %v768_v25 = vld [vmem:[%s12753_s1 + $0x70] sm:$0xff]  ;;  %v767_v26 = vld [vmem:[%s12753_s1 + $0x68] sm:$0xff]  ;;  %v766_v27 = vld [vmem:[%s12753_s1 + $0x60] sm:$0xff] }
  0x14   : > { %458 = vmatpush.msra.mxu0 %v338_v7  ;;  %6488 = vmatpush.msra.mxu2 %v338_v7  ;;  %v310_v28 = vld [vmem:[%s7613_s22 + $0x20] sm:$0xff]  ;;  %v335_v29 = vld [vmem:[%s7613_s22 + $0xe8] sm:$0xff]  ;;  %v769_v32 = vld [vmem:[%s12753_s1 + $0x78] sm:$0xff] }
  0x15   : > { %6161 = vmatmul.msk.f32.vlgmr.msra.gmra.mxu0 %vm346_vm0, %v306_v8  ;;  %6186 = vmatmul.msk.f32.vlgmr.msra.gmra.mxu2 %vm346_vm0, %v331_v9  ;;  %v771_v30 = vld [vmem:[%s12753_s1 + $0x88] sm:$0xff]  ;;  %v770_v31 = vld [vmem:[%s12753_s1 + $0x80] sm:$0xff]  ;;  %v336_v34 = vld [vmem:[%s7613_s22 + $0xf0] sm:$0xff] }
  0x16   : > { %813 = vperm.xlu2 %6527, %v759_v10   ;;  %v311_v33 = vld [vmem:[%s7613_s22 + $0x28] sm:$0xff]  ;;  %v774_v35 = vld [vmem:[%s12753_s1 + $0xa0] sm:$0xff]  ;;  %v773_v36 = vld [vmem:[%s12753_s1 + $0x98] sm:$0xff] }
  0x17   : > { %803 = vperm.xlu1 %6526, %v757_v11   ;;  %793 = vperm.xlu0 %6525, %v755_v12   ;;  %v772_v37 = vld [vmem:[%s12753_s1 + $0x90] sm:$0xff]  ;;  %v337_v39 = vld [vmem:[%s7613_s22 + $0xf8] sm:$0xff]  ;;  %v775_v42 = vld [vmem:[%s12753_s1 + $0xa8] sm:$0xff] }
  0x18   : > { %v312_v38 = vld [vmem:[%s7613_s22 + $0x30] sm:$0xff]  ;;  %v777_v40 = vld [vmem:[%s12753_s1 + $0xb8] sm:$0xff]  ;;  %v779_v45 = vld [vmem:[%s12753_s1 + $0xc8] sm:$0xff] }
  0x19   : > { %v776_v41 = vld [vmem:[%s12753_s1 + $0xb0] sm:$0xff]  ;;  %v313_v43 = vld [vmem:[%s7613_s22 + $0x38] sm:$0xff]  ;;  %v778_v46 = vld [vmem:[%s12753_s1 + $0xc0] sm:$0xff] }
  0x1a   : > { %v780_v44 = vld [vmem:[%s12753_s1 + $0xd0] sm:$0xff]  ;;  %v314_v47 = vld [vmem:[%s7613_s22 + $0x40] sm:$0xff]  ;;  %v783_v48 = vld [vmem:[%s12753_s1 + $0xe8] sm:$0xff] }
  0x1b   : > { %v782_v49 = vld [vmem:[%s12753_s1 + $0xe0] sm:$0xff]  ;;  %v781_v50 = vld [vmem:[%s12753_s1 + $0xd8] sm:$0xff]  ;;  %v315_v51 = vld [vmem:[%s7613_s22 + $0x48] sm:$0xff] }
  0x1c   : > { %v6193_v52 = vld [vmem:[%s12753_s1 + $0x100] sm:$0xff]  ;;  %v785_v53 = vld [vmem:[%s12753_s1 + $0xf8] sm:$0xff]  ;;  %v784_v54 = vld [vmem:[%s12753_s1 + $0xf0] sm:$0xff] }
  0x1d   : > { %6162 = vmatmul.msk.f32.gmra.mxu0 %vm346_vm0, %v307_v13  ;;  %6187 = vmatmul.msk.f32.gmra.mxu2 %vm346_vm0, %v332_v14  ;;  %v316_v55 = vld [vmem:[%s7613_s22 + $0x50] sm:$0xff]  ;;  %v6196_v56 = vld [vmem:[%s12753_s1 + $0x118] sm:$0xff]  ;;  %v6194_v58 = vld [vmem:[%s12753_s1 + $0x108] sm:$0xff] }
  0x1e   : > { %828 = vperm.xlu2 %6527, %v762_v15   ;;  %v6195_v57 = vld [vmem:[%s12753_s1 + $0x110] sm:$0xff]  ;;  %v317_v60 = vld [vmem:[%s7613_s22 + $0x58] sm:$0xff]  ;;  %v6198_v62 = vld [vmem:[%s12753_s1 + $0x128] sm:$0xff] }
  0x1f   : > { %823 = vperm.xlu1 %6526, %v761_v16   ;;  %818 = vperm.xlu0 %6525, %v760_v17   ;;  %v6199_v61 = vld [vmem:[%s12753_s1 + $0x130] sm:$0xff]  ;;  %v6197_v63 = vld [vmem:[%s12753_s1 + $0x120] sm:$0xff]  ;;  %v6202_v2 = vld [vmem:[%s12753_s1 + $0x148] sm:$0xff] }
  0x20   : > { %v318_v1 = vld [vmem:[%s7613_s22 + $0x60] sm:$0xff]  ;;  %v6200_v4 = vld [vmem:[%s12753_s1 + $0x138] sm:$0xff]  ;;  %v319_v6 = vld [vmem:[%s7613_s22 + $0x68] sm:$0xff] }
  0x21   : > { %v6201_v3 = vld [vmem:[%s12753_s1 + $0x140] sm:$0xff]  ;;  %v6204_v8 = vld [vmem:[%s12753_s1 + $0x158] sm:$0xff]  ;;  %v6203_v9 = vld [vmem:[%s12753_s1 + $0x150] sm:$0xff] }
  0x22   : > { %v6205_v7 = vld [vmem:[%s12753_s1 + $0x160] sm:$0xff]  ;;  %v320_v13 = vld [vmem:[%s7613_s22 + $0x70] sm:$0xff]  ;;  %v6208_v14 = vld [vmem:[%s12753_s1 + $0x178] sm:$0xff] }
  0x23   : > { %v6207_v15 = vld [vmem:[%s12753_s1 + $0x170] sm:$0xff]  ;;  %v6206_v16 = vld [vmem:[%s12753_s1 + $0x168] sm:$0xff] }
  0x25   : > { %6163 = vmatmul.msk.f32.gmra.mxu0 %vm346_vm0, %v308_v18  ;;  %6188 = vmatmul.msk.f32.gmra.mxu2 %vm346_vm0, %v333_v19 }
  0x26   : > { %843 = vperm.xlu2 %6527, %v765_v20   ;;  %v321_v20 = vld [vmem:[%s7613_s22 + $0x78] sm:$0xff] }
  0x27   : > { %838 = vperm.xlu1 %6526, %v764_v21   ;;  %833 = vperm.xlu0 %6525, %v763_v22   ;;  %v6211_v21 = vld [vmem:[%s12753_s1 + $0x190] sm:$0xff]  ;;  %v6210_v22 = vld [vmem:[%s12753_s1 + $0x188] sm:$0xff] }
  0x2d   : > { %6164 = vmatmul.msk.f32.gmra.mxu0 %vm346_vm0, %v309_v23  ;;  %6189 = vmatmul.msk.f32.gmra.mxu2 %vm346_vm0, %v334_v24  ;;  %v6209_v23 = vld [vmem:[%s12753_s1 + $0x180] sm:$0xff] }
  0x2e   : > { %858 = vperm.xlu2 %6527, %v768_v25  }
  0x2f   : > { %853 = vperm.xlu1 %6526, %v767_v26   ;;  %848 = vperm.xlu0 %6525, %v766_v27   ;;  %v322_v27 = vld [vmem:[%s7613_s22 + $0x80] sm:$0xff] }
  0x35   : > { %6165 = vmatmul.msk.f32.gmra.mxu0 %vm346_vm0, %v310_v28  ;;  %6190 = vmatmul.msk.f32.gmra.mxu2 %vm346_vm0, %v335_v29  ;;  %v6214_v28 = vld [vmem:[%s12753_s1 + $0x1a8] sm:$0xff]  ;;  %v6213_v29 = vld [vmem:[%s12753_s1 + $0x1a0] sm:$0xff] }
  0x36   : > { %873 = vperm.xlu2 %6527, %v771_v30   ;;  %v6212_v30 = vld [vmem:[%s12753_s1 + $0x198] sm:$0xff] }
  0x37   : > { %868 = vperm.xlu1 %6526, %v770_v31   ;;  %863 = vperm.xlu0 %6525, %v769_v32  }
  0x3d   : > { %6166 = vmatmul.msk.f32.gmra.mxu0 %vm346_vm0, %v311_v33  ;;  %6191 = vmatmul.msk.f32.gmra.mxu2 %vm346_vm0, %v336_v34  ;;  %v323_v34 = vld [vmem:[%s7613_s22 + $0x88] sm:$0xff] }
  0x3e   : > { %888 = vperm.xlu2 %6527, %v774_v35   ;;  %v6217_v35 = vld [vmem:[%s12753_s1 + $0x1c0] sm:$0xff] }
  0x3f   : > { %883 = vperm.xlu1 %6526, %v773_v36   ;;  %878 = vperm.xlu0 %6525, %v772_v37   ;;  %v6216_v36 = vld [vmem:[%s12753_s1 + $0x1b8] sm:$0xff]  ;;  %v6215_v37 = vld [vmem:[%s12753_s1 + $0x1b0] sm:$0xff] }
  0x45   : > { %6167 = vmatmul.msk.f32.gmra.mxu0 %vm346_vm0, %v312_v38  ;;  %6192 = vmatmul.msk.f32.gmra.mxu2 %vm346_vm0, %v337_v39 }
  0x46   : > { %903 = vperm.xlu2 %6527, %v777_v40  }
  0x47   : > { %898 = vperm.xlu1 %6526, %v776_v41   ;;  %893 = vperm.xlu0 %6525, %v775_v42   ;;  %v324_v41 = vld [vmem:[%s7613_s22 + $0x90] sm:$0xff]  ;;  %v6220_v42 = vld [vmem:[%s12753_s1 + $0x1d8] sm:$0xff] }
  0x4d   : > { %6168 = vmatmul.msk.f32.gmra.mxu0 %vm346_vm0, %v313_v43  ;;  %v6219_v43 = vld [vmem:[%s12753_s1 + $0x1d0] sm:$0xff] }
  0x4e   : > { %918 = vperm.xlu2 %6527, %v780_v44   ;;  %v6218_v44 = vld [vmem:[%s12753_s1 + $0x1c8] sm:$0xff] }
  0x4f   : > { %913 = vperm.xlu1 %6526, %v779_v45   ;;  %908 = vperm.xlu0 %6525, %v778_v46  }
  0x55   : > { %6169 = vmatmul.msk.f32.gmra.mxu0 %vm346_vm0, %v314_v47 }
  0x56   : > { %933 = vperm.xlu2 %6527, %v783_v48   ;;  %v325_v48 = vld [vmem:[%s7613_s22 + $0x98] sm:$0xff] }
  0x57   : > { %928 = vperm.xlu1 %6526, %v782_v49   ;;  %923 = vperm.xlu0 %6525, %v781_v50   ;;  %v6223_v49 = vld [vmem:[%s12753_s1 + $0x1f0] sm:$0xff]  ;;  %v6222_v50 = vld [vmem:[%s12753_s1 + $0x1e8] sm:$0xff] }
  0x5d   : > { %6170 = vmatmul.msk.f32.gmra.mxu0 %vm346_vm0, %v315_v51  ;;  %v6221_v51 = vld [vmem:[%s12753_s1 + $0x1e0] sm:$0xff] }
  0x5e   : > { %1013 = vperm.xlu2 %6527, %v6193_v52  }
  0x5f   : > { %943 = vperm.xlu1 %6526, %v785_v53   ;;  %938 = vperm.xlu0 %6525, %v784_v54  }
  0x65   : > { %6171 = vmatmul.msk.f32.gmra.mxu0 %vm346_vm0, %v316_v55  ;;  %v326_v55 = vld [vmem:[%s7613_s22 + $0xa0] sm:$0xff] }
  0x66   : > { %1028 = vperm.xlu2 %6527, %v6196_v56   ;;  %v6226_v56 = vld [vmem:[%s12753_s1 + $0x208] sm:$0xff] }
  0x67   : > { %1023 = vperm.xlu1 %6526, %v6195_v57   ;;  %1018 = vperm.xlu0 %6525, %v6194_v58   ;;  %v6225_v57 = vld [vmem:[%s12753_s1 + $0x200] sm:$0xff]  ;;  %v6224_v58 = vld [vmem:[%s12753_s1 + $0x1f8] sm:$0xff] }
  0x68   : > { %v7753_v59 = vpop.permute.xlu2 %808 }
  0x69   : > { %13239 = vst [vmem:[#allocation2_spill] sm:$0xff] %v7753_v59 }
  0x6d   : > { %6172 = vmatmul.msk.f32.gmra.mxu0 %vm346_vm0, %v317_v60 }
  0x6e   : > { %1043 = vperm.xlu2 %6527, %v6199_v61  }
  0x6f   : > { %1038 = vperm.xlu1 %6526, %v6198_v62   ;;  %1033 = vperm.xlu0 %6525, %v6197_v63   ;;  %v327_v63 = vld [vmem:[%s7613_s22 + $0xa8] sm:$0xff] }
  0x70   : > { %v7766_v0 = vpop.permute.xlu2 %813 }
  0x71   : > { %13240 = vst [vmem:[#allocation3_spill] sm:$0xff] %v7766_v0 }
  0x75   : > { %6173 = vmatmul.msk.f32.gmra.mxu0 %vm346_vm0, %v318_v1  ;;  %v6229_v1 = vld [vmem:[%s12753_s1 + $0x220] sm:$0xff] }
  0x76   : > { %1058 = vperm.xlu2 %6527, %v6202_v2   ;;  %v6228_v2 = vld [vmem:[%s12753_s1 + $0x218] sm:$0xff] }
  0x77   : > { %1053 = vperm.xlu1 %6526, %v6201_v3   ;;  %1048 = vperm.xlu0 %6525, %v6200_v4   ;;  %v6227_v3 = vld [vmem:[%s12753_s1 + $0x210] sm:$0xff] }
  0x78   : > { %v7779_v5 = vpop.permute.xlu2 %828 }
  0x79   : > { %13241 = vst [vmem:[#allocation4_spill] sm:$0xff] %v7779_v5 }
  0x7d   : > { %6174 = vmatmul.msk.f32.gmra.mxu0 %vm346_vm0, %v319_v6 }
  0x7e   : > { %1073 = vperm.xlu2 %6527, %v6205_v7  }
  0x7f   : > { %1068 = vperm.xlu1 %6526, %v6204_v8   ;;  %1063 = vperm.xlu0 %6525, %v6203_v9   ;;  %v328_v8 = vld [vmem:[%s7613_s22 + $0xb0] sm:$0xff]  ;;  %v6232_v9 = vld [vmem:[%s12753_s1 + $0x238] sm:$0xff] }
  0x80   : > { %v7792_v10 = vpop.permute.xlu2 %843 }
  0x81   : > { %13242 = vst [vmem:[#allocation5_spill] sm:$0xff] %v7792_v10  ;;  %v7794_v11 = vpop.permute.xlu1 %798  ;;  %v7796_v12 = vpop.permute.xlu0 %788 }
  0x82   : > { %13243 = vst [vmem:[#allocation6_spill] sm:$0xff] %v7794_v11  ;;  %v6289_v11 = vld [vmem:[%s12753_s1 + $0x500] sm:$0xff] }
  0x83   : > { %13244 = vst [vmem:[#allocation7_spill] sm:$0xff] %v7796_v12  ;;  %v6291_v12 = vld [vmem:[%s12753_s1 + $0x510] sm:$0xff] }
  0x85   : > { %6175 = vmatmul.msk.f32.gmra.mxu0 %vm346_vm0, %v320_v13  ;;  %v6231_v13 = vld [vmem:[%s12753_s1 + $0x230] sm:$0xff] }
  0x86   : > { %1088 = vperm.xlu2 %6527, %v6208_v14   ;;  %v6230_v14 = vld [vmem:[%s12753_s1 + $0x228] sm:$0xff] }
  0x87   : > { %1083 = vperm.xlu1 %6526, %v6207_v15   ;;  %1078 = vperm.xlu0 %6525, %v6206_v16  }
  0x88   : > { %v7809_v17 = vpop.permute.xlu2 %858 }
  0x89   : > { %13245 = vst [vmem:[#allocation8_spill] sm:$0xff] %v7809_v17  ;;  %v7811_v18 = vpop.permute.xlu1 %803  ;;  %v7813_v19 = vpop.permute.xlu0 %793 }
  0x8a   : > { %13246 = vst [vmem:[#allocation9_spill] sm:$0xff] %v7811_v18  ;;  %v6286_v18 = vld [vmem:[%s12753_s1 + $0x3e8] sm:$0xff] }
  0x8b   : > { %13247 = vst [vmem:[#allocation10_spill] sm:$0xff] %v7813_v19 }
  0x8d   : > { %6176 = vmatmul.msk.f32.gmra.mxu0 %vm346_vm0, %v321_v20 }
  0x8e   : > { %1103 = vperm.xlu2 %6527, %v6211_v21   ;;  %v329_v21 = vld [vmem:[%s7613_s22 + $0xb8] sm:$0xff] }
  0x8f   : > { %1098 = vperm.xlu1 %6526, %v6210_v22   ;;  %1093 = vperm.xlu0 %6525, %v6209_v23   ;;  %v6235_v22 = vld [vmem:[%s12753_s1 + $0x250] sm:$0xff]  ;;  %v6234_v23 = vld [vmem:[%s12753_s1 + $0x248] sm:$0xff] }
  0x90   : > { %v7826_v24 = vpop.permute.xlu2 %873 }
  0x91   : > { %13248 = vst [vmem:[#allocation11_spill] sm:$0xff] %v7826_v24  ;;  %v7828_v25 = vpop.permute.xlu1 %823  ;;  %v7830_v26 = vpop.permute.xlu0 %818 }
  0x92   : > { %13249 = vst [vmem:[#allocation12_spill] sm:$0xff] %v7828_v25  ;;  %v6276_v25 = vld [vmem:[%s12753_s1 + $0x398] sm:$0xff] }
  0x93   : > { %13250 = vst [vmem:[#allocation13_spill] sm:$0xff] %v7830_v26  ;;  %v6280_v26 = vld [vmem:[%s12753_s1 + $0x3b8] sm:$0xff] }
  0x95   : > { %6177 = vmatmul.msk.f32.gmra.mxu0 %vm346_vm0, %v322_v27  ;;  %v6233_v27 = vld [vmem:[%s12753_s1 + $0x240] sm:$0xff] }
  0x96   : > { %1118 = vperm.xlu2 %6527, %v6214_v28  }
  0x97   : > { %1113 = vperm.xlu1 %6526, %v6213_v29   ;;  %1108 = vperm.xlu0 %6525, %v6212_v30  }
  0x98   : > { %v7843_v31 = vpop.permute.xlu2 %888 }
  0x99   : > { %13251 = vst [vmem:[#allocation14_spill] sm:$0xff] %v7843_v31  ;;  %v7845_v32 = vpop.permute.xlu1 %838  ;;  %v7847_v33 = vpop.permute.xlu0 %833 }
  0x9a   : > { %13252 = vst [vmem:[#allocation15_spill] sm:$0xff] %v7845_v32  ;;  %v6274_v32 = vld [vmem:[%s12753_s1 + $0x388] sm:$0xff] }
  0x9b   : > { %13253 = vst [vmem:[#allocation16_spill] sm:$0xff] %v7847_v33  ;;  %v6273_v33 = vld [vmem:[%s12753_s1 + $0x380] sm:$0xff] }
  0x9d   : > { %6178 = vmatmul.msk.f32.gmra.mxu0 %vm346_vm0, %v323_v34  ;;  %v330_v34 = vld [vmem:[%s7613_s22 + $0xc0] sm:$0xff] }
  0x9e   : > { %1133 = vperm.xlu2 %6527, %v6217_v35   ;;  %v6238_v35 = vld [vmem:[%s12753_s1 + $0x268] sm:$0xff] }
  0x9f   : > { %1128 = vperm.xlu1 %6526, %v6216_v36   ;;  %1123 = vperm.xlu0 %6525, %v6215_v37   ;;  %v6237_v36 = vld [vmem:[%s12753_s1 + $0x260] sm:$0xff]  ;;  %v6236_v37 = vld [vmem:[%s12753_s1 + $0x258] sm:$0xff] }
  0xa0   : > { %v7860_v38 = vpop.permute.xlu2 %903 }
  0xa1   : > { %13254 = vst [vmem:[#allocation17_spill] sm:$0xff] %v7860_v38  ;;  %v7862_v39 = vpop.permute.xlu1 %853  ;;  %v7864_v40 = vpop.permute.xlu0 %848  ;;  %v6292_v38 = vld [vmem:[%s12753_s1 + $0x518] sm:$0xff] }
  0xa2   : > { %13255 = vst [vmem:[#allocation18_spill] sm:$0xff] %v7862_v39  ;;  %v6271_v39 = vld [vmem:[%s12753_s1 + $0x370] sm:$0xff] }
  0xa3   : > { %13256 = vst [vmem:[#allocation19_spill] sm:$0xff] %v7864_v40  ;;  %v6270_v40 = vld [vmem:[%s12753_s1 + $0x368] sm:$0xff] }
  0xa5   : > { %6179 = vmatmul.msk.f32.gmra.mxu0 %vm346_vm0, %v324_v41  ;;  %v7978_v41 = vpop.f32.mrf.mxu0 }
  0xa6   : > { %1148 = vperm.xlu2 %6527, %v6220_v42  }
  0xa7   : > { %1143 = vperm.xlu1 %6526, %v6219_v43   ;;  %1138 = vperm.xlu0 %6525, %v6218_v44  }
  0xa8   : > { %v7877_v45 = vpop.permute.xlu2 %918 }
  0xa9   : > { %13257 = vst [vmem:[#allocation20_spill] sm:$0xff] %v7877_v45  ;;  %v7879_v46 = vpop.permute.xlu1 %868  ;;  %v7881_v47 = vpop.permute.xlu0 %863  ;;  %v6285_v45 = vld [vmem:[%s12753_s1 + $0x3e0] sm:$0xff] }
  0xaa   : > { %13258 = vst [vmem:[#allocation21_spill] sm:$0xff] %v7879_v46  ;;  %v6268_v46 = vld [vmem:[%s12753_s1 + $0x358] sm:$0xff] }
  0xab   : > { %13259 = vst [vmem:[#allocation22_spill] sm:$0xff] %v7881_v47  ;;  %v6267_v47 = vld [vmem:[%s12753_s1 + $0x350] sm:$0xff] }
  0xad   : > { %6180 = vmatmul.msk.f32.gmra.mxu0 %vm346_vm0, %v325_v48  ;;  %v6241_v48 = vld [vmem:[%s12753_s1 + $0x280] sm:$0xff] }
  0xae   : > { %1163 = vperm.xlu2 %6527, %v6223_v49   ;;  %v6240_v49 = vld [vmem:[%s12753_s1 + $0x278] sm:$0xff] }
  0xaf   : > { %1158 = vperm.xlu1 %6526, %v6222_v50   ;;  %1153 = vperm.xlu0 %6525, %v6221_v51   ;;  %v6239_v50 = vld [vmem:[%s12753_s1 + $0x270] sm:$0xff] }
  0xb0   : > { %v7894_v52 = vpop.permute.xlu2 %933 }
  0xb1   : > { %13260 = vst [vmem:[#allocation23_spill] sm:$0xff] %v7894_v52  ;;  %v7896_v53 = vpop.permute.xlu1 %883  ;;  %v7898_v54 = vpop.permute.xlu0 %878  ;;  %v6279_v52 = vld [vmem:[%s12753_s1 + $0x3b0] sm:$0xff] }
  0xb2   : > { %13261 = vst [vmem:[#allocation24_spill] sm:$0xff] %v7896_v53  ;;  %v6265_v53 = vld [vmem:[%s12753_s1 + $0x340] sm:$0xff] }
  0xb3   : > { %13262 = vst [vmem:[#allocation25_spill] sm:$0xff] %v7898_v54  ;;  %v6264_v54 = vld [vmem:[%s12753_s1 + $0x338] sm:$0xff] }
  0xb5   : > { %6181 = vmatmul.msk.f32.gmra.mxu0 %vm346_vm0, %v326_v55 }
  0xb6   : > { %1341 = vperm.xlu2 %6527, %v6226_v56  }
  0xb7   : > { %1336 = vperm.xlu1 %6526, %v6225_v57   ;;  %1168 = vperm.xlu0 %6525, %v6224_v58   ;;  %v6244_v57 = vld [vmem:[%s12753_s1 + $0x298] sm:$0xff]  ;;  %v6243_v58 = vld [vmem:[%s12753_s1 + $0x290] sm:$0xff] }
  0xb8   : > { %v7911_v60 = vpop.permute.xlu2 %1013 }
  0xb9   : > { %13263 = vst [vmem:[#allocation26_spill] sm:$0xff] %v7911_v60  ;;  %v7913_v61 = vpop.permute.xlu1 %898  ;;  %v7915_v62 = vpop.permute.xlu0 %893 }
  0xba   : > { %13264 = vst [vmem:[#allocation27_spill] sm:$0xff] %v7913_v61  ;;  %v6262_v61 = vld [vmem:[%s12753_s1 + $0x328] sm:$0xff] }
  0xbb   : > { %13265 = vst [vmem:[#allocation28_spill] sm:$0xff] %v7915_v62  ;;  %v6261_v62 = vld [vmem:[%s12753_s1 + $0x320] sm:$0xff] }
  0xbd   : > { %6182 = vmatmul.msk.f32.gmra.mxu0 %vm346_vm0, %v327_v63  ;;  %v6242_v63 = vld [vmem:[%s12753_s1 + $0x288] sm:$0xff] }
  0xbe   : > { %1356 = vperm.xlu2 %6527, %v6229_v1  }
  0xbf   : > { %1351 = vperm.xlu1 %6526, %v6228_v2   ;;  %1346 = vperm.xlu0 %6525, %v6227_v3  }
  0xc0   : > { %v7928_v4 = vpop.permute.xlu2 %1028 }
  0xc1   : > { %13266 = vst [vmem:[#allocation29_spill] sm:$0xff] %v7928_v4  ;;  %v7930_v6 = vpop.permute.xlu1 %913  ;;  %v7932_v7 = vpop.permute.xlu0 %908 }
  0xc2   : > { %13267 = vst [vmem:[#allocation30_spill] sm:$0xff] %v7930_v6 }
  0xc3   : > { %13268 = vst [vmem:[#allocation31_spill] sm:$0xff] %v7932_v7  ;;  %v6288_v7 = vld [vmem:[%s12753_s1 + $0x3f8] sm:$0xff] }
  0xc5   : > { %6183 = vmatmul.msk.f32.gmra.mxu0 %vm346_vm0, %v328_v8  ;;  %v6247_v8 = vld [vmem:[%s12753_s1 + $0x2b0] sm:$0xff] }
  0xc6   : > { %1371 = vperm.xlu2 %6527, %v6232_v9   ;;  %v6246_v9 = vld [vmem:[%s12753_s1 + $0x2a8] sm:$0xff] }
  0xc7   : > { %1366 = vperm.xlu1 %6526, %v6231_v13   ;;  %1361 = vperm.xlu0 %6525, %v6230_v14   ;;  %v6245_v13 = vld [vmem:[%s12753_s1 + $0x2a0] sm:$0xff] }
  0xc8   : > { %v7945_v15 = vpop.permute.xlu2 %1043 }
  0xc9   : > { %13269 = vst [vmem:[#allocation32_spill] sm:$0xff] %v7945_v15  ;;  %v7947_v16 = vpop.permute.xlu1 %928  ;;  %v7949_v20 = vpop.permute.xlu0 %923 }
  0xca   : > { %13270 = vst [vmem:[#allocation33_spill] sm:$0xff] %v7947_v16  ;;  %v6283_v16 = vld [vmem:[%s12753_s1 + $0x3d0] sm:$0xff] }
  0xcb   : > { %13271 = vst [vmem:[#allocation34_spill] sm:$0xff] %v7949_v20  ;;  %v6282_v20 = vld [vmem:[%s12753_s1 + $0x3c8] sm:$0xff] }
  0xcd   : > { %6184 = vmatmul.msk.f32.gmra.mxu0 %vm346_vm0, %v329_v21 }
  0xce   : > { %1386 = vperm.xlu2 %6527, %v6235_v22  }
  0xcf   : > { %1381 = vperm.xlu1 %6526, %v6234_v23   ;;  %1376 = vperm.xlu0 %6525, %v6233_v27   ;;  %v6250_v23 = vld [vmem:[%s12753_s1 + $0x2c8] sm:$0xff]  ;;  %v6249_v27 = vld [vmem:[%s12753_s1 + $0x2c0] sm:$0xff] }
  0xd0   : > { %v7962_v28 = vpop.permute.xlu2 %1058 }
  0xd1   : > { %13272 = vst [vmem:[#allocation35_spill] sm:$0xff] %v7962_v28  ;;  %v7964_v29 = vpop.permute.xlu1 %943  ;;  %v7966_v30 = vpop.permute.xlu0 %938 }
  0xd2   : > { %13273 = vst [vmem:[#allocation36_spill] sm:$0xff] %v7964_v29  ;;  %v6277_v29 = vld [vmem:[%s12753_s1 + $0x3a0] sm:$0xff] }
  0xd3   : > { %13274 = vst [vmem:[#allocation37_spill] sm:$0xff] %v7966_v30 }
  0xd5   : > { %6185 = vmatmul.msk.f32.gmra.mxu0 %vm346_vm0, %v330_v34  ;;  %v6248_v34 = vld [vmem:[%s12753_s1 + $0x2b8] sm:$0xff] }
  0xd6   : > { %1401 = vperm.xlu2 %6527, %v6238_v35  }
  0xd7   : > { %1396 = vperm.xlu1 %6526, %v6237_v36   ;;  %1391 = vperm.xlu0 %6525, %v6236_v37  }
  0xd8   : > { %v7981_v42 = vpop.permute.xlu2 %1073 }
  0xd9   : > { %13275 = vst [vmem:[#allocation38_spill] sm:$0xff] %v7981_v42  ;;  %v7983_v43 = vpop.permute.xlu1 %1023  ;;  %v7985_v44 = vpop.permute.xlu0 %1018 }
  0xda   : > { %13276 = vst [vmem:[#allocation39_spill] sm:$0xff] %v7983_v43 }
  0xdb   : > { %13277 = vst [vmem:[#allocation40_spill] sm:$0xff] %v7985_v44 }
  0xde   : > { %1416 = vperm.xlu2 %6527, %v6241_v48   ;;  %v6253_v48 = vld [vmem:[%s12753_s1 + $0x2e0] sm:$0xff] }
  0xdf   : > { %1411 = vperm.xlu1 %6526, %v6240_v49   ;;  %1406 = vperm.xlu0 %6525, %v6239_v50   ;;  %v6252_v49 = vld [vmem:[%s12753_s1 + $0x2d8] sm:$0xff]  ;;  %v6251_v50 = vld [vmem:[%s12753_s1 + $0x2d0] sm:$0xff] }
  0xe0   : > { %v7996_v51 = vpop.permute.xlu2 %1088 }
  0xe1   : > { %13278 = vst [vmem:[#allocation41_spill] sm:$0xff] %v7996_v51  ;;  %v7998_v55 = vpop.permute.xlu1 %1038  ;;  %v8000_v56 = vpop.permute.xlu0 %1033 }
  0xe2   : > { %13279 = vst [vmem:[#allocation42_spill] sm:$0xff] %v7998_v55 }
  0xe3   : > { %13280 = vst [vmem:[#allocation43_spill] sm:$0xff] %v8000_v56 }
  0xe6   : > { %1431 = vperm.xlu2 %6527, %v6244_v57  }
  0xe7   : > { %1426 = vperm.xlu1 %6526, %v6243_v58   ;;  %1421 = vperm.xlu0 %6525, %v6242_v63  }
  0xe8   : > { %v8011_v1 = vpop.permute.xlu2 %1103 }
  0xe9   : > { %13281 = vst [vmem:[#allocation44_spill] sm:$0xff] %v8011_v1  ;;  %v8013_v2 = vpop.permute.xlu1 %1053  ;;  %v8015_v3 = vpop.permute.xlu0 %1048 }
  0xea   : > { %13282 = vst [vmem:[#allocation45_spill] sm:$0xff] %v8013_v2 }
  0xeb   : > { %13283 = vst [vmem:[#allocation46_spill] sm:$0xff] %v8015_v3 }
  0xee   : > { %1446 = vperm.xlu2 %6527, %v6247_v8   ;;  %v6256_v8 = vld [vmem:[%s12753_s1 + $0x2f8] sm:$0xff] }
  0xef   : > { %1441 = vperm.xlu1 %6526, %v6246_v9   ;;  %1436 = vperm.xlu0 %6525, %v6245_v13   ;;  %v6255_v9 = vld [vmem:[%s12753_s1 + $0x2f0] sm:$0xff]  ;;  %v6254_v13 = vld [vmem:[%s12753_s1 + $0x2e8] sm:$0xff] }
  0xf0   : > { %v8026_v14 = vpop.permute.xlu2 %1118 }
  0xf1   : > { %13284 = vst [vmem:[#allocation47_spill] sm:$0xff] %v8026_v14  ;;  %v8028_v21 = vpop.permute.xlu1 %1068  ;;  %v8030_v22 = vpop.permute.xlu0 %1063 }
  0xf2   : > { %13285 = vst [vmem:[#allocation48_spill] sm:$0xff] %v8028_v21 }
  0xf3   : > { %13286 = vst [vmem:[#allocation49_spill] sm:$0xff] %v8030_v22 }
  0xf6   : > { %1461 = vperm.xlu2 %6527, %v6250_v23  }
  0xf7   : > { %1456 = vperm.xlu1 %6526, %v6249_v27   ;;  %1451 = vperm.xlu0 %6525, %v6248_v34  }
  0xf8   : > { %v8041_v35 = vpop.permute.xlu2 %1133 }
  0xf9   : > { %13287 = vst [vmem:[#allocation50_spill] sm:$0xff] %v8041_v35  ;;  %v8043_v36 = vpop.permute.xlu1 %1083  ;;  %v8045_v37 = vpop.permute.xlu0 %1078 }
  0xfa   : > { %13288 = vst [vmem:[#allocation51_spill] sm:$0xff] %v8043_v36 }
  0xfb   : > { %13289 = vst [vmem:[#allocation52_spill] sm:$0xff] %v8045_v37 }
  0xfe   : > { %1476 = vperm.xlu2 %6527, %v6253_v48   ;;  %v6259_v48 = vld [vmem:[%s12753_s1 + $0x310] sm:$0xff] }
  0xff   : > { %1471 = vperm.xlu1 %6526, %v6252_v49   ;;  %1466 = vperm.xlu0 %6525, %v6251_v50   ;;  %v6258_v49 = vld [vmem:[%s12753_s1 + $0x308] sm:$0xff]  ;;  %v6257_v50 = vld [vmem:[%s12753_s1 + $0x300] sm:$0xff] }
 0x100   : > { %v8056_v57 = vpop.permute.xlu2 %1148 }
 0x101   : > { %13290 = vst [vmem:[#allocation53_spill] sm:$0xff] %v8056_v57  ;;  %v8058_v58 = vpop.permute.xlu1 %1098  ;;  %v8060_v63 = vpop.permute.xlu0 %1093 }
 0x102   : > { %13291 = vst [vmem:[#allocation54_spill] sm:$0xff] %v8058_v58 }
 0x103   : > { %13292 = vst [vmem:[#allocation55_spill] sm:$0xff] %v8060_v63 }
 0x106   : > { %1491 = vperm.xlu2 %6527, %v6256_v8  }
 0x107   : > { %1486 = vperm.xlu1 %6526, %v6255_v9   ;;  %1481 = vperm.xlu0 %6525, %v6254_v13  }
 0x108   : > { %v8071_v23 = vpop.permute.xlu2 %1163 }
 0x109   : > { %13293 = vst [vmem:[#allocation56_spill] sm:$0xff] %v8071_v23  ;;  %v8073_v27 = vpop.permute.xlu1 %1113  ;;  %v8075_v34 = vpop.permute.xlu0 %1108  ;;  %v6406_v23 = vld [vmem:[%s12753_s1 + $0x8a8] sm:$0xff] }
 0x10a   : > { %13294 = vst [vmem:[#allocation57_spill] sm:$0xff] %v8073_v27 }
 0x10b   : > { %13295 = vst [vmem:[#allocation58_spill] sm:$0xff] %v8075_v34 }
 0x10e   : > { %1571 = vperm.xlu2 %6527, %v6259_v48   ;;  %v6260_v48 = vld [vmem:[%s12753_s1 + $0x318] sm:$0xff] }
 0x10f   : > { %1566 = vperm.xlu1 %6526, %v6258_v49   ;;  %1561 = vperm.xlu0 %6525, %v6257_v50  }
 0x110   : > { %v8086_v8 = vpop.permute.xlu2 %1341 }
 0x111   : > { %13296 = vst [vmem:[#allocation59_spill] sm:$0xff] %v8086_v8  ;;  %v8088_v9 = vpop.permute.xlu1 %1128  ;;  %v8090_v13 = vpop.permute.xlu0 %1123 }
 0x112   : > { %13297 = vst [vmem:[#allocation60_spill] sm:$0xff] %v8088_v9 }
 0x113   : > { %13298 = vst [vmem:[#allocation61_spill] sm:$0xff] %v8090_v13 }
 0x116   : > { %1586 = vperm.xlu2 %6527, %v6262_v61   ;;  %v6263_v61 = vld [vmem:[%s12753_s1 + $0x330] sm:$0xff] }
 0x117   : > { %1581 = vperm.xlu1 %6526, %v6261_v62   ;;  %1576 = vperm.xlu0 %6525, %v6260_v48  }
 0x118   : > { %v8101_v49 = vpop.permute.xlu2 %1356 }
 0x119   : > { %13299 = vst [vmem:[#allocation62_spill] sm:$0xff] %v8101_v49  ;;  %v8103_v50 = vpop.permute.xlu1 %1143  ;;  %v8105_v31 = vpop.permute.xlu0 %1138 }
 0x11a   : > { %13300 = vst [vmem:[#allocation63_spill] sm:$0xff] %v8103_v50 }
 0x11b   : > { %13301 = vst [vmem:[#allocation64_spill] sm:$0xff] %v8105_v31 }
 0x11e   : > { %1601 = vperm.xlu2 %6527, %v6265_v53   ;;  %v6266_v53 = vld [vmem:[%s12753_s1 + $0x348] sm:$0xff] }
 0x11f   : > { %1596 = vperm.xlu1 %6526, %v6264_v54   ;;  %1591 = vperm.xlu0 %6525, %v6263_v61  }
 0x120   : > { %v8116_v62 = vpop.permute.xlu2 %1371 }
 0x121   : > { %13302 = vst [vmem:[#allocation65_spill] sm:$0xff] %v8116_v62  ;;  %v8118_v48 = vpop.permute.xlu1 %1158  ;;  %v8120_v24 = vpop.permute.xlu0 %1153  ;;  %v6393_v62 = vld [vmem:[%s12753_s1 + $0x840] sm:$0xff] }
 0x122   : > { %13303 = vst [vmem:[#allocation66_spill] sm:$0xff] %v8118_v48  ;;  %v6411_v48 = vld [vmem:[%s12753_s1 + $0x8d0] sm:$0xff] }
 0x123   : > { %13304 = vst [vmem:[#allocation67_spill] sm:$0xff] %v8120_v24  ;;  %v6408_v24 = vld [vmem:[%s12753_s1 + $0x8b8] sm:$0xff] }
 0x126   : > { %1616 = vperm.xlu2 %6527, %v6268_v46   ;;  %v6269_v46 = vld [vmem:[%s12753_s1 + $0x360] sm:$0xff] }
 0x127   : > { %1611 = vperm.xlu1 %6526, %v6267_v47   ;;  %1606 = vperm.xlu0 %6525, %v6266_v53  }
 0x128   : > { %v8131_v54 = vpop.permute.xlu2 %1386 }
 0x129   : > { %13305 = vst [vmem:[#allocation68_spill] sm:$0xff] %v8131_v54  ;;  %v8133_v61 = vpop.permute.xlu1 %1336  ;;  %v8135_v17 = vpop.permute.xlu0 %1168  ;;  %v6372_v54 = vld [vmem:[%s12753_s1 + $0x798] sm:$0xff] }
 0x12a   : > { %13306 = vst [vmem:[#allocation69_spill] sm:$0xff] %v8133_v61 }
 0x12b   : > { %13307 = vst [vmem:[#allocation70_spill] sm:$0xff] %v8135_v17 }
 0x12e   : > { %1631 = vperm.xlu2 %6527, %v6271_v39   ;;  %v6272_v39 = vld [vmem:[%s12753_s1 + $0x378] sm:$0xff] }
 0x12f   : > { %1626 = vperm.xlu1 %6526, %v6270_v40   ;;  %1621 = vperm.xlu0 %6525, %v6269_v46  }
 0x130   : > { %v8146_v47 = vpop.permute.xlu2 %1401 }
 0x131   : > { %13308 = vst [vmem:[#allocation71_spill] sm:$0xff] %v8146_v47  ;;  %v8148_v53 = vpop.permute.xlu1 %1351  ;;  %v8150_v10 = vpop.permute.xlu0 %1346  ;;  %v6375_v47 = vld [vmem:[%s12753_s1 + $0x7b0] sm:$0xff] }
 0x132   : > { %13309 = vst [vmem:[#allocation72_spill] sm:$0xff] %v8148_v53  ;;  %v6399_v53 = vld [vmem:[%s12753_s1 + $0x870] sm:$0xff] }
 0x133   : > { %13310 = vst [vmem:[#allocation73_spill] sm:$0xff] %v8150_v10  ;;  %v6400_v10 = vld [vmem:[%s12753_s1 + $0x878] sm:$0xff] }
 0x136   : > { %1646 = vperm.xlu2 %6527, %v6274_v32   ;;  %v6275_v32 = vld [vmem:[%s12753_s1 + $0x390] sm:$0xff] }
 0x137   : > { %1641 = vperm.xlu1 %6526, %v6273_v33   ;;  %1636 = vperm.xlu0 %6525, %v6272_v39  }
 0x138   : > { %v8161_v40 = vpop.permute.xlu2 %1416 }
 0x139   : > { %13311 = vst [vmem:[#allocation74_spill] sm:$0xff] %v8161_v40  ;;  %v8163_v46 = vpop.permute.xlu1 %1366  ;;  %v8165_v5 = vpop.permute.xlu0 %1361  ;;  %v6348_v40 = vld [vmem:[%s12753_s1 + $0x6d8] sm:$0xff] }
 0x13a   : > { %13312 = vst [vmem:[#allocation75_spill] sm:$0xff] %v8163_v46  ;;  %v6403_v46 = vld [vmem:[%s12753_s1 + $0x890] sm:$0xff] }
 0x13b   : > { %13313 = vst [vmem:[#allocation76_spill] sm:$0xff] %v8165_v5  ;;  %v6396_v5 = vld [vmem:[%s12753_s1 + $0x858] sm:$0xff] }
 0x13e   : > { %1661 = vperm.xlu2 %6527, %v6277_v29   ;;  %v6278_v29 = vld [vmem:[%s12753_s1 + $0x3a8] sm:$0xff] }
 0x13f   : > { %1656 = vperm.xlu1 %6526, %v6276_v25   ;;  %1651 = vperm.xlu0 %6525, %v6275_v32  }
 0x140   : > { %v8176_v33 = vpop.permute.xlu2 %1431 }
 0x141   : > { %13314 = vst [vmem:[#allocation77_spill] sm:$0xff] %v8176_v33  ;;  %v8178_v39 = vpop.permute.xlu1 %1381  ;;  %v8180_v30 = vpop.permute.xlu0 %1376  ;;  %v6354_v33 = vld [vmem:[%s12753_s1 + $0x708] sm:$0xff] }
 0x142   : > { %13315 = vst [vmem:[#allocation78_spill] sm:$0xff] %v8178_v39  ;;  %v6387_v39 = vld [vmem:[%s12753_s1 + $0x810] sm:$0xff] }
 0x143   : > { %13316 = vst [vmem:[#allocation79_spill] sm:$0xff] %v8180_v30  ;;  %v6384_v30 = vld [vmem:[%s12753_s1 + $0x7f8] sm:$0xff] }
 0x146   : > { %1676 = vperm.xlu2 %6527, %v6280_v26   ;;  %v6281_v26 = vld [vmem:[%s12753_s1 + $0x3c0] sm:$0xff] }
 0x147   : > { %1671 = vperm.xlu1 %6526, %v6279_v52   ;;  %1666 = vperm.xlu0 %6525, %v6278_v29  }
 0x148   : > { %v8191_v25 = vpop.permute.xlu2 %1446 }
 0x149   : > { %13317 = vst [vmem:[#allocation80_spill] sm:$0xff] %v8191_v25  ;;  %v8193_v32 = vpop.permute.xlu1 %1396  ;;  %v8195_v0 = vpop.permute.xlu0 %1391  ;;  %v6294_v25 = vld [vmem:[%s12753_s1 + $0x528] sm:$0xff] }
 0x14a   : > { %13318 = vst [vmem:[#allocation81_spill] sm:$0xff] %v8193_v32  ;;  %v8770_v32 = vpop.f32.mrf.mxu2 }
 0x14b   : > { %13319 = vst [vmem:[#allocation82_spill] sm:$0xff] %v8195_v0  ;;  %v6378_v0 = vld [vmem:[%s12753_s1 + $0x7c8] sm:$0xff] }
 0x14e   : > { %1691 = vperm.xlu2 %6527, %v6283_v16   ;;  %v6284_v16 = vld [vmem:[%s12753_s1 + $0x3d8] sm:$0xff] }
 0x14f   : > { %1686 = vperm.xlu1 %6526, %v6282_v20   ;;  %1681 = vperm.xlu0 %6525, %v6281_v26  }
 0x150   : > { %v8206_v52 = vpop.permute.xlu2 %1461 }
 0x151   : > { %13320 = vst [vmem:[#allocation83_spill] sm:$0xff] %v8206_v52  ;;  %v8208_v29 = vpop.permute.xlu1 %1411  ;;  %v8210_v59 = vpop.permute.xlu0 %1406  ;;  %v6298_v52 = vld [vmem:[%s12753_s1 + $0x548] sm:$0xff] }
 0x152   : > { %13321 = vst [vmem:[#allocation84_spill] sm:$0xff] %v8208_v29  ;;  %v6363_v29 = vld [vmem:[%s12753_s1 + $0x750] sm:$0xff] }
 0x153   : > { %13322 = vst [vmem:[#allocation85_spill] sm:$0xff] %v8210_v59  ;;  %v6360_v59 = vld [vmem:[%s12753_s1 + $0x738] sm:$0xff] }
 0x156   : > { %1706 = vperm.xlu2 %6527, %v6286_v18   ;;  %v6287_v18 = vld [vmem:[%s12753_s1 + $0x3f0] sm:$0xff] }
 0x157   : > { %1701 = vperm.xlu1 %6526, %v6285_v45   ;;  %1696 = vperm.xlu0 %6525, %v6284_v16  }
 0x158   : > { %v8221_v20 = vpop.permute.xlu2 %1476 }
 0x159   : > { %13323 = vst [vmem:[#allocation86_spill] sm:$0xff] %v8221_v20  ;;  %v8223_v26 = vpop.permute.xlu1 %1426  ;;  %v8225_v6 = vpop.permute.xlu0 %1421 }
 0x15a   : > { %13324 = vst [vmem:[#allocation87_spill] sm:$0xff] %v8223_v26  ;;  %v6369_v26 = vld [vmem:[%s12753_s1 + $0x780] sm:$0xff] }
 0x15b   : > { %13325 = vst [vmem:[#allocation88_spill] sm:$0xff] %v8225_v6  ;;  %v6357_v6 = vld [vmem:[%s12753_s1 + $0x720] sm:$0xff] }
 0x15e   : > { %1786 = vperm.xlu2 %6527, %v6289_v11   ;;  %v6290_v11 = vld [vmem:[%s12753_s1 + $0x508] sm:$0xff] }
 0x15f   : > { %1716 = vperm.xlu1 %6526, %v6288_v7   ;;  %1711 = vperm.xlu0 %6525, %v6287_v18  }
 0x160   : > { %v8236_v45 = vpop.permute.xlu2 %1491 }
 0x161   : > { %13326 = vst [vmem:[#allocation89_spill] sm:$0xff] %v8236_v45  ;;  %v8238_v16 = vpop.permute.xlu1 %1441  ;;  %v8240_v19 = vpop.permute.xlu0 %1436  ;;  %v6295_v45 = vld [vmem:[%s12753_s1 + $0x530] sm:$0xff] }
 0x162   : > { %13327 = vst [vmem:[#allocation90_spill] sm:$0xff] %v8238_v16  ;;  %v6342_v16 = vld [vmem:[%s12753_s1 + $0x6a8] sm:$0xff] }
 0x163   : > { %13328 = vst [vmem:[#allocation91_spill] sm:$0xff] %v8240_v19  ;;  %v6339_v19 = vld [vmem:[%s12753_s1 + $0x690] sm:$0xff] }
 0x166   : > { %1801 = vperm.xlu2 %6527, %v6292_v38   ;;  %v6293_v38 = vld [vmem:[%s12753_s1 + $0x520] sm:$0xff] }
 0x167   : > { %1796 = vperm.xlu1 %6526, %v6291_v12   ;;  %1791 = vperm.xlu0 %6525, %v6290_v11  }
 0x168   : > { %v8251_v7 = vpop.permute.xlu2 %1571 }
 0x169   : > { %13329 = vst [vmem:[#allocation92_spill] sm:$0xff] %v8251_v7  ;;  %v8253_v18 = vpop.permute.xlu1 %1456  ;;  %v8255_v20 = vpop.permute.xlu0 %1451 }
 0x16a   : > { %13330 = vst [vmem:[#allocation93_spill] sm:$0xff] %v8253_v18  ;;  %v6345_v18 = vld [vmem:[%s12753_s1 + $0x6c0] sm:$0xff] }
 0x16b   : > { %13331 = vst [vmem:[#allocation94_spill] sm:$0xff] %v8255_v20  ;;  %v6297_v20 = vld [vmem:[%s12753_s1 + $0x540] sm:$0xff] }
 0x16e   : > { %1816 = vperm.xlu2 %6527, %v6295_v45   ;;  %v6296_v45 = vld [vmem:[%s12753_s1 + $0x538] sm:$0xff] }
 0x16f   : > { %1811 = vperm.xlu1 %6526, %v6294_v25   ;;  %1806 = vperm.xlu0 %6525, %v6293_v38  }
 0x170   : > { %v8266_v12 = vpop.permute.xlu2 %1586 }
 0x171   : > { %13332 = vst [vmem:[#allocation95_spill] sm:$0xff] %v8266_v12  ;;  %v8268_v11 = vpop.permute.xlu1 %1471  ;;  %v8270_v7 = vpop.permute.xlu0 %1466 }
 0x172   : > { %13333 = vst [vmem:[#allocation96_spill] sm:$0xff] %v8268_v11  ;;  %v6300_v11 = vld [vmem:[%s12753_s1 + $0x558] sm:$0xff] }
 0x173   : > { %13334 = vst [vmem:[#allocation97_spill] sm:$0xff] %v8270_v7  ;;  %v6301_v7 = vld [vmem:[%s12753_s1 + $0x560] sm:$0xff] }
 0x176   : > { %1831 = vperm.xlu2 %6527, %v6298_v52   ;;  %v6299_v52 = vld [vmem:[%s12753_s1 + $0x550] sm:$0xff] }
 0x177   : > { %1826 = vperm.xlu1 %6526, %v6297_v20   ;;  %1821 = vperm.xlu0 %6525, %v6296_v45  }
 0x178   : > { %v8281_v25 = vpop.permute.xlu2 %1601 }
 0x179   : > { %13335 = vst [vmem:[#allocation98_spill] sm:$0xff] %v8281_v25  ;;  %v8283_v38 = vpop.permute.xlu1 %1486  ;;  %v8285_v12 = vpop.permute.xlu0 %1481 }
 0x17a   : > { %13336 = vst [vmem:[#allocation99_spill] sm:$0xff] %v8283_v38  ;;  %v6303_v38 = vld [vmem:[%s12753_s1 + $0x570] sm:$0xff] }
 0x17b   : > { %13337 = vst [vmem:[#allocation100_spill] sm:$0xff] %v8285_v12  ;;  %v6304_v12 = vld [vmem:[%s12753_s1 + $0x578] sm:$0xff] }
 0x17e   : > { %1846 = vperm.xlu2 %6527, %v6301_v7   ;;  %v6302_v7 = vld [vmem:[%s12753_s1 + $0x568] sm:$0xff] }
 0x17f   : > { %1841 = vperm.xlu1 %6526, %v6300_v11   ;;  %1836 = vperm.xlu0 %6525, %v6299_v52  }
 0x180   : > { %v8296_v20 = vpop.permute.xlu2 %1616 }
 0x181   : > { %13338 = vst [vmem:[#allocation101_spill] sm:$0xff] %v8296_v20  ;;  %v8298_v45 = vpop.permute.xlu1 %1566  ;;  %v8300_v25 = vpop.permute.xlu0 %1561 }
 0x182   : > { %13339 = vst [vmem:[#allocation102_spill] sm:$0xff] %v8298_v45  ;;  %v6306_v45 = vld [vmem:[%s12753_s1 + $0x588] sm:$0xff] }
 0x183   : > { %13340 = vst [vmem:[#allocation103_spill] sm:$0xff] %v8300_v25  ;;  %v6307_v25 = vld [vmem:[%s12753_s1 + $0x590] sm:$0xff] }
 0x186   : > { %1861 = vperm.xlu2 %6527, %v6304_v12   ;;  %v6305_v12 = vld [vmem:[%s12753_s1 + $0x580] sm:$0xff] }
 0x187   : > { %1856 = vperm.xlu1 %6526, %v6303_v38   ;;  %1851 = vperm.xlu0 %6525, %v6302_v7  }
 0x188   : > { %v8311_v11 = vpop.permute.xlu2 %1631 }
 0x189   : > { %13341 = vst [vmem:[#allocation104_spill] sm:$0xff] %v8311_v11  ;;  %v8313_v52 = vpop.permute.xlu1 %1581  ;;  %v8315_v20 = vpop.permute.xlu0 %1576 }
 0x18a   : > { %13342 = vst [vmem:[#allocation105_spill] sm:$0xff] %v8313_v52  ;;  %v6310_v52 = vld [vmem:[%s12753_s1 + $0x5a8] sm:$0xff] }
 0x18b   : > { %13343 = vst [vmem:[#allocation106_spill] sm:$0xff] %v8315_v20  ;;  %v6309_v20 = vld [vmem:[%s12753_s1 + $0x5a0] sm:$0xff] }
 0x18e   : > { %1876 = vperm.xlu2 %6527, %v6307_v25   ;;  %v6308_v25 = vld [vmem:[%s12753_s1 + $0x598] sm:$0xff] }
 0x18f   : > { %1871 = vperm.xlu1 %6526, %v6306_v45   ;;  %1866 = vperm.xlu0 %6525, %v6305_v12  }
 0x190   : > { %v8326_v38 = vpop.permute.xlu2 %1646 }
 0x191   : > { %13344 = vst [vmem:[#allocation107_spill] sm:$0xff] %v8326_v38  ;;  %v8328_v7 = vpop.permute.xlu1 %1596  ;;  %v8330_v11 = vpop.permute.xlu0 %1591 }
 0x192   : > { %13345 = vst [vmem:[#allocation108_spill] sm:$0xff] %v8328_v7  ;;  %v6312_v7 = vld [vmem:[%s12753_s1 + $0x5b8] sm:$0xff] }
 0x193   : > { %13346 = vst [vmem:[#allocation109_spill] sm:$0xff] %v8330_v11  ;;  %v6313_v11 = vld [vmem:[%s12753_s1 + $0x5c0] sm:$0xff] }
 0x196   : > { %1891 = vperm.xlu2 %6527, %v6310_v52   ;;  %v6311_v52 = vld [vmem:[%s12753_s1 + $0x5b0] sm:$0xff] }
 0x197   : > { %1886 = vperm.xlu1 %6526, %v6309_v20   ;;  %1881 = vperm.xlu0 %6525, %v6308_v25  }
 0x198   : > { %v8341_v45 = vpop.permute.xlu2 %1661 }
 0x199   : > { %13347 = vst [vmem:[#allocation110_spill] sm:$0xff] %v8341_v45  ;;  %v8343_v12 = vpop.permute.xlu1 %1611  ;;  %v8345_v38 = vpop.permute.xlu0 %1606 }
 0x19a   : > { %13348 = vst [vmem:[#allocation111_spill] sm:$0xff] %v8343_v12  ;;  %v6315_v12 = vld [vmem:[%s12753_s1 + $0x5d0] sm:$0xff] }
 0x19b   : > { %13349 = vst [vmem:[#allocation112_spill] sm:$0xff] %v8345_v38  ;;  %v6316_v38 = vld [vmem:[%s12753_s1 + $0x5d8] sm:$0xff] }
 0x19e   : > { %1906 = vperm.xlu2 %6527, %v6313_v11   ;;  %v6314_v11 = vld [vmem:[%s12753_s1 + $0x5c8] sm:$0xff] }
 0x19f   : > { %1901 = vperm.xlu1 %6526, %v6312_v7   ;;  %1896 = vperm.xlu0 %6525, %v6311_v52  }
 0x1a0   : > { %v8356_v20 = vpop.permute.xlu2 %1676 }
 0x1a1   : > { %13350 = vst [vmem:[#allocation113_spill] sm:$0xff] %v8356_v20  ;;  %v8358_v25 = vpop.permute.xlu1 %1626  ;;  %v8360_v45 = vpop.permute.xlu0 %1621  ;;  %v6318_v20 = vld [vmem:[%s12753_s1 + $0x5e8] sm:$0xff] }
 0x1a2   : > { %13351 = vst [vmem:[#allocation114_spill] sm:$0xff] %v8358_v25  ;;  %v6319_v25 = vld [vmem:[%s12753_s1 + $0x5f0] sm:$0xff] }
 0x1a3   : > { %13352 = vst [vmem:[#allocation115_spill] sm:$0xff] %v8360_v45 }
 0x1a6   : > { %1921 = vperm.xlu2 %6527, %v6316_v38   ;;  %v6317_v38 = vld [vmem:[%s12753_s1 + $0x5e0] sm:$0xff] }
 0x1a7   : > { %1916 = vperm.xlu1 %6526, %v6315_v12   ;;  %1911 = vperm.xlu0 %6525, %v6314_v11  }
 0x1a8   : > { %v8371_v7 = vpop.permute.xlu2 %1691 }
 0x1a9   : > { %13353 = vst [vmem:[#allocation116_spill] sm:$0xff] %v8371_v7  ;;  %v8373_v52 = vpop.permute.xlu1 %1641  ;;  %v8375_v45 = vpop.permute.xlu0 %1636  ;;  %v6321_v7 = vld [vmem:[%s12753_s1 + $0x600] sm:$0xff] }
 0x1aa   : > { %13354 = vst [vmem:[#allocation117_spill] sm:$0xff] %v8373_v52 }
 0x1ab   : > { %13355 = vst [vmem:[#allocation118_spill] sm:$0xff] %v8375_v45  ;;  %v6322_v45 = vld [vmem:[%s12753_s1 + $0x608] sm:$0xff] }
 0x1ae   : > { %1936 = vperm.xlu2 %6527, %v6319_v25   ;;  %v6320_v25 = vld [vmem:[%s12753_s1 + $0x5f8] sm:$0xff] }
 0x1af   : > { %1931 = vperm.xlu1 %6526, %v6318_v20   ;;  %1926 = vperm.xlu0 %6525, %v6317_v38  }
 0x1b0   : > { %v8386_v12 = vpop.permute.xlu2 %1706 }
 0x1b1   : > { %13356 = vst [vmem:[#allocation119_spill] sm:$0xff] %v8386_v12  ;;  %v8388_v11 = vpop.permute.xlu1 %1656  ;;  %v8390_v52 = vpop.permute.xlu0 %1651  ;;  %v6324_v12 = vld [vmem:[%s12753_s1 + $0x618] sm:$0xff] }
 0x1b2   : > { %13357 = vst [vmem:[#allocation120_spill] sm:$0xff] %v8388_v11  ;;  %v6325_v11 = vld [vmem:[%s12753_s1 + $0x620] sm:$0xff] }
 0x1b3   : > { %13358 = vst [vmem:[#allocation121_spill] sm:$0xff] %v8390_v52 }
 0x1b6   : > { %2016 = vperm.xlu2 %6527, %v6322_v45   ;;  %v6323_v45 = vld [vmem:[%s12753_s1 + $0x610] sm:$0xff] }
 0x1b7   : > { %2011 = vperm.xlu1 %6526, %v6321_v7   ;;  %1941 = vperm.xlu0 %6525, %v6320_v25  }
 0x1b8   : > { %v8401_v20 = vpop.permute.xlu2 %1786 }
 0x1b9   : > { %13359 = vst [vmem:[#allocation122_spill] sm:$0xff] %v8401_v20  ;;  %v8403_v38 = vpop.permute.xlu1 %1671  ;;  %v8405_v52 = vpop.permute.xlu0 %1666  ;;  %v6327_v20 = vld [vmem:[%s12753_s1 + $0x630] sm:$0xff] }
 0x1ba   : > { %13360 = vst [vmem:[#allocation123_spill] sm:$0xff] %v8403_v38  ;;  %v6328_v38 = vld [vmem:[%s12753_s1 + $0x638] sm:$0xff] }
 0x1bb   : > { %13361 = vst [vmem:[#allocation124_spill] sm:$0xff] %v8405_v52 }
 0x1be   : > { %2031 = vperm.xlu2 %6527, %v6325_v11   ;;  %v6326_v11 = vld [vmem:[%s12753_s1 + $0x628] sm:$0xff] }
 0x1bf   : > { %2026 = vperm.xlu1 %6526, %v6324_v12   ;;  %2021 = vperm.xlu0 %6525, %v6323_v45  }
 0x1c0   : > { %v8416_v7 = vpop.permute.xlu2 %1801 }
 0x1c1   : > { %13362 = vst [vmem:[#allocation125_spill] sm:$0xff] %v8416_v7  ;;  %v8418_v25 = vpop.permute.xlu1 %1686  ;;  %v8420_v52 = vpop.permute.xlu0 %1681 }
 0x1c2   : > { %13363 = vst [vmem:[#allocation126_spill] sm:$0xff] %v8418_v25  ;;  %v6331_v25 = vld [vmem:[%s12753_s1 + $0x650] sm:$0xff] }
 0x1c3   : > { %13364 = vst [vmem:[#allocation127_spill] sm:$0xff] %v8420_v52  ;;  %v6330_v52 = vld [vmem:[%s12753_s1 + $0x648] sm:$0xff] }
 0x1c6   : > { %2046 = vperm.xlu2 %6527, %v6328_v38   ;;  %v6329_v38 = vld [vmem:[%s12753_s1 + $0x640] sm:$0xff] }
 0x1c7   : > { %2041 = vperm.xlu1 %6526, %v6327_v20   ;;  %2036 = vperm.xlu0 %6525, %v6326_v11  }
 0x1c8   : > { %v8431_v12 = vpop.permute.xlu2 %1816 }
 0x1c9   : > { %13365 = vst [vmem:[#allocation128_spill] sm:$0xff] %v8431_v12  ;;  %v8433_v45 = vpop.permute.xlu1 %1701  ;;  %v8435_v7 = vpop.permute.xlu0 %1696 }
 0x1ca   : > { %13366 = vst [vmem:[#allocation129_spill] sm:$0xff] %v8433_v45  ;;  %v6333_v45 = vld [vmem:[%s12753_s1 + $0x660] sm:$0xff] }
 0x1cb   : > { %13367 = vst [vmem:[#allocation130_spill] sm:$0xff] %v8435_v7  ;;  %v6334_v7 = vld [vmem:[%s12753_s1 + $0x668] sm:$0xff] }
 0x1ce   : > { %2061 = vperm.xlu2 %6527, %v6331_v25   ;;  %v6332_v25 = vld [vmem:[%s12753_s1 + $0x658] sm:$0xff] }
 0x1cf   : > { %2056 = vperm.xlu1 %6526, %v6330_v52   ;;  %2051 = vperm.xlu0 %6525, %v6329_v38  }
 0x1d0   : > { %v8446_v20 = vpop.permute.xlu2 %1831 }
 0x1d1   : > { %13368 = vst [vmem:[#allocation131_spill] sm:$0xff] %v8446_v20  ;;  %v8448_v11 = vpop.permute.xlu1 %1716  ;;  %v8450_v12 = vpop.permute.xlu0 %1711 }
 0x1d2   : > { %13369 = vst [vmem:[#allocation132_spill] sm:$0xff] %v8448_v11  ;;  %v6337_v11 = vld [vmem:[%s12753_s1 + $0x680] sm:$0xff] }
 0x1d3   : > { %13370 = vst [vmem:[#allocation133_spill] sm:$0xff] %v8450_v12  ;;  %v6336_v12 = vld [vmem:[%s12753_s1 + $0x678] sm:$0xff] }
 0x1d6   : > { %2076 = vperm.xlu2 %6527, %v6334_v7   ;;  %v6335_v7 = vld [vmem:[%s12753_s1 + $0x670] sm:$0xff] }
 0x1d7   : > { %2071 = vperm.xlu1 %6526, %v6333_v45   ;;  %2066 = vperm.xlu0 %6525, %v6332_v25   ;;  %v8476_v45 = vpop.f32.mrf.mxu0 }
 0x1d8   : > { %v8461_v52 = vpop.permute.xlu2 %1846 }
 0x1d9   : > { %13371 = vst [vmem:[#allocation134_spill] sm:$0xff] %v8461_v52  ;;  %v8463_v38 = vpop.permute.xlu1 %1796  ;;  %v8465_v20 = vpop.permute.xlu0 %1791 }
 0x1da   : > { %13372 = vst [vmem:[#allocation135_spill] sm:$0xff] %v8463_v38 }
 0x1db   : > { %13373 = vst [vmem:[#allocation136_spill] sm:$0xff] %v8465_v20  ;;  %v6340_v20 = vld [vmem:[%s12753_s1 + $0x698] sm:$0xff] }
 0x1de   : > { %2091 = vperm.xlu2 %6527, %v6337_v11   ;;  %v6338_v11 = vld [vmem:[%s12753_s1 + $0x688] sm:$0xff] }
 0x1df   : > { %2086 = vperm.xlu1 %6526, %v6336_v12   ;;  %2081 = vperm.xlu0 %6525, %v6335_v7   ;;  %v8493_v12 = vpop.f32.mrf.mxu0 }
 0x1e0   : > { %v8478_v25 = vpop.permute.xlu2 %1861 }
 0x1e1   : > { %13374 = vst [vmem:[#allocation137_spill] sm:$0xff] %v8478_v25  ;;  %v8480_v52 = vpop.permute.xlu1 %1811  ;;  %v8482_v38 = vpop.permute.xlu0 %1806 }
 0x1e2   : > { %13375 = vst [vmem:[#allocation138_spill] sm:$0xff] %v8480_v52  ;;  %v6343_v52 = vld [vmem:[%s12753_s1 + $0x6b0] sm:$0xff] }
 0x1e3   : > { %13376 = vst [vmem:[#allocation139_spill] sm:$0xff] %v8482_v38 }
 0x1e6   : > { %2106 = vperm.xlu2 %6527, %v6340_v20  }
 0x1e7   : > { %2101 = vperm.xlu1 %6526, %v6339_v19   ;;  %2096 = vperm.xlu0 %6525, %v6338_v11   ;;  %v6341_v19 = vld [vmem:[%s12753_s1 + $0x6a0] sm:$0xff] }
 0x1e8   : > { %v8495_v7 = vpop.permute.xlu2 %1876 }
 0x1e9   : > { %13377 = vst [vmem:[#allocation140_spill] sm:$0xff] %v8495_v7  ;;  %v8497_v25 = vpop.permute.xlu1 %1826  ;;  %v8499_v38 = vpop.permute.xlu0 %1821 }
 0x1ea   : > { %13378 = vst [vmem:[#allocation141_spill] sm:$0xff] %v8497_v25  ;;  %v8516_v25 = vpop.f32.mrf.mxu0 }
 0x1eb   : > { %13379 = vst [vmem:[#allocation142_spill] sm:$0xff] %v8499_v38  ;;  %v6346_v38 = vld [vmem:[%s12753_s1 + $0x6c8] sm:$0xff] }
 0x1ee   : > { %2121 = vperm.xlu2 %6527, %v6343_v52  }
 0x1ef   : > { %2116 = vperm.xlu1 %6526, %v6342_v16   ;;  %2111 = vperm.xlu0 %6525, %v6341_v19   ;;  %v6344_v16 = vld [vmem:[%s12753_s1 + $0x6b8] sm:$0xff] }
 0x1f0   : > { %v8510_v20 = vpop.permute.xlu2 %1891 }
 0x1f1   : > { %13380 = vst [vmem:[#allocation143_spill] sm:$0xff] %v8510_v20  ;;  %v8512_v11 = vpop.permute.xlu1 %1841  ;;  %v8514_v7 = vpop.permute.xlu0 %1836 }
 0x1f2   : > { %13381 = vst [vmem:[#allocation144_spill] sm:$0xff] %v8512_v11  ;;  %v8536_v11 = vpop.f32.mrf.mxu0 }
 0x1f3   : > { %13382 = vst [vmem:[#allocation145_spill] sm:$0xff] %v8514_v7  ;;  %v6349_v7 = vld [vmem:[%s12753_s1 + $0x6e0] sm:$0xff] }
 0x1f6   : > { %2136 = vperm.xlu2 %6527, %v6346_v38  }
 0x1f7   : > { %2131 = vperm.xlu1 %6526, %v6345_v18   ;;  %2126 = vperm.xlu0 %6525, %v6344_v16   ;;  %v6347_v18 = vld [vmem:[%s12753_s1 + $0x6d0] sm:$0xff] }
 0x1f8   : > { %v8527_v52 = vpop.permute.xlu2 %1906 }
 0x1f9   : > { %13383 = vst [vmem:[#allocation146_spill] sm:$0xff] %v8527_v52  ;;  %v8529_v19 = vpop.permute.xlu1 %1856  ;;  %v8531_v20 = vpop.permute.xlu0 %1851 }
 0x1fa   : > { %13384 = vst [vmem:[#allocation147_spill] sm:$0xff] %v8529_v19  ;;  %v6352_v19 = vld [vmem:[%s12753_s1 + $0x6f8] sm:$0xff] }
 0x1fb   : > { %13385 = vst [vmem:[#allocation148_spill] sm:$0xff] %v8531_v20  ;;  %v6351_v20 = vld [vmem:[%s12753_s1 + $0x6f0] sm:$0xff] }
 0x1fe   : > { %2151 = vperm.xlu2 %6527, %v6349_v7   ;;  %v6350_v7 = vld [vmem:[%s12753_s1 + $0x6e8] sm:$0xff] }
 0x1ff   : > { %2146 = vperm.xlu1 %6526, %v6348_v40   ;;  %2141 = vperm.xlu0 %6525, %v6347_v18   ;;  %v8559_v40 = vpop.f32.mrf.mxu0 }
 0x200   : > { %v8544_v38 = vpop.permute.xlu2 %1921 }
 0x201   : > { %13386 = vst [vmem:[#allocation149_spill] sm:$0xff] %v8544_v38  ;;  %v8546_v16 = vpop.permute.xlu1 %1871  ;;  %v8548_v52 = vpop.permute.xlu0 %1866 }
 0x202   : > { %13387 = vst [vmem:[#allocation150_spill] sm:$0xff] %v8546_v16  ;;  %v6355_v16 = vld [vmem:[%s12753_s1 + $0x710] sm:$0xff] }
 0x203   : > { %13388 = vst [vmem:[#allocation151_spill] sm:$0xff] %v8548_v52 }
 0x206   : > { %2166 = vperm.xlu2 %6527, %v6352_v19   ;;  %v6353_v19 = vld [vmem:[%s12753_s1 + $0x700] sm:$0xff] }
 0x207   : > { %2161 = vperm.xlu1 %6526, %v6351_v20   ;;  %2156 = vperm.xlu0 %6525, %v6350_v7   ;;  %v8576_v20 = vpop.f32.mrf.mxu0 }
 0x208   : > { %v8561_v18 = vpop.permute.xlu2 %1936 }
 0x209   : > { %13389 = vst [vmem:[#allocation152_spill] sm:$0xff] %v8561_v18  ;;  %v8563_v38 = vpop.permute.xlu1 %1886  ;;  %v8565_v52 = vpop.permute.xlu0 %1881 }
 0x20a   : > { %13390 = vst [vmem:[#allocation153_spill] sm:$0xff] %v8563_v38 }
 0x20b   : > { %13391 = vst [vmem:[#allocation154_spill] sm:$0xff] %v8565_v52  ;;  %v6358_v52 = vld [vmem:[%s12753_s1 + $0x728] sm:$0xff] }
 0x20e   : > { %2246 = vperm.xlu2 %6527, %v6355_v16  }
 0x20f   : > { %2241 = vperm.xlu1 %6526, %v6354_v33   ;;  %2236 = vperm.xlu0 %6525, %v6353_v19   ;;  %v6356_v33 = vld [vmem:[%s12753_s1 + $0x718] sm:$0xff] }
 0x210   : > { %v8578_v7 = vpop.permute.xlu2 %2016 }
 0x211   : > { %13392 = vst [vmem:[#allocation155_spill] sm:$0xff] %v8578_v7  ;;  %v8580_v18 = vpop.permute.xlu1 %1901  ;;  %v8582_v38 = vpop.permute.xlu0 %1896  ;;  %v6361_v7 = vld [vmem:[%s12753_s1 + $0x740] sm:$0xff] }
 0x212   : > { %13393 = vst [vmem:[#allocation156_spill] sm:$0xff] %v8580_v18  ;;  %v8599_v18 = vpop.f32.mrf.mxu0 }
 0x213   : > { %13394 = vst [vmem:[#allocation157_spill] sm:$0xff] %v8582_v38 }
 0x216   : > { %2261 = vperm.xlu2 %6527, %v6358_v52  }
 0x217   : > { %2256 = vperm.xlu1 %6526, %v6357_v6   ;;  %2251 = vperm.xlu0 %6525, %v6356_v33   ;;  %v6359_v6 = vld [vmem:[%s12753_s1 + $0x730] sm:$0xff] }
 0x218   : > { %v8593_v16 = vpop.permute.xlu2 %2031 }
 0x219   : > { %13395 = vst [vmem:[#allocation158_spill] sm:$0xff] %v8593_v16  ;;  %v8595_v19 = vpop.permute.xlu1 %1916  ;;  %v8597_v38 = vpop.permute.xlu0 %1911 }
 0x21a   : > { %13396 = vst [vmem:[#allocation159_spill] sm:$0xff] %v8595_v19  ;;  %v8619_v16 = vpop.f32.mrf.mxu0 }
 0x21b   : > { %13397 = vst [vmem:[#allocation160_spill] sm:$0xff] %v8597_v38  ;;  %v6364_v38 = vld [vmem:[%s12753_s1 + $0x758] sm:$0xff] }
 0x21e   : > { %2276 = vperm.xlu2 %6527, %v6361_v7  }
 0x21f   : > { %2271 = vperm.xlu1 %6526, %v6360_v59   ;;  %2266 = vperm.xlu0 %6525, %v6359_v6   ;;  %v6362_v59 = vld [vmem:[%s12753_s1 + $0x748] sm:$0xff] }
 0x220   : > { %v8610_v52 = vpop.permute.xlu2 %2046 }
 0x221   : > { %13398 = vst [vmem:[#allocation161_spill] sm:$0xff] %v8610_v52  ;;  %v8612_v33 = vpop.permute.xlu1 %1931  ;;  %v8614_v19 = vpop.permute.xlu0 %1926  ;;  %v6366_v52 = vld [vmem:[%s12753_s1 + $0x768] sm:$0xff] }
 0x222   : > { %13399 = vst [vmem:[#allocation162_spill] sm:$0xff] %v8612_v33  ;;  %v6367_v33 = vld [vmem:[%s12753_s1 + $0x770] sm:$0xff] }
 0x223   : > { %13400 = vst [vmem:[#allocation163_spill] sm:$0xff] %v8614_v19 }
 0x226   : > { %2291 = vperm.xlu2 %6527, %v6364_v38   ;;  %v6365_v38 = vld [vmem:[%s12753_s1 + $0x760] sm:$0xff] }
 0x227   : > { %2286 = vperm.xlu1 %6526, %v6363_v29   ;;  %2281 = vperm.xlu0 %6525, %v6362_v59   ;;  %v8642_v29 = vpop.f32.mrf.mxu0 }
 0x228   : > { %v8627_v7 = vpop.permute.xlu2 %2061 }
 0x229   : > { %13401 = vst [vmem:[#allocation164_spill] sm:$0xff] %v8627_v7  ;;  %v8629_v6 = vpop.permute.xlu1 %2011  ;;  %v8631_v19 = vpop.permute.xlu0 %1941 }
 0x22a   : > { %13402 = vst [vmem:[#allocation165_spill] sm:$0xff] %v8629_v6  ;;  %v6370_v6 = vld [vmem:[%s12753_s1 + $0x788] sm:$0xff] }
 0x22b   : > { %13403 = vst [vmem:[#allocation166_spill] sm:$0xff] %v8631_v19 }
 0x22e   : > { %2306 = vperm.xlu2 %6527, %v6367_v33   ;;  %v6368_v33 = vld [vmem:[%s12753_s1 + $0x778] sm:$0xff] }
 0x22f   : > { %2301 = vperm.xlu1 %6526, %v6366_v52   ;;  %2296 = vperm.xlu0 %6525, %v6365_v38   ;;  %v8659_v52 = vpop.f32.mrf.mxu0 }
 0x230   : > { %v8644_v59 = vpop.permute.xlu2 %2076 }
 0x231   : > { %13404 = vst [vmem:[#allocation167_spill] sm:$0xff] %v8644_v59  ;;  %v8646_v19 = vpop.permute.xlu1 %2026  ;;  %v8648_v7 = vpop.permute.xlu0 %2021 }
 0x232   : > { %13405 = vst [vmem:[#allocation168_spill] sm:$0xff] %v8646_v19  ;;  %v6373_v19 = vld [vmem:[%s12753_s1 + $0x7a0] sm:$0xff] }
 0x233   : > { %13406 = vst [vmem:[#allocation169_spill] sm:$0xff] %v8648_v7 }
 0x236   : > { %2321 = vperm.xlu2 %6527, %v6370_v6  }
 0x237   : > { %2316 = vperm.xlu1 %6526, %v6369_v26   ;;  %2311 = vperm.xlu0 %6525, %v6368_v33   ;;  %v6371_v26 = vld [vmem:[%s12753_s1 + $0x790] sm:$0xff] }
 0x238   : > { %v8661_v38 = vpop.permute.xlu2 %2091 }
 0x239   : > { %13407 = vst [vmem:[#allocation170_spill] sm:$0xff] %v8661_v38  ;;  %v8663_v59 = vpop.permute.xlu1 %2041  ;;  %v8665_v7 = vpop.permute.xlu0 %2036 }
 0x23a   : > { %13408 = vst [vmem:[#allocation171_spill] sm:$0xff] %v8663_v59  ;;  %v8682_v59 = vpop.f32.mrf.mxu0 }
 0x23b   : > { %13409 = vst [vmem:[#allocation172_spill] sm:$0xff] %v8665_v7  ;;  %v6376_v7 = vld [vmem:[%s12753_s1 + $0x7b8] sm:$0xff] }
 0x23e   : > { %2336 = vperm.xlu2 %6527, %v6373_v19  }
 0x23f   : > { %2331 = vperm.xlu1 %6526, %v6372_v54   ;;  %2326 = vperm.xlu0 %6525, %v6371_v26   ;;  %v6374_v54 = vld [vmem:[%s12753_s1 + $0x7a8] sm:$0xff] }
 0x240   : > { %v8676_v6 = vpop.permute.xlu2 %2106 }
 0x241   : > { %13410 = vst [vmem:[#allocation173_spill] sm:$0xff] %v8676_v6  ;;  %v8678_v33 = vpop.permute.xlu1 %2056  ;;  %v8680_v38 = vpop.permute.xlu0 %2051 }
 0x242   : > { %13411 = vst [vmem:[#allocation174_spill] sm:$0xff] %v8678_v33  ;;  %v8702_v33 = vpop.f32.mrf.mxu0 }
 0x243   : > { %13412 = vst [vmem:[#allocation175_spill] sm:$0xff] %v8680_v38  ;;  %v6379_v38 = vld [vmem:[%s12753_s1 + $0x7d0] sm:$0xff] }
 0x246   : > { %2351 = vperm.xlu2 %6527, %v6376_v7  }
 0x247   : > { %2346 = vperm.xlu1 %6526, %v6375_v47   ;;  %2341 = vperm.xlu0 %6525, %v6374_v54   ;;  %v6377_v47 = vld [vmem:[%s12753_s1 + $0x7c0] sm:$0xff] }
 0x248   : > { %v8693_v19 = vpop.permute.xlu2 %2121 }
 0x249   : > { %13413 = vst [vmem:[#allocation176_spill] sm:$0xff] %v8693_v19  ;;  %v8695_v26 = vpop.permute.xlu1 %2071  ;;  %v8697_v6 = vpop.permute.xlu0 %2066 }
 0x24a   : > { %13414 = vst [vmem:[#allocation177_spill] sm:$0xff] %v8695_v26  ;;  %v6382_v26 = vld [vmem:[%s12753_s1 + $0x7e8] sm:$0xff] }
 0x24b   : > { %13415 = vst [vmem:[#allocation178_spill] sm:$0xff] %v8697_v6  ;;  %v6381_v6 = vld [vmem:[%s12753_s1 + $0x7e0] sm:$0xff] }
 0x24e   : > { %2366 = vperm.xlu2 %6527, %v6379_v38   ;;  %v6380_v38 = vld [vmem:[%s12753_s1 + $0x7d8] sm:$0xff] }
 0x24f   : > { %2361 = vperm.xlu1 %6526, %v6378_v0   ;;  %2356 = vperm.xlu0 %6525, %v6377_v47   ;;  %v8725_v0 = vpop.f32.mrf.mxu0 }
 0x250   : > { %v8710_v7 = vpop.permute.xlu2 %2136 }
 0x251   : > { %13416 = vst [vmem:[#allocation179_spill] sm:$0xff] %v8710_v7  ;;  %v8712_v54 = vpop.permute.xlu1 %2086  ;;  %v8714_v19 = vpop.permute.xlu0 %2081 }
 0x252   : > { %13417 = vst [vmem:[#allocation180_spill] sm:$0xff] %v8712_v54  ;;  %v6385_v54 = vld [vmem:[%s12753_s1 + $0x800] sm:$0xff] }
 0x253   : > { %13418 = vst [vmem:[#allocation181_spill] sm:$0xff] %v8714_v19 }
 0x256   : > { %2381 = vperm.xlu2 %6527, %v6382_v26   ;;  %v6383_v26 = vld [vmem:[%s12753_s1 + $0x7f0] sm:$0xff] }
 0x257   : > { %2376 = vperm.xlu1 %6526, %v6381_v6   ;;  %2371 = vperm.xlu0 %6525, %v6380_v38   ;;  %v8742_v6 = vpop.f32.mrf.mxu0 }
 0x258   : > { %v8727_v47 = vpop.permute.xlu2 %2151 }
 0x259   : > { %13419 = vst [vmem:[#allocation182_spill] sm:$0xff] %v8727_v47  ;;  %v8729_v7 = vpop.permute.xlu1 %2101  ;;  %v8731_v19 = vpop.permute.xlu0 %2096 }
 0x25a   : > { %13420 = vst [vmem:[#allocation183_spill] sm:$0xff] %v8729_v7 }
 0x25b   : > { %13421 = vst [vmem:[#allocation184_spill] sm:$0xff] %v8731_v19  ;;  %v6388_v19 = vld [vmem:[%s12753_s1 + $0x818] sm:$0xff] }
 0x25e   : > { %2461 = vperm.xlu2 %6527, %v6385_v54  }
 0x25f   : > { %2391 = vperm.xlu1 %6526, %v6384_v30   ;;  %2386 = vperm.xlu0 %6525, %v6383_v26   ;;  %v6386_v30 = vld [vmem:[%s12753_s1 + $0x808] sm:$0xff] }
 0x260   : > { %v8744_v38 = vpop.permute.xlu2 %2166 }
 0x261   : > { %13422 = vst [vmem:[#allocation185_spill] sm:$0xff] %v8744_v38  ;;  %v8746_v47 = vpop.permute.xlu1 %2116  ;;  %v8748_v7 = vpop.permute.xlu0 %2111 }
 0x262   : > { %13423 = vst [vmem:[#allocation186_spill] sm:$0xff] %v8746_v47  ;;  %v6391_v47 = vld [vmem:[%s12753_s1 + $0x830] sm:$0xff] }
 0x263   : > { %13424 = vst [vmem:[#allocation187_spill] sm:$0xff] %v8748_v7  ;;  %v8765_v7 = vpop.f32.mrf.mxu0 }
 0x266   : > { %2476 = vperm.xlu2 %6527, %v6388_v19   ;;  %v6390_v19 = vld [vmem:[%s12753_s1 + $0x828] sm:$0xff] }
 0x267   : > { %2471 = vperm.xlu1 %6526, %v6387_v39   ;;  %2466 = vperm.xlu0 %6525, %v6386_v30   ;;  %v6389_v39 = vld [vmem:[%s12753_s1 + $0x820] sm:$0xff] }
 0x268   : > { %v8759_v54 = vpop.permute.xlu2 %2246 }
 0x269   : > { %13425 = vst [vmem:[#allocation188_spill] sm:$0xff] %v8759_v54  ;;  %v8761_v26 = vpop.permute.xlu1 %2131  ;;  %v8763_v38 = vpop.permute.xlu0 %2126  ;;  %v6394_v54 = vld [vmem:[%s12753_s1 + $0x848] sm:$0xff] }
 0x26a   : > { %13426 = vst [vmem:[#allocation189_spill] sm:$0xff] %v8761_v26 }
 0x26b   : > { %13427 = vst [vmem:[#allocation190_spill] sm:$0xff] %v8763_v38  ;;  %v8787_v49 = vpop.f32.mrf.mxu0 }
 0x26e   : > { %2491 = vperm.xlu2 %6527, %v6391_v47   ;;  %v6392_v47 = vld [vmem:[%s12753_s1 + $0x838] sm:$0xff] }
 0x26f   : > { %2486 = vperm.xlu1 %6526, %v6390_v19   ;;  %2481 = vperm.xlu0 %6525, %v6389_v39   ;;  %v8795_v19 = vpop.f32.mrf.mxu2 }
 0x270   : > { %v8778_v30 = vpop.permute.xlu2 %2261 }
 0x271   : > { %13428 = vst [vmem:[#allocation191_spill] sm:$0xff] %v8778_v30  ;;  %v8780_v26 = vpop.permute.xlu1 %2146  ;;  %v8782_v38 = vpop.permute.xlu0 %2141  ;;  %v6397_v30 = vld [vmem:[%s12753_s1 + $0x860] sm:$0xff] }
 0x272   : > { %13429 = vst [vmem:[#allocation192_spill] sm:$0xff] %v8780_v26 }
 0x273   : > { %13430 = vst [vmem:[#allocation193_spill] sm:$0xff] %v8782_v38 }
 0x276   : > { %2506 = vperm.xlu2 %6527, %v6394_v54   ;;  %v6395_v54 = vld [vmem:[%s12753_s1 + $0x850] sm:$0xff] }
 0x277   : > { %2501 = vperm.xlu1 %6526, %v6393_v62   ;;  %2496 = vperm.xlu0 %6525, %v6392_v47   ;;  %v8812_v62 = vpop.f32.mrf.mxu0  ;;  %v8814_v47 = vpop.f32.mrf.mxu2 }
 0x278   : > { %v8797_v39 = vpop.permute.xlu2 %2276 }
 0x279   : > { %13431 = vst [vmem:[#allocation194_spill] sm:$0xff] %v8797_v39  ;;  %v8799_v38 = vpop.permute.xlu1 %2161  ;;  %v8801_v26 = vpop.permute.xlu0 %2156 }
 0x27a   : > { %13432 = vst [vmem:[#allocation195_spill] sm:$0xff] %v8799_v38 }
 0x27b   : > { %13433 = vst [vmem:[#allocation196_spill] sm:$0xff] %v8801_v26 }
 0x27e   : > { %2521 = vperm.xlu2 %6527, %v6397_v30  }
 0x27f   : > { %2516 = vperm.xlu1 %6526, %v6396_v5   ;;  %2511 = vperm.xlu0 %6525, %v6395_v54   ;;  %v6398_v5 = vld [vmem:[%s12753_s1 + $0x868] sm:$0xff]  ;;  %v8831_v30 = vpop.f32.mrf.mxu0 }
 0x280   : > { %v8816_v38 = vpop.permute.xlu2 %2291 }
 0x281   : > { %13434 = vst [vmem:[#allocation197_spill] sm:$0xff] %v8816_v38  ;;  %v8818_v26 = vpop.permute.xlu1 %2241  ;;  %v8820_v39 = vpop.permute.xlu0 %2236 }
 0x282   : > { %13435 = vst [vmem:[#allocation198_spill] sm:$0xff] %v8818_v26  ;;  %v8839_v26 = vpop.f32.mrf.mxu2 }
 0x283   : > { %13436 = vst [vmem:[#allocation199_spill] sm:$0xff] %v8820_v39 }
 0x284   : > { %13440 = vst [vmem:[#allocation203_spill] sm:$0xff] %v8839_v26 }
 0x286   : > { %2536 = vperm.xlu2 %6527, %v6400_v10   ;;  %v6402_v10 = vld [vmem:[%s12753_s1 + $0x888] sm:$0xff] }
 0x287   : > { %2531 = vperm.xlu1 %6526, %v6399_v53   ;;  %2526 = vperm.xlu0 %6525, %v6398_v5   ;;  %v6401_v53 = vld [vmem:[%s12753_s1 + $0x880] sm:$0xff] }
 0x288   : > { %v8833_v54 = vpop.permute.xlu2 %2306 }
 0x289   : > { %13437 = vst [vmem:[#allocation200_spill] sm:$0xff] %v8833_v54  ;;  %v8835_v38 = vpop.permute.xlu1 %2256  ;;  %v8837_v39 = vpop.permute.xlu0 %2251 }
 0x28a   : > { %13438 = vst [vmem:[#allocation201_spill] sm:$0xff] %v8835_v38  ;;  %v8861_v8 = vpop.f32.mrf.mxu2 }
 0x28b   : > { %13439 = vst [vmem:[#allocation202_spill] sm:$0xff] %v8837_v39  ;;  %v8856_v39 = vpop.f32.mrf.mxu0 }
 0x28c   : > { %13444 = vst [vmem:[#allocation207_spill] sm:$0xff] %v8861_v8 }
 0x28e   : > { %2551 = vperm.xlu2 %6527, %v6403_v46   ;;  %v6405_v46 = vld [vmem:[%s12753_s1 + $0x8a0] sm:$0xff] }
 0x28f   : > { %2546 = vperm.xlu1 %6526, %v6402_v10   ;;  %2541 = vperm.xlu0 %6525, %v6401_v53   ;;  %v6404_v10 = vld [vmem:[%s12753_s1 + $0x898] sm:$0xff] }
 0x290   : > { %v8850_v5 = vpop.permute.xlu2 %2321 }
 0x291   : > { %13441 = vst [vmem:[#allocation204_spill] sm:$0xff] %v8850_v5  ;;  %v8852_v54 = vpop.permute.xlu1 %2271  ;;  %v8854_v38 = vpop.permute.xlu0 %2266 }
 0x292   : > { %13442 = vst [vmem:[#allocation205_spill] sm:$0xff] %v8852_v54  ;;  %v6409_v54 = vld [vmem:[%s12753_s1 + $0x8c0] sm:$0xff] }
 0x293   : > { %13443 = vst [vmem:[#allocation206_spill] sm:$0xff] %v8854_v38  ;;  %v8878_v17 = vpop.f32.mrf.mxu0 }
 0x296   : > { %2566 = vperm.xlu2 %6527, %v6406_v23   ;;  %v6407_v23 = vld [vmem:[%s12753_s1 + $0x8b0] sm:$0xff] }
 0x297   : > { %2561 = vperm.xlu1 %6526, %v6405_v46   ;;  %2556 = vperm.xlu0 %6525, %v6404_v10   ;;  %v550_v46 = vpop.f32.mrf.mxu2 }
 0x298   : > { %v8869_v53 = vpop.permute.xlu2 %2336 }
 0x299   : > { %13445 = vst [vmem:[#allocation208_spill] sm:$0xff] %v8869_v53  ;;  %v8871_v5 = vpop.permute.xlu1 %2286  ;;  %v8873_v38 = vpop.permute.xlu0 %2281 }
 0x29a   : > { %13446 = vst [vmem:[#allocation209_spill] sm:$0xff] %v8871_v5 }
 0x29b   : > { %13447 = vst [vmem:[#allocation210_spill] sm:$0xff] %v8873_v38  ;;  %v6412_v38 = vld [vmem:[%s12753_s1 + $0x8d8] sm:$0xff] }
 0x29e   : > { %2581 = vperm.xlu2 %6527, %v6409_v54   ;;  %v6410_v54 = vld [vmem:[%s12753_s1 + $0x8c8] sm:$0xff] }
 0x29f   : > { %2576 = vperm.xlu1 %6526, %v6408_v24   ;;  %2571 = vperm.xlu0 %6525, %v6407_v23   ;;  %v8904_v24 = vld [vmem:[%s12755_s3] ss:$0 sm:$0xff]  ;;  %v8906_v23 = vpop.f32.mrf.mxu0 }
 0x2a0   : > { %v8886_v10 = vpop.permute.xlu2 %2351  ;;  %v461_v26 = vadd.f32 %v8904_v24, %v7978_v41  ;;  %v551_v13 = vadd.f32 %v8904_v24, %v550_v46 }
 0x2a1   : > { %13448 = vst [vmem:[#allocation211_spill] sm:$0xff] %v8886_v10  ;;  %v8888_v53 = vpop.permute.xlu1 %2301  ;;  %v8890_v5 = vpop.permute.xlu0 %2296 }
 0x2a2   : > { %13449 = vst [vmem:[#allocation212_spill] sm:$0xff] %v8888_v53  ;;  %v553_v10 = vpop.f32.mrf.mxu2  ;;  %v8929_v41 = vmax.f32 %v461_v26, 0.0  ;;  %v8931_v46 = vmax.f32 %v551_v13, 0.0 }
 0x2a3   : > { %13450 = vst [vmem:[#allocation213_spill] sm:$0xff] %v8890_v5  ;;  %v554_v35 = vadd.f32 %v8904_v24, %v553_v10 }
 0x2a4   : > { %13454 = vst [vmem:[#allocation217_spill] sm:$0xff] %v8929_v41 }
 0x2a5   : > { %13455 = vst [vmem:[#allocation218_spill] sm:$0xff] %v8931_v46  ;;  %v8933_v10 = vmax.f32 %v554_v35, 0.0 }
 0x2a6   : > { %2596 = vperm.xlu2 %6527, %v6412_v38   ;;  %v6415_v38 = vld [vmem:[%s12753_s1 + $0x8f0] sm:$0xff] }
 0x2a7   : > { %2591 = vperm.xlu1 %6526, %v6411_v48   ;;  %2586 = vperm.xlu0 %6525, %v6410_v54   ;;  %v464_v48 = vadd.f32 %v8904_v24, %v8476_v45  ;;  %v6414_v54 = vld [vmem:[%s12753_s1 + $0x8e8] sm:$0xff]  ;;  %v1173_v45 = vmul.f32 %v7983_v43, %v8929_v41  ;;  %v1172_v26 = vmul.f32 %v7985_v44, %v8933_v10 }
 0x2a8   : > { %v8908_v5 = vpop.permute.xlu2 %2366  ;;  %v1171_v43 = vmul.f32 %v7911_v60, %v8931_v46  ;;  %v482_v44 = vadd.f32 %v8904_v24, %v8599_v18 }
 0x2a9   : > { %13451 = vst [vmem:[#allocation214_spill] sm:$0xff] %v8908_v5  ;;  %v8910_v53 = vpop.permute.xlu1 %2316  ;;  %v8912_v61 = vpop.permute.xlu0 %2311  ;;  %v6413_v5 = vld [vmem:[%s12753_s1 + $0x8e0] sm:$0xff] }
 0x2aa   : > { %13452 = vst [vmem:[#allocation215_spill] sm:$0xff] %v8910_v53  ;;  %v8935_v53 = vmax.f32 %v464_v48, 0.0  ;;  %v470_v48 = vadd.f32 %v8904_v24, %v8516_v25  ;;  %v8978_v18 = vmax.f32 %v482_v44, 0.0 }
 0x2ab   : > { %13453 = vst [vmem:[#allocation216_spill] sm:$0xff] %v8912_v61  ;;  %v8939_v61 = vpop.f32.mrf.mxu0 }
 0x2ac   : > { %13456 = vst [vmem:[#allocation219_spill] sm:$0xff] %v8935_v53  ;;  %v1174_v35 = vmul.f32 %v7928_v4, %v8935_v53  ;;  %v6528_v4 = vpack.i.bf16 %v1172_v26, %v1171_v43  ;;  %v500_v43 = vadd.f32 %v8904_v24, %v8725_v0  ;;  %v1180_v0 = vmul.f32 %v7962_v28, %v8978_v18 }
 0x2ad   : > { %13464 = vst [vmem:[#allocation227_spill] sm:$0xff] %v8978_v18  ;;  %v497_v28 = vadd.f32 %v8904_v24, %v8702_v33 }
 0x2ae   : > { %2611 = vperm.xlu2 %6527, %v6415_v38   ;;  %v467_v38 = vadd.f32 %v8904_v24, %v8493_v12  ;;  %v473_v12 = vadd.f32 %v8904_v24, %v8536_v11 }
 0x2af   : > { %2606 = vperm.xlu1 %6526, %v6414_v54   ;;  %2601 = vperm.xlu0 %6525, %v6413_v5   ;;  %v479_v5 = vadd.f32 %v8904_v24, %v8576_v20  ;;  %v476_v54 = vadd.f32 %v8904_v24, %v8559_v40  ;;  %v6416_v20 = vld [vmem:[%s12753_s1 + $0x8f8] sm:$0xff]  ;;  %v8973_v40 = vmax.f32 %v470_v48, 0.0  ;;  %v9027_v33 = vmax.f32 %v497_v28, 0.0 }
 0x2b0   : > { %v8941_v57 = vpop.permute.xlu2 %2381  ;;  %v8971_v25 = vmax.f32 %v467_v38, 0.0  ;;  %v488_v38 = vadd.f32 %v8904_v24, %v8642_v29  ;;  %v512_v28 = vadd.f32 %v8904_v24, %v8812_v62 }
 0x2b1   : > { %13457 = vst [vmem:[#allocation220_spill] sm:$0xff] %v8941_v57  ;;  %v8945_v8 = vpop.permute.xlu1 %2331  ;;  %v8947_v13 = vpop.permute.xlu0 %2326  ;;  %v6533_v57 = vpack.i.bf16 %v1174_v35, %v1173_v45  ;;  %v8975_v60 = vmax.f32 %v476_v54, 0.0  ;;  %v1176_v26 = vmul.f32 %v7998_v55, %v8973_v40  ;;  %v485_v54 = vadd.f32 %v8904_v24, %v8619_v16 }
 0x2b2   : > { %13458 = vst [vmem:[#allocation221_spill] sm:$0xff] %v8945_v8  ;;  %v1175_v35 = vmul.f32 %v8000_v56, %v8971_v25  ;;  %v9012_v55 = vmax.f32 %v500_v43, 0.0 }
 0x2b3   : > { %13459 = vst [vmem:[#allocation222_spill] sm:$0xff] %v8947_v13  ;;  %v8968_v13 = vmax.f32 %v479_v5, 0.0  ;;  %v9017_v16 = vmax.f32 %v485_v54, 0.0  ;;  %v503_v54 = vadd.f32 %v8904_v24, %v8742_v6 }
 0x2b4   : > { %13461 = vst [vmem:[#allocation224_spill] sm:$0xff] %v8971_v25  ;;  %v6538_v29 = vpack.i.bf16 %v1176_v26, %v1175_v35  ;;  %v506_v35 = vadd.f32 %v8904_v24, %v8765_v7  ;;  %v622_v7 = vld [vmem:[%s12756_s4 + $0x110] sm:$0xff] }
 0x2b5   : > { %13460 = vst [vmem:[#allocation223_spill] sm:$0xff] %v8968_v13  ;;  %v1179_v11 = vmul.f32 %v8013_v2, %v8968_v13  ;;  %v529_v2 = vpop.f32.mrf.mxu0  ;;  %v1181_v26 = vmul.f32 %v8030_v22, %v9017_v16  ;;  %v9072_v6 = vmax.f32 %v503_v54, 0.0 }
 0x2b6   : > { %6534 = vrot.lane.b32.xlu2 %v6533_v57, %s7531_s9  ;;  %13462 = vst [vmem:[#allocation225_spill] sm:$0xff] %v8973_v40  ;;  %v8986_v57 = vmax.f32 %v473_v12, 0.0  ;;  %v494_v12 = vadd.f32 %v8904_v24, %v8682_v59  ;;  %v9065_v22 = vmax.f32 %v506_v35, 0.0 }
 0x2b7   : > { %13463 = vst [vmem:[#allocation226_spill] sm:$0xff] %v8975_v60  ;;  %2616 = vperm.xlu0 %6525, %v6416_v20   ;;  %6529 = vrot.lane.b32.xlu1 %v6528_v4, %s7531_s9  ;;  %v1178_v4 = vmul.f32 %v8015_v3, %v8975_v60  ;;  %v491_v20 = vadd.f32 %v8904_v24, %v8659_v52 }
 0x2b8   : > { %v8984_v45 = vpop.permute.xlu2 %2461  ;;  %13466 = vst [vmem:[#allocation229_spill] sm:$0xff] %v8986_v57  ;;  %v1177_v48 = vmul.f32 %v7945_v15, %v8986_v57  ;;  %v6548_v3 = vpack.i.bf16 %v1180_v0, %v1179_v11  ;;  %v9021_v52 = vmax.f32 %v494_v12, 0.0  ;;  %v518_v11 = vadd.f32 %v8904_v24, %v8856_v39 }
 0x2b9   : > { %13465 = vst [vmem:[#allocation228_spill] sm:$0xff] %v8984_v45  ;;  %v8994_v44 = vpop.permute.xlu1 %2346  ;;  %v8996_v5 = vpop.permute.xlu0 %2341  ;;  %v9014_v45 = vmax.f32 %v488_v38, 0.0  ;;  %v9019_v15 = vmax.f32 %v491_v20, 0.0  ;;  %v1185_v0 = vmul.f32 %v8043_v36, %v9027_v33  ;;  %v515_v38 = vadd.f32 %v8904_v24, %v8831_v30 }
 0x2ba   : > { %13467 = vst [vmem:[#allocation230_spill] sm:$0xff] %v8994_v44  ;;  %v6543_v56 = vpack.i.bf16 %v1178_v4, %v1177_v48  ;;  %v623_v48 = vld [vmem:[%s12756_s4 + $0x118] sm:$0xff]  ;;  %v509_v20 = vadd.f32 %v8904_v24, %v8787_v49  ;;  %v9063_v12 = vmax.f32 %v518_v11, 0.0 }
 0x2bb   : > { %13468 = vst [vmem:[#allocation231_spill] sm:$0xff] %v8996_v5  ;;  %v1182_v59 = vmul.f32 %v8028_v21, %v9014_v45  ;;  %v1183_v62 = vmul.f32 %v7981_v42, %v9019_v15  ;;  %6505 = vmatpush.msra.mxu3 %v623_v48  ;;  %v9067_v21 = vmax.f32 %v512_v28, 0.0  ;;  %v13543_v5 = vld [vmem:[#allocation68_spill] sm:$0xff] }
 0x2bc   : > { %13469 = vst [vmem:[#allocation232_spill] sm:$0xff] %v9012_v55  ;;  %v9074_v42 = vmax.f32 %v509_v20, 0.0  ;;  %v1192_v11 = vmul.f32 %v8026_v14, %v9063_v12 }
 0x2bd   : > { %13470 = vst [vmem:[#allocation233_spill] sm:$0xff] %v9014_v45  ;;  %v532_v36 = vpop.f32.mrf.mxu0  ;;  %6506 = vmatpush.msra.mxu3 %v622_v7  ;;  %v1187_v7 = vmul.f32 %v8060_v63, %v9072_v6  ;;  %v1242_v8 = vrot.slane %v9067_v21, 1 }
 0x2be   : > { %6549 = vrot.lane.b32.xlu2 %v6548_v3, %s7531_s9  ;;  %13471 = vst [vmem:[#allocation234_spill] sm:$0xff] %v9017_v16  ;;  %v1186_v3 = vmul.f32 %v7996_v51, %v9012_v55  ;;  %v9069_v51 = vmax.f32 %v515_v38, 0.0  ;;  %v533_v49 = vadd.f32 %v8904_v24, %v532_v36  ;;  %v1188_v36 = vmul.f32 %v8058_v58, %v9065_v22 }
 0x2bf   : > { %13472 = vst [vmem:[#allocation235_spill] sm:$0xff] %v9019_v15  ;;  %6544 = vrot.lane.b32.xlu1 %v6543_v56, %s7531_s9  ;;  %6539 = vrot.lane.b32.xlu0 %v6538_v29, %s7531_s9  ;;  %v1184_v56 = vmul.f32 %v8045_v37, %v9021_v52  ;;  %v6553_v29 = vpack.i.bf16 %v1182_v59, %v1181_v26  ;;  %v1214_v58 = vrot.slane %v8973_v40, 1 }
 0x2c0   : > { %13473 = vst [vmem:[#allocation236_spill] sm:$0xff] %v9021_v52  ;;  %v9031_v43 = vpop.permute.xlu2 %2476  ;;  %v6563_v30 = vpack.i.bf16 %v1186_v3, %v1185_v0  ;;  %v524_v3 = vadd.f32 %v8904_v24, %v8906_v23  ;;  %v530_v26 = vadd.f32 %v8904_v24, %v529_v2  ;;  %v1191_v28 = vmul.f32 %v8073_v27, %v9069_v51  ;;  %v621_v0 = vld [vmem:[%s12756_s4 + $0x108] sm:$0xff]  ;;  %v620_v2 = vld [vmem:[%s12756_s4 + $0x100] sm:$0xff] }
 0x2c1   : > { %13474 = vst [vmem:[#allocation237_spill] sm:$0xff] %v9027_v33  ;;  %v9043_v4 = vpop.permute.xlu1 %2361  ;;  %v9045_v39 = vpop.permute.xlu0 %2356  ;;  %v6558_v37 = vpack.i.bf16 %v1184_v56, %v1183_v62  ;;  %v521_v23 = vadd.f32 %v8904_v24, %v8878_v17  ;;  %v527_v38 = vadd.f32 %v8904_v24, %v8939_v61  ;;  %v1189_v48 = vmul.f32 %v8011_v1, %v9074_v42 }
 0x2c2   : > { %13475 = vst [vmem:[#allocation238_spill] sm:$0xff] %v9031_v43  ;;  %6507 = vmatpush.msra.mxu3 %v621_v0  ;;  %v536_v62 = vadd.f32 %v8904_v24, %v8770_v32  ;;  %v9112_v54 = vmax.f32 %v533_v49, 0.0  ;;  %v6578_v20 = vpack.i.bf16 %v1192_v11, %v1191_v28  ;;  %v6568_v27 = vpack.i.bf16 %v1188_v36, %v1187_v7 }
 0x2c3   : > { %13476 = vst [vmem:[#allocation239_spill] sm:$0xff] %v9043_v4  ;;  %v9119_v61 = vmax.f32 %v521_v23, 0.0  ;;  %v9121_v1 = vmax.f32 %v527_v38, 0.0  ;;  %v542_v0 = vadd.f32 %v8904_v24, %v8814_v47  ;;  %v13497_v38 = vld [vmem:[#allocation53_spill] sm:$0xff]  ;;  %v1205_v7 = vrot.slane %v8933_v10, 1 }
 0x2c4   : > { %13477 = vst [vmem:[#allocation240_spill] sm:$0xff] %v9045_v39  ;;  %6508 = vmatpush.msra.mxu3 %v620_v2  ;;  %v9125_v32 = vmax.f32 %v536_v62, 0.0  ;;  %v1197_v11 = vmul.f32 %v8103_v50, %v9112_v54  ;;  %v13496_v2 = vld [vmem:[#allocation207_spill] sm:$0xff]  ;;  %v1209_v62 = vrot.slane %v8929_v41, 1 }
 0x2c5   : > { %13478 = vst [vmem:[#allocation241_spill] sm:$0xff] %v9063_v12  ;;  %v548_v23 = vadd.f32 %v8904_v24, %v13496_v2  ;;  %v13501_v2 = vrot.slane %v8931_v46, 1 }
 0x2c6   : > { %13479 = vst [vmem:[#allocation242_spill] sm:$0xff] %v9065_v22  ;;  %6564 = vrot.lane.b32.xlu2 %v6563_v30, %s7531_s9  ;;  %v9114_v30 = vmax.f32 %v524_v3, 0.0  ;;  %v13499_v3 = vld [vmem:[#allocation61_spill] sm:$0xff] }
 0x2c7   : > { %13480 = vst [vmem:[#allocation243_spill] sm:$0xff] %v9067_v21  ;;  %6559 = vrot.lane.b32.xlu1 %v6558_v37, %s7531_s9  ;;  %6554 = vrot.lane.b32.xlu0 %v6553_v29, %s7531_s9  ;;  %v1190_v37 = vmul.f32 %v8075_v34, %v9067_v21  ;;  %v9116_v29 = vmax.f32 %v530_v26, 0.0  ;;  %v1193_v50 = vmul.f32 %v13499_v3, %v9119_v61  ;;  %v9166_v63 = vmax.f32 %v548_v23, 0.0  ;;  %v13552_v21 = vld [vmem:[#allocation74_spill] sm:$0xff] }
 0x2c8   : > { %13481 = vst [vmem:[#allocation244_spill] sm:$0xff] %v9069_v51  ;;  %v9079_v59 = vpop.permute.xlu2 %2491  ;;  %v1194_v28 = vmul.f32 %v8088_v9, %v9114_v30  ;;  %v9159_v34 = vsel %vm1203_vm1, %v13501_v2, %v1205_v7  ;;  %v9169_v3 = vsel %vm1203_vm1, %v1205_v7, %v1209_v62  ;;  %v13516_v2 = vld [vmem:[#allocation56_spill] sm:$0xff] }
 0x2c9   : > { %13482 = vst [vmem:[#allocation245_spill] sm:$0xff] %v9072_v6  ;;  %v9086_v56 = vpop.permute.xlu1 %2376  ;;  %v9088_v35 = vpop.permute.xlu0 %2371  ;;  %v6573_v17 = vpack.i.bf16 %v1190_v37, %v1189_v48  ;;  %v1196_v36 = vmul.f32 %v8105_v31, %v9116_v29  ;;  %v1198_v48 = vmul.f32 %v13497_v38, %v9125_v32 }
 0x2ca   : > { %13483 = vst [vmem:[#allocation246_spill] sm:$0xff] %v9074_v42  ;;  %v6583_v14 = vpack.i.bf16 %v1194_v28, %v1193_v50  ;;  %v13510_v28 = vld [vmem:[#allocation66_spill] sm:$0xff] }
 0x2cb   : > { %13484 = vst [vmem:[#allocation247_spill] sm:$0xff] %v9079_v59  ;;  %v6593_v47 = vpack.i.bf16 %v1198_v48, %v1197_v11  ;;  %v13508_v11 = vld [vmem:[#allocation69_spill] sm:$0xff]  ;;  %v13512_v48 = vld [vmem:[#allocation70_spill] sm:$0xff] }
 0x2cc   : > { %13485 = vst [vmem:[#allocation248_spill] sm:$0xff] %v9086_v56  ;;  %v1494_v50 = vmul.f32 %v13508_v11, %v9159_v34  ;;  %v1202_v7 = vmul.f32 %v13512_v48, %v9166_v63  ;;  %v1212_v48 = vrot.slane %v8971_v25, 1  ;;  %v13529_v56 = vld [vmem:[#allocation62_spill] sm:$0xff] }
 0x2cd   : > { %13486 = vst [vmem:[#allocation249_spill] sm:$0xff] %v9088_v35  ;;  %v1226_v35 = vrot.slane %v9014_v45, 1 }
 0x2ce   : > { %13487 = vst [vmem:[#allocation250_spill] sm:$0xff] %v9112_v54  ;;  %6579 = vrot.lane.b32.xlu2 %v6578_v20, %s7531_s9  ;;  %v13498_v20 = vld [vmem:[#allocation50_spill] sm:$0xff] }
 0x2cf   : > { %13488 = vst [vmem:[#allocation251_spill] sm:$0xff] %v9114_v30  ;;  %6574 = vrot.lane.b32.xlu1 %v6573_v17, %s7531_s9  ;;  %6569 = vrot.lane.b32.xlu0 %v6568_v27, %s7531_s9  ;;  %v539_v27 = vadd.f32 %v8904_v24, %v8795_v19  ;;  %v1195_v17 = vmul.f32 %v13498_v20, %v9121_v1  ;;  %v13500_v19 = vld [vmem:[#allocation203_spill] sm:$0xff]  ;;  %v9164_v20 = vmax.f32 %v542_v0, 0.0 }
 0x2d0   : > { %13489 = vst [vmem:[#allocation252_spill] sm:$0xff] %v9116_v29  ;;  %v9127_v49 = vpop.permute.xlu2 %2506  ;;  %v545_v31 = vadd.f32 %v8904_v24, %v13500_v19  ;;  %v13511_v0 = vld [vmem:[#allocation67_spill] sm:$0xff] }
 0x2d1   : > { %13490 = vst [vmem:[#allocation253_spill] sm:$0xff] %v9119_v61  ;;  %v9132_v26 = vpop.permute.xlu1 %2391  ;;  %v9134_v37 = vpop.permute.xlu0 %2386  ;;  %v6588_v38 = vpack.i.bf16 %v1196_v36, %v1195_v17  ;;  %v9162_v9 = vmax.f32 %v539_v27, 0.0  ;;  %v1200_v27 = vmul.f32 %v13510_v28, %v9164_v20  ;;  %v1218_v28 = vrot.slane %v8975_v60, 1 }
 0x2d2   : > { %13491 = vst [vmem:[#allocation254_spill] sm:$0xff] %v9121_v1  ;;  %v9173_v24 = vmax.f32 %v545_v31, 0.0 }
 0x2d3   : > { %13492 = vst [vmem:[#allocation255_spill] sm:$0xff] %v9125_v32  ;;  %v1199_v23 = vmul.f32 %v13511_v0, %v9162_v9  ;;  %v1220_v0 = vrot.slane %v8968_v13, 1 }
 0x2d4   : > { %13493 = vst [vmem:[#allocation256_spill] sm:$0xff] %v9127_v49  ;;  %v1201_v11 = vmul.f32 %v13516_v2, %v9173_v24 }
 0x2d5   : > { %13494 = vst [vmem:[#allocation257_spill] sm:$0xff] %v9132_v26  ;;  %v6598_v43 = vpack.i.bf16 %v1200_v27, %v1199_v23  ;;  %v9213_v26 = vsel %vm1203_vm1, %v1218_v28, %v1220_v0  ;;  %v13523_v23 = vld [vmem:[#allocation72_spill] sm:$0xff] }
 0x2d6   : > { %13495 = vst [vmem:[#allocation258_spill] sm:$0xff] %v9134_v37  ;;  %6594 = vrot.lane.b32.xlu2 %v6593_v47, %s7531_s9  ;;  %v1210_v47 = vrot.slane %v8935_v53, 1 }
 0x2d7   : > { %13502 = vst [vmem:[#allocation207_spill] sm:$0xff] %v9159_v34  ;;  %6589 = vrot.lane.b32.xlu1 %v6588_v38, %s7531_s9  ;;  %6584 = vrot.lane.b32.xlu0 %v6583_v14, %s7531_s9  ;;  %v1216_v38 = vrot.slane %v8986_v57, 1  ;;  %v13515_v14 = vld [vmem:[#allocation59_spill] sm:$0xff] }
 0x2d8   : > { %13503 = vst [vmem:[#allocation203_spill] sm:$0xff] %v9162_v9  ;;  %v9177_v36 = vpop.permute.xlu2 %2521  ;;  %v1495_v19 = vmul.f32 %v13515_v14, %v9169_v3  ;;  %v9203_v14 = vsel %vm1203_vm1, %v1210_v47, %v1212_v48  ;;  %v9206_v37 = vsel %vm1203_vm1, %v1209_v62, %v1210_v47 }
 0x2d9   : > { %13504 = vst [vmem:[#allocation259_spill] sm:$0xff] %v9164_v20  ;;  %v9186_v17 = vpop.permute.xlu1 %2471  ;;  %v9188_v31 = vpop.permute.xlu0 %2466  ;;  %v9209_v2 = vsel %vm1203_vm1, %v1214_v58, %v1216_v38 }
 0x2da   : > { %13505 = vst [vmem:[#allocation260_spill] sm:$0xff] %v9166_v63  ;;  %v6608_v59 = vpack.i.bf16 %v1495_v19, %v1494_v50  ;;  %v13521_v50 = vld [vmem:[#allocation75_spill] sm:$0xff] }
 0x2db   : > { %13506 = vst [vmem:[#allocation261_spill] sm:$0xff] %v9169_v3  ;;  %v1230_v3 = vrot.slane %v9021_v52, 1 }
 0x2dc   : > { %13507 = vst [vmem:[#allocation262_spill] sm:$0xff] %v9173_v24 }
 0x2dd   : > { %13509 = vst [vmem:[#allocation263_spill] sm:$0xff] %v9177_v36 }
 0x2de   : > { %13513 = vst [vmem:[#allocation264_spill] sm:$0xff] %v9186_v17  ;;  %v6603_v17 = vpack.i.bf16 %v1202_v7, %v1201_v11  ;;  %6609 = vrot.lane.b32.xlu2 %v6608_v59, %s7532_s18  ;;  %v9218_v11 = vsel %vm1203_vm1, %v1212_v48, %v1214_v58  ;;  %v1497_v7 = vmul.f32 %v13523_v23, %v9203_v14  ;;  %v13524_v59 = vld [vmem:[#allocation73_spill] sm:$0xff] }
 0x2df   : > { %13514 = vst [vmem:[#allocation265_spill] sm:$0xff] %v9188_v31  ;;  %v9200_v31 = vsel %vm1203_vm1, %v1216_v38, %v1218_v28  ;;  %6599 = vrot.lane.b32.xlu0 %v6598_v43, %s7531_s9  ;;  %v1496_v38 = vmul.f32 %v13524_v59, %v9206_v37  ;;  %v13525_v28 = vld [vmem:[#allocation76_spill] sm:$0xff]  ;;  %v13528_v48 = vld [vmem:[#allocation65_spill] sm:$0xff]  ;;  %v1498_v23 = vmul.f32 %v13529_v56, %v9218_v11  ;;  %v1232_v59 = vrot.slane %v9027_v33, 1 }
 0x2e0   : > { %13517 = vst [vmem:[#allocation266_spill] sm:$0xff] %v9200_v31  ;;  %6604 = vrot.lane.b32.xlu1 %v6603_v17, %s7531_s9  ;;  %v1500_v62 = vmul.f32 %v13521_v50, %v9200_v31  ;;  %v9222_v27 = vpop.permute.xlu2 %2536  ;;  %v1499_v19 = vmul.f32 %v13525_v28, %v9209_v2  ;;  %v1228_v17 = vrot.slane %v9019_v15, 1  ;;  %v1501_v47 = vmul.f32 %v13528_v48, %v9213_v26 }
 0x2e1   : > { %13518 = vst [vmem:[#allocation267_spill] sm:$0xff] %v9209_v2  ;;  %v9231_v43 = vpop.permute.xlu1 %2486  ;;  %v9233_v58 = vpop.permute.xlu0 %2481  ;;  %v1222_v50 = vrot.slane %v8978_v18, 1  ;;  %v1224_v28 = vrot.slane %v9017_v16, 1  ;;  %v9258_v44 = vsel %vm1203_vm1, %v1230_v3, %v1232_v59 }
 0x2e2   : > { %13519 = vst [vmem:[#allocation268_spill] sm:$0xff] %v9213_v26  ;;  %v6623_v34 = vpack.i.bf16 %v1501_v47, %v1500_v62  ;;  %v6618_v39 = vpack.i.bf16 %v1499_v19, %v1498_v23  ;;  %v9254_v56 = vsel %vm1203_vm1, %v1226_v35, %v1228_v17  ;;  %v13535_v23 = vld [vmem:[#allocation81_spill] sm:$0xff] }
 0x2e3   : > { %13520 = vst [vmem:[#allocation269_spill] sm:$0xff] %v9218_v11  ;;  %v9248_v48 = vsel %vm1203_vm1, %v1222_v50, %v1224_v28  ;;  %v9251_v4 = vsel %vm1203_vm1, %v1220_v0, %v1222_v50  ;;  %v9263_v62 = vsel %vm1203_vm1, %v1224_v28, %v1226_v35  ;;  %v13537_v50 = vld [vmem:[#allocation78_spill] sm:$0xff]  ;;  %v13542_v28 = vld [vmem:[#allocation71_spill] sm:$0xff] }
 0x2e4   : > { %13522 = vst [vmem:[#allocation270_spill] sm:$0xff] %v9222_v27  ;;  %v1507_v47 = vmul.f32 %v13542_v28, %v9258_v44 }
 0x2e5   : > { %13526 = vst [vmem:[#allocation271_spill] sm:$0xff] %v9231_v43  ;;  %v6613_v43 = vpack.i.bf16 %v1497_v7, %v1496_v38  ;;  %v1503_v38 = vmul.f32 %v13537_v50, %v9248_v48 }
 0x2e6   : > { %13527 = vst [vmem:[#allocation272_spill] sm:$0xff] %v9233_v58  ;;  %v9245_v58 = vsel %vm1203_vm1, %v1228_v17, %v1230_v3  ;;  %6624 = vrot.lane.b32.xlu2 %v6623_v34, %s7532_s18  ;;  %v13538_v34 = vld [vmem:[#allocation79_spill] sm:$0xff]  ;;  %v13539_v3 = vld [vmem:[#allocation82_spill] sm:$0xff] }
 0x2e7   : > { %13530 = vst [vmem:[#allocation273_spill] sm:$0xff] %v9245_v58  ;;  %6614 = vrot.lane.b32.xlu0 %v6613_v43, %s7532_s18  ;;  %v1506_v7 = vmul.f32 %v13535_v23, %v9245_v58  ;;  %v1502_v19 = vmul.f32 %v13538_v34, %v9251_v4  ;;  %v1505_v17 = vmul.f32 %v13539_v3, %v9254_v56  ;;  %v1234_v23 = vrot.slane %v9012_v55, 1 }
 0x2e8   : > { %13531 = vst [vmem:[#allocation274_spill] sm:$0xff] %v9248_v48  ;;  %6619 = vrot.lane.b32.xlu1 %v6618_v39, %s7532_s18  ;;  %v9267_v0 = vpop.permute.xlu2 %2551  ;;  %v1240_v39 = vrot.slane %v9074_v42, 1  ;;  %v1504_v34 = vmul.f32 %v13543_v5, %v9263_v62  ;;  %v1244_v3 = vrot.slane %v9069_v51, 1 }
 0x2e9   : > { %13532 = vst [vmem:[#allocation275_spill] sm:$0xff] %v9251_v4  ;;  %v9276_v43 = vpop.permute.xlu1 %2501  ;;  %v9278_v35 = vpop.permute.xlu0 %2496  ;;  %v1236_v4 = vrot.slane %v9072_v6, 1  ;;  %v6638_v48 = vpack.i.bf16 %v1507_v47, %v1506_v7  ;;  %v6628_v28 = vpack.i.bf16 %v1503_v38, %v1502_v19  ;;  %v9299_v5 = vsel %vm1203_vm1, %v1232_v59, %v1234_v23  ;;  %v13544_v38 = vld [vmem:[#allocation87_spill] sm:$0xff] }
 0x2ea   : > { %13533 = vst [vmem:[#allocation276_spill] sm:$0xff] %v9254_v56  ;;  %v2626_v50 = vmul.f32 %v9278_v35, %v9254_v56  ;;  %v6633_v31 = vpack.i.bf16 %v1505_v17, %v1504_v34  ;;  %v9293_v26 = vsel %vm1203_vm1, %v1240_v39, %v1242_v8  ;;  %v9306_v7 = vsel %vm1203_vm1, %v1242_v8, %v1244_v3  ;;  %v13548_v8 = vld [vmem:[#allocation88_spill] sm:$0xff] }
 0x2eb   : > { %13534 = vst [vmem:[#allocation277_spill] sm:$0xff] %v9263_v62  ;;  %v1512_v34 = vmul.f32 %v13544_v38, %v9293_v26  ;;  %v1246_v38 = vrot.slane %v9063_v12, 1  ;;  %v1248_v56 = vrot.slane %v9119_v61, 1  ;;  %v1250_v62 = vrot.slane %v9114_v30, 1 }
 0x2ec   : > { %13536 = vst [vmem:[#allocation278_spill] sm:$0xff] %v9267_v0  ;;  %v1238_v0 = vrot.slane %v9065_v22, 1  ;;  %6424 = vmatmul.msk.f32.vlgmr.msra.gmra.mxu3 %vm346_vm0, %v2626_v50  ;;  %v1266_v30 = vrot.slane %v9166_v63, 1  ;;  %v1262_v61 = vrot.slane %v9164_v20, 1 }
 0x2ed   : > { %13540 = vst [vmem:[#allocation279_spill] sm:$0xff] %v9276_v43 }
 0x2ee   : > { %13541 = vst [vmem:[#allocation280_spill] sm:$0xff] %v9278_v35  ;;  %v9296_v35 = vsel %vm1203_vm1, %v1234_v23, %v1236_v4  ;;  %v9302_v51 = vsel %vm1203_vm1, %v1238_v0, %v1240_v39  ;;  %6639 = vrot.lane.b32.xlu2 %v6638_v48, %s7532_s18  ;;  %v9311_v50 = vsel %vm1203_vm1, %v1236_v4, %v1238_v0  ;;  %v13546_v23 = vld [vmem:[#allocation84_spill] sm:$0xff]  ;;  %v13547_v48 = vld [vmem:[#allocation85_spill] sm:$0xff] }
 0x2ef   : > { %6629 = vrot.lane.b32.xlu0 %v6628_v28, %s7532_s18  ;;  %v1509_v19 = vmul.f32 %v13546_v23, %v9296_v35  ;;  %v1508_v17 = vmul.f32 %v13547_v48, %v9299_v5  ;;  %v1511_v39 = vmul.f32 %v13548_v8, %v9302_v51  ;;  %v13551_v0 = vld [vmem:[#allocation77_spill] sm:$0xff]  ;;  %v2627_v23 = vmul.f32 %v9276_v43, %v9245_v58 }
 0x2f0   : > { %6634 = vrot.lane.b32.xlu1 %v6633_v31, %s7532_s18  ;;  %v9315_v59 = vpop.permute.xlu2 %2566  ;;  %v1252_v31 = vrot.slane %v9121_v1, 1  ;;  %v1513_v47 = vmul.f32 %v13551_v0, %v9306_v7  ;;  %v1510_v48 = vmul.f32 %v13552_v21, %v9311_v50  ;;  %v1256_v8 = vrot.slane %v9112_v54, 1 }
 0x2f1   : > { %13545 = vst [vmem:[#allocation281_spill] sm:$0xff] %v9315_v59  ;;  %v9324_v28 = vpop.permute.xlu1 %2516  ;;  %v9326_v4 = vpop.permute.xlu0 %2511  ;;  %v1254_v59 = vrot.slane %v9116_v29, 1  ;;  %v6643_v0 = vpack.i.bf16 %v1509_v19, %v1508_v17  ;;  %v9344_v43 = vsel %vm1203_vm1, %v1246_v38, %v1248_v56  ;;  %v9347_v21 = vsel %vm1203_vm1, %v1244_v3, %v1246_v38  ;;  %v13557_v19 = vld [vmem:[#allocation93_spill] sm:$0xff]  ;;  %v13559_v38 = vld [vmem:[#allocation90_spill] sm:$0xff] }
 0x2f2   : > { %13549 = vst [vmem:[#allocation282_spill] sm:$0xff] %v9324_v28  ;;  %v6653_v2 = vpack.i.bf16 %v1513_v47, %v1512_v34  ;;  %v6648_v11 = vpack.i.bf16 %v1511_v39, %v1510_v48  ;;  %v9350_v58 = vsel %vm1203_vm1, %v1250_v62, %v1252_v31  ;;  %v1515_v17 = vmul.f32 %v13559_v38, %v9344_v43 }
 0x2f3   : > { %13550 = vst [vmem:[#allocation283_spill] sm:$0xff] %v9326_v4  ;;  %v9341_v12 = vsel %vm1203_vm1, %v1252_v31, %v1254_v59  ;;  %v9354_v34 = vsel %vm1203_vm1, %v1254_v59, %v1256_v8  ;;  %v13561_v59 = vld [vmem:[#allocation94_spill] sm:$0xff]  ;;  %v2628_v38 = vmul.f32 %v9127_v49, %v9258_v44 }
 0x2f4   : > { %6425 = vmatmul.msk.f32.gmra.mxu3 %vm346_vm0, %v2627_v23  ;;  %13553 = vst [vmem:[#allocation284_spill] sm:$0xff] %v9341_v12  ;;  %v9359_v23 = vsel %vm1203_vm1, %v1248_v56, %v1250_v62  ;;  %v1518_v48 = vmul.f32 %v13557_v19, %v9341_v12  ;;  %v1517_v31 = vmul.f32 %v13561_v59, %v9350_v58  ;;  %v13564_v62 = vld [vmem:[#allocation83_spill] sm:$0xff]  ;;  %v1258_v19 = vrot.slane %v9125_v32, 1 }
 0x2f5   : > { %13554 = vst [vmem:[#allocation285_spill] sm:$0xff] %v9344_v43  ;;  %v1519_v47 = vmul.f32 %v13564_v62, %v9354_v34  ;;  %v1260_v59 = vrot.slane %v9162_v9, 1 }
 0x2f6   : > { %13555 = vst [vmem:[#allocation286_spill] sm:$0xff] %v9350_v58  ;;  %6654 = vrot.lane.b32.xlu2 %v6653_v2, %s7532_s18  ;;  %v13560_v2 = vld [vmem:[#allocation91_spill] sm:$0xff]  ;;  %v9394_v49 = vsel %vm1203_vm1, %v1256_v8, %v1258_v19 }
 0x2f7   : > { %13556 = vst [vmem:[#allocation287_spill] sm:$0xff] %v9354_v34  ;;  %6644 = vrot.lane.b32.xlu0 %v6643_v0, %s7532_s18  ;;  %v1514_v39 = vmul.f32 %v13560_v2, %v9347_v21  ;;  %v6668_v12 = vpack.i.bf16 %v1519_v47, %v1518_v48  ;;  %v9391_v34 = vsel %vm1203_vm1, %v1258_v19, %v1260_v59  ;;  %v13570_v48 = vrot.slane %v8931_v46, 1  ;;  %v13573_v8 = vld [vmem:[#allocation99_spill] sm:$0xff] }
 0x2f8   : > { %6649 = vrot.lane.b32.xlu1 %v6648_v11, %s7532_s18  ;;  %v9363_v3 = vpop.permute.xlu2 %2581  ;;  %v1264_v11 = vrot.slane %v9173_v24, 1  ;;  %13567 = vst [vmem:[#allocation292_spill] sm:$0xff] %v9391_v34 }
 0x2f9   : > { %13558 = vst [vmem:[#allocation288_spill] sm:$0xff] %v9363_v3  ;;  %v9372_v0 = vpop.permute.xlu1 %2531  ;;  %v9374_v56 = vpop.permute.xlu0 %2526  ;;  %v13565_v3 = vld [vmem:[#allocation80_spill] sm:$0xff]  ;;  %v6658_v58 = vpack.i.bf16 %v1515_v17, %v1514_v39  ;;  %v9408_v17 = vsel %vm1203_vm1, %v1260_v59, %v1262_v61 }
 0x2fa   : > { %13562 = vst [vmem:[#allocation289_spill] sm:$0xff] %v9372_v0  ;;  %v1516_v2 = vmul.f32 %v13565_v3, %v9359_v23  ;;  %v9388_v62 = vsel %vm1203_vm1, %v1264_v11, %v1266_v30  ;;  %v9397_v3 = vsel %vm1203_vm1, %v1262_v61, %v1264_v11  ;;  %v13575_v39 = vld [vmem:[#allocation96_spill] sm:$0xff]  ;;  %v13580_v61 = vld [vmem:[#allocation89_spill] sm:$0xff] }
 0x2fb   : > { %13563 = vst [vmem:[#allocation290_spill] sm:$0xff] %v9374_v56  ;;  %v1524_v19 = vmul.f32 %v13573_v8, %v9388_v62  ;;  %v13581_v8 = vld [vmem:[#allocation86_spill] sm:$0xff] }
 0x2fc   : > { %6426 = vmatmul.msk.f32.gmra.mxu3 %vm346_vm0, %v2628_v38  ;;  %v6663_v43 = vpack.i.bf16 %v1517_v31, %v1516_v2  ;;  %13566 = vst [vmem:[#allocation291_spill] sm:$0xff] %v9388_v62  ;;  %v9403_v38 = vsel %vm1203_vm1, %v1266_v30, %v13570_v48  ;;  %v13576_v31 = vld [vmem:[#allocation97_spill] sm:$0xff]  ;;  %v13577_v30 = vld [vmem:[#allocation100_spill] sm:$0xff]  ;;  %v2629_v48 = vmul.f32 %v9326_v4, %v9299_v5  ;;  %v666_v62 = vrot.slane %v8935_v53, 7 }
 0x2fd   : > { %13568 = vst [vmem:[#allocation293_spill] sm:$0xff] %v9394_v49  ;;  %v1520_v11 = vmul.f32 %v13576_v31, %v9394_v49  ;;  %v1523_v47 = vmul.f32 %v13577_v30, %v9397_v3  ;;  %v1525_v59 = vmul.f32 %v13580_v61, %v9403_v38  ;;  %v712_v31 = vrot.slane %v9112_v54, 7 }
 0x2fe   : > { %13569 = vst [vmem:[#allocation294_spill] sm:$0xff] %v9397_v3  ;;  %6669 = vrot.lane.b32.xlu2 %v6668_v12, %s7532_s18  ;;  %v1521_v12 = vmul.f32 %v13575_v39, %v9391_v34  ;;  %v665_v39 = vrot.slane %v8929_v41, 7  ;;  %v13052_v3 = vrot.slane %v8933_v10, 7  ;;  %v710_v34 = vrot.slane %v9116_v29, 7 }
 0x2ff   : > { %13571 = vst [vmem:[#allocation295_spill] sm:$0xff] %v9403_v38  ;;  %6659 = vrot.lane.b32.xlu0 %v6658_v58, %s7532_s18  ;;  %v6683_v30 = vpack.i.bf16 %v1525_v59, %v1524_v19  ;;  %v670_v4 = vrot.slane %v8973_v40, 7  ;;  %v13055_v41 = vrot.slane %v9121_v1, 7  ;;  %v13589_v59 = vld [vmem:[#allocation103_spill] sm:$0xff] }
 0x300   : > { %6664 = vrot.lane.b32.xlu1 %v6663_v43, %s7532_s18  ;;  %13572 = vst [vmem:[#allocation296_spill] sm:$0xff] %v9408_v17  ;;  %v9412_v2 = vpop.permute.xlu2 %2596  ;;  %v6673_v61 = vpack.i.bf16 %v1521_v12, %v1520_v11  ;;  %v9441_v53 = vsel %vm627_vm2, %v710_v34, %v712_v31  ;;  %v9446_v19 = vsel %vm627_vm2, %v665_v39, %v666_v62  ;;  %v13586_v11 = vld [vmem:[#allocation127_spill] sm:$0xff] }
 0x301   : > { %13574 = vst [vmem:[#allocation297_spill] sm:$0xff] %v9412_v2  ;;  %v9420_v43 = vpop.permute.xlu1 %2546  ;;  %v9422_v58 = vpop.permute.xlu0 %2541  ;;  %v1522_v2 = vmul.f32 %v13581_v8, %v9408_v17  ;;  %v668_v8 = vrot.slane %v8971_v25, 7  ;;  %v9456_v12 = vsel %vm627_vm2, %v13055_v41, %v710_v34 }
 0x302   : > { %13578 = vst [vmem:[#allocation298_spill] sm:$0xff] %v9420_v43 }
 0x303   : > { %13579 = vst [vmem:[#allocation299_spill] sm:$0xff] %v9422_v58  ;;  %v6678_v38 = vpack.i.bf16 %v1523_v47, %v1522_v2  ;;  %v9451_v2 = vsel %vm627_vm2, %v13052_v3, %v665_v39  ;;  %v9467_v54 = vsel %vm627_vm2, %v668_v8, %v670_v4  ;;  %v13590_v39 = vld [vmem:[#allocation113_spill] sm:$0xff]  ;;  %v9476_v41 = vsel %vm627_vm2, %v666_v62, %v668_v8 }
 0x304   : > { %6427 = vmatmul.msk.f32.gmra.mxu3 %vm346_vm0, %v2629_v48  ;;  %13582 = vst [vmem:[#allocation300_spill] sm:$0xff] %v9441_v53  ;;  %v1719_v48 = vmul.f32 %v13589_v59, %v9451_v2  ;;  %v1742_v3 = vmul.f32 %v13590_v39, %v9456_v12  ;;  %v714_v59 = vrot.slane %v9125_v32, 7  ;;  %v672_v39 = vrot.slane %v8986_v57, 7 }
 0x305   : > { %13583 = vst [vmem:[#allocation301_spill] sm:$0xff] %v9446_v19  ;;  %v678_v62 = vrot.slane %v8978_v18, 7  ;;  %v720_v32 = vrot.slane %v9173_v24, 7  ;;  %v680_v24 = vrot.slane %v9017_v16, 7 }
 0x306   : > { %6684 = vrot.lane.b32.xlu2 %v6683_v30, %s7532_s18  ;;  %13584 = vst [vmem:[#allocation302_spill] sm:$0xff] %v9451_v2  ;;  %v1743_v30 = vmul.f32 %v13586_v11, %v9441_v53  ;;  %v13593_v11 = vld [vmem:[#allocation106_spill] sm:$0xff] }
 0x307   : > { %6674 = vrot.lane.b32.xlu0 %v6673_v61, %s7532_s18  ;;  %13585 = vst [vmem:[#allocation303_spill] sm:$0xff] %v9456_v12  ;;  %v716_v12 = vrot.slane %v9162_v9, 7 }
 0x308   : > { %6679 = vrot.lane.b32.xlu1 %v6678_v38, %s7532_s18  ;;  %v9460_v47 = vpop.permute.xlu2 %2611  ;;  %v13588_v38 = vld [vmem:[#allocation102_spill] sm:$0xff] }
 0x309   : > { %13587 = vst [vmem:[#allocation304_spill] sm:$0xff] %v9460_v47  ;;  %v1720_v61 = vmul.f32 %v13588_v38, %v9446_v19  ;;  %v9471_v29 = vpop.permute.xlu1 %2561  ;;  %v9473_v34 = vpop.permute.xlu0 %2556  ;;  %v1722_v47 = vmul.f32 %v13593_v11, %v9467_v54  ;;  %v2630_v38 = vmul.f32 %v9324_v28, %v9296_v35  ;;  %v13594_v19 = vld [vmem:[#allocation92_spill] sm:$0xff]  ;;  %v674_v11 = vrot.slane %v8975_v60, 7 }
 0x30a   : > { %13591 = vst [vmem:[#allocation305_spill] sm:$0xff] %v9471_v29  ;;  %v1721_v2 = vmul.f32 %v13594_v19, %v9476_v41  ;;  %v676_v28 = vrot.slane %v8968_v13, 7  ;;  %v9493_v19 = vsel %vm627_vm2, %v714_v59, %v716_v12 }
 0x30b   : > { %13592 = vst [vmem:[#allocation306_spill] sm:$0xff] %v9473_v34  ;;  %v6698_v53 = vpack.i.bf16 %v1743_v30, %v1722_v47  ;;  %v6688_v8 = vpack.i.bf16 %v1720_v61, %v1719_v48  ;;  %v9498_v30 = vsel %vm627_vm2, %v670_v4, %v672_v39  ;;  %v13597_v47 = vld [vmem:[#allocation116_spill] sm:$0xff] }
 0x30c   : > { %6428 = vmatmul.msk.f32.gmra.mxu3 %vm346_vm0, %v2630_v38  ;;  %v6693_v1 = vpack.i.bf16 %v1721_v2, %v1742_v3  ;;  %13595 = vst [vmem:[#allocation307_spill] sm:$0xff] %v9493_v19  ;;  %v1745_v3 = vmul.f32 %v13597_v47, %v9493_v19  ;;  %v9503_v2 = vsel %vm627_vm2, %v712_v31, %v714_v59  ;;  %v13606_v31 = vld [vmem:[#allocation108_spill] sm:$0xff] }
 0x30d   : > { %13596 = vst [vmem:[#allocation308_spill] sm:$0xff] %v9498_v30  ;;  %v9510_v48 = vsel %vm627_vm2, %v676_v28, %v678_v62  ;;  %v9519_v47 = vsel %vm627_vm2, %v672_v39, %v674_v11  ;;  %v718_v39 = vrot.slane %v9164_v20, 7 }
 0x30e   : > { %6699 = vrot.lane.b32.xlu2 %v6698_v53, %s7533_s20  ;;  %13598 = vst [vmem:[#allocation309_spill] sm:$0xff] %v9503_v2  ;;  %v13600_v53 = vld [vmem:[#allocation105_spill] sm:$0xff]  ;;  %v1726_v59 = vmul.f32 %v13606_v31, %v9510_v48  ;;  %v682_v31 = vrot.slane %v9014_v45, 7 }
 0x30f   : > { %6689 = vrot.lane.b32.xlu0 %v6688_v8, %s7533_s20  ;;  %v1723_v61 = vmul.f32 %v13600_v53, %v9498_v30  ;;  %13601 = vst [vmem:[#allocation311_spill] sm:$0xff] %v9510_v48  ;;  %v2631_v53 = vmul.f32 %v9177_v36, %v9311_v50 }
 0x310   : > { %6694 = vrot.lane.b32.xlu1 %v6693_v1, %s7533_s20  ;;  %v9505_v38 = vpop.permute.xlu2 %6534  ;;  %v13602_v1 = vld [vmem:[#allocation126_spill] sm:$0xff]  ;;  %13605 = vst [vmem:[#allocation314_spill] sm:$0xff] %v9519_v47 }
 0x311   : > { %13599 = vst [vmem:[#allocation310_spill] sm:$0xff] %v9505_v38  ;;  %v1744_v8 = vmul.f32 %v13602_v1, %v9503_v2  ;;  %v9514_v9 = vpop.permute.xlu1 %2576  ;;  %v9516_v4 = vpop.permute.xlu0 %2571  ;;  %v9524_v38 = vsel %vm627_vm2, %v674_v11, %v676_v28  ;;  %v13608_v1 = vld [vmem:[#allocation95_spill] sm:$0xff]  ;;  %v13609_v2 = vld [vmem:[#allocation109_spill] sm:$0xff]  ;;  %v686_v28 = vrot.slane %v9021_v52, 7 }
 0x312   : > { %13603 = vst [vmem:[#allocation312_spill] sm:$0xff] %v9514_v9  ;;  %v1724_v19 = vmul.f32 %v13608_v1, %v9519_v47  ;;  %v1725_v17 = vmul.f32 %v13609_v2, %v9524_v38  ;;  %v684_v9 = vrot.slane %v9019_v15, 7  ;;  %v9541_v1 = vsel %vm627_vm2, %v718_v39, %v720_v32 }
 0x313   : > { %13604 = vst [vmem:[#allocation313_spill] sm:$0xff] %v9516_v4  ;;  %v6713_v4 = vpack.i.bf16 %v1726_v59, %v1745_v3  ;;  %v9546_v2 = vsel %vm627_vm2, %v716_v12, %v718_v39  ;;  %v13618_v12 = vld [vmem:[#allocation112_spill] sm:$0xff]  ;;  %v13619_v39 = vld [vmem:[#allocation130_spill] sm:$0xff] }
 0x314   : > { %13607 = vst [vmem:[#allocation315_spill] sm:$0xff] %v9524_v38  ;;  %6429 = vmatmul.msk.f32.gmra.mxu3 %vm346_vm0, %v2631_v53  ;;  %v6703_v11 = vpack.i.bf16 %v1724_v19, %v1723_v61  ;;  %v6708_v36 = vpack.i.bf16 %v1725_v17, %v1744_v8  ;;  %v9549_v3 = vsel %vm627_vm2, %v682_v31, %v684_v9  ;;  %v13614_v17 = vld [vmem:[#allocation129_spill] sm:$0xff] }
 0x315   : > { %13610 = vst [vmem:[#allocation316_spill] sm:$0xff] %v9541_v1  ;;  %v9552_v19 = vsel %vm627_vm2, %v680_v24, %v682_v31  ;;  %v1747_v53 = vmul.f32 %v13614_v17, %v9541_v1  ;;  %v9559_v8 = vsel %vm627_vm2, %v684_v9, %v686_v28  ;;  %v9572_v17 = vsel %vm627_vm2, %v678_v62, %v680_v24 }
 0x316   : > { %6714 = vrot.lane.b32.xlu2 %v6713_v4, %s7533_s20  ;;  %13611 = vst [vmem:[#allocation317_spill] sm:$0xff] %v9546_v2  ;;  %v1728_v59 = vmul.f32 %v13618_v12, %v9552_v19  ;;  %v2632_v1 = vmul.f32 %v9374_v56, %v9302_v51  ;;  %v694_v12 = vrot.slane %v9065_v22, 7  ;;  %v692_v24 = vrot.slane %v9072_v6, 7 }
 0x317   : > { %6704 = vrot.lane.b32.xlu0 %v6703_v11, %s7533_s20  ;;  %13612 = vst [vmem:[#allocation318_spill] sm:$0xff] %v9549_v3  ;;  %v1746_v11 = vmul.f32 %v13619_v39, %v9546_v2  ;;  %v628_v39 = vrot.slane %v9166_v63, 7  ;;  %v688_v56 = vrot.slane %v9027_v33, 7 }
 0x318   : > { %6709 = vrot.lane.b32.xlu1 %v6708_v36, %s7533_s20  ;;  %13613 = vst [vmem:[#allocation319_spill] sm:$0xff] %v9552_v19  ;;  %v9556_v61 = vpop.permute.xlu2 %6549  ;;  %v13617_v36 = vld [vmem:[#allocation111_spill] sm:$0xff] }
 0x319   : > { %13615 = vst [vmem:[#allocation320_spill] sm:$0xff] %v9556_v61  ;;  %v1729_v4 = vmul.f32 %v13617_v36, %v9549_v3  ;;  %v9567_v20 = vpop.permute.xlu1 %2591  ;;  %v9569_v31 = vpop.permute.xlu0 %2586  ;;  %v13623_v61 = vld [vmem:[#allocation101_spill] sm:$0xff]  ;;  %v13624_v36 = vld [vmem:[#allocation98_spill] sm:$0xff] }
 0x31a   : > { %13616 = vst [vmem:[#allocation321_spill] sm:$0xff] %v9559_v8  ;;  %v1730_v9 = vmul.f32 %v13623_v61, %v9559_v8  ;;  %v1727_v49 = vmul.f32 %v13624_v36, %v9572_v17  ;;  %v690_v61 = vrot.slane %v9012_v55, 7  ;;  %v9589_v36 = vsel %vm627_vm2, %v692_v24, %v694_v12 }
 0x31b   : > { %13620 = vst [vmem:[#allocation322_spill] sm:$0xff] %v9567_v20  ;;  %v629_v20 = vrot.slane %v8931_v46, 7  ;;  %v6723_v62 = vpack.i.bf16 %v1729_v4, %v1728_v59 }
 0x31c   : > { %13621 = vst [vmem:[#allocation323_spill] sm:$0xff] %v9569_v31  ;;  %v6728_v2 = vpack.i.bf16 %v1730_v9, %v1747_v53  ;;  %6430 = vmatmul.msk.f32.gmra.mxu3 %vm346_vm0, %v2632_v1  ;;  %v6718_v31 = vpack.i.bf16 %v1746_v11, %v1727_v49  ;;  %v9594_v53 = vsel %vm627_vm2, %v720_v32, %v628_v39  ;;  %v13627_v1 = vld [vmem:[#allocation118_spill] sm:$0xff]  ;;  %v13631_v11 = vld [vmem:[#allocation119_spill] sm:$0xff] }
 0x31d   : > { %13622 = vst [vmem:[#allocation324_spill] sm:$0xff] %v9572_v17  ;;  %v1734_v4 = vmul.f32 %v13627_v1, %v9589_v36  ;;  %v9599_v49 = vsel %vm627_vm2, %v628_v39, %v629_v20  ;;  %v1748_v9 = vmul.f32 %v13631_v11, %v9594_v53  ;;  %v13635_v1 = vld [vmem:[#allocation104_spill] sm:$0xff]  ;;  %v9617_v39 = vsel %vm627_vm2, %v688_v56, %v690_v61  ;;  %v13638_v11 = vld [vmem:[#allocation114_spill] sm:$0xff] }
 0x31e   : > { %6729 = vrot.lane.b32.xlu2 %v6728_v2, %s7533_s20  ;;  %13625 = vst [vmem:[#allocation325_spill] sm:$0xff] %v9589_v36  ;;  %v9604_v2 = vsel %vm627_vm2, %v690_v61, %v692_v24  ;;  %v2633_v24 = vmul.f32 %v9372_v0, %v9293_v26  ;;  %v13108_v61 = vrot.slane %v9074_v42, 7  ;;  %v13648_v0 = vld [vmem:[#allocation122_spill] sm:$0xff] }
 0x31f   : > { %6719 = vrot.lane.b32.xlu0 %v6718_v31, %s7533_s20  ;;  %13626 = vst [vmem:[#allocation326_spill] sm:$0xff] %v9594_v53  ;;  %v1733_v63 = vmul.f32 %v13635_v1, %v9604_v2  ;;  %v1732_v53 = vmul.f32 %v13638_v11, %v9617_v39  ;;  %v13641_v11 = vld [vmem:[#allocation165_spill] sm:$0xff] }
 0x320   : > { %6724 = vrot.lane.b32.xlu1 %v6723_v62, %s7533_s20  ;;  %13628 = vst [vmem:[#allocation327_spill] sm:$0xff] %v9599_v49  ;;  %v9601_v59 = vpop.permute.xlu2 %6564  ;;  %v13632_v62 = vld [vmem:[#allocation133_spill] sm:$0xff] }
 0x321   : > { %13629 = vst [vmem:[#allocation328_spill] sm:$0xff] %v9601_v59  ;;  %v1749_v31 = vmul.f32 %v13632_v62, %v9599_v49  ;;  %v9610_v46 = vpop.permute.xlu1 %2606  ;;  %v9612_v32 = vpop.permute.xlu0 %2601  ;;  %v9620_v59 = vsel %vm627_vm2, %v686_v28, %v688_v56  ;;  %v13639_v62 = vld [vmem:[#allocation115_spill] sm:$0xff]  ;;  %v6743_v49 = vpack.i.bf16 %v1734_v4, %v1733_v63  ;;  %v13640_v56 = vrot.slane %v8933_v10, 7 }
 0x322   : > { %13630 = vst [vmem:[#allocation329_spill] sm:$0xff] %v9604_v2  ;;  %v2169_v63 = vmul.f32 %v13641_v11, %v9476_v41  ;;  %v1944_v11 = vmul.f32 %v13648_v0, %v9206_v37 }
 0x323   : > { %13633 = vst [vmem:[#allocation330_spill] sm:$0xff] %v9610_v46  ;;  %v1731_v46 = vmul.f32 %v13639_v62, %v9620_v59  ;;  %v6738_v1 = vpack.i.bf16 %v1749_v31, %v1732_v53  ;;  %v9636_v28 = vsel %vm627_vm2, %v629_v20, %v13640_v56  ;;  %v9653_v20 = vsel %vm627_vm2, %v694_v12, %v13108_v61  ;;  %v603_v12 = vld [vmem:[%s12756_s4 + $0x78] sm:$0xff] }
 0x324   : > { %13634 = vst [vmem:[#allocation331_spill] sm:$0xff] %v9612_v32  ;;  %6431 = vmatmul.msk.f32.gmra.mxu3 %vm346_vm0, %v2633_v24  ;;  %v2634_v56 = vmul.f32 %v9222_v27, %v9306_v7  ;;  %6489 = vmatpush.msrb.mxu2 %v603_v12 }
 0x325   : > { %13636 = vst [vmem:[#allocation332_spill] sm:$0xff] %v9617_v39  ;;  %v6733_v32 = vpack.i.bf16 %v1731_v46, %v1748_v9  ;;  %v13643_v46 = vld [vmem:[#allocation132_spill] sm:$0xff]  ;;  %3713 = vmatpush.msra.mxu1 %v603_v12 }
 0x326   : > { %13637 = vst [vmem:[#allocation333_spill] sm:$0xff] %v9620_v59  ;;  %6744 = vrot.lane.b32.xlu2 %v6743_v49, %s7533_s20  ;;  %v1750_v53 = vmul.f32 %v13643_v46, %v9636_v28  ;;  %v13644_v9 = vld [vmem:[#allocation136_spill] sm:$0xff]  ;;  %v13647_v46 = vld [vmem:[#allocation117_spill] sm:$0xff] }
 0x327   : > { %6734 = vrot.lane.b32.xlu0 %v6733_v32, %s7533_s20  ;;  %v1945_v49 = vmul.f32 %v13644_v9, %v9203_v14  ;;  %13645 = vst [vmem:[#allocation335_spill] sm:$0xff] %v9653_v20  ;;  %v13646_v32 = vld [vmem:[#allocation155_spill] sm:$0xff]  ;;  %v1735_v62 = vmul.f32 %v13647_v46, %v9653_v20  ;;  %v13650_v46 = vld [vmem:[#allocation169_spill] sm:$0xff] }
 0x328   : > { %6739 = vrot.lane.b32.xlu1 %v6738_v1, %s7533_s20  ;;  %v9640_v4 = vpop.permute.xlu2 %6579  ;;  %v2170_v24 = vmul.f32 %v13646_v32, %v9467_v54  ;;  %v2171_v27 = vmul.f32 %v13650_v46, %v9498_v30  ;;  %v13655_v46 = vld [vmem:[#allocation267_spill] sm:$0xff] }
 0x329   : > { %13642 = vst [vmem:[#allocation334_spill] sm:$0xff] %v9640_v4  ;;  %v9646_v31 = vpop.permute.xlu0 %2616  ;;  %v9648_v1 = vpop.permute.xlu1 %6529  ;;  %v6748_v61 = vpack.i.bf16 %v1735_v62, %v1750_v53  ;;  %v6753_v4 = vpack.i.bf16 %v1945_v49, %v1944_v11  ;;  %v13651_v11 = vld [vmem:[#allocation269_spill] sm:$0xff]  ;;  %v13652_v53 = vld [vmem:[#allocation135_spill] sm:$0xff] }
 0x32a   : > { %v6758_v9 = vpack.i.bf16 %v2170_v24, %v2169_v63  ;;  %v602_v63 = vld [vmem:[%s12756_s4 + $0x70] sm:$0xff]  ;;  %v13654_v49 = vld [vmem:[#allocation199_spill] sm:$0xff] }
 0x32b   : > { %v13649_v24 = vld [vmem:[#allocation168_spill] sm:$0xff]  ;;  %6490 = vmatpush.msrb.mxu2 %v602_v63  ;;  %3714 = vmatpush.msra.mxu1 %v602_v63  ;;  %v2394_v12 = vmul.f32 %v13654_v49, %v8971_v25  ;;  %v601_v63 = vld [vmem:[%s12756_s4 + $0x68] sm:$0xff]  ;;  %v13666_v25 = vld [vmem:[#allocation285_spill] sm:$0xff] }
 0x32c   : > { %6432 = vmatmul.msk.f32.gmra.mxu3 %vm346_vm0, %v2634_v56  ;;  %v2172_v56 = vmul.f32 %v13649_v24, %v9519_v47  ;;  %v2635_v24 = vmul.f32 %v9422_v58, %v9347_v21  ;;  %v13656_v47 = vld [vmem:[#allocation125_spill] sm:$0xff]  ;;  %v600_v58 = vld [vmem:[%s12756_s4 + $0x60] sm:$0xff] }
 0x32d   : > { %6491 = vmatpush.msrb.mxu2 %v601_v63  ;;  %3715 = vmatpush.msra.mxu1 %v601_v63  ;;  %v13665_v63 = vld [vmem:[#allocation158_spill] sm:$0xff] }
 0x32e   : > { %6759 = vrot.lane.b32.xlu2 %v6758_v9, %s7532_s18  ;;  %v1946_v9 = vmul.f32 %v13652_v53, %v13651_v11  ;;  %v1947_v53 = vmul.f32 %v13656_v47, %v13655_v46 }
 0x32f   : > { %6749 = vrot.lane.b32.xlu0 %v6748_v61, %s7533_s20  ;;  %6492 = vmatpush.msrb.mxu2 %v600_v58 }
 0x330   : > { %6754 = vrot.lane.b32.xlu1 %v6753_v4, %s7531_s9  ;;  %v9677_v62 = vpop.permute.xlu2 %6594  ;;  %v13653_v4 = vld [vmem:[#allocation198_spill] sm:$0xff]  ;;  %v6768_v49 = vpack.i.bf16 %v1947_v53, %v1946_v9  ;;  %3716 = vmatpush.msra.mxu1 %v600_v58  ;;  %v13661_v9 = vld [vmem:[#allocation139_spill] sm:$0xff]  ;;  %v599_v58 = vld [vmem:[%s12756_s4 + $0x58] sm:$0xff] }
 0x331   : > { %v2395_v61 = vmul.f32 %v13653_v4, %v8973_v40  ;;  %v9685_v32 = vpop.permute.xlu1 %6544  ;;  %v9687_v0 = vpop.permute.xlu0 %6539  ;;  %v6773_v4 = vpack.i.bf16 %v2172_v56, %v2171_v27  ;;  %v13657_v40 = vld [vmem:[#allocation172_spill] sm:$0xff]  ;;  %v13660_v53 = vld [vmem:[#allocation266_spill] sm:$0xff]  ;;  %6493 = vmatpush.msrb.mxu2 %v599_v58 }
 0x332   : > { %v2174_v47 = vmul.f32 %v13657_v40, %v9510_v48  ;;  %v13658_v27 = vld [vmem:[#allocation268_spill] sm:$0xff]  ;;  %v2173_v40 = vmul.f32 %v13665_v63, %v9524_v38  ;;  %v2636_v48 = vmul.f32 %v9420_v43, %v13666_v25  ;;  %3717 = vmatpush.msra.mxu1 %v599_v58  ;;  %v13668_v43 = vld [vmem:[#allocation171_spill] sm:$0xff] }
 0x333   : > { %v6763_v11 = vpack.i.bf16 %v2395_v61, %v2394_v12  ;;  %v13662_v61 = vld [vmem:[#allocation202_spill] sm:$0xff]  ;;  %v2175_v58 = vmul.f32 %v13668_v43, %v9572_v17  ;;  %v13677_v43 = vld [vmem:[#allocation275_spill] sm:$0xff] }
 0x334   : > { %6433 = vmatmul.msk.f32.gmra.mxu3 %vm346_vm0, %v2635_v24  ;;  %v13659_v24 = vld [vmem:[#allocation138_spill] sm:$0xff]  ;;  %v13759_v17 = vld [vmem:[#allocation7_spill] sm:$0xff] }
 0x335   : > { %v1949_v56 = vmul.f32 %v13659_v24, %v13658_v27  ;;  %v13667_v24 = vld [vmem:[#allocation188_spill] sm:$0xff] }
 0x336   : > { %6774 = vrot.lane.b32.xlu2 %v6773_v4, %s7532_s18  ;;  %v1948_v4 = vmul.f32 %v13661_v9, %v13660_v53  ;;  %v2396_v9 = vmul.f32 %v13667_v24, %v8986_v57  ;;  %v598_v27 = vld [vmem:[%s12756_s4 + $0x50] sm:$0xff] }
 0x337   : > { %6764 = vrot.lane.b32.xlu0 %v6763_v11, %s7533_s20  ;;  %v2397_v11 = vmul.f32 %v13662_v61, %v8975_v60  ;;  %v6788_v61 = vpack.i.bf16 %v2174_v47, %v2173_v40  ;;  %6494 = vmatpush.msrb.mxu2 %v598_v27  ;;  %v13670_v47 = vld [vmem:[#allocation274_spill] sm:$0xff]  ;;  %v13672_v60 = vld [vmem:[#allocation201_spill] sm:$0xff]  ;;  %v13678_v57 = vld [vmem:[#allocation128_spill] sm:$0xff] }
 0x338   : > { %6769 = vrot.lane.b32.xlu1 %v6768_v49, %s7531_s9  ;;  %v9705_v46 = vpop.permute.xlu2 %6609  ;;  %v6783_v63 = vpack.i.bf16 %v1949_v56, %v1948_v4  ;;  %3718 = vmatpush.msra.mxu1 %v598_v27  ;;  %v2398_v56 = vmul.f32 %v13672_v60, %v8968_v13  ;;  %v13675_v4 = vld [vmem:[#allocation161_spill] sm:$0xff]  ;;  %v13690_v13 = vld [vmem:[#allocation131_spill] sm:$0xff] }
 0x339   : > { %v9713_v49 = vpop.permute.xlu1 %6559  ;;  %v9715_v12 = vpop.permute.xlu0 %6554  ;;  %v6778_v53 = vpack.i.bf16 %v2397_v11, %v2396_v9 }
 0x33a   : > { %13663 = vst [vmem:[#allocation336_spill] sm:$0xff] %v9713_v49  ;;  %v13732_v49 = vld [vmem:[#allocation312_spill] sm:$0xff] }
 0x33b   : > { %13664 = vst [vmem:[#allocation337_spill] sm:$0xff] %v9715_v12  ;;  %v6611_v12 = vunpack.i.l.bf16 %v9705_v46 }
 0x33c   : > { %6434 = vmatmul.msk.f32.gmra.mxu3 %vm346_vm0, %v2636_v48  ;;  %v13671_v48 = vld [vmem:[#allocation142_spill] sm:$0xff] }
 0x33d   : > { %v1951_v24 = vmul.f32 %v13671_v48, %v13670_v47  ;;  %v1950_v48 = vmul.f32 %v13678_v57, %v13677_v43  ;;  %v13679_v47 = vld [vmem:[#allocation191_spill] sm:$0xff] }
 0x33e   : > { %6789 = vrot.lane.b32.xlu2 %v6788_v61, %s7532_s18  ;;  %v2176_v61 = vmul.f32 %v13675_v4, %v9552_v19  ;;  %v2399_v60 = vmul.f32 %v13679_v47, %v8978_v18  ;;  %v596_v4 = vld [vmem:[%s12756_s4 + $0x40] sm:$0xff]  ;;  %v13689_v18 = vld [vmem:[#allocation276_spill] sm:$0xff] }
 0x33f   : > { %6779 = vrot.lane.b32.xlu0 %v6778_v53, %s7533_s20  ;;  %v13676_v53 = vld [vmem:[#allocation278_spill] sm:$0xff] }
 0x340   : > { %6784 = vrot.lane.b32.xlu1 %v6783_v63, %s7531_s9  ;;  %v9735_v40 = vpop.permute.xlu2 %6624  ;;  %v2637_v11 = vmul.f32 %v13676_v53, %v9359_v23  ;;  %v597_v63 = vld [vmem:[%s12756_s4 + $0x48] sm:$0xff]  ;;  %v6798_v53 = vpack.i.bf16 %v1951_v24, %v1950_v48  ;;  %v13684_v48 = vld [vmem:[#allocation141_spill] sm:$0xff] }
 0x341   : > { %13669 = vst [vmem:[#allocation285_spill] sm:$0xff] %v9735_v40  ;;  %v9741_v9 = vpop.permute.xlu1 %6574  ;;  %v9743_v27 = vpop.permute.xlu0 %6569  ;;  %6495 = vmatpush.msrb.mxu2 %v597_v63  ;;  %3719 = vmatpush.msra.mxu1 %v597_v63  ;;  %v13681_v63 = vld [vmem:[#allocation175_spill] sm:$0xff] }
 0x342   : > { %13673 = vst [vmem:[#allocation338_spill] sm:$0xff] %v9741_v9  ;;  %v6803_v9 = vpack.i.bf16 %v2176_v61, %v2175_v58  ;;  %v595_v58 = vld [vmem:[%s12756_s4 + $0x38] sm:$0xff]  ;;  %v13680_v61 = vld [vmem:[#allocation174_spill] sm:$0xff]  ;;  %v2177_v47 = vmul.f32 %v13681_v63, %v9549_v3 }
 0x343   : > { %13674 = vst [vmem:[#allocation339_spill] sm:$0xff] %v9743_v27  ;;  %v6793_v27 = vpack.i.bf16 %v2399_v60, %v2398_v56  ;;  %6496 = vmatpush.msrb.mxu2 %v596_v4  ;;  %3720 = vmatpush.msra.mxu1 %v596_v4  ;;  %v13683_v60 = vld [vmem:[#allocation277_spill] sm:$0xff]  ;;  %v13686_v4 = vld [vmem:[#allocation206_spill] sm:$0xff] }
 0x344   : > { %6435 = vmatmul.msk.f32.gmra.mxu3 %vm346_vm0, %v2637_v11  ;;  %v2178_v11 = vmul.f32 %v13680_v61, %v9559_v8  ;;  %v1952_v56 = vmul.f32 %v13684_v48, %v13683_v60  ;;  %v13688_v61 = vld [vmem:[#allocation286_spill] sm:$0xff]  ;;  %v1953_v8 = vmul.f32 %v13690_v13, %v13689_v18  ;;  %v593_v18 = vld [vmem:[%s12756_s4 + $0x28] sm:$0xff]  ;;  %v13698_v13 = vld [vmem:[#allocation164_spill] sm:$0xff] }
 0x345   : > { %6497 = vmatpush.msrb.mxu2 %v595_v58  ;;  %3721 = vmatpush.msra.mxu1 %v595_v58  ;;  %v2638_v63 = vmul.f32 %v9473_v34, %v13688_v61 }
 0x346   : > { %6804 = vrot.lane.b32.xlu2 %v6803_v9, %s7532_s18  ;;  %v13685_v9 = vld [vmem:[#allocation205_spill] sm:$0xff]  ;;  %v6818_v58 = vpack.i.bf16 %v2178_v11, %v2177_v47  ;;  %v6813_v48 = vpack.i.bf16 %v1953_v8, %v1952_v56  ;;  %v13691_v47 = vld [vmem:[#allocation178_spill] sm:$0xff]  ;;  %v13693_v8 = vld [vmem:[#allocation144_spill] sm:$0xff] }
 0x347   : > { %6794 = vrot.lane.b32.xlu0 %v6793_v27, %s7533_s20  ;;  %v2401_v27 = vmul.f32 %v13685_v9, %v9014_v45  ;;  %v594_v9 = vld [vmem:[%s12756_s4 + $0x30] sm:$0xff]  ;;  %v2180_v11 = vmul.f32 %v13691_v47, %v9617_v39  ;;  %v1955_v56 = vmul.f32 %v13693_v8, %v9258_v44  ;;  %v2179_v47 = vmul.f32 %v13698_v13, %v9620_v59  ;;  %v592_v44 = vld [vmem:[%s12756_s4 + $0x20] sm:$0xff]  ;;  %v591_v8 = vld [vmem:[%s12756_s4 + $0x18] sm:$0xff] }
 0x348   : > { %6799 = vrot.lane.b32.xlu1 %v6798_v53, %s7531_s9  ;;  %v9770_v24 = vpop.permute.xlu2 %6639  ;;  %v2400_v53 = vmul.f32 %v13686_v4, %v9017_v16  ;;  %6498 = vmatpush.msrb.mxu2 %v594_v9  ;;  %v13699_v4 = vld [vmem:[#allocation284_spill] sm:$0xff] }
 0x349   : > { %13682 = vst [vmem:[#allocation340_spill] sm:$0xff] %v9770_v24  ;;  %v9778_v57 = vpop.permute.xlu1 %6589  ;;  %v9780_v43 = vpop.permute.xlu0 %6584  ;;  %3722 = vmatpush.msra.mxu1 %v594_v9  ;;  %v13694_v9 = vld [vmem:[#allocation273_spill] sm:$0xff] }
 0x34a   : > { %13687 = vst [vmem:[#allocation341_spill] sm:$0xff] %v9780_v43  ;;  %v6808_v60 = vpack.i.bf16 %v2401_v27, %v2400_v53  ;;  %6499 = vmatpush.msrb.mxu2 %v593_v18  ;;  %v13695_v27 = vld [vmem:[#allocation145_spill] sm:$0xff] }
 0x34b   : > { %3723 = vmatpush.msra.mxu1 %v593_v18  ;;  %v1954_v53 = vmul.f32 %v13695_v27, %v13694_v9  ;;  %v13700_v18 = vld [vmem:[#allocation194_spill] sm:$0xff] }
 0x34c   : > { %6436 = vmatmul.msk.f32.gmra.mxu3 %vm346_vm0, %v2638_v63  ;;  %v2402_v9 = vmul.f32 %v13700_v18, %v9019_v15  ;;  %6500 = vmatpush.msrb.mxu2 %v592_v44  ;;  %v13703_v18 = vld [vmem:[#allocation209_spill] sm:$0xff]  ;;  %v13707_v15 = vld [vmem:[#allocation243_spill] sm:$0xff] }
 0x34d   : > { %3724 = vmatpush.msra.mxu1 %v592_v44  ;;  %v6828_v13 = vpack.i.bf16 %v1955_v56, %v1954_v53  ;;  %v2404_v56 = vmul.f32 %v13703_v18, %v9027_v33  ;;  %v698_v45 = vrot.slane %v13707_v15, 7  ;;  %v13709_v18 = vld [vmem:[#allocation197_spill] sm:$0xff] }
 0x34e   : > { %6819 = vrot.lane.b32.xlu2 %v6818_v58, %s7532_s18  ;;  %6501 = vmatpush.msrb.mxu2 %v591_v8  ;;  %v2405_v16 = vmul.f32 %v13709_v18, %v9012_v55  ;;  %v13719_v18 = vld [vmem:[#allocation293_spill] sm:$0xff] }
 0x34f   : > { %6809 = vrot.lane.b32.xlu0 %v6808_v60, %s7533_s20  ;;  %3725 = vmatpush.msra.mxu1 %v591_v8 }
 0x350   : > { %6814 = vrot.lane.b32.xlu1 %v6813_v48, %s7531_s9  ;;  %v9798_v63 = vpop.permute.xlu2 %6654  ;;  %v13696_v48 = vld [vmem:[#allocation210_spill] sm:$0xff] }
 0x351   : > { %13692 = vst [vmem:[#allocation286_spill] sm:$0xff] %v9798_v63  ;;  %v2403_v60 = vmul.f32 %v13696_v48, %v9021_v52  ;;  %v9808_v34 = vpop.permute.xlu0 %6599  ;;  %v2639_v63 = vmul.f32 %v9471_v29, %v13699_v4  ;;  %v6833_v48 = vpack.i.bf16 %v2180_v11, %v2179_v47  ;;  %v13701_v29 = vld [vmem:[#allocation177_spill] sm:$0xff]  ;;  %v13702_v11 = vld [vmem:[#allocation148_spill] sm:$0xff] }
 0x352   : > { %v9806_v58 = vpop.permute.xlu1 %6604  ;;  %v2181_v44 = vmul.f32 %v13701_v29, %v9604_v2  ;;  %v590_v29 = vld [vmem:[%s12756_s4 + $0x10] sm:$0xff] }
 0x353   : > { %13697 = vst [vmem:[#allocation276_spill] sm:$0xff] %v9806_v58  ;;  %v6823_v27 = vpack.i.bf16 %v2403_v60, %v2402_v9  ;;  %v13705_v60 = vld [vmem:[#allocation287_spill] sm:$0xff]  ;;  %6502 = vmatpush.msrb.mxu2 %v590_v29  ;;  %3726 = vmatpush.msra.mxu1 %v590_v29  ;;  %v13711_v29 = vld [vmem:[#allocation180_spill] sm:$0xff] }
 0x354   : > { %6437 = vmatmul.msk.f32.gmra.mxu3 %vm346_vm0, %v2639_v63  ;;  %v1957_v63 = vmul.f32 %v13702_v11, %v9296_v35  ;;  %v13708_v35 = vld [vmem:[#allocation134_spill] sm:$0xff] }
 0x355   : > { %v1956_v11 = vmul.f32 %v13708_v35, %v9299_v5  ;;  %v13710_v5 = vrot.slane %v9074_v42, 7 }
 0x356   : > { %6834 = vrot.lane.b32.xlu2 %v6833_v48, %s7532_s18  ;;  %v13704_v48 = vld [vmem:[#allocation167_spill] sm:$0xff] }
 0x357   : > { %6824 = vrot.lane.b32.xlu0 %v6823_v27, %s7533_s20  ;;  %v13706_v27 = vld [vmem:[#allocation281_spill] sm:$0xff]  ;;  %v9858_v35 = vsel %vm627_vm2, %v13710_v5, %v698_v45 }
 0x358   : > { %6829 = vrot.lane.b32.xlu1 %v6828_v13, %s7531_s9  ;;  %v9828_v47 = vpop.permute.xlu2 %6669  ;;  %v2182_v13 = vmul.f32 %v13704_v48, %v9589_v36  ;;  %v2640_v9 = vmul.f32 %v13706_v27, %v13705_v60  ;;  %v589_v27 = vld [vmem:[%s12756_s4 + $0x8] sm:$0xff]  ;;  %v6843_v48 = vpack.i.bf16 %v1957_v63, %v1956_v11  ;;  %v6838_v36 = vpack.i.bf16 %v2405_v16, %v2404_v56  ;;  %v13715_v56 = vld [vmem:[#allocation212_spill] sm:$0xff] }
 0x359   : > { %v9836_v8 = vpop.permute.xlu0 %6614  ;;  %6503 = vmatpush.msrb.mxu2 %v589_v27  ;;  %3727 = vmatpush.msra.mxu1 %v589_v27  ;;  %v13714_v63 = vld [vmem:[#allocation147_spill] sm:$0xff]  ;;  %v2407_v27 = vmul.f32 %v13715_v56, %v9065_v22 }
 0x35a   : > { %v9834_v53 = vpop.permute.xlu1 %6619  ;;  %v6848_v2 = vpack.i.bf16 %v2182_v13, %v2181_v44  ;;  %v2184_v44 = vmul.f32 %v13711_v29, %v9858_v35  ;;  %v13712_v13 = vld [vmem:[#allocation181_spill] sm:$0xff] }
 0x35b   : > { %v2183_v11 = vmul.f32 %v13712_v13, %v9653_v20  ;;  %v13720_v29 = vld [vmem:[#allocation313_spill] sm:$0xff]  ;;  %v588_v13 = vld [vmem:[%s12756_s4] sm:$0xff] }
 0x35c   : > { %6438 = vmatmul.msk.f32.gmra.mxu3 %vm346_vm0, %v2640_v9  ;;  %v13716_v9 = vld [vmem:[#allocation213_spill] sm:$0xff]  ;;  %v2641_v39 = vmul.f32 %v13720_v29, %v13719_v18  ;;  %6504 = vmatpush.msrb.mxu2 %v588_v13 }
 0x35d   : > { %v2406_v5 = vmul.f32 %v13716_v9, %v9072_v6  ;;  %v13721_v20 = vld [vmem:[#allocation241_spill] sm:$0xff]  ;;  %3728 = vmatpush.msra.mxu1 %v588_v13  ;;  %v6863_v56 = vpack.i.bf16 %v2184_v44, %v2183_v11  ;;  %v13723_v9 = vld [vmem:[#allocation244_spill] sm:$0xff]  ;;  %v13725_v11 = vld [vmem:[#allocation150_spill] sm:$0xff] }
 0x35e   : > { %6849 = vrot.lane.b32.xlu2 %v6848_v2, %s7532_s18  ;;  %v1958_v2 = vmul.f32 %v13714_v63, %v9311_v50  ;;  %v702_v59 = vrot.slane %v13721_v20, 7  ;;  %v13722_v50 = vld [vmem:[#allocation137_spill] sm:$0xff]  ;;  %v700_v3 = vrot.slane %v13723_v9, 7 }
 0x35f   : > { %6839 = vrot.lane.b32.xlu0 %v6838_v36, %s7533_s20  ;;  %v1959_v63 = vmul.f32 %v13722_v50, %v9302_v51  ;;  %v6853_v22 = vpack.i.bf16 %v2407_v27, %v2406_v5  ;;  %v619_v29 = vld [vmem:[%s12756_s4 + $0xf8] sm:$0xff]  ;;  %v13724_v51 = vld [vmem:[#allocation184_spill] sm:$0xff]  ;;  %v13730_v5 = vld [vmem:[#allocation170_spill] sm:$0xff] }
 0x360   : > { %6844 = vrot.lane.b32.xlu1 %v6843_v48, %s7531_s9  ;;  %v9866_v16 = vpop.permute.xlu2 %6684  ;;  %3826 = vmatpush.msra.mxu2 %v619_v29  ;;  %v9893_v6 = vsel %vm627_vm2, %v700_v3, %v702_v59  ;;  %v9902_v13 = vsel %vm627_vm2, %v698_v45, %v700_v3  ;;  %v13726_v29 = vld [vmem:[#allocation151_spill] sm:$0xff]  ;;  %v13731_v50 = vld [vmem:[#allocation292_spill] sm:$0xff]  ;;  %v13733_v3 = vld [vmem:[#allocation253_spill] sm:$0xff] }
 0x361   : > { %13713 = vst [vmem:[#allocation273_spill] sm:$0xff] %v9866_v16  ;;  %v9876_v36 = vpop.permute.xlu0 %6629  ;;  %v6858_v24 = vpack.i.bf16 %v1959_v63, %v1958_v2  ;;  %v1961_v63 = vmul.f32 %v13725_v11, %v9306_v7  ;;  %v1960_v2 = vmul.f32 %v13726_v29, %v9293_v26  ;;  %v2642_v45 = vmul.f32 %v13732_v49, %v13731_v50  ;;  %v618_v7 = vld [vmem:[%s12756_s4 + $0xf0] sm:$0xff]  ;;  %v617_v49 = vld [vmem:[%s12756_s4 + $0xe8] sm:$0xff] }
 0x362   : > { %v9874_v48 = vpop.permute.xlu1 %6634  ;;  %13718 = vst [vmem:[#allocation287_spill] sm:$0xff] %v9876_v36  ;;  %v704_v11 = vrot.slane %v13733_v3, 7  ;;  %v13734_v26 = vld [vmem:[#allocation200_spill] sm:$0xff]  ;;  %3827 = vmatpush.msra.mxu2 %v618_v7  ;;  %v13771_v36 = vld [vmem:[#allocation322_spill] sm:$0xff] }
 0x363   : > { %13717 = vst [vmem:[#allocation284_spill] sm:$0xff] %v9874_v48  ;;  %v2408_v29 = vmul.f32 %v13734_v26, %v9074_v42  ;;  %v13743_v7 = vld [vmem:[#allocation296_spill] sm:$0xff] }
 0x364   : > { %6439 = vmatmul.msk.f32.gmra.mxu3 %vm346_vm0, %v2641_v39  ;;  %v2186_v39 = vmul.f32 %v13724_v51, %v9893_v6  ;;  %v2185_v51 = vmul.f32 %v13730_v5, %v9902_v13  ;;  %3828 = vmatpush.msra.mxu2 %v617_v49  ;;  %v9931_v19 = vsel %vm627_vm2, %v702_v59, %v704_v11  ;;  %v13739_v49 = vld [vmem:[#allocation215_spill] sm:$0xff]  ;;  %v13745_v42 = vld [vmem:[#allocation140_spill] sm:$0xff] }
 0x366   : > { %6864 = vrot.lane.b32.xlu2 %v6863_v56, %s7532_s18  ;;  %v13727_v56 = vld [vmem:[#allocation216_spill] sm:$0xff] }
 0x367   : > { %6854 = vrot.lane.b32.xlu0 %v6853_v22, %s7533_s20  ;;  %v2409_v27 = vmul.f32 %v13727_v56, %v13707_v15  ;;  %v6878_v56 = vpack.i.bf16 %v2186_v39, %v2185_v51  ;;  %v6873_v15 = vpack.i.bf16 %v1961_v63, %v1960_v2  ;;  %v13736_v51 = vld [vmem:[#allocation183_spill] sm:$0xff] }
 0x368   : > { %6859 = vrot.lane.b32.xlu1 %v6858_v24, %s7531_s9  ;;  %v9899_v44 = vpop.permute.xlu2 %6699  ;;  %v2187_v39 = vmul.f32 %v13736_v51, %v9931_v19  ;;  %v13744_v51 = vld [vmem:[#allocation288_spill] sm:$0xff] }
 0x369   : > { %v9912_v22 = vpop.permute.xlu0 %6644  ;;  %v6868_v5 = vpack.i.bf16 %v2409_v27, %v2408_v29  ;;  %v13738_v29 = vld [vmem:[#allocation154_spill] sm:$0xff]  ;;  %v2643_v26 = vmul.f32 %v13744_v51, %v13743_v7  ;;  %v615_v51 = vld [vmem:[%s12756_s4 + $0xd8] sm:$0xff] }
 0x36a   : > { %v9910_v24 = vpop.permute.xlu1 %6649  ;;  %13729 = vst [vmem:[#allocation342_spill] sm:$0xff] %v9912_v22  ;;  %v1963_v2 = vmul.f32 %v13738_v29, %v13666_v25  ;;  %v1962_v25 = vmul.f32 %v13745_v42, %v9347_v21  ;;  %v13746_v29 = vld [vmem:[#allocation204_spill] sm:$0xff]  ;;  %v13755_v42 = vld [vmem:[#allocation294_spill] sm:$0xff] }
 0x36b   : > { %13728 = vst [vmem:[#allocation293_spill] sm:$0xff] %v9910_v24  ;;  %v13735_v24 = vld [vmem:[#allocation251_spill] sm:$0xff] }
 0x36c   : > { %6440 = vmatmul.msk.f32.gmra.mxu3 %vm346_vm0, %v2642_v45  ;;  %v706_v22 = vrot.slane %v13735_v24, 7 }
 0x36e   : > { %6879 = vrot.lane.b32.xlu2 %v6878_v56, %s7532_s18  ;;  %v9940_v63 = vsel %vm627_vm2, %v704_v11, %v706_v22  ;;  %v2410_v56 = vmul.f32 %v13739_v49, %v13723_v9  ;;  %v616_v11 = vld [vmem:[%s12756_s4 + $0xe0] sm:$0xff]  ;;  %v2411_v49 = vmul.f32 %v13746_v29, %v13721_v20  ;;  %v13757_v20 = vld [vmem:[#allocation143_spill] sm:$0xff] }
 0x36f   : > { %6869 = vrot.lane.b32.xlu0 %v6868_v5, %s7533_s20  ;;  %13737 = vst [vmem:[#allocation292_spill] sm:$0xff] %v9940_v63  ;;  %3829 = vmatpush.msra.mxu2 %v616_v11  ;;  %v13753_v11 = vld [vmem:[#allocation221_spill] sm:$0xff] }
 0x370   : > { %6874 = vrot.lane.b32.xlu1 %v6873_v15, %s7531_s9  ;;  %v9937_v45 = vpop.permute.xlu2 %6714  ;;  %v13742_v15 = vld [vmem:[#allocation173_spill] sm:$0xff]  ;;  %v6883_v55 = vpack.i.bf16 %v2411_v49, %v2410_v56  ;;  %v13751_v49 = vld [vmem:[#allocation187_spill] sm:$0xff] }
 0x371   : > { %v9948_v27 = vpop.permute.xlu0 %6659  ;;  %v2188_v5 = vmul.f32 %v13742_v15, %v9940_v63  ;;  %3830 = vmatpush.msra.mxu2 %v615_v51  ;;  %v13747_v15 = vld [vmem:[#allocation254_spill] sm:$0xff] }
 0x372   : > { %v9946_v59 = vpop.permute.xlu1 %6664  ;;  %13741 = vst [vmem:[#allocation344_spill] sm:$0xff] %v9948_v27  ;;  %v6888_v27 = vpack.i.bf16 %v1963_v2, %v1962_v25  ;;  %v13748_v33 = vrot.slane %v13747_v15, 7  ;;  %v2413_v25 = vmul.f32 %v13753_v11, %v13735_v24  ;;  %v6531_v24 = vunpack.i.l.bf16 %v9648_v1 }
 0x373   : > { %13740 = vst [vmem:[#allocation343_spill] sm:$0xff] %v9946_v59  ;;  %v6893_v9 = vpack.i.bf16 %v2188_v5, %v2187_v39  ;;  %v13749_v39 = vld [vmem:[#allocation303_spill] sm:$0xff]  ;;  %v6667_v52 = vunpack.i.h.bf16 %v9946_v59  ;;  %v13768_v59 = vld [vmem:[#allocation252_spill] sm:$0xff] }
 0x374   : > { %6441 = vmatmul.msk.f32.gmra.mxu3 %vm346_vm0, %v2643_v26  ;;  %v9969_v21 = vsel %vm627_vm2, %v706_v22, %v13748_v33  ;;  %v13750_v26 = vld [vmem:[#allocation186_spill] sm:$0xff] }
 0x375   : > { %v2190_v2 = vmul.f32 %v13750_v26, %v13749_v39  ;;  %v2189_v56 = vmul.f32 %v13751_v49, %v9969_v21  ;;  %v13754_v33 = vld [vmem:[#allocation222_spill] sm:$0xff]  ;;  %v13756_v26 = vld [vmem:[#allocation323_spill] sm:$0xff]  ;;  %v614_v49 = vld [vmem:[%s12756_s4 + $0xd0] sm:$0xff] }
 0x376   : > { %6894 = vrot.lane.b32.xlu2 %v6893_v9, %s7532_s18  ;;  %v13752_v9 = vld [vmem:[#allocation153_spill] sm:$0xff]  ;;  %v2412_v22 = vmul.f32 %v13754_v33, %v13733_v3  ;;  %v2644_v29 = vmul.f32 %v13756_v26, %v13755_v42  ;;  %3831 = vmatpush.msra.mxu2 %v614_v49  ;;  %v6587_v3 = vunpack.i.h.bf16 %v9780_v43  ;;  %v13758_v26 = vld [vmem:[#allocation327_spill] sm:$0xff]  ;;  %v13761_v49 = vld [vmem:[#allocation156_spill] sm:$0xff] }
 0x377   : > { %6884 = vrot.lane.b32.xlu0 %v6883_v55, %s7533_s20  ;;  %v1964_v51 = vmul.f32 %v13752_v9, %v9359_v23  ;;  %v1965_v23 = vmul.f32 %v13757_v20, %v13688_v61  ;;  %v6908_v9 = vpack.i.bf16 %v2190_v2, %v2189_v56  ;;  %v946_v48 = vmul.f32 %v13759_v17, %v13758_v26  ;;  %v613_v61 = vld [vmem:[%s12756_s4 + $0xc8] sm:$0xff]  ;;  %v13767_v20 = vld [vmem:[#allocation176_spill] sm:$0xff] }
 0x378   : > { %6889 = vrot.lane.b32.xlu1 %v6888_v27, %s7531_s9  ;;  %v9977_v5 = vpop.permute.xlu2 %6729  ;;  %v6898_v33 = vpack.i.bf16 %v2413_v25, %v2412_v22  ;;  %v1967_v56 = vmul.f32 %v13761_v49, %v13705_v60  ;;  %3832 = vmatpush.msra.mxu2 %v613_v61  ;;  %v13769_v43 = vld [vmem:[#allocation231_spill] sm:$0xff] }
 0x379   : > { %v9987_v55 = vpop.permute.xlu0 %6674  ;;  %v6903_v11 = vpack.i.bf16 %v1965_v23, %v1964_v51  ;;  %v13763_v51 = vld [vmem:[#allocation190_spill] sm:$0xff]  ;;  %v13766_v23 = vld [vmem:[#allocation300_spill] sm:$0xff]  ;;  %v2415_v38 = vmul.f32 %v13769_v43, %v13768_v59  ;;  %v3419_v61 = vsel %vm346_vm0, %v946_v48, %v6531_v24  ;;  %v6591_v24 = vunpack.i.l.bf16 %v9778_v57 }
 0x37a   : > { %v9985_v27 = vpop.permute.xlu1 %6679  ;;  %v2191_v17 = vmul.f32 %v13767_v20, %v13766_v23  ;;  %v3452_v20 = vsel %vm3451_vm3, %v3419_v61, %v6611_v12  ;;  %v612_v48 = vld [vmem:[%s12756_s4 + $0xc0] sm:$0xff]  ;;  %v6532_v12 = vunpack.i.h.bf16 %v9648_v1  ;;  %v611_v1 = vld [vmem:[%s12756_s4 + $0xb8] sm:$0xff] }
 0x37b   : > { %3833 = vmatpush.msra.mxu2 %v612_v48  ;;  %v13783_v48 = vld [vmem:[#allocation295_spill] sm:$0xff] }
 0x37c   : > { %6442 = vmatmul.msk.f32.gmra.mxu3 %vm346_vm0, %v2644_v29  ;;  %v13760_v29 = vld [vmem:[#allocation17_spill] sm:$0xff] }
 0x37d   : > { %v969_v2 = vmul.f32 %v13760_v29, %v9940_v63  ;;  %v13770_v29 = vld [vmem:[#allocation291_spill] sm:$0xff]  ;;  %3834 = vmatpush.msra.mxu2 %v611_v1 }
 0x37e   : > { %6909 = vrot.lane.b32.xlu2 %v6908_v9, %s7532_s18  ;;  %v13762_v9 = vld [vmem:[#allocation309_spill] sm:$0xff]  ;;  %v2645_v16 = vmul.f32 %v13771_v36, %v13770_v29 }
 0x37f   : > { %6899 = vrot.lane.b32.xlu0 %v6898_v33, %s7533_s20  ;;  %v2192_v25 = vmul.f32 %v13763_v51, %v13762_v9  ;;  %v3442_v58 = vsel %vm346_vm0, %v969_v2, %v6587_v3 }
 0x380   : > { %6904 = vrot.lane.b32.xlu1 %v6903_v11, %s7531_s9  ;;  %v10015_v22 = vpop.permute.xlu2 %6744  ;;  %v13765_v11 = vld [vmem:[#allocation157_spill] sm:$0xff]  ;;  %v3475_v43 = vsel %vm3451_vm3, %v3442_v58, %v6667_v52  ;;  %v13773_v52 = vld [vmem:[#allocation10_spill] sm:$0xff] }
 0x381   : > { %13764 = vst [vmem:[#allocation296_spill] sm:$0xff] %v10015_v22  ;;  %v1966_v33 = vmul.f32 %v13765_v11, %v13699_v4  ;;  %v6690_v49 = vpop.permute.xlu0 %6689  ;;  %v13772_v4 = vld [vmem:[#allocation208_spill] sm:$0xff]  ;;  %v6923_v59 = vpack.i.bf16 %v2192_v25, %v2191_v17  ;;  %v947_v17 = vmul.f32 %v13773_v52, %v9636_v28 }
 0x382   : > { %v10025_v60 = vpop.permute.xlu1 %6694  ;;  %v6691_v22 = vunpack.i.l.bf16 %v6690_v49  ;;  %v2414_v11 = vmul.f32 %v13772_v4, %v13747_v15  ;;  %v13785_v4 = vld [vmem:[#allocation146_spill] sm:$0xff] }
 0x383   : > { %v6696_v51 = vunpack.i.l.bf16 %v10025_v60  ;;  %v6918_v30 = vpack.i.bf16 %v1967_v56, %v1966_v33  ;;  %v13780_v56 = vld [vmem:[#allocation230_spill] sm:$0xff]  ;;  %v13782_v33 = vld [vmem:[#allocation179_spill] sm:$0xff] }
 0x384   : > { %6443 = vmatmul.msk.f32.gmra.mxu3 %vm346_vm0, %v2645_v16  ;;  %v3485_v36 = vsel %vm3484_vm4, %v3452_v20, %v6691_v22  ;;  %v6913_v40 = vpack.i.bf16 %v2415_v38, %v2414_v11  ;;  %v6671_v38 = vunpack.i.l.bf16 %v9828_v47  ;;  %v13774_v20 = vld [vmem:[#allocation31_spill] sm:$0xff]  ;;  %v13781_v11 = vld [vmem:[#allocation317_spill] sm:$0xff] }
 0x385   : > { %v3508_v63 = vsel %vm3484_vm4, %v3475_v43, %v6696_v51  ;;  %3729 = vmatmul.f32.vlgmr.msra.gmra.mxu1 %v3485_v36  ;;  %v6612_v43 = vunpack.i.h.bf16 %v9705_v46  ;;  %v970_v58 = vmul.f32 %v13774_v20, %v9969_v21  ;;  %v13775_v16 = vld [vmem:[#allocation307_spill] sm:$0xff]  ;;  %v13776_v36 = vld [vmem:[#allocation189_spill] sm:$0xff]  ;;  %v2194_v61 = vmul.f32 %v13782_v33, %v13781_v11 }
 0x386   : > { %3798 = vmatmul.f32.vlgmr.msrb.gmra.mxu2 %v3508_v63  ;;  %6924 = vrot.lane.b32.xlu2 %v6923_v59, %s7532_s18  ;;  %v2193_v3 = vmul.f32 %v13776_v36, %v13775_v16  ;;  %v6702_v63 = vunpack.i.h.bf16 %v9899_v44  ;;  %v6692_v59 = vunpack.i.h.bf16 %v6690_v49  ;;  %v13784_v36 = vld [vmem:[#allocation297_spill] sm:$0xff]  ;;  %v3420_v49 = vsel %vm346_vm0, %v947_v17, %v6532_v12  ;;  %v13787_v20 = vld [vmem:[#allocation211_spill] sm:$0xff] }
 0x387   : > { %6914 = vrot.lane.b32.xlu0 %v6913_v40, %s7533_s20  ;;  %v13779_v40 = vld [vmem:[#allocation250_spill] sm:$0xff]  ;;  %v2646_v52 = vmul.f32 %v13784_v36, %v13783_v48  ;;  %v3443_v1 = vsel %vm346_vm0, %v970_v58, %v6591_v24 }
 0x388   : > { %6919 = vrot.lane.b32.xlu1 %v6918_v30, %s7531_s9  ;;  %v10057_v46 = vpop.permute.xlu2 %6759  ;;  %v13778_v30 = vld [vmem:[#allocation160_spill] sm:$0xff]  ;;  %v2416_v51 = vmul.f32 %v13780_v56, %v13779_v40  ;;  %v3453_v40 = vsel %vm3451_vm3, %v3420_v49, %v6612_v43  ;;  %v3476_v15 = vsel %vm3451_vm3, %v3443_v1, %v6671_v38  ;;  %v13788_v24 = vld [vmem:[#allocation310_spill] sm:$0xff]  ;;  %v6592_v43 = vunpack.i.h.bf16 %v9778_v57 }
 0x389   : > { %13777 = vst [vmem:[#allocation303_spill] sm:$0xff] %v10057_v46  ;;  %v1969_v2 = vmul.f32 %v13778_v30, %v13731_v50  ;;  %v10065_v22 = vpop.permute.xlu0 %6704  ;;  %v1968_v50 = vmul.f32 %v13785_v4, %v13719_v18  ;;  %v13786_v30 = vld [vmem:[#allocation255_spill] sm:$0xff]  ;;  %v6938_v46 = vpack.i.bf16 %v2194_v61, %v2193_v3  ;;  %v3486_v33 = vsel %vm3484_vm4, %v3453_v40, %v6692_v59  ;;  %v610_v18 = vld [vmem:[%s12756_s4 + $0xb0] sm:$0xff]  ;;  %v13790_v38 = vld [vmem:[#allocation6_spill] sm:$0xff] }
 0x38a   : > { %v10063_v25 = vpop.permute.xlu1 %6709  ;;  %v2417_v56 = vmul.f32 %v13787_v20, %v13786_v30  ;;  %v3509_v36 = vsel %vm3484_vm4, %v3476_v15, %v6702_v63  ;;  %v6536_v58 = vunpack.i.l.bf16 %v13788_v24  ;;  %3835 = vmatpush.msra.mxu2 %v610_v18  ;;  %v13791_v15 = vld [vmem:[#allocation30_spill] sm:$0xff]  ;;  %v6616_v59 = vunpack.i.l.bf16 %v9836_v8  ;;  %v13793_v40 = vld [vmem:[#allocation192_spill] sm:$0xff]  ;;  %v13800_v18 = vld [vmem:[#allocation203_spill] sm:$0xff] }
 0x38b   : > { %v6933_v12 = vpack.i.bf16 %v1969_v2, %v1968_v50  ;;  %v971_v63 = vmul.f32 %v13791_v15, %v13749_v39  ;;  %v13792_v2 = vld [vmem:[#allocation326_spill] sm:$0xff]  ;;  %v6711_v61 = vunpack.i.l.bf16 %v10063_v25  ;;  %v13797_v39 = vld [vmem:[#allocation159_spill] sm:$0xff] }
 0x38c   : > { %6444 = vmatmul.msk.f32.gmra.mxu3 %vm346_vm0, %v2646_v52  ;;  %v6928_v17 = vpack.i.bf16 %v2417_v56, %v2416_v51  ;;  %v13789_v52 = vld [vmem:[#allocation302_spill] sm:$0xff]  ;;  %v2196_v57 = vmul.f32 %v13793_v40, %v13792_v2  ;;  %v13794_v56 = vld [vmem:[#allocation316_spill] sm:$0xff]  ;;  %v1970_v1 = vmul.f32 %v13797_v39, %v13743_v7  ;;  %v13799_v50 = vld [vmem:[#allocation239_spill] sm:$0xff] }
 0x38d   : > { %3732 = vmatmul.f32.gmra.mxu1 %v3486_v33  ;;  %v948_v3 = vmul.f32 %v13790_v38, %v13789_v52  ;;  %v6697_v33 = vunpack.i.h.bf16 %v10025_v60  ;;  %v13803_v15 = vld [vmem:[#allocation331_spill] sm:$0xff]  ;;  %v3444_v30 = vsel %vm346_vm0, %v971_v63, %v6592_v43  ;;  %v13804_v39 = vld [vmem:[#allocation149_spill] sm:$0xff] }
 0x38e   : > { %3801 = vmatmul.f32.gmra.mxu2 %v3509_v36  ;;  %6939 = vrot.lane.b32.xlu2 %v6938_v46, %s7532_s18  ;;  %v6672_v36 = vunpack.i.h.bf16 %v9828_v47  ;;  %v13795_v46 = vld [vmem:[#allocation193_spill] sm:$0xff]  ;;  %v13798_v47 = vld [vmem:[#allocation259_spill] sm:$0xff] }
 0x38f   : > { %6929 = vrot.lane.b32.xlu0 %v6928_v17, %s7533_s20  ;;  %v2195_v51 = vmul.f32 %v13795_v46, %v13794_v56  ;;  %v13801_v17 = vld [vmem:[#allocation240_spill] sm:$0xff]  ;;  %v13802_v46 = vld [vmem:[#allocation207_spill] sm:$0xff]  ;;  %v3421_v38 = vsel %vm346_vm0, %v948_v3, %v6536_v58 }
 0x390   : > { %6934 = vrot.lane.b32.xlu1 %v6933_v12, %s7531_s9  ;;  %v10102_v49 = vpop.permute.xlu2 %6774  ;;  %v2419_v12 = vmul.f32 %v13799_v50, %v13798_v47  ;;  %v2418_v4 = vmul.f32 %v13801_v17, %v13800_v18  ;;  %v2647_v60 = vmul.f32 %v13803_v15, %v13802_v46  ;;  %v609_v7 = vld [vmem:[%s12756_s4 + $0xa8] sm:$0xff]  ;;  %v1971_v50 = vmul.f32 %v13804_v39, %v13755_v42  ;;  %v608_v42 = vld [vmem:[%s12756_s4 + $0xa0] sm:$0xff] }
 0x391   : > { %13796 = vst [vmem:[#allocation294_spill] sm:$0xff] %v10102_v49  ;;  %v10112_v40 = vpop.permute.xlu0 %6719  ;;  %v3454_v17 = vsel %vm3451_vm3, %v3421_v38, %v6616_v59  ;;  %v3477_v47 = vsel %vm3451_vm3, %v3444_v30, %v6672_v36  ;;  %3836 = vmatpush.msra.mxu2 %v609_v7  ;;  %v6953_v18 = vpack.i.bf16 %v2196_v57, %v2195_v51  ;;  %v6596_v49 = vunpack.i.l.bf16 %v9677_v62  ;;  %v13805_v30 = vld [vmem:[#allocation20_spill] sm:$0xff]  ;;  %v13807_v57 = vld [vmem:[#allocation9_spill] sm:$0xff] }
 0x392   : > { %v10110_v20 = vpop.permute.xlu1 %6724  ;;  %v3487_v58 = vsel %vm3484_vm4, %v3454_v17, %v6697_v33  ;;  %v3510_v43 = vsel %vm3484_vm4, %v3477_v47, %v6711_v61  ;;  %v6948_v3 = vpack.i.bf16 %v1971_v50, %v1970_v1  ;;  %v6943_v63 = vpack.i.bf16 %v2419_v12, %v2418_v4  ;;  %v13806_v4 = vld [vmem:[#allocation301_spill] sm:$0xff]  ;;  %v13808_v33 = vld [vmem:[#allocation196_spill] sm:$0xff]  ;;  %v13809_v47 = vld [vmem:[#allocation162_spill] sm:$0xff] }
 0x393   : > { %v6676_v15 = vunpack.i.l.bf16 %v9987_v55  ;;  %v972_v38 = vmul.f32 %v13805_v30, %v13766_v23  ;;  %v6537_v59 = vunpack.i.h.bf16 %v13788_v24  ;;  %3837 = vmatpush.msra.mxu2 %v608_v42  ;;  %v6617_v36 = vunpack.i.h.bf16 %v9836_v8  ;;  %v13810_v8 = vld [vmem:[#allocation163_spill] sm:$0xff]  ;;  %v13812_v17 = vld [vmem:[#allocation249_spill] sm:$0xff]  ;;  %v13864_v30 = vld [vmem:[#allocation232_spill] sm:$0xff] }
 0x394   : > { %6445 = vmatmul.msk.f32.gmra.mxu3 %vm346_vm0, %v2647_v60  ;;  %v949_v51 = vmul.f32 %v13807_v57, %v13806_v4  ;;  %v2198_v61 = vmul.f32 %v13808_v33, %v9636_v28  ;;  %v6701_v1 = vunpack.i.l.bf16 %v9899_v44  ;;  %v1973_v50 = vmul.f32 %v13809_v47, %v13783_v48  ;;  %v13813_v44 = vld [vmem:[#allocation182_spill] sm:$0xff]  ;;  %v13827_v47 = vld [vmem:[#allocation220_spill] sm:$0xff] }
 0x395   : > { %3735 = vmatmul.f32.gmra.mxu1 %v3487_v58  ;;  %v3445_v24 = vsel %vm346_vm0, %v972_v38, %v6596_v49  ;;  %v1972_v12 = vmul.f32 %v13810_v8, %v13770_v29  ;;  %v13815_v49 = vld [vmem:[#allocation330_spill] sm:$0xff]  ;;  %v6716_v48 = vunpack.i.l.bf16 %v9937_v45  ;;  %v607_v29 = vld [vmem:[%s12756_s4 + $0x98] sm:$0xff]  ;;  %v2423_v39 = vmul.f32 %v13827_v47, %v8933_v10  ;;  %v10266_v47 = vpop.f32.mrf.mxu3 }
 0x396   : > { %3804 = vmatmul.f32.gmra.mxu2 %v3510_v43  ;;  %6954 = vrot.lane.b32.xlu2 %v6953_v18, %s7532_s18  ;;  %v13811_v18 = vld [vmem:[#allocation260_spill] sm:$0xff]  ;;  %v3478_v28 = vsel %vm3451_vm3, %v3445_v24, %v6676_v15  ;;  %v2197_v43 = vmul.f32 %v13813_v44, %v13758_v26  ;;  %v3422_v42 = vsel %vm346_vm0, %v949_v51, %v6537_v59  ;;  %v13816_v38 = vld [vmem:[#allocation262_spill] sm:$0xff]  ;;  %v6541_v59 = vunpack.i.l.bf16 %v9687_v0 }
 0x397   : > { %6944 = vrot.lane.b32.xlu0 %v6943_v63, %s7533_s20  ;;  %v2421_v60 = vmul.f32 %v13812_v17, %v13811_v18  ;;  %v13817_v33 = vld [vmem:[#allocation214_spill] sm:$0xff]  ;;  %v3455_v8 = vsel %vm3451_vm3, %v3422_v42, %v6617_v36  ;;  %3838 = vmatpush.msra.mxu2 %v607_v29  ;;  %v3511_v24 = vsel %vm3484_vm4, %v3478_v28, %v6716_v48  ;;  %v6597_v51 = vunpack.i.h.bf16 %v9677_v62 }
 0x398   : > { %6949 = vrot.lane.b32.xlu1 %v6948_v3, %s7531_s9  ;;  %v10145_v23 = vpop.permute.xlu2 %6789  ;;  %v13814_v3 = vld [vmem:[#allocation261_spill] sm:$0xff]  ;;  %v2420_v17 = vmul.f32 %v13817_v33, %v13816_v38  ;;  %v6968_v15 = vpack.i.bf16 %v2198_v61, %v2197_v43  ;;  %v3488_v26 = vsel %vm3484_vm4, %v3455_v8, %v6701_v1  ;;  %v6963_v44 = vpack.i.bf16 %v1973_v50, %v1972_v12  ;;  %v13818_v36 = vld [vmem:[#allocation2_spill] sm:$0xff]  ;;  %v606_v1 = vld [vmem:[%s12756_s4 + $0x90] sm:$0xff] }
 0x399   : > { %v10156_v58 = vpop.permute.xlu0 %6734  ;;  %v2648_v63 = vmul.f32 %v13815_v49, %v13814_v3  ;;  %v950_v42 = vmul.f32 %v13818_v36, %v9476_v41  ;;  %v6621_v61 = vunpack.i.l.bf16 %v9834_v53  ;;  %v6677_v43 = vunpack.i.h.bf16 %v9987_v55  ;;  %v13819_v50 = vld [vmem:[#allocation34_spill] sm:$0xff]  ;;  %v13820_v8 = vld [vmem:[#allocation195_spill] sm:$0xff]  ;;  %3839 = vmatpush.msra.mxu2 %v606_v1 }
 0x39a   : > { %v10154_v7 = vpop.permute.xlu1 %6739  ;;  %v6958_v49 = vpack.i.bf16 %v2421_v60, %v2420_v17  ;;  %v973_v62 = vmul.f32 %v13819_v50, %v13762_v9  ;;  %v2199_v12 = vmul.f32 %v13820_v8, %v13789_v52  ;;  %v6706_v41 = vunpack.i.l.bf16 %v10065_v22  ;;  %v13821_v55 = vld [vmem:[#allocation166_spill] sm:$0xff]  ;;  %v13824_v9 = vld [vmem:[#allocation185_spill] sm:$0xff]  ;;  %v13826_v8 = vld [vmem:[#allocation152_spill] sm:$0xff] }
 0x39b   : > { %v6722_v17 = vunpack.i.h.bf16 %v10112_v40  ;;  %v1975_v28 = vmul.f32 %v13821_v55, %v13814_v3  ;;  %v2200_v52 = vmul.f32 %v13824_v9, %v13806_v4  ;;  %v605_v3 = vld [vmem:[%s12756_s4 + $0x88] sm:$0xff] }
 0x39c   : > { %6446 = vmatmul.msk.f32.gmra.mxu3 %vm346_vm0, %v2648_v63  ;;  %v3446_v1 = vsel %vm346_vm0, %v973_v62, %v6597_v51  ;;  %3840 = vmatpush.msra.mxu2 %v605_v3 }
 0x39d   : > { %3738 = vmatmul.f32.gmra.mxu1 %v3488_v26  ;;  %v3479_v4 = vsel %vm3451_vm3, %v3446_v1, %v6677_v43  ;;  %v6542_v43 = vunpack.i.h.bf16 %v9687_v0  ;;  %v6731_v0 = vunpack.i.l.bf16 %v9977_v5  ;;  %v13835_v1 = vld [vmem:[#allocation258_spill] sm:$0xff] }
 0x39e   : > { %3807 = vmatmul.f32.gmra.mxu2 %v3511_v24  ;;  %6969 = vrot.lane.b32.xlu2 %v6968_v15, %s7532_s18  ;;  %v13825_v15 = vld [vmem:[#allocation304_spill] sm:$0xff]  ;;  %v3423_v24 = vsel %vm346_vm0, %v950_v42, %v6541_v59  ;;  %v6601_v59 = vunpack.i.l.bf16 %v9808_v34  ;;  %v3512_v42 = vsel %vm3484_vm4, %v3479_v4, %v6722_v17  ;;  %v6707_v17 = vunpack.i.h.bf16 %v10065_v22  ;;  %v7486_v22 = vld [vmem:[%s12756_s4 + $0x118] sm:$0xff] }
 0x39f   : > { %6959 = vrot.lane.b32.xlu0 %v6958_v49, %s7533_s20  ;;  %v13823_v49 = vld [vmem:[#allocation248_spill] sm:$0xff]  ;;  %v2649_v26 = vmul.f32 %v13825_v15, %v9206_v37  ;;  %v3456_v33 = vsel %vm3451_vm3, %v3423_v24, %v6621_v61  ;;  %v6983_v37 = vpack.i.bf16 %v2200_v52, %v2199_v12  ;;  %v13828_v61 = vld [vmem:[#allocation33_spill] sm:$0xff]  ;;  %v13829_v12 = vld [vmem:[#allocation3_spill] sm:$0xff] }
 0x3a0   : > { %6964 = vrot.lane.b32.xlu1 %v6963_v44, %s7531_s9  ;;  %v10192_v60 = vpop.permute.xlu2 %6804  ;;  %v13822_v44 = vld [vmem:[#allocation218_spill] sm:$0xff]  ;;  %v3489_v51 = vsel %vm3484_vm4, %v3456_v33, %v6706_v41  ;;  %v974_v24 = vmul.f32 %v13828_v61, %v13775_v16  ;;  %v951_v52 = vmul.f32 %v13829_v12, %v9467_v54  ;;  %v6622_v33 = vunpack.i.h.bf16 %v9834_v53  ;;  %v13830_v41 = vld [vmem:[#allocation120_spill] sm:$0xff]  ;;  %v13831_v54 = vld [vmem:[#allocation121_spill] sm:$0xff] }
 0x3a1   : > { %v2422_v63 = vmul.f32 %v13823_v49, %v13822_v44  ;;  %v10200_v29 = vpop.permute.xlu0 %6749  ;;  %v1974_v49 = vmul.f32 %v13826_v8, %v13802_v46  ;;  %v6681_v46 = vunpack.i.l.bf16 %v9985_v27  ;;  %v1738_v16 = vmul.f32 %v13830_v41, %v9893_v6  ;;  %v13859_v61 = vld [vmem:[#allocation337_spill] sm:$0xff] }
 0x3a2   : > { %v10198_v48 = vpop.permute.xlu1 %6754  ;;  %v1737_v53 = vmul.f32 %v13831_v54, %v9902_v13  ;;  %v6556_v50 = vunpack.i.l.bf16 %v13859_v61 }
 0x3a3   : > { %v6978_v62 = vpack.i.bf16 %v1975_v28, %v1974_v49  ;;  %v6973_v15 = vpack.i.bf16 %v2423_v39, %v2422_v63  ;;  %v604_v39 = vld [vmem:[%s12756_s4 + $0x80] sm:$0xff]  ;;  %v3447_v28 = vsel %vm346_vm0, %v974_v24, %v6601_v59  ;;  %v13832_v49 = vld [vmem:[#allocation219_spill] sm:$0xff]  ;;  %v13833_v63 = vld [vmem:[#allocation257_spill] sm:$0xff] }
 0x3a4   : > { %6447 = vmatmul.msk.f32.gmra.mxu3 %vm346_vm0, %v2649_v26  ;;  %3841 = vmatpush.msra.mxu2 %v604_v39  ;;  %v13834_v26 = vld [vmem:[#allocation217_spill] sm:$0xff]  ;;  %v13836_v59 = vld [vmem:[#allocation110_spill] sm:$0xff]  ;;  %v3424_v39 = vsel %vm346_vm0, %v951_v52, %v6542_v43 }
 0x3a5   : > { %3741 = vmatmul.f32.gmra.mxu1 %v3489_v51  ;;  %v2424_v3 = vmul.f32 %v13835_v1, %v13834_v26  ;;  %v3480_v51 = vsel %vm3451_vm3, %v3447_v28, %v6681_v46  ;;  %v13837_v1 = vld [vmem:[#allocation107_spill] sm:$0xff]  ;;  %v3457_v46 = vsel %vm3451_vm3, %v3424_v39, %v6622_v33  ;;  %v7487_v28 = vld [vmem:[%s12756_s4 + $0x110] sm:$0xff]  ;;  %v6546_v33 = vunpack.i.l.bf16 %v9685_v32 }
 0x3a6   : > { %3810 = vmatmul.f32.gmra.mxu2 %v3512_v42  ;;  %6984 = vrot.lane.b32.xlu2 %v6983_v37, %s7532_s18  ;;  %v1739_v42 = vmul.f32 %v13836_v59, %v9931_v19  ;;  %v3513_v59 = vsel %vm3484_vm4, %v3480_v51, %v6731_v0  ;;  %v6602_v39 = vunpack.i.h.bf16 %v9808_v34  ;;  %v13839_v0 = vld [vmem:[#allocation23_spill] sm:$0xff]  ;;  %v13841_v34 = vld [vmem:[#allocation13_spill] sm:$0xff]  ;;  %v6736_v51 = vunpack.i.l.bf16 %v10156_v58 }
 0x3a7   : > { %6974 = vrot.lane.b32.xlu0 %v6973_v15, %s7533_s20  ;;  %v2425_v15 = vmul.f32 %v13833_v63, %v13832_v49  ;;  %3951 = vmatpush.msrb.mxu2 %v7486_v22  ;;  %v1736_v63 = vmul.f32 %v13837_v1, %v9858_v35  ;;  %v13855_v1 = vld [vmem:[#allocation311_spill] sm:$0xff] }
 0x3a8   : > { %6979 = vrot.lane.b32.xlu1 %v6978_v62, %s7531_s9  ;;  %v2650_v62 = vmul.f32 %v9646_v31, %v9203_v14  ;;  %v10257_v24 = vpop.permute.xlu2 %6819  ;;  %v6998_v22 = vpack.i.bf16 %v1739_v42, %v1738_v16  ;;  %v3490_v14 = vsel %vm3484_vm4, %v3457_v46, %v6707_v17  ;;  %v7488_v16 = vld [vmem:[%s12756_s4 + $0x108] sm:$0xff]  ;;  %v13838_v42 = vld [vmem:[#allocation285_spill] sm:$0xff]  ;;  %v6682_v17 = vunpack.i.h.bf16 %v9985_v27 }
 0x3a9   : > { %v10247_v37 = vpop.permute.xlu0 %6764  ;;  %3952 = vmatpush.msrb.mxu2 %v7487_v28  ;;  %v6993_v43 = vpack.i.bf16 %v1737_v53, %v1736_v63  ;;  %v6988_v52 = vpack.i.bf16 %v2425_v15, %v2424_v3  ;;  %v975_v53 = vmul.f32 %v13839_v0, %v13781_v11  ;;  %v13840_v63 = vld [vmem:[#allocation308_spill] sm:$0xff]  ;;  %v6712_v3 = vunpack.i.h.bf16 %v10063_v25  ;;  %v13842_v27 = vld [vmem:[#allocation123_spill] sm:$0xff] }
 0x3aa   : > { %v10245_v4 = vpop.permute.xlu1 %6769  ;;  %v952_v15 = vmul.f32 %v13841_v34, %v13840_v63  ;;  %v1741_v46 = vmul.f32 %v13842_v27, %v9969_v21  ;;  %v13843_v28 = vld [vmem:[#allocation292_spill] sm:$0xff] }
 0x3ab   : > { %3953 = vmatpush.msrb.mxu2 %v7488_v16  ;;  %v3448_v25 = vsel %vm346_vm0, %v975_v53, %v6602_v39  ;;  %v13846_v39 = vld [vmem:[#allocation273_spill] sm:$0xff] }
 0x3ac   : > { %6448 = vmatmul.msk.f32.gmra.mxu3 %vm346_vm0, %v2650_v62  ;;  %v6626_v62 = vunpack.i.l.bf16 %v13838_v42  ;;  %v3481_v63 = vsel %vm3451_vm3, %v3448_v25, %v6682_v17  ;;  %v6686_v53 = vunpack.i.l.bf16 %v13846_v39 }
 0x3ad   : > { %3744 = vmatmul.f32.gmra.mxu1 %v3490_v14  ;;  %v3514_v21 = vsel %vm3484_vm4, %v3481_v63, %v6736_v51  ;;  %v6717_v51 = vunpack.i.h.bf16 %v9937_v45  ;;  %v13850_v45 = vld [vmem:[#allocation320_spill] sm:$0xff] }
 0x3ae   : > { %3813 = vmatmul.f32.gmra.mxu2 %v3513_v59  ;;  %6999 = vrot.lane.b32.xlu2 %v6998_v22, %s7533_s20  ;;  %v7489_v59 = vld [vmem:[%s12756_s4 + $0x100] sm:$0xff]  ;;  %v13844_v22 = vld [vmem:[#allocation124_spill] sm:$0xff] }
 0x3af   : > { %6989 = vrot.lane.b32.xlu0 %v6988_v52, %s7533_s20  ;;  %3954 = vmatpush.msrb.mxu2 %v7489_v59  ;;  %v1740_v14 = vmul.f32 %v13844_v22, %v13843_v28  ;;  %v3425_v52 = vsel %vm346_vm0, %v952_v15, %v6546_v33  ;;  %v6547_v28 = vunpack.i.h.bf16 %v9685_v32  ;;  %v13845_v22 = vld [vmem:[#allocation276_spill] sm:$0xff]  ;;  %v6627_v33 = vunpack.i.h.bf16 %v13838_v42  ;;  %v13848_v15 = vld [vmem:[#allocation314_spill] sm:$0xff] }
 0x3b0   : > { %6994 = vrot.lane.b32.xlu1 %v6993_v43, %s7533_s20  ;;  %v3458_v16 = vsel %vm3451_vm3, %v3425_v52, %v6626_v62  ;;  %v10302_v54 = vpop.permute.xlu2 %6834  ;;  %v6606_v41 = vunpack.i.l.bf16 %v13845_v22  ;;  %v13847_v62 = vld [vmem:[#allocation37_spill] sm:$0xff] }
 0x3b1   : > { %v10296_v11 = vpop.permute.xlu0 %6779  ;;  %v3491_v59 = vsel %vm3484_vm4, %v3458_v16, %v6712_v3  ;;  %v7003_v27 = vpack.i.bf16 %v1741_v46, %v1740_v14  ;;  %v976_v17 = vmul.f32 %v13847_v62, %v13794_v56  ;;  %v13849_v3 = vld [vmem:[#allocation12_spill] sm:$0xff]  ;;  %v6742_v46 = vunpack.i.h.bf16 %v10154_v7  ;;  %v13851_v62 = vld [vmem:[#allocation287_spill] sm:$0xff] }
 0x3b2   : > { %v10294_v43 = vpop.permute.xlu1 %6784  ;;  %v953_v52 = vmul.f32 %v13849_v3, %v13848_v15 }
 0x3b3   : > { %v3449_v25 = vsel %vm346_vm0, %v976_v17, %v6606_v41  ;;  %v6687_v41 = vunpack.i.h.bf16 %v13846_v39 }
 0x3b4   : > { %v3426_v42 = vsel %vm346_vm0, %v953_v52, %v6547_v28  ;;  %v3482_v16 = vsel %vm3451_vm3, %v3449_v25, %v6686_v53  ;;  %v6631_v28 = vunpack.i.l.bf16 %v13851_v62  ;;  %v13853_v53 = vld [vmem:[#allocation315_spill] sm:$0xff]  ;;  %v13854_v52 = vld [vmem:[#allocation4_spill] sm:$0xff] }
 0x3b5   : > { %3747 = vmatmul.f32.gmra.mxu1 %v3491_v59  ;;  %v3515_v63 = vsel %vm3484_vm4, %v3482_v16, %v6742_v46  ;;  %v6551_v59 = vunpack.i.l.bf16 %v13850_v45  ;;  %v6721_v46 = vunpack.i.l.bf16 %v10112_v40 }
 0x3b6   : > { %3816 = vmatmul.f32.gmra.mxu2 %v3514_v21  ;;  %v6607_v21 = vunpack.i.h.bf16 %v13845_v22 }
 0x3b7   : > { %7004 = vrot.lane.b32.xlu0 %v7003_v27, %s7533_s20  ;;  %v3459_v27 = vsel %vm3451_vm3, %v3426_v42, %v6627_v33  ;;  %v13852_v33 = vld [vmem:[#allocation36_spill] sm:$0xff]  ;;  %v6751_v42 = vunpack.i.l.bf16 %v10200_v29 }
 0x3b8   : > { %v3492_v56 = vsel %vm3484_vm4, %v3459_v27, %v6717_v51  ;;  %v10329_v15 = vpop.permute.xlu2 %6849  ;;  %v977_v17 = vmul.f32 %v13852_v33, %v13792_v2  ;;  %v954_v51 = vmul.f32 %v13854_v52, %v13853_v53  ;;  %v6756_v2 = vunpack.i.l.bf16 %v10198_v48  ;;  %v13889_v52 = vld [vmem:[#allocation253_spill] sm:$0xff] }
 0x3b9   : > { %v10319_v32 = vpop.permute.xlu0 %6794  ;;  %v6552_v53 = vunpack.i.h.bf16 %v13850_v45  ;;  %v6632_v33 = vunpack.i.h.bf16 %v13851_v62 }
 0x3ba   : > { %v10317_v14 = vpop.permute.xlu1 %6799  ;;  %v3427_v22 = vsel %vm346_vm0, %v954_v51, %v6551_v59  ;;  %v3450_v16 = vsel %vm346_vm0, %v977_v17, %v6607_v21  ;;  %v13856_v59 = vld [vmem:[#allocation16_spill] sm:$0xff]  ;;  %v6726_v21 = vunpack.i.l.bf16 %v10110_v20  ;;  %v3517_v17 = vsel %vm346_vm0, %v13834_v26, %v6756_v2 }
 0x3bb   : > { %v3460_v39 = vsel %vm3451_vm3, %v3427_v22, %v6631_v28  ;;  %v955_v51 = vmul.f32 %v13856_v59, %v13855_v1  ;;  %v6766_v28 = vunpack.i.l.bf16 %v10247_v37  ;;  %v6837_v1 = vunpack.i.h.bf16 %v10302_v54 }
 0x3bd   : > { %3750 = vmatmul.f32.gmra.mxu1 %v3492_v56  ;;  %v3483_v56 = vsel %vm3451_vm3, %v3450_v16, %v6687_v41  ;;  %v3428_v45 = vsel %vm346_vm0, %v955_v51, %v6552_v53  ;;  %v13860_v51 = vld [vmem:[#allocation284_spill] sm:$0xff] }
 0x3be   : > { %3819 = vmatmul.f32.gmra.mxu2 %v3515_v63  ;;  %v3493_v63 = vsel %vm3484_vm4, %v3460_v39, %v6721_v46  ;;  %v3516_v40 = vsel %vm3484_vm4, %v3483_v56, %v6751_v42  ;;  %v13857_v46 = vld [vmem:[#allocation303_spill] sm:$0xff]  ;;  %v3461_v39 = vsel %vm3451_vm3, %v3428_v45, %v6632_v33  ;;  %v6636_v33 = vunpack.i.l.bf16 %v13860_v51  ;;  %v13861_v45 = vld [vmem:[#allocation324_spill] sm:$0xff] }
 0x3bf   : > { %v6761_v42 = vunpack.i.l.bf16 %v13857_v46  ;;  %v3494_v26 = vsel %vm3484_vm4, %v3461_v39, %v6726_v21  ;;  %v6767_v21 = vunpack.i.h.bf16 %v10247_v37  ;;  %v6852_v37 = vunpack.i.h.bf16 %v10329_v15 }
 0x3c0   : > { %v10356_v41 = vpop.permute.xlu2 %6864 }
 0x3c1   : > { %v10341_v27 = vpop.permute.xlu0 %6809  ;;  %v3549_v56 = vsel %vm3451_vm3, %v3517_v17, %v6761_v42  ;;  %v13862_v17 = vld [vmem:[#allocation15_spill] sm:$0xff] }
 0x3c2   : > { %v10339_v25 = vpop.permute.xlu1 %6814  ;;  %v3581_v2 = vsel %vm3484_vm4, %v3549_v56, %v6766_v28  ;;  %v956_v42 = vmul.f32 %v13862_v17, %v13861_v45  ;;  %v6851_v45 = vunpack.i.l.bf16 %v10329_v15  ;;  %v13872_v17 = vld [vmem:[#allocation340_spill] sm:$0xff] }
 0x3c3   : > { %v6641_v59 = vunpack.i.l.bf16 %v13872_v17 }
 0x3c5   : > { %3753 = vmatmul.f32.gmra.mxu1 %v3493_v63  ;;  %v6757_v63 = vunpack.i.h.bf16 %v10198_v48  ;;  %v6727_v48 = vunpack.i.h.bf16 %v10110_v20 }
 0x3c6   : > { %3822 = vmatmul.f32.gmra.mxu2 %v3516_v40  ;;  %v13858_v40 = vld [vmem:[#allocation236_spill] sm:$0xff] }
 0x3c7   : > { %v3518_v28 = vsel %vm346_vm0, %v13832_v49, %v6757_v63  ;;  %v6771_v63 = vunpack.i.l.bf16 %v10245_v4 }
 0x3c9   : > { %v10363_v16 = vpop.permute.xlu0 %6824 }
 0x3ca   : > { %v10361_v22 = vpop.permute.xlu1 %6829 }
 0x3cb   : > { %v6832_v62 = vunpack.i.h.bf16 %v10361_v22 }
 0x3cd   : > { %v3528_v0 = vsel %vm346_vm0, %v13858_v40, %v6832_v62  ;;  %3756 = vmatmul.f32.gmra.mxu1 %v3494_v26  ;;  %v6762_v62 = vunpack.i.h.bf16 %v13857_v46  ;;  %v10391_v26 = vpop.permute.xlu2 %6879 }
 0x3ce   : > { %3842 = vmatmul.f32.vlgmr.msra.gmra.mxu2 %v3581_v2  ;;  %v10377_v53 = vsel %vm3451_vm3, %v3528_v0, %v6837_v1  ;;  %v3429_v0 = vsel %vm346_vm0, %v956_v42, %v6556_v50  ;;  %v6557_v1 = vunpack.i.h.bf16 %v13859_v61  ;;  %v13863_v42 = vld [vmem:[#allocation237_spill] sm:$0xff] }
 0x3cf   : > { %v3462_v20 = vsel %vm3451_vm3, %v3429_v0, %v6636_v33  ;;  %v3550_v46 = vsel %vm3451_vm3, %v3518_v28, %v6762_v62  ;;  %v6637_v33 = vunpack.i.h.bf16 %v13860_v51  ;;  %v13865_v28 = vld [vmem:[#allocation319_spill] sm:$0xff]  ;;  %v13866_v62 = vld [vmem:[#allocation5_spill] sm:$0xff]  ;;  %v13868_v51 = vld [vmem:[#allocation336_spill] sm:$0xff] }
 0x3d0   : > { %v3495_v49 = vsel %vm3484_vm4, %v3462_v20, %v6727_v48  ;;  %v3582_v50 = vsel %vm3484_vm4, %v3550_v46, %v6767_v21  ;;  %v957_v0 = vmul.f32 %v13866_v62, %v13865_v28  ;;  %v6732_v21 = vunpack.i.h.bf16 %v9977_v5  ;;  %v13867_v46 = vld [vmem:[#allocation224_spill] sm:$0xff] }
 0x3d1   : > { %v10387_v56 = vpop.permute.xlu0 %6839  ;;  %v6781_v20 = vunpack.i.l.bf16 %v10296_v11 }
 0x3d2   : > { %v6845_v39 = vpop.permute.xlu1 %6844 }
 0x3d3   : > { %v6847_v2 = vunpack.i.h.bf16 %v6845_v39  ;;  %v6846_v40 = vunpack.i.l.bf16 %v6845_v39 }
 0x3d5   : > { %v3529_v61 = vsel %vm346_vm0, %v13863_v42, %v6846_v40  ;;  %v3530_v39 = vsel %vm346_vm0, %v13864_v30, %v6847_v2  ;;  %3759 = vmatmul.f32.gmra.mxu1 %v3495_v49  ;;  %v3430_v40 = vsel %vm346_vm0, %v957_v0, %v6557_v1  ;;  %v3519_v30 = vsel %vm346_vm0, %v13867_v46, %v6771_v63  ;;  %v13869_v49 = vld [vmem:[#allocation294_spill] sm:$0xff]  ;;  %v10427_v3 = vpop.permute.xlu2 %6894 }
 0x3d6   : > { %3845 = vmatmul.f32.gmra.mxu2 %v3582_v50  ;;  %v10406_v15 = vsel %vm3451_vm3, %v3529_v61, %v6851_v45  ;;  %v3562_v48 = vsel %vm3451_vm3, %v3530_v39, %v6852_v37  ;;  %v6561_v2 = vunpack.i.l.bf16 %v13868_v51  ;;  %v6776_v50 = vunpack.i.l.bf16 %v13869_v49 }
 0x3d7   : > { %v3463_v37 = vsel %vm3451_vm3, %v3430_v40, %v6637_v33  ;;  %v6772_v61 = vunpack.i.h.bf16 %v10245_v4  ;;  %v6867_v1 = vunpack.i.h.bf16 %v10356_v41  ;;  %v6866_v0 = vunpack.i.l.bf16 %v10356_v41  ;;  %v13870_v4 = vld [vmem:[#allocation245_spill] sm:$0xff] }
 0x3d8   : > { %v3496_v63 = vsel %vm3484_vm4, %v3463_v37, %v6732_v21  ;;  %v3551_v46 = vsel %vm3451_vm3, %v3519_v30, %v6776_v50  ;;  %v13873_v30 = vld [vmem:[#allocation318_spill] sm:$0xff]  ;;  %v13874_v50 = vld [vmem:[#allocation19_spill] sm:$0xff]  ;;  %v13875_v37 = vld [vmem:[#allocation225_spill] sm:$0xff] }
 0x3d9   : > { %v10418_v42 = vpop.permute.xlu0 %6854  ;;  %v3583_v34 = vsel %vm3484_vm4, %v3551_v46, %v6781_v20  ;;  %v958_v20 = vmul.f32 %v13874_v50, %v13873_v30 }
 0x3da   : > { %v6860_v45 = vpop.permute.xlu1 %6859  ;;  %v6857_v28 = vunpack.i.h.bf16 %v10418_v42 }
 0x3db   : > { %v6862_v39 = vunpack.i.h.bf16 %v6860_v45  ;;  %v6861_v5 = vunpack.i.l.bf16 %v6860_v45  ;;  %v13871_v45 = vld [vmem:[#allocation242_spill] sm:$0xff]  ;;  %v3431_v46 = vsel %vm346_vm0, %v958_v20, %v6561_v2 }
 0x3dc   : > { %v10431_v33 = vsel %vm3484_vm4, %v3562_v48, %v6857_v28  ;;  %v3520_v48 = vsel %vm346_vm0, %v13875_v37, %v6772_v61  ;;  %v6777_v28 = vunpack.i.h.bf16 %v13869_v49 }
 0x3dd   : > { %v3531_v40 = vsel %vm346_vm0, %v13870_v4, %v6861_v5  ;;  %v3532_v62 = vsel %vm346_vm0, %v13871_v45, %v6862_v39  ;;  %3762 = vmatmul.f32.gmra.mxu1 %v3496_v63  ;;  %v6737_v5 = vunpack.i.h.bf16 %v10156_v58  ;;  %v6782_v39 = vunpack.i.h.bf16 %v10296_v11 }
 0x3de   : > { %3848 = vmatmul.f32.gmra.mxu2 %v3583_v34  ;;  %v3563_v41 = vsel %vm3451_vm3, %v3531_v40, %v6866_v0  ;;  %v3564_v21 = vsel %vm3451_vm3, %v3532_v62, %v6867_v1  ;;  %v6562_v34 = vunpack.i.h.bf16 %v13868_v51  ;;  %v6786_v0 = vunpack.i.l.bf16 %v10294_v43 }
 0x3df   : > { %v3464_v1 = vsel %vm3451_vm3, %v3431_v46, %v6641_v59  ;;  %v3552_v4 = vsel %vm3451_vm3, %v3520_v48, %v6777_v28  ;;  %v6882_v58 = vunpack.i.h.bf16 %v10391_v26  ;;  %v6881_v11 = vunpack.i.l.bf16 %v10391_v26  ;;  %v13876_v59 = vld [vmem:[#allocation246_spill] sm:$0xff]  ;;  %v13877_v48 = vld [vmem:[#allocation243_spill] sm:$0xff] }
 0x3e0   : > { %v3497_v2 = vsel %vm3484_vm4, %v3464_v1, %v6737_v5  ;;  %v3584_v51 = vsel %vm3484_vm4, %v3552_v4, %v6782_v39  ;;  %v6642_v46 = vunpack.i.h.bf16 %v13872_v17  ;;  %v13878_v39 = vld [vmem:[#allocation321_spill] sm:$0xff]  ;;  %v6741_v4 = vunpack.i.l.bf16 %v10154_v7 }
 0x3e1   : > { %v6870_v62 = vpop.permute.xlu0 %6869 }
 0x3e2   : > { %v6875_v63 = vpop.permute.xlu1 %6874  ;;  %v6872_v45 = vunpack.i.h.bf16 %v6870_v62  ;;  %v6871_v49 = vunpack.i.l.bf16 %v6870_v62  ;;  %v6910_v62 = vpop.permute.xlu2 %6909 }
 0x3e3   : > { %v6877_v40 = vunpack.i.h.bf16 %v6875_v63  ;;  %v6876_v61 = vunpack.i.l.bf16 %v6875_v63  ;;  %v6911_v50 = vunpack.i.l.bf16 %v6910_v62 }
 0x3e4   : > { %v10457_v30 = vsel %vm3484_vm4, %v3563_v41, %v6871_v49  ;;  %v10460_v20 = vsel %vm3484_vm4, %v3564_v21, %v6872_v45  ;;  %v13879_v41 = vld [vmem:[#allocation18_spill] sm:$0xff]  ;;  %v13880_v21 = vld [vmem:[#allocation229_spill] sm:$0xff]  ;;  %v13881_v45 = vld [vmem:[#allocation328_spill] sm:$0xff] }
 0x3e5   : > { %v3533_v37 = vsel %vm346_vm0, %v13876_v59, %v6876_v61  ;;  %v3534_v28 = vsel %vm346_vm0, %v13877_v48, %v6877_v40  ;;  %3765 = vmatmul.f32.gmra.mxu1 %v3497_v2  ;;  %v959_v63 = vmul.f32 %v13879_v41, %v13878_v39  ;;  %v3521_v1 = vsel %vm346_vm0, %v13880_v21, %v6786_v0 }
 0x3e6   : > { %3851 = vmatmul.f32.gmra.mxu2 %v3584_v51  ;;  %v3565_v26 = vsel %vm3451_vm3, %v3533_v37, %v6881_v11  ;;  %v3566_v5 = vsel %vm3451_vm3, %v3534_v28, %v6882_v58  ;;  %v6791_v61 = vunpack.i.l.bf16 %v10145_v23  ;;  %v6796_v40 = vunpack.i.l.bf16 %v10319_v32 }
 0x3e7   : > { %v3432_v17 = vsel %vm346_vm0, %v959_v63, %v6562_v34  ;;  %v6566_v49 = vunpack.i.l.bf16 %v13881_v45  ;;  %v6787_v11 = vunpack.i.h.bf16 %v10294_v43  ;;  %v6897_v28 = vunpack.i.h.bf16 %v10427_v3 }
 0x3e8   : > { %v3465_v51 = vsel %vm3451_vm3, %v3432_v17, %v6642_v46  ;;  %v3553_v59 = vsel %vm3451_vm3, %v3521_v1, %v6791_v61  ;;  %v6896_v39 = vunpack.i.l.bf16 %v10427_v3  ;;  %v13882_v46 = vld [vmem:[#allocation244_spill] sm:$0xff]  ;;  %v13883_v61 = vld [vmem:[#allocation241_spill] sm:$0xff] }
 0x3e9   : > { %v6885_v2 = vpop.permute.xlu0 %6884  ;;  %v3498_v34 = vsel %vm3484_vm4, %v3465_v51, %v6741_v4  ;;  %v3585_v63 = vsel %vm3484_vm4, %v3553_v59, %v6796_v40  ;;  %v13885_v40 = vld [vmem:[#allocation333_spill] sm:$0xff]  ;;  %v13887_v59 = vld [vmem:[#allocation226_spill] sm:$0xff] }
 0x3ea   : > { %v6890_v58 = vpop.permute.xlu1 %6889  ;;  %v6887_v48 = vunpack.i.h.bf16 %v6885_v2  ;;  %v6886_v7 = vunpack.i.l.bf16 %v6885_v2 }
 0x3eb   : > { %v6892_v37 = vunpack.i.h.bf16 %v6890_v58  ;;  %v6891_v0 = vunpack.i.l.bf16 %v6890_v58  ;;  %v13884_v58 = vld [vmem:[#allocation342_spill] sm:$0xff] }
 0x3ec   : > { %v10486_v43 = vsel %vm3484_vm4, %v3565_v26, %v6886_v7  ;;  %v10489_v21 = vsel %vm3484_vm4, %v3566_v5, %v6887_v48  ;;  %v6646_v2 = vunpack.i.l.bf16 %v13884_v58  ;;  %v13886_v26 = vld [vmem:[#allocation8_spill] sm:$0xff]  ;;  %v3522_v5 = vsel %vm346_vm0, %v13887_v59, %v6787_v11 }
 0x3ed   : > { %v3535_v1 = vsel %vm346_vm0, %v13882_v46, %v6891_v0  ;;  %v3536_v17 = vsel %vm346_vm0, %v13883_v61, %v6892_v37  ;;  %3768 = vmatmul.f32.gmra.mxu1 %v3498_v34  ;;  %v960_v51 = vmul.f32 %v13886_v26, %v13885_v40  ;;  %v13888_v48 = vld [vmem:[#allocation296_spill] sm:$0xff]  ;;  %v6792_v0 = vunpack.i.h.bf16 %v10145_v23  ;;  %v6925_v46 = vpop.permute.xlu2 %6924 }
 0x3ee   : > { %3854 = vmatmul.f32.gmra.mxu2 %v3585_v63  ;;  %v3567_v3 = vsel %vm3451_vm3, %v3535_v1, %v6896_v39  ;;  %v3568_v4 = vsel %vm3451_vm3, %v3536_v17, %v6897_v28  ;;  %v6746_v7 = vunpack.i.l.bf16 %v13888_v48  ;;  %v6797_v37 = vunpack.i.h.bf16 %v10319_v32 }
 0x3ef   : > { %v3433_v34 = vsel %vm346_vm0, %v960_v51, %v6566_v49  ;;  %v6567_v63 = vunpack.i.h.bf16 %v13881_v45  ;;  %v6801_v39 = vunpack.i.l.bf16 %v10317_v14  ;;  %v3554_v17 = vsel %vm3451_vm3, %v3522_v5, %v6792_v0  ;;  %v13890_v5 = vld [vmem:[#allocation251_spill] sm:$0xff] }
 0x3f0   : > { %v3466_v61 = vsel %vm3451_vm3, %v3433_v34, %v6646_v2  ;;  %v6912_v23 = vunpack.i.h.bf16 %v6910_v62  ;;  %v3586_v49 = vsel %vm3484_vm4, %v3554_v17, %v6797_v37  ;;  %v6647_v34 = vunpack.i.h.bf16 %v13884_v58  ;;  %v13891_v37 = vld [vmem:[#allocation332_spill] sm:$0xff]  ;;  %v13894_v17 = vld [vmem:[#allocation339_spill] sm:$0xff] }
 0x3f1   : > { %v6900_v1 = vpop.permute.xlu0 %6899  ;;  %v3499_v32 = vsel %vm3484_vm4, %v3466_v61, %v6746_v7  ;;  %v6811_v61 = vunpack.i.l.bf16 %v10341_v27 }
 0x3f2   : > { %v6905_v28 = vpop.permute.xlu1 %6904  ;;  %v6902_v59 = vunpack.i.h.bf16 %v6900_v1  ;;  %v6901_v41 = vunpack.i.l.bf16 %v6900_v1  ;;  %v6747_v1 = vunpack.i.h.bf16 %v13888_v48 }
 0x3f3   : > { %v6907_v11 = vunpack.i.h.bf16 %v6905_v28  ;;  %v6906_v40 = vunpack.i.l.bf16 %v6905_v28  ;;  %v13893_v28 = vld [vmem:[#allocation223_spill] sm:$0xff] }
 0x3f4   : > { %v10513_v45 = vsel %vm3484_vm4, %v3567_v3, %v6901_v41  ;;  %v10516_v51 = vsel %vm3484_vm4, %v3568_v4, %v6902_v59  ;;  %v13892_v41 = vld [vmem:[#allocation22_spill] sm:$0xff]  ;;  %v3523_v4 = vsel %vm346_vm0, %v13893_v28, %v6801_v39 }
 0x3f5   : > { %v3537_v2 = vsel %vm346_vm0, %v13889_v52, %v6906_v40  ;;  %v3538_v0 = vsel %vm346_vm0, %v13890_v5, %v6907_v11  ;;  %3771 = vmatmul.f32.gmra.mxu1 %v3499_v32  ;;  %v961_v3 = vmul.f32 %v13892_v41, %v13891_v37  ;;  %v6806_v52 = vunpack.i.l.bf16 %v10192_v60 }
 0x3f6   : > { %3857 = vmatmul.f32.gmra.mxu2 %v3586_v49  ;;  %v3569_v62 = vsel %vm3451_vm3, %v3537_v2, %v6911_v50  ;;  %v3570_v7 = vsel %vm3451_vm3, %v3538_v0, %v6912_v23  ;;  %v6571_v11 = vunpack.i.l.bf16 %v13894_v17  ;;  %v6802_v50 = vunpack.i.h.bf16 %v10317_v14  ;;  %v6940_v49 = vpop.permute.xlu2 %6939 }
 0x3f7   : > { %v3434_v58 = vsel %vm346_vm0, %v961_v3, %v6567_v63  ;;  %v3555_v32 = vsel %vm3451_vm3, %v3523_v4, %v6806_v52  ;;  %v6927_v0 = vunpack.i.h.bf16 %v6925_v46  ;;  %v6926_v37 = vunpack.i.l.bf16 %v6925_v46  ;;  %v13896_v52 = vld [vmem:[#allocation252_spill] sm:$0xff] }
 0x3f8   : > { %v3467_v23 = vsel %vm3451_vm3, %v3434_v58, %v6647_v34  ;;  %v3587_v63 = vsel %vm3484_vm4, %v3555_v32, %v6811_v61  ;;  %v13895_v34 = vld [vmem:[#allocation254_spill] sm:$0xff]  ;;  %v13898_v61 = vld [vmem:[#allocation329_spill] sm:$0xff]  ;;  %v13900_v32 = vld [vmem:[#allocation227_spill] sm:$0xff] }
 0x3f9   : > { %v6915_v59 = vpop.permute.xlu0 %6914  ;;  %v3500_v28 = vsel %vm3484_vm4, %v3467_v23, %v6747_v1 }
 0x3fa   : > { %v6920_v40 = vpop.permute.xlu1 %6919  ;;  %v6917_v48 = vunpack.i.h.bf16 %v6915_v59  ;;  %v6916_v5 = vunpack.i.l.bf16 %v6915_v59 }
 0x3fb   : > { %v6922_v39 = vunpack.i.h.bf16 %v6920_v40  ;;  %v6921_v2 = vunpack.i.l.bf16 %v6920_v40  ;;  %v13897_v40 = vld [vmem:[#allocation293_spill] sm:$0xff] }
 0x3fc   : > { %v10540_v3 = vsel %vm3484_vm4, %v3569_v62, %v6916_v5  ;;  %v10543_v14 = vsel %vm3484_vm4, %v3570_v7, %v6917_v48  ;;  %v6651_v59 = vunpack.i.l.bf16 %v13897_v40  ;;  %v13899_v62 = vld [vmem:[#allocation21_spill] sm:$0xff]  ;;  %v3524_v7 = vsel %vm346_vm0, %v13900_v32, %v6802_v50 }
 0x3fd   : > { %v3539_v4 = vsel %vm346_vm0, %v13895_v34, %v6921_v2  ;;  %v3540_v58 = vsel %vm346_vm0, %v13896_v52, %v6922_v39  ;;  %3774 = vmatmul.f32.gmra.mxu1 %v3500_v28  ;;  %v962_v23 = vmul.f32 %v13899_v62, %v13898_v61  ;;  %v6807_v48 = vunpack.i.h.bf16 %v10192_v60 }
 0x3fe   : > { %3860 = vmatmul.f32.gmra.mxu2 %v3587_v63  ;;  %v3571_v46 = vsel %vm3451_vm3, %v3539_v4, %v6926_v37  ;;  %v3572_v1 = vsel %vm3451_vm3, %v3540_v58, %v6927_v0  ;;  %v6752_v2 = vunpack.i.h.bf16 %v10200_v29  ;;  %v6812_v39 = vunpack.i.h.bf16 %v10341_v27  ;;  %v6955_v32 = vpop.permute.xlu2 %6954 }
 0x3ff   : > { %v3435_v5 = vsel %vm346_vm0, %v962_v23, %v6571_v11  ;;  %v6816_v28 = vunpack.i.l.bf16 %v10339_v25  ;;  %v3556_v34 = vsel %vm3451_vm3, %v3524_v7, %v6807_v48  ;;  %v6942_v61 = vunpack.i.h.bf16 %v6940_v49  ;;  %v13902_v48 = vld [vmem:[#allocation255_spill] sm:$0xff] }
 0x400   : > { %v3468_v0 = vsel %vm3451_vm3, %v3435_v5, %v6651_v59  ;;  %v6941_v60 = vunpack.i.l.bf16 %v6940_v49  ;;  %v3588_v27 = vsel %vm3484_vm4, %v3556_v34, %v6812_v39  ;;  %v13901_v59 = vld [vmem:[#allocation250_spill] sm:$0xff] }
 0x401   : > { %v6930_v37 = vpop.permute.xlu0 %6929  ;;  %v3501_v29 = vsel %vm3484_vm4, %v3468_v0, %v6752_v2  ;;  %v13903_v39 = vld [vmem:[#allocation234_spill] sm:$0xff]  ;;  %v6817_v0 = vunpack.i.h.bf16 %v10339_v25 }
 0x402   : > { %v6935_v63 = vpop.permute.xlu1 %6934  ;;  %v6932_v58 = vunpack.i.h.bf16 %v6930_v37  ;;  %v6931_v50 = vunpack.i.l.bf16 %v6930_v37 }
 0x403   : > { %v6937_v4 = vunpack.i.h.bf16 %v6935_v63  ;;  %v6936_v52 = vunpack.i.l.bf16 %v6935_v63  ;;  %v3525_v63 = vsel %vm346_vm0, %v13903_v39, %v6816_v28 }
 0x404   : > { %v10566_v11 = vsel %vm3484_vm4, %v3571_v46, %v6931_v50  ;;  %v10569_v23 = vsel %vm3484_vm4, %v3572_v1, %v6932_v58  ;;  %v6821_v46 = vunpack.i.l.bf16 %v10257_v24  ;;  %v6826_v1 = vunpack.i.l.bf16 %v10363_v16 }
 0x405   : > { %v3541_v7 = vsel %vm346_vm0, %v13901_v59, %v6936_v52  ;;  %v3542_v5 = vsel %vm346_vm0, %v13902_v48, %v6937_v4  ;;  %3777 = vmatmul.f32.gmra.mxu1 %v3501_v29  ;;  %v13904_v48 = vld [vmem:[#allocation203_spill] sm:$0xff] }
 0x406   : > { %3863 = vmatmul.f32.gmra.mxu2 %v3588_v27  ;;  %v3573_v49 = vsel %vm3451_vm3, %v3541_v7, %v6941_v60  ;;  %v3574_v2 = vsel %vm3451_vm3, %v3542_v5, %v6942_v61  ;;  %v3557_v4 = vsel %vm3451_vm3, %v3525_v63, %v6821_v46  ;;  %v6957_v61 = vunpack.i.h.bf16 %v6955_v32  ;;  %v13905_v5 = vld [vmem:[#allocation259_spill] sm:$0xff] }
 0x407   : > { %v6956_v27 = vunpack.i.l.bf16 %v6955_v32  ;;  %v3589_v28 = vsel %vm3484_vm4, %v3557_v4, %v6826_v1  ;;  %v6970_v32 = vpop.permute.xlu2 %6969  ;;  %v6831_v4 = vunpack.i.l.bf16 %v10361_v22 }
 0x409   : > { %v10581_v37 = vpop.f32.mrf.mxu2  ;;  %v6945_v52 = vpop.permute.xlu0 %6944 }
 0x40a   : > { %v6950_v34 = vpop.permute.xlu1 %6949  ;;  %v6947_v60 = vunpack.i.h.bf16 %v6945_v52  ;;  %v6946_v29 = vunpack.i.l.bf16 %v6945_v52 }
 0x40b   : > { %v6952_v58 = vunpack.i.h.bf16 %v6950_v34  ;;  %v6951_v50 = vunpack.i.l.bf16 %v6950_v34  ;;  %v13906_v34 = vld [vmem:[#allocation233_spill] sm:$0xff] }
 0x40c   : > { %v10587_v59 = vsel %vm3484_vm4, %v3573_v49, %v6946_v29  ;;  %v10590_v7 = vsel %vm3484_vm4, %v3574_v2, %v6947_v60  ;;  %v3526_v1 = vsel %vm346_vm0, %v13906_v34, %v6817_v0  ;;  %v6822_v49 = vunpack.i.h.bf16 %v10257_v24 }
 0x40d   : > { %v3543_v25 = vsel %vm346_vm0, %v13904_v48, %v6951_v50  ;;  %v3544_v39 = vsel %vm346_vm0, %v13905_v5, %v6952_v58  ;;  %v6827_v2 = vunpack.i.h.bf16 %v10363_v16  ;;  %v6972_v48 = vunpack.i.h.bf16 %v6970_v32 }
 0x40e   : > { %3866 = vmatmul.f32.gmra.mxu2 %v3589_v28  ;;  %v3575_v63 = vsel %vm3451_vm3, %v3543_v25, %v6956_v27  ;;  %v3576_v46 = vsel %vm3451_vm3, %v3544_v39, %v6957_v61  ;;  %v3558_v58 = vsel %vm3451_vm3, %v3526_v1, %v6822_v49  ;;  %v6971_v25 = vunpack.i.l.bf16 %v6970_v32  ;;  %v13907_v32 = vld [vmem:[#allocation235_spill] sm:$0xff] }
 0x40f   : > { %v3590_v0 = vsel %vm3484_vm4, %v3558_v58, %v6827_v2  ;;  %v3527_v1 = vsel %vm346_vm0, %v13907_v32, %v6831_v4  ;;  %v6841_v49 = vunpack.i.l.bf16 %v10387_v56  ;;  %v6572_v32 = vunpack.i.h.bf16 %v13894_v17 }
 0x411   : > { %v10602_v52 = vpop.f32.mrf.mxu2  ;;  %v6960_v60 = vpop.permute.xlu0 %6959 }
 0x412   : > { %v6965_v50 = vpop.permute.xlu1 %6964  ;;  %v6962_v28 = vunpack.i.h.bf16 %v6960_v60  ;;  %v6961_v61 = vunpack.i.l.bf16 %v6960_v60 }
 0x413   : > { %v6967_v29 = vunpack.i.h.bf16 %v6965_v50  ;;  %v6966_v27 = vunpack.i.l.bf16 %v6965_v50 }
 0x414   : > { %v10608_v24 = vsel %vm3484_vm4, %v3575_v63, %v6961_v61  ;;  %v10611_v16 = vsel %vm3484_vm4, %v3576_v46, %v6962_v28  ;;  %v6836_v63 = vunpack.i.l.bf16 %v10302_v54  ;;  %v6985_v46 = vpop.permute.xlu2 %6984 }
 0x415   : > { %v3545_v22 = vsel %vm346_vm0, %v13816_v38, %v6966_v27  ;;  %v3546_v5 = vsel %vm346_vm0, %v13811_v18, %v6967_v29  ;;  %v6987_v28 = vunpack.i.h.bf16 %v6985_v46  ;;  %v6986_v61 = vunpack.i.l.bf16 %v6985_v46 }
 0x416   : > { %3869 = vmatmul.f32.gmra.mxu2 %v3590_v0  ;;  %v3577_v39 = vsel %vm3451_vm3, %v3545_v22, %v6971_v25  ;;  %v3578_v34 = vsel %vm3451_vm3, %v3546_v5, %v6972_v48  ;;  %v3559_v60 = vsel %vm3451_vm3, %v3527_v1, %v6836_v63  ;;  %v6652_v1 = vunpack.i.h.bf16 %v13897_v40  ;;  %v13909_v63 = vld [vmem:[#allocation11_spill] sm:$0xff] }
 0x417   : > { %v3591_v48 = vsel %vm3484_vm4, %v3559_v60, %v6841_v49 }
 0x419   : > { %v10623_v2 = vpop.f32.mrf.mxu2  ;;  %v6975_v38 = vpop.permute.xlu0 %6974 }
 0x41a   : > { %v6980_v50 = vpop.permute.xlu1 %6979  ;;  %v6977_v29 = vunpack.i.h.bf16 %v6975_v38  ;;  %v6976_v27 = vunpack.i.l.bf16 %v6975_v38 }
 0x41b   : > { %v6982_v18 = vunpack.i.h.bf16 %v6980_v50  ;;  %v6981_v58 = vunpack.i.l.bf16 %v6980_v50 }
 0x41c   : > { %v10628_v4 = vsel %vm3484_vm4, %v3577_v39, %v6976_v27  ;;  %v10631_v54 = vsel %vm3484_vm4, %v3578_v34, %v6977_v29  ;;  %v13908_v39 = vld [vmem:[#allocation325_spill] sm:$0xff]  ;;  %v6842_v34 = vunpack.i.h.bf16 %v10387_v56  ;;  %v13910_v27 = vld [vmem:[#allocation338_spill] sm:$0xff] }
 0x41d   : > { %v3547_v25 = vsel %vm346_vm0, %v13822_v44, %v6981_v58  ;;  %v3548_v0 = vsel %vm346_vm0, %v8933_v10, %v6982_v18  ;;  %v963_v49 = vmul.f32 %v13909_v63, %v13908_v39 }
 0x41e   : > { %3872 = vmatmul.f32.gmra.mxu2 %v3591_v48  ;;  %v3579_v22 = vsel %vm3451_vm3, %v3547_v25, %v6986_v61  ;;  %v3580_v5 = vsel %vm3451_vm3, %v3548_v0, %v6987_v28  ;;  %v3592_v40 = vsel %vm3484_vm4, %v10377_v53, %v6842_v34  ;;  %v6576_v28 = vunpack.i.l.bf16 %v13910_v27  ;;  %v13911_v61 = vld [vmem:[#allocation286_spill] sm:$0xff]  ;;  %v13912_v25 = vld [vmem:[#allocation335_spill] sm:$0xff]  ;;  %v13913_v0 = vld [vmem:[#allocation25_spill] sm:$0xff] }
 0x41f   : > { %v3436_v18 = vsel %vm346_vm0, %v963_v49, %v6572_v32  ;;  %v6656_v48 = vunpack.i.l.bf16 %v13911_v61  ;;  %v964_v32 = vmul.f32 %v13913_v0, %v13912_v25 }
 0x420   : > { %v3469_v58 = vsel %vm3451_vm3, %v3436_v18, %v6652_v1  ;;  %v6856_v1 = vunpack.i.l.bf16 %v10418_v42  ;;  %v13914_v42 = vld [vmem:[#allocation24_spill] sm:$0xff] }
 0x421   : > { %v10644_v46 = vpop.f32.mrf.mxu2  ;;  %v6990_v50 = vpop.permute.xlu0 %6989  ;;  %v3437_v53 = vsel %vm346_vm0, %v964_v32, %v6576_v28 }
 0x422   : > { %v6995_v44 = vpop.permute.xlu1 %6994  ;;  %v6992_v10 = vunpack.i.h.bf16 %v6990_v50  ;;  %v6991_v60 = vunpack.i.l.bf16 %v6990_v50  ;;  %v3593_v34 = vsel %vm3484_vm4, %v10406_v15, %v6856_v1  ;;  %v7000_v50 = vpop.permute.xlu2 %6999 }
 0x423   : > { %v6996_v38 = vunpack.i.l.bf16 %v6995_v44  ;;  %v6997_v39 = vunpack.i.h.bf16 %v6995_v44  ;;  %v965_v44 = vmul.f32 %v13914_v42, %v9858_v35  ;;  %v7001_v18 = vunpack.i.l.bf16 %v7000_v50  ;;  %v13917_v35 = vld [vmem:[#allocation14_spill] sm:$0xff] }
 0x424   : > { %v10652_v29 = vsel %vm3484_vm4, %v3579_v22, %v6991_v60  ;;  %v10655_v56 = vsel %vm3484_vm4, %v3580_v5, %v6992_v10  ;;  %v3470_v22 = vsel %vm3451_vm3, %v3437_v53, %v6656_v48  ;;  %v6657_v10 = vunpack.i.h.bf16 %v13911_v61  ;;  %v10673_v60 = vpop.f32.mrf.mxu1  ;;  %v13916_v61 = vld [vmem:[#allocation344_spill] sm:$0xff]  ;;  %v10766_v42 = vld [vmem:[%s12757_s5] ss:$0 sm:$0xff] }
 0x425   : > { %v3502_v17 = vsel %vm3484_vm4, %v3469_v58, %v6996_v38  ;;  %v3503_v5 = vsel %vm3484_vm4, %v3470_v22, %v6997_v39  ;;  %v6577_v38 = vunpack.i.h.bf16 %v13910_v27  ;;  %v13915_v27 = vld [vmem:[#allocation334_spill] sm:$0xff]  ;;  %v6661_v48 = vunpack.i.l.bf16 %v13916_v61 }
 0x426   : > { %3780 = vmatmul.f32.gmra.mxu1 %v3502_v17  ;;  %3875 = vmatmul.f32.gmra.mxu2 %v3592_v40  ;;  %v6581_v28 = vunpack.i.l.bf16 %v13915_v27  ;;  %v966_v25 = vmul.f32 %v13917_v35, %v9902_v13  ;;  %v7002_v32 = vunpack.i.h.bf16 %v7000_v50  ;;  %v13918_v13 = vld [vmem:[#allocation28_spill] sm:$0xff] }
 0x427   : > { %v3438_v17 = vsel %vm346_vm0, %v965_v44, %v6577_v38  ;;  %v6662_v38 = vunpack.i.h.bf16 %v13916_v61  ;;  %v967_v50 = vmul.f32 %v13918_v13, %v9893_v6  ;;  %v13921_v6 = vld [vmem:[#allocation27_spill] sm:$0xff] }
 0x428   : > { %v3471_v40 = vsel %vm3451_vm3, %v3438_v17, %v6657_v10  ;;  %v3439_v53 = vsel %vm346_vm0, %v966_v25, %v6581_v28  ;;  %v13920_v28 = vld [vmem:[#allocation343_spill] sm:$0xff] }
 0x429   : > { %v10662_v49 = vpop.f32.mrf.mxu2  ;;  %v3504_v15 = vsel %vm3484_vm4, %v3471_v40, %v7001_v18  ;;  %v3472_v22 = vsel %vm3451_vm3, %v3439_v53, %v6661_v48  ;;  %v6666_v61 = vunpack.i.l.bf16 %v13920_v28  ;;  %v968_v48 = vmul.f32 %v13921_v6, %v9931_v19 }
 0x42c   : > { %v10687_v39 = vpop.f32.mrf.mxu1 }
 0x42e   : > { %3783 = vmatmul.f32.gmra.mxu1 %v3503_v5  ;;  %3878 = vmatmul.f32.gmra.mxu2 %v3593_v34  ;;  %v3505_v5 = vsel %vm3484_vm4, %v3472_v22, %v7002_v32  ;;  %v7005_v34 = vpop.permute.xlu0 %7004 }
 0x42f   : > { %v7006_v10 = vunpack.i.l.bf16 %v7005_v34  ;;  %v7007_v25 = vunpack.i.h.bf16 %v7005_v34 }
 0x431   : > { %v10675_v58 = vpop.f32.mrf.mxu2 }
 0x434   : > { %v10701_v40 = vpop.f32.mrf.mxu1 }
 0x436   : > { %3786 = vmatmul.f32.gmra.mxu1 %v3504_v15  ;;  %3881 = vmatmul.f32.gmra.mxu2 %v10431_v33  ;;  %v6582_v33 = vunpack.i.h.bf16 %v13915_v27 }
 0x438   : > { %v3440_v18 = vsel %vm346_vm0, %v967_v50, %v6582_v33 }
 0x439   : > { %v10685_v1 = vpop.f32.mrf.mxu2  ;;  %v3473_v17 = vsel %vm3451_vm3, %v3440_v18, %v6662_v38 }
 0x43a   : > { %v3506_v15 = vsel %vm3484_vm4, %v3473_v17, %v7006_v10  ;;  %v10729_v10 = vpop.f32.mrf.mxu3 }
 0x43e   : > { %3789 = vmatmul.f32.gmra.mxu1 %v3505_v5  ;;  %3884 = vmatmul.f32.gmra.mxu2 %v10457_v30  ;;  %v13919_v30 = vld [vmem:[#allocation341_spill] sm:$0xff] }
 0x43f   : > { %v6586_v27 = vunpack.i.l.bf16 %v13919_v30 }
 0x441   : > { %v10697_v44 = vpop.f32.mrf.mxu2  ;;  %v3441_v53 = vsel %vm346_vm0, %v968_v48, %v6586_v27 }
 0x442   : > { %v3474_v22 = vsel %vm3451_vm3, %v3441_v53, %v6666_v61 }
 0x443   : > { %v3507_v5 = vsel %vm3484_vm4, %v3474_v22, %v7007_v25 }
 0x446   : > { %3792 = vmatmul.f32.gmra.mxu1 %v3506_v15  ;;  %3887 = vmatmul.f32.gmra.mxu2 %v10460_v20  ;;  %v10715_v20 = vpop.f32.mrf.mxu1 }
 0x449   : > { %v10709_v32 = vpop.f32.mrf.mxu2 }
 0x44e   : > { %3795 = vmatmul.f32.gmra.mxu1 %v3507_v5  ;;  %3890 = vmatmul.f32.gmra.mxu2 %v10486_v43  ;;  %v10720_v38 = vpop.f32.mrf.mxu1 }
 0x451   : > { %v10717_v33 = vpop.f32.mrf.mxu2 }
 0x456   : > { %3893 = vmatmul.f32.gmra.mxu2 %v10489_v21  ;;  %v10727_v50 = vpop.f32.mrf.mxu1  ;;  %v10737_v21 = vpop.f32.mrf.mxu3 }
 0x459   : > { %v10722_v19 = vpop.f32.mrf.mxu2 }
 0x45e   : > { %3896 = vmatmul.f32.gmra.mxu2 %v10513_v45  ;;  %v10734_v18 = vpop.f32.mrf.mxu1  ;;  %v3986_v15 = vpop.f32.mrf.mxu3 }
 0x461   : > { %v10725_v34 = vpop.f32.mrf.mxu2 }
 0x466   : > { %3899 = vmatmul.f32.gmra.mxu2 %v10516_v51  ;;  %v10742_v45 = vpop.f32.mrf.mxu1  ;;  %v3989_v28 = vpop.f32.mrf.mxu3 }
 0x469   : > { %v10732_v43 = vpop.f32.mrf.mxu2 }
 0x46e   : > { %3902 = vmatmul.f32.gmra.mxu2 %v10540_v3  ;;  %v10747_v51 = vpop.f32.mrf.mxu1  ;;  %v3992_v48 = vpop.f32.mrf.mxu3 }
 0x471   : > { %v10739_v17 = vpop.f32.mrf.mxu2 }
 0x476   : > { %3905 = vmatmul.f32.gmra.mxu2 %v10543_v14  ;;  %v10754_v61 = vpop.f32.mrf.mxu1 }
 0x479   : > { %v10744_v30 = vpop.f32.mrf.mxu2 }
 0x47e   : > { %3908 = vmatmul.f32.gmra.mxu2 %v10566_v11  ;;  %v3760_v25 = vpop.f32.mrf.mxu1  ;;  %v3995_v11 = vpop.f32.mrf.mxu3 }
 0x481   : > { %v10749_v27 = vpop.f32.mrf.mxu2 }
 0x486   : > { %3911 = vmatmul.f32.gmra.mxu2 %v10569_v23  ;;  %v3763_v22 = vpop.f32.mrf.mxu1  ;;  %v3998_v5 = vpop.f32.mrf.mxu3 }
 0x487   : > { %v3764_v0 = vadd.f32 %v10766_v42, %v3763_v22 }
 0x489   : > { %v10752_v3 = vpop.f32.mrf.mxu2 }
 0x48e   : > { %3914 = vmatmul.f32.gmra.mxu2 %v10587_v59  ;;  %v3761_v59 = vadd.f32 %v10766_v42, %v3760_v25  ;;  %v10771_v13 = vpop.f32.mrf.mxu3 }
 0x491   : > { %v10757_v14 = vpop.f32.mrf.mxu2 }
 0x496   : > { %3917 = vmatmul.f32.gmra.mxu2 %v10590_v7  ;;  %v3766_v7 = vpop.f32.mrf.mxu1 }
 0x497   : > { %v3767_v12 = vadd.f32 %v10766_v42, %v3766_v7 }
 0x499   : > { %v10760_v53 = vpop.f32.mrf.mxu2 }
 0x49e   : > { %3920 = vmatmul.f32.gmra.mxu2 %v10608_v24  ;;  %v3769_v26 = vpop.f32.mrf.mxu1 }
 0x4a1   : > { %v3873_v23 = vpop.f32.mrf.mxu2 }
 0x4a2   : > { %v3874_v63 = vadd.f32 %v3873_v23, %v3761_v59  ;;  %v10780_v23 = vpop.f32.mrf.mxu3 }
 0x4a3   : > { %13924 = vst [vmem:[#allocation300_spill] sm:$0xff] %v10780_v23  ;;  %v13955_v23 = vld [vmem:[#allocation271_spill] sm:$0xff] }
 0x4a4   : > { %v3987_v35 = vadd.f32 %v3986_v15, %v3874_v63  ;;  %v13928_v15 = vld [vmem:[#allocation145_spill] sm:$0xff] }
 0x4a6   : > { %3923 = vmatmul.f32.gmra.mxu2 %v10611_v16  ;;  %v10777_v16 = vmax.f32 %v3987_v35, 0.0  ;;  %v3772_v59 = vpop.f32.mrf.mxu1 }
 0x4a8   : > { %13923 = vst [vmem:[#allocation309_spill] sm:$0xff] %v10777_v16 }
 0x4a9   : > { %v3876_v6 = vpop.f32.mrf.mxu2 }
 0x4aa   : > { %v3877_v62 = vadd.f32 %v3876_v6, %v3764_v0 }
 0x4ac   : > { %v3990_v24 = vadd.f32 %v3989_v28, %v3877_v62  ;;  %v13169_v62 = vrot.slane %v10777_v16, 1 }
 0x4ae   : > { %3926 = vmatmul.f32.gmra.mxu2 %v10628_v4  ;;  %v10775_v36 = vmax.f32 %v3990_v24, 0.0  ;;  %v3770_v4 = vadd.f32 %v10766_v42, %v3769_v26  ;;  %v10807_v24 = vpop.f32.mrf.mxu3 }
 0x4af   : > { %13932 = vst [vmem:[#allocation302_spill] sm:$0xff] %v10807_v24  ;;  %v13958_v24 = vld [vmem:[#allocation247_spill] sm:$0xff] }
 0x4b0   : > { %13922 = vst [vmem:[#allocation327_spill] sm:$0xff] %v10775_v36  ;;  %v4339_v57 = vrot.slane %v10775_v36, 1 }
 0x4b1   : > { %v3879_v41 = vpop.f32.mrf.mxu2 }
 0x4b2   : > { %v3880_v25 = vadd.f32 %v3879_v41, %v3767_v12  ;;  %v10791_v12 = vsel %vm1203_vm1, %v13169_v62, %v4339_v57 }
 0x4b3   : > { %13926 = vst [vmem:[#allocation307_spill] sm:$0xff] %v10791_v12  ;;  %v10798_v28 = vmul.f32 %v10791_v12, %v13928_v15  ;;  %v13948_v12 = vld [vmem:[#allocation264_spill] sm:$0xff] }
 0x4b4   : > { %v3993_v22 = vadd.f32 %v3992_v48, %v3880_v25 }
 0x4b5   : > { %13929 = vst [vmem:[#allocation295_spill] sm:$0xff] %v10798_v28  ;;  %v13946_v28 = vld [vmem:[#allocation265_spill] sm:$0xff] }
 0x4b6   : > { %v10782_v0 = vmax.f32 %v3993_v22, 0.0  ;;  %3929 = vmatmul.f32.gmra.mxu2 %v10631_v54  ;;  %v13930_v54 = vld [vmem:[#allocation144_spill] sm:$0xff] }
 0x4b8   : > { %13925 = vst [vmem:[#allocation291_spill] sm:$0xff] %v10782_v0  ;;  %v4341_v63 = vrot.slane %v10782_v0, 1 }
 0x4b9   : > { %v3882_v41 = vpop.f32.mrf.mxu2 }
 0x4ba   : > { %v3883_v35 = vadd.f32 %v3882_v41, %v3770_v4  ;;  %v10794_v6 = vsel %vm1203_vm1, %v4339_v57, %v4341_v63  ;;  %v3773_v57 = vadd.f32 %v10766_v42, %v3772_v59 }
 0x4bb   : > { %13927 = vst [vmem:[#allocation317_spill] sm:$0xff] %v10794_v6  ;;  %v10802_v48 = vmul.f32 %v10794_v6, %v13930_v54 }
 0x4bc   : > { %v3996_v26 = vadd.f32 %v3995_v11, %v3883_v35  ;;  %v10820_v35 = vpop.f32.mrf.mxu3 }
 0x4bd   : > { %13931 = vst [vmem:[#allocation310_spill] sm:$0xff] %v10802_v48 }
 0x4be   : > { %3932 = vmatmul.f32.gmra.mxu2 %v10652_v29  ;;  %v10810_v25 = vmax.f32 %v3996_v26, 0.0  ;;  %13936 = vst [vmem:[#allocation301_spill] sm:$0xff] %v10820_v35 }
 0x4c0   : > { %13933 = vst [vmem:[#allocation326_spill] sm:$0xff] %v10810_v25  ;;  %v4343_v15 = vrot.slane %v10810_v25, 1 }
 0x4c1   : > { %v3885_v22 = vpop.f32.mrf.mxu2 }
 0x4c2   : > { %v3886_v4 = vadd.f32 %v3885_v22, %v3773_v57  ;;  %v10817_v11 = vsel %vm1203_vm1, %v4341_v63, %v4343_v15  ;;  %v13940_v57 = vld [vmem:[#allocation148_spill] sm:$0xff]  ;;  %v13942_v63 = vld [vmem:[#allocation269_spill] sm:$0xff] }
 0x4c3   : > { %13935 = vst [vmem:[#allocation207_spill] sm:$0xff] %v10817_v11  ;;  %v13943_v22 = vld [vmem:[#allocation228_spill] sm:$0xff] }
 0x4c4   : > { %v3999_v41 = vadd.f32 %v3998_v5, %v3886_v4  ;;  %v13938_v5 = vld [vmem:[#allocation134_spill] sm:$0xff]  ;;  %v2619_v4 = vmul.f32 %v13943_v22, %v13942_v63 }
 0x4c5   : > { %v10831_v59 = vmul.f32 %v10817_v11, %v13938_v5 }
 0x4c6   : > { %v10813_v54 = vmax.f32 %v3999_v41, 0.0  ;;  %3935 = vmatmul.f32.gmra.mxu2 %v10655_v56 }
 0x4c7   : > { %13939 = vst [vmem:[#allocation261_spill] sm:$0xff] %v10831_v59  ;;  %v13950_v59 = vld [vmem:[#allocation238_spill] sm:$0xff] }
 0x4c8   : > { %13934 = vst [vmem:[#allocation316_spill] sm:$0xff] %v10813_v54  ;;  %v13170_v29 = vrot.slane %v10813_v54, 1 }
 0x4c9   : > { %v10822_v7 = vpop.f32.mrf.mxu2 }
 0x4ca   : > { %v10827_v26 = vsel %vm1203_vm1, %v4343_v15, %v13170_v29  ;;  %v10844_v15 = vpop.f32.mrf.mxu3  ;;  %v13945_v29 = vld [vmem:[#allocation267_spill] sm:$0xff] }
 0x4cb   : > { %13937 = vst [vmem:[#allocation260_spill] sm:$0xff] %v10827_v26  ;;  %v10835_v56 = vmul.f32 %v10827_v26, %v13940_v57  ;;  %v2620_v5 = vmul.f32 %v13946_v28, %v13945_v29  ;;  %v13947_v57 = vld [vmem:[#allocation266_spill] sm:$0xff]  ;;  %v13952_v26 = vld [vmem:[#allocation272_spill] sm:$0xff] }
 0x4cc   : > { %13944 = vst [vmem:[#allocation166_spill] sm:$0xff] %v10844_v15  ;;  %v2621_v6 = vmul.f32 %v13948_v12, %v13947_v57 }
 0x4cd   : > { %13941 = vst [vmem:[#allocation262_spill] sm:$0xff] %v10835_v56 }
 0x4ce   : > { %6417 = vmatmul.msk.f32.vlgmr.msrb.gmra.mxu2 %vm346_vm0, %v2619_v4  ;;  %v13949_v4 = vld [vmem:[#allocation268_spill] sm:$0xff] }
 0x4cf   : > { %v2622_v56 = vmul.f32 %v13950_v59, %v13949_v4  ;;  %v13957_v59 = vld [vmem:[#allocation277_spill] sm:$0xff] }
 0x4d0   : > { %v2625_v36 = vmul.f32 %v13958_v24, %v13957_v59 }
 0x4d1   : > { %v10842_v62 = vpop.f32.mrf.mxu2 }
 0x4d2   : > { %v10853_v63 = vpop.f32.mrf.mxu3 }
 0x4d6   : > { %6418 = vmatmul.msk.f32.gmra.mxu2 %vm346_vm0, %v2620_v5  ;;  %v13951_v5 = vld [vmem:[#allocation275_spill] sm:$0xff] }
 0x4d7   : > { %v2623_v35 = vmul.f32 %v13952_v26, %v13951_v5  ;;  %v3800_v26 = vadd.f32 %v10766_v42, %v10581_v37  ;;  %v3809_v37 = vadd.f32 %v10766_v42, %v10644_v46 }
 0x4d9   : > { %v10849_v48 = vpop.f32.mrf.mxu2 }
 0x4da   : > { %v10861_v11 = vpop.f32.mrf.mxu3 }
 0x4de   : > { %6419 = vmatmul.msk.f32.gmra.mxu2 %vm346_vm0, %v2621_v6  ;;  %v13954_v6 = vld [vmem:[#allocation274_spill] sm:$0xff] }
 0x4df   : > { %v2624_v15 = vmul.f32 %v13955_v23, %v13954_v6  ;;  %v3803_v23 = vadd.f32 %v10766_v42, %v10602_v52  ;;  %v3812_v52 = vadd.f32 %v10766_v42, %v10662_v49 }
 0x4e1   : > { %v10856_v41 = vpop.f32.mrf.mxu2 }
 0x4e2   : > { %v10868_v57 = vpop.f32.mrf.mxu3 }
 0x4e3   : > { %13953 = vst [vmem:[#allocation218_spill] sm:$0xff] %v10868_v57 }
 0x4e6   : > { %6420 = vmatmul.msk.f32.gmra.mxu2 %vm346_vm0, %v2622_v56 }
 0x4e9   : > { %v10863_v29 = vpop.f32.mrf.mxu2 }
 0x4ea   : > { %v10877_v56 = vpop.f32.mrf.mxu3 }
 0x4eb   : > { %13956 = vst [vmem:[#allocation185_spill] sm:$0xff] %v10877_v56 }
 0x4ee   : > { %6421 = vmatmul.msk.f32.gmra.mxu2 %vm346_vm0, %v2623_v35 }
 0x4f1   : > { %v10870_v16 = vpop.f32.mrf.mxu2 }
 0x4f2   : > { %v10884_v35 = vpop.f32.mrf.mxu3 }
 0x4f3   : > { %13960 = vst [vmem:[#allocation219_spill] sm:$0xff] %v10884_v35 }
 0x4f6   : > { %6422 = vmatmul.msk.f32.gmra.mxu2 %vm346_vm0, %v2624_v15 }
 0x4f9   : > { %v10875_v4 = vpop.f32.mrf.mxu2 }
 0x4fa   : > { %v10890_v15 = vpop.f32.mrf.mxu3 }
 0x4fb   : > { %13962 = vst [vmem:[#allocation285_spill] sm:$0xff] %v10890_v15 }
 0x4fe   : > { %6423 = vmatmul.msk.f32.gmra.mxu2 %vm346_vm0, %v2625_v36  ;;  %v3806_v36 = vadd.f32 %v10766_v42, %v10623_v2 }
 0x501   : > { %v10882_v5 = vpop.f32.mrf.mxu2 }
 0x502   : > { %13959 = vst [vmem:[#allocation152_spill] sm:$0xff] %v10882_v5  ;;  %v10898_v59 = vpop.f32.mrf.mxu3 }
 0x503   : > { %13964 = vst [vmem:[#allocation292_spill] sm:$0xff] %v10898_v59 }
 0x509   : > { %v3912_v57 = vpop.f32.mrf.mxu2 }
 0x50a   : > { %v10888_v6 = vadd.f32 %v3912_v57, %v3800_v26  ;;  %v10906_v15 = vpop.f32.mrf.mxu3 }
 0x50b   : > { %13967 = vst [vmem:[#allocation314_spill] sm:$0xff] %v10906_v15 }
 0x50c   : > { %13961 = vst [vmem:[#allocation217_spill] sm:$0xff] %v10888_v6 }
 0x511   : > { %v3915_v56 = vpop.f32.mrf.mxu2 }
 0x512   : > { %v10894_v12 = vadd.f32 %v3915_v56, %v3803_v23  ;;  %v10912_v2 = vpop.f32.mrf.mxu3 }
 0x513   : > { %13968 = vst [vmem:[#allocation320_spill] sm:$0xff] %v10912_v2 }
 0x514   : > { %13963 = vst [vmem:[#allocation308_spill] sm:$0xff] %v10894_v12 }
 0x519   : > { %v3918_v24 = vpop.f32.mrf.mxu2 }
 0x51a   : > { %v10900_v35 = vadd.f32 %v3918_v24, %v3806_v36  ;;  %v3815_v24 = vadd.f32 %v10766_v42, %v10675_v58  ;;  %v4043_v46 = vpop.f32.mrf.mxu3  ;;  %v4119_v58 = vld [vmem:[%s12758_s6 + $0x118] sm:$0xff] }
 0x51b   : > { %6509 = vmatpush.msra.mxu2 %v4119_v58  ;;  %5900 = vmatpush.msrb.mxu1 %v4119_v58 }
 0x51c   : > { %13965 = vst [vmem:[#allocation276_spill] sm:$0xff] %v10900_v35  ;;  %v10920_v35 = vpop.f32.mrf.mxu1 }
 0x521   : > { %v3921_v26 = vpop.f32.mrf.mxu2 }
 0x522   : > { %v10904_v57 = vadd.f32 %v3921_v26, %v3809_v37  ;;  %v3818_v37 = vadd.f32 %v10766_v42, %v10685_v1  ;;  %v4046_v49 = vpop.f32.mrf.mxu3  ;;  %v4118_v1 = vld [vmem:[%s12758_s6 + $0x110] sm:$0xff] }
 0x523   : > { %6510 = vmatpush.msra.mxu2 %v4118_v1  ;;  %5901 = vmatpush.msrb.mxu1 %v4118_v1  ;;  %v4115_v1 = vld [vmem:[%s12758_s6 + $0xf8] sm:$0xff] }
 0x524   : > { %13966 = vst [vmem:[#allocation273_spill] sm:$0xff] %v10904_v57  ;;  %5775 = vmatpush.msrb.mxu3 %v4115_v1 }
 0x529   : > { %v3924_v23 = vpop.f32.mrf.mxu2 }
 0x52a   : > { %v10910_v56 = vadd.f32 %v3924_v23, %v3812_v52  ;;  %v3821_v52 = vadd.f32 %v10766_v42, %v10697_v44  ;;  %v10924_v23 = vpop.f32.mrf.mxu1  ;;  %v4117_v44 = vld [vmem:[%s12758_s6 + $0x108] sm:$0xff] }
 0x52b   : > { %6511 = vmatpush.msra.mxu2 %v4117_v44  ;;  %5902 = vmatpush.msrb.mxu1 %v4117_v44  ;;  %v13971_v44 = vld [vmem:[#allocation26_spill] sm:$0xff] }
 0x531   : > { %v3927_v36 = vpop.f32.mrf.mxu2 }
 0x532   : > { %v10916_v12 = vadd.f32 %v3927_v36, %v3815_v24  ;;  %v3824_v24 = vadd.f32 %v10766_v42, %v10709_v32  ;;  %v10940_v58 = vpop.f32.mrf.mxu1 }
 0x534   : > { %13969 = vst [vmem:[#allocation287_spill] sm:$0xff] %v10916_v12 }
 0x539   : > { %v3930_v26 = vpop.f32.mrf.mxu2 }
 0x53a   : > { %v3931_v6 = vadd.f32 %v3930_v26, %v3818_v37  ;;  %v4049_v26 = vpop.f32.mrf.mxu3 }
 0x53c   : > { %v4044_v15 = vadd.f32 %v4043_v46, %v3931_v6 }
 0x541   : > { %v3933_v5 = vpop.f32.mrf.mxu2 }
 0x542   : > { %v3934_v2 = vadd.f32 %v3933_v5, %v3821_v52  ;;  %v4116_v52 = vld [vmem:[%s12758_s6 + $0x100] sm:$0xff] }
 0x543   : > { %6512 = vmatpush.msra.mxu2 %v4116_v52  ;;  %5903 = vmatpush.msrb.mxu1 %v4116_v52 }
 0x544   : > { %v4047_v36 = vadd.f32 %v4046_v49, %v3934_v2  ;;  %v3731_v2 = vadd.f32 %v10766_v42, %v10673_v60 }
 0x546   : > { %v10942_v12 = vmax.f32 %v4047_v36, 0.0  ;;  %v3844_v36 = vadd.f32 %v10717_v33, %v3731_v2  ;;  %v3734_v33 = vadd.f32 %v10766_v42, %v10687_v39  ;;  %v10966_v2 = vpop.f32.mrf.mxu1  ;;  %v10981_v39 = vmax.f32 %v4044_v15, 0.0 }
 0x548   : > { %v4313_v1 = vrot.slane %v10942_v12, 1  ;;  %v13189_v15 = vrot.slane %v10981_v39, 1 }
 0x549   : > { %v3936_v5 = vpop.f32.mrf.mxu2 }
 0x54a   : > { %v3937_v37 = vadd.f32 %v3936_v5, %v3824_v24  ;;  %v4099_v24 = vld [vmem:[%s12758_s6 + $0x78] sm:$0xff]  ;;  %v4281_v5 = vmul.f32 %v10942_v12, %v13971_v44 }
 0x54b   : > { %5662 = vmatpush.msrb.mxu0 %v4099_v24 }
 0x54c   : > { %v4050_v32 = vadd.f32 %v4049_v26, %v3937_v37  ;;  %v13972_v37 = vld [vmem:[#allocation40_spill] sm:$0xff] }
 0x54e   : > { %v10946_v49 = vmax.f32 %v4050_v32, 0.0 }
 0x550   : > { %13970 = vst [vmem:[#allocation315_spill] sm:$0xff] %v10946_v49  ;;  %v4282_v60 = vmul.f32 %v10946_v49, %v13972_v37  ;;  %v4314_v59 = vrot.slane %v10946_v49, 1 }
 0x551   : > { %v3956_v26 = vpop.f32.mrf.mxu2 }
 0x552   : > { %v3957_v52 = vadd.f32 %v3956_v26, %v3844_v36  ;;  %v7008_v32 = vpack.i.bf16 %v4282_v60, %v4281_v5  ;;  %v4114_v36 = vld [vmem:[%s12758_s6 + $0xf0] sm:$0xff]  ;;  %v10973_v44 = vsel %vm1203_vm1, %v4313_v1, %v4314_v59  ;;  %v3847_v5 = vadd.f32 %v10722_v19, %v3734_v33  ;;  %v11013_v19 = vpop.f32.mrf.mxu1 }
 0x553   : > { %5776 = vmatpush.msrb.mxu3 %v4114_v36  ;;  %13974 = vst [vmem:[#allocation303_spill] sm:$0xff] %v10973_v44  ;;  %v10985_v60 = vmul.f32 %v10973_v44, %v13826_v8  ;;  %v13979_v8 = vld [vmem:[#allocation39_spill] sm:$0xff] }
 0x554   : > { %v10960_v57 = vmax.f32 %v3957_v52, 0.0  ;;  %7009 = vrot.lane.b32.xlu1 %v7008_v32, %s7531_s9 }
 0x555   : > { %13976 = vst [vmem:[#allocation337_spill] sm:$0xff] %v10985_v60 }
 0x556   : > { %13973 = vst [vmem:[#allocation311_spill] sm:$0xff] %v10960_v57  ;;  %v13187_v24 = vrot.slane %v10960_v57, 1  ;;  %v13191_v32 = vrot.slane %v10960_v57, 7  ;;  %v4283_v36 = vmul.f32 %v10960_v57, %v13979_v8 }
 0x558   : > { %v10979_v6 = vsel %vm1203_vm1, %v4314_v59, %v13187_v24  ;;  %v3737_v59 = vadd.f32 %v10766_v42, %v10701_v40  ;;  %v11010_v40 = vsel %vm1203_vm1, %v13189_v15, %v4313_v1  ;;  %v4097_v15 = vld [vmem:[%s12758_s6 + $0x68] sm:$0xff] }
 0x559   : > { %13975 = vst [vmem:[#allocation236_spill] sm:$0xff] %v10979_v6  ;;  %v3959_v46 = vpop.f32.mrf.mxu2  ;;  %v10989_v26 = vmul.f32 %v10979_v6, %v13821_v55 }
 0x55a   : > { %v3960_v37 = vadd.f32 %v3959_v46, %v3847_v5  ;;  %v13980_v5 = vld [vmem:[#allocation29_spill] sm:$0xff]  ;;  %v4098_v46 = vld [vmem:[%s12758_s6 + $0x70] sm:$0xff]  ;;  %13981 = vst [vmem:[#allocation237_spill] sm:$0xff] %v11010_v40 }
 0x55b   : > { %13977 = vst [vmem:[#allocation284_spill] sm:$0xff] %v10989_v26  ;;  %5663 = vmatpush.msrb.mxu0 %v4098_v46  ;;  %v13982_v46 = vld [vmem:[#allocation89_spill] sm:$0xff] }
 0x55c   : > { %v10991_v52 = vmax.f32 %v3960_v37, 0.0  ;;  %v3850_v37 = vadd.f32 %v10725_v34, %v3737_v59  ;;  %v11025_v1 = vmul.f32 %v11010_v40, %v13982_v46  ;;  %v3790_v40 = vpop.f32.mrf.mxu1 }
 0x55d   : > { %5664 = vmatpush.msrb.mxu0 %v4097_v15 }
 0x55e   : > { %13978 = vst [vmem:[#allocation324_spill] sm:$0xff] %v10991_v52  ;;  %v13190_v33 = vrot.slane %v10991_v52, 7  ;;  %v4284_v55 = vmul.f32 %v10991_v52, %v13980_v5 }
 0x55f   : > { %13983 = vst [vmem:[#allocation232_spill] sm:$0xff] %v11025_v1 }
 0x560   : > { %v7013_v24 = vpack.i.bf16 %v4284_v55, %v4283_v36  ;;  %v11020_v8 = vsel %vm627_vm2, %v13191_v32, %v13190_v33  ;;  %v13986_v36 = vld [vmem:[#allocation41_spill] sm:$0xff] }
 0x561   : > { %v3962_v5 = vpop.f32.mrf.mxu2  ;;  %v11029_v34 = vmul.f32 %v11020_v8, %v13824_v9  ;;  %v4296_v55 = vmul.f32 %v10810_v25, %v13986_v36  ;;  %v13987_v9 = vld [vmem:[#allocation51_spill] sm:$0xff] }
 0x562   : > { %v3963_v60 = vadd.f32 %v3962_v5, %v3850_v37  ;;  %7014 = vrot.lane.b32.xlu2 %v7013_v24, %s7531_s9  ;;  %v3740_v37 = vadd.f32 %v10766_v42, %v10715_v20  ;;  %v3758_v24 = vadd.f32 %v10766_v42, %v10754_v61  ;;  %v4319_v5 = vrot.slane %v10991_v52, 1  ;;  %v4113_v36 = vld [vmem:[%s12758_s6 + $0xe8] sm:$0xff] }
 0x563   : > { %13984 = vst [vmem:[#allocation319_spill] sm:$0xff] %v11029_v34  ;;  %v3755_v20 = vadd.f32 %v10766_v42, %v10747_v51  ;;  %5777 = vmatpush.msrb.mxu3 %v4113_v36 }
 0x564   : > { %v11031_v59 = vmax.f32 %v3963_v60, 0.0  ;;  %v4295_v60 = vmul.f32 %v10782_v0, %v13987_v9  ;;  %v3853_v61 = vadd.f32 %v10732_v43, %v3740_v37  ;;  %v3871_v33 = vadd.f32 %v10760_v53, %v3758_v24  ;;  %v4112_v43 = vld [vmem:[%s12758_s6 + $0xe0] sm:$0xff] }
 0x565   : > { %v3868_v26 = vadd.f32 %v10757_v14, %v3755_v20  ;;  %5778 = vmatpush.msrb.mxu3 %v4112_v43  ;;  %v3776_v14 = vadd.f32 %v10766_v42, %v10920_v35  ;;  %v13990_v37 = vld [vmem:[#allocation42_spill] sm:$0xff] }
 0x566   : > { %13985 = vst [vmem:[#allocation224_spill] sm:$0xff] %v11031_v59  ;;  %v4321_v46 = vrot.slane %v11031_v59, 1  ;;  %v7038_v32 = vpack.i.bf16 %v4296_v55, %v4295_v60  ;;  %v3984_v53 = vadd.f32 %v10737_v21, %v3871_v33 }
 0x567   : > { %v3889_v60 = vadd.f32 %v10822_v7, %v3776_v14  ;;  %v3793_v7 = vpop.f32.mrf.mxu1 }
 0x568   : > { %v11058_v9 = vsel %vm1203_vm1, %v4319_v5, %v4321_v46  ;;  %v11082_v33 = vmax.f32 %v3984_v53, 0.0 }
 0x569   : > { %v3965_v34 = vpop.f32.mrf.mxu2  ;;  %v4601_v1 = vmul.f32 %v11058_v9, %v9646_v31  ;;  %v3743_v31 = vadd.f32 %v10766_v42, %v10720_v38 }
 0x56a   : > { %v3966_v51 = vadd.f32 %v3965_v34, %v3853_v61  ;;  %7039 = vrot.lane.b32.xlu2 %v7038_v32, %s7531_s9  ;;  %v3981_v34 = vadd.f32 %v10729_v10, %v3868_v26  ;;  %13991 = vst [vmem:[#allocation294_spill] sm:$0xff] %v11082_v33  ;;  %v4002_v61 = vadd.f32 %v10771_v13, %v3889_v60 }
 0x56b   : > { %6480 = vmatmul.msk.f32.vlgmr.msra.gmra.mxu2 %vm346_vm0, %v4601_v1  ;;  %v13989_v1 = vld [vmem:[#allocation43_spill] sm:$0xff]  ;;  %v3856_v21 = vadd.f32 %v10739_v17, %v3743_v31  ;;  %v4096_v17 = vld [vmem:[%s12758_s6 + $0x60] sm:$0xff]  ;;  %v13995_v31 = vld [vmem:[#allocation49_spill] sm:$0xff] }
 0x56c   : > { %v11069_v15 = vmax.f32 %v3966_v51, 0.0  ;;  %v4285_v55 = vmul.f32 %v11031_v59, %v13989_v1  ;;  %v11090_v26 = vmax.f32 %v3981_v34, 0.0  ;;  %v13994_v51 = vld [vmem:[#allocation48_spill] sm:$0xff]  ;;  %5665 = vmatpush.msrb.mxu0 %v4096_v17  ;;  %v3752_v34 = vadd.f32 %v10766_v42, %v10742_v45 }
 0x56d   : > { %v4292_v43 = vmul.f32 %v11082_v33, %v13994_v51  ;;  %v3794_v1 = vadd.f32 %v10766_v42, %v3793_v7  ;;  %v3782_v17 = vadd.f32 %v10766_v42, %v10940_v58  ;;  %v3788_v7 = vadd.f32 %v10766_v42, %v11013_v19 }
 0x56e   : > { %13988 = vst [vmem:[#allocation336_spill] sm:$0xff] %v11069_v15  ;;  %v4323_v32 = vrot.slane %v11069_v15, 1  ;;  %v4286_v24 = vmul.f32 %v11069_v15, %v13990_v37  ;;  %v4291_v14 = vmul.f32 %v11090_v26, %v13995_v31  ;;  %v14001_v31 = vld [vmem:[#allocation55_spill] sm:$0xff] }
 0x56f   : > { %13992 = vst [vmem:[#allocation245_spill] sm:$0xff] %v11090_v26  ;;  %v3907_v60 = vadd.f32 %v10875_v4, %v3794_v1  ;;  %v4095_v4 = vld [vmem:[%s12758_s6 + $0x58] sm:$0xff]  ;;  %v3895_v58 = vadd.f32 %v10849_v48, %v3782_v17  ;;  %v3901_v19 = vadd.f32 %v10863_v29, %v3788_v7  ;;  %v3796_v17 = vpop.f32.mrf.mxu1 }
 0x570   : > { %v7018_v38 = vpack.i.bf16 %v4286_v24, %v4285_v55  ;;  %v11086_v36 = vsel %vm1203_vm1, %v4321_v46, %v4323_v32  ;;  %v11111_v55 = vmax.f32 %v4002_v61, 0.0  ;;  %v7023_v37 = vpack.i.bf16 %v4292_v43, %v4291_v14  ;;  %5666 = vmatpush.msrb.mxu0 %v4095_v4  ;;  %v14000_v43 = vld [vmem:[#allocation46_spill] sm:$0xff]  ;;  %v14010_v4 = vld [vmem:[#allocation300_spill] sm:$0xff]  ;;  %v14014_v7 = vld [vmem:[#allocation301_spill] sm:$0xff] }
 0x571   : > { %v3968_v35 = vpop.f32.mrf.mxu2  ;;  %v4570_v10 = vmul.f32 %v11086_v36, %v13943_v22  ;;  %v3746_v22 = vadd.f32 %v10766_v42, %v10727_v50  ;;  %v3865_v50 = vadd.f32 %v10752_v3, %v3752_v34  ;;  %v4111_v3 = vld [vmem:[%s12758_s6 + $0xd8] sm:$0xff]  ;;  %v4297_v14 = vmul.f32 %v10813_v54, %v14001_v31 }
 0x572   : > { %v3969_v20 = vadd.f32 %v3968_v35, %v3856_v21  ;;  %7019 = vrot.lane.b32.xlu0 %v7018_v38, %s7531_s9  ;;  %13996 = vst [vmem:[#allocation340_spill] sm:$0xff] %v11111_v55  ;;  %v3791_v21 = vadd.f32 %v10766_v42, %v3790_v40  ;;  %v3749_v35 = vadd.f32 %v10766_v42, %v10734_v18 }
 0x573   : > { %6449 = vmatmul.msk.f32.vlgmr.msrb.gmra.mxu1 %vm346_vm0, %v4570_v10  ;;  %v3859_v13 = vadd.f32 %v10744_v30, %v3746_v22  ;;  %v3779_v18 = vadd.f32 %v10766_v42, %v10924_v23  ;;  %5779 = vmatpush.msrb.mxu3 %v4111_v3  ;;  %v13999_v23 = vld [vmem:[#allocation32_spill] sm:$0xff] }
 0x574   : > { %v11098_v46 = vmax.f32 %v3969_v20, 0.0  ;;  %v3904_v10 = vadd.f32 %v10870_v16, %v3791_v21  ;;  %v3978_v20 = vadd.f32 %v10266_v47, %v3865_v50  ;;  %v3785_v47 = vadd.f32 %v10766_v42, %v10966_v2  ;;  %v4110_v3 = vld [vmem:[%s12758_s6 + $0xd0] sm:$0xff] }
 0x575   : > { %v3892_v34 = vadd.f32 %v10842_v62, %v3779_v18  ;;  %v14005_v62 = vld [vmem:[#allocation52_spill] sm:$0xff]  ;;  %5780 = vmatpush.msrb.mxu3 %v4110_v3 }
 0x576   : > { %13993 = vst [vmem:[#allocation242_spill] sm:$0xff] %v11098_v46  ;;  %v4325_v53 = vrot.slane %v11098_v46, 1  ;;  %v4287_v51 = vmul.f32 %v11098_v46, %v13999_v23  ;;  %v3898_v50 = vadd.f32 %v10856_v41, %v3785_v47  ;;  %v11166_v48 = vmax.f32 %v3978_v20, 0.0  ;;  %v14015_v23 = vld [vmem:[#allocation314_spill] sm:$0xff] }
 0x578   : > { %v11114_v24 = vsel %vm1203_vm1, %v4323_v32, %v4325_v53  ;;  %v13998_v32 = vld [vmem:[#allocation54_spill] sm:$0xff]  ;;  %14004 = vst [vmem:[#allocation246_spill] sm:$0xff] %v11166_v48 }
 0x579   : > { %v3971_v38 = vpop.f32.mrf.mxu2  ;;  %v4571_v45 = vmul.f32 %v11114_v24, %v13946_v28  ;;  %v3862_v28 = vadd.f32 %v10749_v27, %v3749_v35  ;;  %v4298_v16 = vmul.f32 %v11111_v55, %v13998_v32  ;;  %v4020_v27 = vadd.f32 %v10861_v11, %v3907_v60  ;;  %v14012_v32 = vld [vmem:[#allocation38_spill] sm:$0xff] }
 0x57a   : > { %v3972_v30 = vadd.f32 %v3971_v38, %v3859_v13  ;;  %7024 = vrot.lane.b32.xlu0 %v7023_v37, %s7531_s9  ;;  %v4017_v11 = vadd.f32 %v10853_v63, %v3904_v10  ;;  %v14003_v38 = vld [vmem:[#allocation264_spill] sm:$0xff]  ;;  %v14006_v63 = vld [vmem:[#allocation327_spill] sm:$0xff] }
 0x57b   : > { %6450 = vmatmul.msk.f32.gmra.mxu1 %vm346_vm0, %v4571_v45  ;;  %v7043_v13 = vpack.i.bf16 %v4298_v16, %v4297_v14  ;;  %v11162_v21 = vmax.f32 %v4020_v27, 0.0  ;;  %v4294_v45 = vmul.f32 %v14006_v63, %v14005_v62  ;;  %v14013_v16 = vld [vmem:[#allocation309_spill] sm:$0xff]  ;;  %v4011_v27 = vadd.f32 %v14014_v7, %v3898_v50  ;;  %v14022_v50 = vld [vmem:[#allocation292_spill] sm:$0xff] }
 0x57c   : > { %v11135_v40 = vmax.f32 %v3972_v30, 0.0  ;;  %v14008_v30 = vld [vmem:[#allocation166_spill] sm:$0xff]  ;;  %v11174_v10 = vmax.f32 %v4017_v11, 0.0  ;;  %v4293_v20 = vmul.f32 %v14013_v16, %v14012_v32  ;;  %v14017_v14 = vld [vmem:[#allocation45_spill] sm:$0xff]  ;;  %v4331_v7 = vrot.slane %v11166_v48, 1 }
 0x57d   : > { %14002 = vst [vmem:[#allocation225_spill] sm:$0xff] %v11162_v21  ;;  %v4014_v41 = vadd.f32 %v14008_v30, %v3901_v19  ;;  %v11209_v30 = vmax.f32 %v4011_v27, 0.0  ;;  %v4094_v27 = vld [vmem:[%s12758_s6 + $0x50] sm:$0xff] }
 0x57e   : > { %13997 = vst [vmem:[#allocation318_spill] sm:$0xff] %v11135_v40  ;;  %v4327_v61 = vrot.slane %v11135_v40, 1  ;;  %v4288_v22 = vmul.f32 %v11135_v40, %v14000_v43  ;;  %v14016_v43 = vld [vmem:[#allocation60_spill] sm:$0xff]  ;;  %v7033_v11 = vpack.i.bf16 %v4294_v45, %v4293_v20  ;;  %v14029_v20 = vld [vmem:[#allocation58_spill] sm:$0xff]  ;;  %5667 = vmatpush.msrb.mxu0 %v4094_v27 }
 0x57f   : > { %14009 = vst [vmem:[#allocation243_spill] sm:$0xff] %v11174_v10 }
 0x580   : > { %v7028_v1 = vpack.i.bf16 %v4288_v22, %v4287_v51  ;;  %v11159_v37 = vsel %vm1203_vm1, %v4325_v53, %v4327_v61  ;;  %v14007_v53 = vld [vmem:[#allocation302_spill] sm:$0xff]  ;;  %v4038_v51 = vadd.f32 %v14015_v23, %v10910_v56  ;;  %v4304_v22 = vmul.f32 %v11162_v21, %v14016_v43  ;;  %v14023_v56 = vld [vmem:[#allocation61_spill] sm:$0xff]  ;;  %14025 = vst [vmem:[#allocation241_spill] sm:$0xff] %v11209_v30 }
 0x581   : > { %v3974_v60 = vpop.f32.mrf.mxu2  ;;  %v4572_v2 = vmul.f32 %v11159_v37, %v14003_v38  ;;  %v4008_v35 = vadd.f32 %v14007_v53, %v3895_v58  ;;  %v14018_v58 = vld [vmem:[#allocation35_spill] sm:$0xff]  ;;  %v4303_v38 = vmul.f32 %v11174_v10, %v14023_v56  ;;  %v14030_v23 = vld [vmem:[#allocation217_spill] sm:$0xff]  ;;  %v14037_v56 = vld [vmem:[#allocation44_spill] sm:$0xff] }
 0x582   : > { %v3975_v29 = vadd.f32 %v3974_v60, %v3862_v28  ;;  %7029 = vrot.lane.b32.xlu1 %v7028_v1, %s7531_s9  ;;  %7044 = vrot.lane.b32.xlu0 %v7043_v13, %s7531_s9  ;;  %v4005_v28 = vadd.f32 %v14010_v4, %v3892_v34  ;;  %v4290_v19 = vmul.f32 %v11166_v48, %v14018_v58  ;;  %v11197_v1 = vmax.f32 %v4014_v41, 0.0  ;;  %v14021_v13 = vld [vmem:[#allocation273_spill] sm:$0xff]  ;;  %v14026_v41 = vld [vmem:[#allocation238_spill] sm:$0xff]  ;;  %v14027_v4 = vld [vmem:[#allocation152_spill] sm:$0xff] }
 0x583   : > { %6451 = vmatmul.msk.f32.gmra.mxu1 %vm346_vm0, %v4572_v2  ;;  %v11195_v34 = vmax.f32 %v4008_v35, 0.0  ;;  %v4035_v60 = vadd.f32 %v14022_v50, %v14021_v13  ;;  %v3797_v2 = vadd.f32 %v10766_v42, %v3796_v17  ;;  %v11211_v45 = vmax.f32 %v4038_v51, 0.0  ;;  %v14031_v51 = vld [vmem:[#allocation185_spill] sm:$0xff]  ;;  %v14034_v58 = vld [vmem:[#allocation139_spill] sm:$0xff] }
 0x584   : > { %v11181_v18 = vmax.f32 %v3975_v29, 0.0  ;;  %14020 = vst [vmem:[#allocation328_spill] sm:$0xff] %v11197_v1  ;;  %v11204_v29 = vmax.f32 %v4005_v28, 0.0  ;;  %v7063_v35 = vpack.i.bf16 %v4304_v22, %v4303_v38  ;;  %v4026_v43 = vadd.f32 %v14031_v51, %v14030_v23  ;;  %v14032_v22 = vld [vmem:[#allocation276_spill] sm:$0xff]  ;;  %v14036_v50 = vld [vmem:[#allocation57_spill] sm:$0xff]  ;;  %v14042_v23 = vld [vmem:[#allocation67_spill] sm:$0xff] }
 0x585   : > { %14019 = vst [vmem:[#allocation229_spill] sm:$0xff] %v11195_v34  ;;  %v3910_v32 = vadd.f32 %v14027_v4, %v3797_v2  ;;  %v11218_v42 = vmax.f32 %v4035_v60, 0.0  ;;  %v4300_v17 = vmul.f32 %v11195_v34, %v14029_v20  ;;  %v4301_v60 = vmul.f32 %v11209_v30, %v14036_v50  ;;  %v14038_v2 = vld [vmem:[#allocation66_spill] sm:$0xff]  ;;  %v14041_v4 = vld [vmem:[#allocation219_spill] sm:$0xff] }
 0x586   : > { %14011 = vst [vmem:[#allocation321_spill] sm:$0xff] %v11181_v18  ;;  %v4329_v31 = vrot.slane %v11181_v18, 1  ;;  %v4289_v47 = vmul.f32 %v11181_v18, %v14017_v14  ;;  %v14033_v14 = vld [vmem:[#allocation285_spill] sm:$0xff]  ;;  %v4299_v38 = vmul.f32 %v11204_v29, %v14037_v56 }
 0x587   : > { %14024 = vst [vmem:[#allocation244_spill] sm:$0xff] %v11204_v29  ;;  %v4309_v51 = vmul.f32 %v11218_v42, %v14042_v23  ;;  %v14052_v23 = vld [vmem:[#allocation320_spill] sm:$0xff] }
 0x588   : > { %v7053_v62 = vpack.i.bf16 %v4290_v19, %v4289_v47  ;;  %v11207_v53 = vsel %vm1203_vm1, %v4327_v61, %v4329_v31  ;;  %v14028_v61 = vld [vmem:[#allocation47_spill] sm:$0xff]  ;;  %v4032_v47 = vadd.f32 %v14033_v14, %v14032_v22  ;;  %v11236_v19 = vmul.f32 %v11159_v37, %v14034_v58 }
 0x589   : > { %v4573_v3 = vmul.f32 %v11207_v53, %v14026_v41  ;;  %v4302_v28 = vmul.f32 %v11197_v1, %v14028_v61  ;;  %v11252_v20 = vsel %vm1203_vm1, %v4329_v31, %v4331_v7  ;;  %v11258_v22 = vmax.f32 %v4026_v43, 0.0  ;;  %v14046_v43 = vld [vmem:[#allocation53_spill] sm:$0xff] }
 0x58a   : > { %7054 = vrot.lane.b32.xlu2 %v7053_v62, %s7531_s9  ;;  %7034 = vrot.lane.b32.xlu1 %v7033_v11, %s7531_s9  ;;  %v14035_v11 = vld [vmem:[#allocation138_spill] sm:$0xff]  ;;  %v4310_v62 = vmul.f32 %v11211_v45, %v14038_v2  ;;  %v11260_v14 = vmax.f32 %v4032_v47, 0.0 }
 0x58b   : > { %7064 = vrot.lane.b32.xlu0 %v7063_v35, %s7531_s9  ;;  %6452 = vmatmul.msk.f32.gmra.mxu1 %vm346_vm0, %v4573_v3  ;;  %v11240_v13 = vmul.f32 %v11207_v53, %v14035_v11  ;;  %v14039_v35 = vld [vmem:[#allocation218_spill] sm:$0xff]  ;;  %v14040_v3 = vld [vmem:[#allocation308_spill] sm:$0xff]  ;;  %14043 = vst [vmem:[#allocation342_spill] sm:$0xff] %v11258_v22  ;;  %v7058_v58 = vpack.i.bf16 %v4302_v28, %v4301_v60  ;;  %v4109_v28 = vld [vmem:[%s12758_s6 + $0xc8] sm:$0xff] }
 0x58c   : > { %v4023_v41 = vadd.f32 %v14039_v35, %v3910_v32  ;;  %v4029_v61 = vadd.f32 %v14041_v4, %v14040_v3  ;;  %v7048_v11 = vpack.i.bf16 %v4300_v17, %v4299_v38  ;;  %v7078_v50 = vpack.i.bf16 %v4310_v62, %v4309_v51  ;;  %v14044_v32 = vld [vmem:[#allocation272_spill] sm:$0xff]  ;;  %v4093_v17 = vld [vmem:[%s12758_s6 + $0x48] sm:$0xff]  ;;  %5781 = vmatpush.msrb.mxu3 %v4109_v28 }
 0x58d   : > { %v4574_v56 = vmul.f32 %v11252_v20, %v14044_v32  ;;  %v4333_v35 = vrot.slane %v11090_v26, 1  ;;  %v4308_v47 = vmul.f32 %v11260_v14, %v14046_v43  ;;  %v14047_v60 = vld [vmem:[#allocation64_spill] sm:$0xff]  ;;  %v14048_v62 = vrot.slane %v10960_v57, 1  ;;  %5668 = vmatpush.msrb.mxu0 %v4093_v17  ;;  %v14055_v43 = vld [vmem:[#allocation73_spill] sm:$0xff] }
 0x58e   : > { %v11264_v2 = vmax.f32 %v4023_v41, 0.0  ;;  %v11266_v31 = vmax.f32 %v4029_v61, 0.0  ;;  %v4306_v38 = vmul.f32 %v11258_v22, %v14047_v60  ;;  %v14050_v3 = vld [vmem:[#allocation72_spill] sm:$0xff]  ;;  %v14051_v61 = vld [vmem:[#allocation287_spill] sm:$0xff] }
 0x58f   : > { %v11288_v41 = vsel %vm1203_vm1, %v14048_v62, %v4319_v5  ;;  %v4413_v4 = vmul.f32 %v11058_v9, %v14050_v3  ;;  %v4041_v51 = vadd.f32 %v14052_v23, %v14051_v61  ;;  %v14056_v62 = vld [vmem:[#allocation271_spill] sm:$0xff]  ;;  %v4335_v61 = vrot.slane %v11082_v33, 1 }
 0x590   : > { %14045 = vst [vmem:[#allocation333_spill] sm:$0xff] %v11264_v2  ;;  %v4412_v5 = vmul.f32 %v11288_v41, %v14055_v43  ;;  %v14059_v23 = vld [vmem:[#allocation79_spill] sm:$0xff] }
 0x591   : > { %14049 = vst [vmem:[#allocation226_spill] sm:$0xff] %v11288_v41  ;;  %v11305_v27 = vmax.f32 %v4041_v51, 0.0  ;;  %v4418_v51 = vmul.f32 %v11252_v20, %v14059_v23 }
 0x592   : > { %7059 = vrot.lane.b32.xlu2 %v7058_v58, %s7531_s9  ;;  %7049 = vrot.lane.b32.xlu1 %v7048_v11, %s7531_s9  ;;  %v14053_v58 = vld [vmem:[#allocation63_spill] sm:$0xff]  ;;  %v7093_v60 = vpack.i.bf16 %v4413_v4, %v4412_v5  ;;  %v11326_v5 = vsel %vm1203_vm1, %v4333_v35, %v4335_v61 }
 0x593   : > { %7079 = vrot.lane.b32.xlu0 %v7078_v50, %s7531_s9  ;;  %6453 = vmatmul.msk.f32.gmra.mxu1 %vm346_vm0, %v4574_v56  ;;  %v4307_v11 = vmul.f32 %v11266_v31, %v14053_v58  ;;  %v14054_v50 = vld [vmem:[#allocation50_spill] sm:$0xff]  ;;  %v11299_v56 = vsel %vm1203_vm1, %v4331_v7, %v4333_v35  ;;  %v14057_v7 = vld [vmem:[#allocation59_spill] sm:$0xff]  ;;  %v14064_v35 = vld [vmem:[#allocation65_spill] sm:$0xff] }
 0x594   : > { %v4305_v32 = vmul.f32 %v11264_v2, %v14054_v50  ;;  %v4575_v3 = vmul.f32 %v11299_v56, %v14056_v62  ;;  %v4108_v58 = vld [vmem:[%s12758_s6 + $0xc0] sm:$0xff]  ;;  %v4417_v23 = vmul.f32 %v11207_v53, %v14064_v35 }
 0x595   : > { %v7073_v28 = vpack.i.bf16 %v4308_v47, %v4307_v11  ;;  %v4411_v47 = vmul.f32 %v10979_v6, %v14057_v7  ;;  %v14060_v11 = vld [vmem:[#allocation69_spill] sm:$0xff]  ;;  %5782 = vmatpush.msrb.mxu3 %v4108_v58  ;;  %v14063_v7 = vld [vmem:[#allocation247_spill] sm:$0xff]  ;;  %v14065_v58 = vld [vmem:[#allocation76_spill] sm:$0xff] }
 0x596   : > { %v7068_v17 = vpack.i.bf16 %v4306_v38, %v4305_v32  ;;  %v14058_v38 = vld [vmem:[#allocation70_spill] sm:$0xff]  ;;  %v4410_v50 = vmul.f32 %v10973_v44, %v14060_v11  ;;  %v14061_v32 = vld [vmem:[#allocation56_spill] sm:$0xff]  ;;  %v4415_v11 = vmul.f32 %v11114_v24, %v14065_v58  ;;  %v13204_v44 = vrot.slane %v11111_v55, 1 }
 0x597   : > { %v4312_v4 = vmul.f32 %v10981_v39, %v14058_v38  ;;  %v4311_v43 = vmul.f32 %v11305_v27, %v14061_v32  ;;  %v4576_v38 = vmul.f32 %v11326_v5, %v14063_v7  ;;  %v14068_v32 = vld [vmem:[#allocation75_spill] sm:$0xff] }
 0x599   : > { %v7083_v62 = vpack.i.bf16 %v4312_v4, %v4311_v43  ;;  %v14067_v4 = vld [vmem:[#allocation260_spill] sm:$0xff]  ;;  %v4416_v43 = vmul.f32 %v11159_v37, %v14068_v32  ;;  %v13199_v37 = vrot.slane %v10946_v49, 7  ;;  %v14076_v32 = vld [vmem:[#allocation82_spill] sm:$0xff]  ;;  %v14085_v49 = vrot.slane %v10991_v52, 7 }
 0x59a   : > { %7074 = vrot.lane.b32.xlu2 %v7073_v28, %s7531_s9  ;;  %7069 = vrot.lane.b32.xlu1 %v7068_v17, %s7531_s9  ;;  %v14062_v28 = vld [vmem:[#allocation78_spill] sm:$0xff] }
 0x59b   : > { %7094 = vrot.lane.b32.xlu0 %v7093_v60, %s7532_s18  ;;  %6454 = vmatmul.msk.f32.gmra.mxu1 %vm346_vm0, %v4575_v3  ;;  %v4419_v17 = vmul.f32 %v11299_v56, %v14062_v28  ;;  %v7088_v60 = vpack.i.bf16 %v4411_v47, %v4410_v50  ;;  %v14066_v47 = vld [vmem:[#allocation84_spill] sm:$0xff]  ;;  %v4092_v50 = vld [vmem:[%s12758_s6 + $0x40] sm:$0xff] }
 0x59c   : > { %v14069_v28 = vld [vmem:[#allocation62_spill] sm:$0xff]  ;;  %5669 = vmatpush.msrb.mxu0 %v4092_v50 }
 0x59d   : > { %v7108_v3 = vpack.i.bf16 %v4419_v17, %v4418_v51  ;;  %v4425_v51 = vmul.f32 %v14067_v4, %v14066_v47  ;;  %v4414_v17 = vmul.f32 %v11086_v36, %v14069_v28  ;;  %v14073_v47 = vld [vmem:[#allocation280_spill] sm:$0xff]  ;;  %v14077_v28 = vrot.slane %v10960_v57, 7 }
 0x59f   : > { %v7098_v35 = vpack.i.bf16 %v4415_v11, %v4414_v17  ;;  %v14074_v11 = vld [vmem:[#allocation71_spill] sm:$0xff]  ;;  %v4163_v17 = vrot.slane %v11031_v59, 7 }
 0x5a2   : > { %7089 = vrot.lane.b32.xlu2 %v7088_v60, %s7532_s18  ;;  %7084 = vrot.lane.b32.xlu1 %v7083_v62, %s7531_s9  ;;  %v14070_v60 = vrot.slane %v14013_v16, 1  ;;  %v14071_v62 = vld [vmem:[#allocation85_spill] sm:$0xff] }
 0x5a3   : > { %7109 = vrot.lane.b32.xlu0 %v7108_v3, %s7532_s18  ;;  %6455 = vmatmul.msk.f32.gmra.mxu1 %vm346_vm0, %v4576_v38  ;;  %v14072_v3 = vld [vmem:[#allocation207_spill] sm:$0xff]  ;;  %v7103_v38 = vpack.i.bf16 %v4417_v23, %v4416_v43  ;;  %v4091_v23 = vld [vmem:[%s12758_s6 + $0x38] sm:$0xff] }
 0x5a4   : > { %v11352_v53 = vsel %vm1203_vm1, %v4335_v61, %v14070_v60  ;;  %v4424_v7 = vmul.f32 %v14072_v3, %v14071_v62  ;;  %v4107_v61 = vld [vmem:[%s12758_s6 + $0xb8] sm:$0xff]  ;;  %5670 = vmatpush.msrb.mxu0 %v4091_v23  ;;  %v14079_v60 = vld [vmem:[#allocation199_spill] sm:$0xff] }
 0x5a5   : > { %v4577_v6 = vmul.f32 %v11352_v53, %v14073_v47  ;;  %v4421_v43 = vmul.f32 %v11352_v53, %v14076_v32  ;;  %5783 = vmatpush.msrb.mxu3 %v4107_v61  ;;  %v4538_v62 = vmul.f32 %v11031_v59, %v14079_v60  ;;  %v14084_v23 = vld [vmem:[#allocation279_spill] sm:$0xff]  ;;  %v11395_v60 = vsel %vm627_vm2, %v14085_v49, %v4163_v17  ;;  %v4106_v49 = vld [vmem:[%s12758_s6 + $0xb0] sm:$0xff] }
 0x5a6   : > { %v7123_v58 = vpack.i.bf16 %v4425_v51, %v4424_v7  ;;  %v14075_v51 = vld [vmem:[#allocation317_spill] sm:$0xff] }
 0x5a7   : > { %v4423_v50 = vmul.f32 %v14075_v51, %v14074_v11  ;;  %v14080_v7 = vld [vmem:[#allocation81_spill] sm:$0xff]  ;;  %v14083_v11 = vld [vmem:[#allocation103_spill] sm:$0xff]  ;;  %5784 = vmatpush.msrb.mxu3 %v4106_v49  ;;  %v14093_v49 = vld [vmem:[#allocation256_spill] sm:$0xff] }
 0x5aa   : > { %7104 = vrot.lane.b32.xlu2 %v7103_v38, %s7532_s18  ;;  %7099 = vrot.lane.b32.xlu1 %v7098_v35, %s7532_s18  ;;  %v14081_v38 = vld [vmem:[#allocation307_spill] sm:$0xff] }
 0x5ab   : > { %7124 = vrot.lane.b32.xlu0 %v7123_v58, %s7532_s18  ;;  %6456 = vmatmul.msk.f32.gmra.mxu1 %vm346_vm0, %v4577_v6  ;;  %v11378_v6 = vsel %vm627_vm2, %v13199_v37, %v14077_v28  ;;  %v4422_v35 = vmul.f32 %v14081_v38, %v14080_v7  ;;  %v14082_v58 = vld [vmem:[#allocation68_spill] sm:$0xff]  ;;  %v4578_v57 = vmul.f32 %v14081_v38, %v14084_v23  ;;  %v14088_v38 = vld [vmem:[#allocation165_spill] sm:$0xff]  ;;  %v14092_v23 = vld [vmem:[#allocation135_spill] sm:$0xff] }
 0x5ac   : > { %14078 = vst [vmem:[#allocation296_spill] sm:$0xff] %v11378_v6  ;;  %v4420_v47 = vmul.f32 %v11326_v5, %v14082_v58  ;;  %v4442_v32 = vmul.f32 %v11378_v6, %v14083_v11 }
 0x5ad   : > { %v7118_v28 = vpack.i.bf16 %v4423_v50, %v4422_v35  ;;  %v14086_v50 = vrot.slane %v10813_v54, 1  ;;  %v14089_v35 = vld [vmem:[#allocation125_spill] sm:$0xff] }
 0x5ae   : > { %v7113_v37 = vpack.i.bf16 %v4421_v43, %v4420_v47  ;;  %v7138_v61 = vpack.i.bf16 %v4442_v32, %v4538_v62  ;;  %v14087_v62 = vld [vmem:[#allocation136_spill] sm:$0xff]  ;;  %v4477_v58 = vmul.f32 %v11114_v24, %v14089_v35  ;;  %v14090_v47 = vld [vmem:[#allocation122_spill] sm:$0xff] }
 0x5af   : > { %v11406_v43 = vsel %vm1203_vm1, %v14086_v50, %v13204_v44  ;;  %v4475_v7 = vmul.f32 %v11058_v9, %v14087_v62  ;;  %v4474_v11 = vmul.f32 %v11288_v41, %v14090_v47  ;;  %v14091_v32 = vld [vmem:[#allocation74_spill] sm:$0xff]  ;;  %v4476_v9 = vmul.f32 %v11086_v36, %v14092_v23  ;;  %v4090_v36 = vld [vmem:[%s12758_s6 + $0x30] sm:$0xff] }
 0x5b0   : > { %v4579_v44 = vmul.f32 %v14075_v51, %v14093_v49  ;;  %v4183_v51 = vrot.slane %v10782_v0, 7  ;;  %5671 = vmatpush.msrb.mxu0 %v4090_v36  ;;  %v14100_v49 = vld [vmem:[#allocation155_spill] sm:$0xff] }
 0x5b1   : > { %v7133_v50 = vpack.i.bf16 %v4475_v7, %v4474_v11  ;;  %v14096_v11 = vld [vmem:[#allocation6_spill] sm:$0xff] }
 0x5b2   : > { %7119 = vrot.lane.b32.xlu2 %v7118_v28, %s7532_s18  ;;  %7114 = vrot.lane.b32.xlu1 %v7113_v37, %s7532_s18  ;;  %v4506_v37 = vmul.f32 %v11395_v60, %v14088_v38  ;;  %v4426_v28 = vmul.f32 %v11406_v43, %v14091_v32  ;;  %v7153_v38 = vpack.i.bf16 %v4477_v58, %v4476_v9  ;;  %v14095_v58 = vld [vmem:[#allocation169_spill] sm:$0xff]  ;;  %v14098_v9 = vld [vmem:[#allocation202_spill] sm:$0xff] }
 0x5b3   : > { %7139 = vrot.lane.b32.xlu0 %v7138_v61, %s7533_s20  ;;  %6457 = vmatmul.msk.f32.gmra.mxu1 %vm346_vm0, %v4578_v57  ;;  %v4167_v57 = vrot.slane %v11098_v46, 7  ;;  %v4165_v61 = vrot.slane %v11069_v15, 7  ;;  %v14097_v32 = vld [vmem:[#allocation9_spill] sm:$0xff] }
 0x5b4   : > { %v7128_v62 = vpack.i.bf16 %v4506_v37, %v4426_v28  ;;  %v14094_v37 = vld [vmem:[#allocation198_spill] sm:$0xff]  ;;  %v4171_v28 = vrot.slane %v11181_v18, 7 }
 0x5b5   : > { %v11428_v59 = vsel %vm627_vm2, %v4165_v61, %v4167_v57  ;;  %v11435_v24 = vsel %vm627_vm2, %v4163_v17, %v4165_v61  ;;  %v4539_v35 = vmul.f32 %v11069_v15, %v14094_v37  ;;  %v4252_v17 = vmul.f32 %v11020_v8, %v14097_v32  ;;  %v14101_v32 = vld [vmem:[#allocation106_spill] sm:$0xff]  ;;  %v14104_v15 = vld [vmem:[#allocation283_spill] sm:$0xff] }
 0x5b6   : > { %v4508_v47 = vmul.f32 %v11428_v59, %v14095_v58  ;;  %v4507_v37 = vmul.f32 %v11435_v24, %v14100_v49  ;;  %v4445_v41 = vmul.f32 %v11435_v24, %v14101_v32  ;;  %v13210_v49 = vrot.slane %v11090_v26, 7 }
 0x5b7   : > { %v4580_v58 = vmul.f32 %v14072_v3, %v14104_v15  ;;  %v14105_v32 = vrot.slane %v14006_v63, 7 }
 0x5ba   : > { %7134 = vrot.lane.b32.xlu2 %v7133_v50, %s7531_s9  ;;  %7129 = vrot.lane.b32.xlu1 %v7128_v62, %s7532_s18  ;;  %v4541_v50 = vmul.f32 %v11135_v40, %v14098_v9  ;;  %v14099_v62 = vld [vmem:[#allocation102_spill] sm:$0xff] }
 0x5bb   : > { %7154 = vrot.lane.b32.xlu0 %v7153_v38, %s7531_s9  ;;  %6458 = vmatmul.msk.f32.gmra.mxu1 %vm346_vm0, %v4579_v44  ;;  %v4251_v44 = vmul.f32 %v11378_v6, %v14096_v11  ;;  %v4443_v38 = vmul.f32 %v11020_v8, %v14099_v62  ;;  %v4169_v11 = vrot.slane %v11135_v40, 7  ;;  %v7143_v8 = vpack.i.bf16 %v4508_v47, %v4507_v37 }
 0x5bc   : > { %v7015_v7 = vpop.permute.xlu2 %7014  ;;  %v4173_v62 = vrot.slane %v11166_v48, 7  ;;  %v7168_v36 = vpack.i.bf16 %v4445_v41, %v4541_v50  ;;  %v14106_v41 = vrot.slane %v10810_v25, 7 }
 0x5bd   : > { %v7017_v61 = vunpack.i.h.bf16 %v7015_v7  ;;  %v7016_v23 = vunpack.i.l.bf16 %v7015_v7  ;;  %v7148_v6 = vpack.i.bf16 %v4443_v38, %v4539_v35  ;;  %v11472_v40 = vsel %vm627_vm2, %v4169_v11, %v4171_v28 }
 0x5be   : > { %v11482_v35 = vsel %vm627_vm2, %v4171_v28, %v4173_v62  ;;  %v11487_v47 = vsel %vm627_vm2, %v4183_v51, %v14106_v41  ;;  %v11492_v15 = vsel %vm627_vm2, %v4167_v57, %v4169_v11  ;;  %v4089_v11 = vld [vmem:[%s12758_s6 + $0x28] sm:$0xff] }
 0x5bf   : > { %v11462_v7 = vsel %vm346_vm0, %v4251_v44, %v7016_v23  ;;  %v11465_v9 = vsel %vm346_vm0, %v4252_v17, %v7017_v61  ;;  %v11477_v44 = vsel %vm627_vm2, %v14105_v32, %v4183_v51  ;;  %v14107_v17 = vld [vmem:[#allocation158_spill] sm:$0xff]  ;;  %v14108_v61 = vld [vmem:[#allocation188_spill] sm:$0xff]  ;;  %v11501_v23 = vsel %vm627_vm2, %v4173_v62, %v13210_v49  ;;  %5672 = vmatpush.msrb.mxu0 %v4089_v11  ;;  %v14120_v11 = vld [vmem:[#allocation263_spill] sm:$0xff] }
 0x5c0   : > { %14102 = vst [vmem:[#allocation253_spill] sm:$0xff] %v11462_v7  ;;  %v4540_v28 = vmul.f32 %v11098_v46, %v14108_v61  ;;  %v14109_v51 = vld [vmem:[#allocation8_spill] sm:$0xff]  ;;  %v14114_v61 = vld [vmem:[#allocation171_spill] sm:$0xff]  ;;  %v14115_v7 = vld [vmem:[#allocation282_spill] sm:$0xff] }
 0x5c1   : > { %14103 = vst [vmem:[#allocation251_spill] sm:$0xff] %v11465_v9  ;;  %v4263_v50 = vmul.f32 %v11477_v44, %v14109_v51  ;;  %v14112_v32 = vld [vmem:[#allocation168_spill] sm:$0xff]  ;;  %v4512_v51 = vmul.f32 %v11501_v23, %v14114_v61 }
 0x5c2   : > { %7149 = vrot.lane.b32.xlu2 %v7148_v6, %s7533_s20  ;;  %7144 = vrot.lane.b32.xlu1 %v7143_v8, %s7532_s18  ;;  %v4510_v6 = vmul.f32 %v11472_v40, %v14107_v17  ;;  %v14111_v8 = vld [vmem:[#allocation22_spill] sm:$0xff]  ;;  %v4509_v41 = vmul.f32 %v11492_v15, %v14112_v32  ;;  %v14113_v17 = vld [vmem:[#allocation92_spill] sm:$0xff]  ;;  %v4581_v32 = vmul.f32 %v14067_v4, %v14115_v7 }
 0x5c3   : > { %7169 = vrot.lane.b32.xlu0 %v7168_v36, %s7533_s20  ;;  %6459 = vmatmul.msk.f32.gmra.mxu1 %vm346_vm0, %v4580_v58  ;;  %v14110_v36 = vld [vmem:[#allocation172_spill] sm:$0xff]  ;;  %v4105_v58 = vld [vmem:[%s12758_s6 + $0xa8] sm:$0xff]  ;;  %v4264_v62 = vmul.f32 %v11487_v47, %v14111_v8 }
 0x5c4   : > { %v7040_v3 = vpop.permute.xlu2 %7039  ;;  %v4511_v57 = vmul.f32 %v11482_v35, %v14110_v36  ;;  %5785 = vmatpush.msrb.mxu3 %v4105_v58  ;;  %v7163_v46 = vpack.i.bf16 %v4510_v6, %v4509_v41  ;;  %v14116_v58 = vld [vmem:[#allocation201_spill] sm:$0xff]  ;;  %v4349_v41 = vrot.slane %v11204_v29, 1 }
 0x5c5   : > { %v7042_v38 = vunpack.i.h.bf16 %v7040_v3  ;;  %v7041_v37 = vunpack.i.l.bf16 %v7040_v3  ;;  %v4444_v3 = vmul.f32 %v11395_v60, %v14113_v17  ;;  %v14118_v6 = vld [vmem:[#allocation105_spill] sm:$0xff]  ;;  %v4104_v17 = vld [vmem:[%s12758_s6 + $0xa0] sm:$0xff] }
 0x5c6   : > { %v7183_v8 = vpack.i.bf16 %v4512_v51, %v4511_v57  ;;  %v14119_v57 = vld [vmem:[#allocation206_spill] sm:$0xff]  ;;  %v14123_v51 = vld [vmem:[#allocation95_spill] sm:$0xff]  ;;  %5786 = vmatpush.msrb.mxu3 %v4104_v17  ;;  %v4351_v17 = vrot.slane %v11195_v34, 1 }
 0x5c7   : > { %v11522_v36 = vsel %vm346_vm0, %v4263_v50, %v7041_v37  ;;  %v11525_v49 = vsel %vm346_vm0, %v4264_v62, %v7042_v38  ;;  %v7158_v9 = vpack.i.bf16 %v4444_v3, %v4540_v28  ;;  %v4542_v50 = vmul.f32 %v11181_v18, %v14116_v58  ;;  %v14117_v37 = vld [vmem:[#allocation109_spill] sm:$0xff]  ;;  %v14122_v3 = vld [vmem:[#allocation128_spill] sm:$0xff]  ;;  %v14125_v58 = vld [vmem:[#allocation142_spill] sm:$0xff] }
 0x5c8   : > { %v4448_v38 = vmul.f32 %v11472_v40, %v14117_v37  ;;  %v4446_v28 = vmul.f32 %v11428_v59, %v14118_v6  ;;  %v4544_v4 = vmul.f32 %v11090_v26, %v14119_v57  ;;  %v14121_v62 = vpack.i.bf16 %v11240_v13, %v11236_v19  ;;  %v14126_v37 = vld [vmem:[#allocation191_spill] sm:$0xff]  ;;  %v14128_v57 = vld [vmem:[#allocation141_spill] sm:$0xff] }
 0x5c9   : > { %v4480_v61 = vmul.f32 %v11252_v20, %v14122_v3  ;;  %v4179_v13 = vrot.slane %v14013_v16, 7  ;;  %v14127_v6 = vrot.slane %v11111_v55, 1  ;;  %v4088_v20 = vld [vmem:[%s12758_s6 + $0x20] sm:$0xff] }
 0x5ca   : > { %7164 = vrot.lane.b32.xlu2 %v7163_v46, %s7532_s18  ;;  %7159 = vrot.lane.b32.xlu1 %v7158_v9, %s7533_s20  ;;  %v7178_v7 = vpack.i.bf16 %v4446_v28, %v4542_v50  ;;  %v7198_v46 = vpack.i.bf16 %v4448_v38, %v4544_v4  ;;  %v4582_v9 = vmul.f32 %v11406_v43, %v14120_v11  ;;  %v4177_v4 = vrot.slane %v11082_v33, 7  ;;  %v14129_v11 = vld [vmem:[#allocation290_spill] sm:$0xff] }
 0x5cb   : > { %7184 = vrot.lane.b32.xlu0 %v7183_v8, %s7532_s18  ;;  %6460 = vmatmul.msk.f32.gmra.mxu1 %vm346_vm0, %v4581_v32  ;;  %v4447_v8 = vmul.f32 %v11492_v15, %v14123_v51  ;;  %v14124_v32 = vld [vmem:[#allocation131_spill] sm:$0xff]  ;;  %v4481_v50 = vmul.f32 %v11299_v56, %v14125_v58  ;;  %v4543_v38 = vmul.f32 %v11166_v48, %v14126_v37  ;;  %v14133_v58 = vld [vmem:[#allocation210_spill] sm:$0xff]  ;;  %v14134_v37 = vld [vmem:[#allocation205_spill] sm:$0xff] }
 0x5cc   : > { %v4483_v19 = vmul.f32 %v11352_v53, %v14124_v32  ;;  %v11568_v28 = vsel %vm1203_vm1, %v14127_v6, %v4349_v41  ;;  %v4482_v53 = vmul.f32 %v11326_v5, %v14128_v57  ;;  %5673 = vmatpush.msrb.mxu0 %v4088_v20  ;;  %v14130_v5 = vrot.slane %v11090_v26, 7  ;;  %v14135_v6 = vld [vmem:[#allocation161_spill] sm:$0xff]  ;;  %v14148_v26 = vld [vmem:[#allocation174_spill] sm:$0xff] }
 0x5cd   : > { %v7188_v56 = vpack.i.bf16 %v4447_v8, %v4543_v38  ;;  %v14132_v8 = vld [vmem:[#allocation175_spill] sm:$0xff]  ;;  %v4545_v38 = vmul.f32 %v11082_v33, %v14134_v37  ;;  %v11603_v57 = vsel %vm1203_vm1, %v4349_v41, %v4351_v17  ;;  %v14138_v41 = vld [vmem:[#allocation289_spill] sm:$0xff]  ;;  %v14141_v37 = vld [vmem:[#allocation194_spill] sm:$0xff]  ;;  %v13218_v33 = vrot.slane %v11195_v34, 7 }
 0x5ce   : > { %v11589_v3 = vsel %vm627_vm2, %v14130_v5, %v4177_v4  ;;  %v14149_v48 = vld [vmem:[#allocation178_spill] sm:$0xff] }
 0x5cf   : > { %v4513_v20 = vmul.f32 %v11589_v3, %v14135_v6  ;;  %v4195_v6 = vrot.slane %v11209_v30, 7 }
 0x5d2   : > { %7179 = vrot.lane.b32.xlu2 %v7178_v7, %s7533_s20  ;;  %7174 = vrot.lane.b32.xlu1 %v14121_v62, %s7531_s9  ;;  %v7193_v7 = vpack.i.bf16 %v4481_v50, %v4480_v61  ;;  %v11579_v62 = vsel %vm627_vm2, %v4177_v4, %v4179_v13  ;;  %v14131_v61 = vld [vmem:[#allocation108_spill] sm:$0xff]  ;;  %v4547_v50 = vmul.f32 %v14006_v63, %v14133_v58 }
 0x5d3   : > { %7199 = vrot.lane.b32.xlu0 %v7198_v46, %s7533_s20  ;;  %6461 = vmatmul.msk.f32.gmra.mxu1 %vm346_vm0, %v4582_v9  ;;  %v7213_v46 = vpack.i.bf16 %v4483_v19, %v4482_v53  ;;  %v4583_v9 = vmul.f32 %v11568_v28, %v14129_v11  ;;  %v4449_v51 = vmul.f32 %v11482_v35, %v14131_v61  ;;  %v13212_v19 = vrot.slane %v10813_v54, 7  ;;  %v4103_v53 = vld [vmem:[%s12758_s6 + $0x98] sm:$0xff]  ;;  %v14136_v4 = vld [vmem:[#allocation112_spill] sm:$0xff] }
 0x5d4   : > { %v4514_v32 = vmul.f32 %v11579_v62, %v14132_v8  ;;  %5787 = vmatpush.msrb.mxu3 %v4103_v53  ;;  %v14137_v11 = vrot.slane %v10810_v25, 7  ;;  %v4584_v61 = vmul.f32 %v11603_v57, %v14138_v41  ;;  %v14139_v8 = vrot.slane %v14006_v63, 7  ;;  %v14142_v53 = vld [vmem:[#allocation164_spill] sm:$0xff]  ;;  %v14144_v41 = vld [vmem:[#allocation2_spill] sm:$0xff] }
 0x5da   : > { %7194 = vrot.lane.b32.xlu2 %v7193_v7, %s7531_s9  ;;  %7189 = vrot.lane.b32.xlu1 %v7188_v56, %s7533_s20  ;;  %v4451_v7 = vmul.f32 %v11589_v3, %v14136_v4  ;;  %v7208_v56 = vpack.i.bf16 %v4449_v51, %v4545_v38  ;;  %v11624_v51 = vsel %vm627_vm2, %v4179_v13, %v14139_v8  ;;  %v14143_v4 = vld [vmem:[#allocation177_spill] sm:$0xff] }
 0x5db   : > { %7214 = vrot.lane.b32.xlu0 %v7213_v46, %s7531_s9  ;;  %6462 = vmatmul.msk.f32.gmra.mxu1 %vm346_vm0, %v4583_v9  ;;  %v7203_v46 = vpack.i.bf16 %v4514_v32, %v4513_v20  ;;  %v11615_v9 = vsel %vm627_vm2, %v14137_v11, %v13212_v19  ;;  %v14140_v32 = vld [vmem:[#allocation98_spill] sm:$0xff]  ;;  %v4546_v38 = vmul.f32 %v14013_v16, %v14141_v37 }
 0x5dc   : > { %v7228_v5 = vpack.i.bf16 %v4451_v7, %v4547_v50  ;;  %v4450_v58 = vmul.f32 %v11501_v23, %v14140_v32  ;;  %v4353_v50 = vrot.slane %v11209_v30, 1  ;;  %v4516_v13 = vmul.f32 %v11477_v44, %v14142_v53  ;;  %v14145_v32 = vld [vmem:[#allocation3_spill] sm:$0xff]  ;;  %v14147_v53 = vld [vmem:[#allocation16_spill] sm:$0xff] }
 0x5dd   : > { %v4518_v7 = vmul.f32 %v11615_v9, %v14143_v4  ;;  %v4253_v8 = vmul.f32 %v11395_v60, %v14144_v41  ;;  %v4258_v19 = vmul.f32 %v11482_v35, %v14147_v53  ;;  %v4517_v60 = vmul.f32 %v11487_v47, %v14149_v48  ;;  %v14157_v53 = vld [vmem:[#allocation5_spill] sm:$0xff] }
 0x5e2   : > { %7209 = vrot.lane.b32.xlu2 %v7208_v56, %s7533_s20  ;;  %7204 = vrot.lane.b32.xlu1 %v7203_v46, %s7532_s18  ;;  %v4087_v56 = vld [vmem:[%s12758_s6 + $0x18] sm:$0xff] }
 0x5e3   : > { %7229 = vrot.lane.b32.xlu0 %v7228_v5, %s7533_s20  ;;  %6463 = vmatmul.msk.f32.gmra.mxu1 %vm346_vm0, %v4584_v61  ;;  %v4254_v5 = vmul.f32 %v11435_v24, %v14145_v32  ;;  %v14146_v61 = vld [vmem:[#allocation4_spill] sm:$0xff]  ;;  %v11656_v24 = vsel %vm1203_vm1, %v4351_v17, %v4353_v50  ;;  %v7243_v32 = vpack.i.bf16 %v4518_v7, %v4517_v60 }
 0x5e4   : > { %v7055_v46 = vpop.permute.xlu2 %7054  ;;  %v7020_v11 = vpop.permute.xlu0 %7019  ;;  %5674 = vmatpush.msrb.mxu0 %v4087_v56  ;;  %v4257_v37 = vmul.f32 %v11472_v40, %v14146_v61  ;;  %v4515_v56 = vmul.f32 %v11624_v51, %v14148_v26  ;;  %v7218_v26 = vpack.i.bf16 %v4450_v58, %v4546_v38  ;;  %v14152_v61 = vld [vmem:[#allocation270_spill] sm:$0xff]  ;;  %v14154_v58 = vld [vmem:[#allocation15_spill] sm:$0xff] }
 0x5e5   : > { %v7057_v4 = vunpack.i.h.bf16 %v7055_v46  ;;  %v7056_v20 = vunpack.i.l.bf16 %v7055_v46  ;;  %v7022_v63 = vunpack.i.h.bf16 %v7020_v11  ;;  %v7021_v16 = vunpack.i.l.bf16 %v7020_v11 }
 0x5e6   : > { %v7223_v41 = vpack.i.bf16 %v4516_v13, %v4515_v56  ;;  %v4585_v48 = vmul.f32 %v11656_v24, %v14152_v61  ;;  %v4259_v38 = vmul.f32 %v11501_v23, %v14154_v58  ;;  %v14155_v13 = vld [vmem:[#allocation209_spill] sm:$0xff]  ;;  %v4260_v23 = vmul.f32 %v11589_v3, %v14157_v53  ;;  %v14159_v61 = vld [vmem:[#allocation28_spill] sm:$0xff]  ;;  %v14160_v3 = vld [vmem:[#allocation111_spill] sm:$0xff] }
 0x5e7   : > { %v11659_v40 = vsel %vm346_vm0, %v4253_v8, %v7021_v16  ;;  %v11662_v35 = vsel %vm346_vm0, %v4254_v5, %v7022_v63  ;;  %v11665_v46 = vsel %vm346_vm0, %v4257_v37, %v7056_v20  ;;  %v11668_v11 = vsel %vm346_vm0, %v4258_v19, %v7057_v4  ;;  %v11687_v20 = vpop.permute.xlu1 %7009  ;;  %v4102_v37 = vld [vmem:[%s12758_s6 + $0x90] sm:$0xff]  ;;  %v14161_v5 = vld [vmem:[#allocation115_spill] sm:$0xff] }
 0x5e8   : > { %14150 = vst [vmem:[#allocation332_spill] sm:$0xff] %v11659_v40  ;;  %v11675_v16 = vsel %vm627_vm2, %v13218_v33, %v4195_v6  ;;  %v14153_v63 = vrot.slane %v11197_v1, 7  ;;  %v13219_v19 = vrot.slane %v11197_v1, 1  ;;  %v4548_v7 = vmul.f32 %v10782_v0, %v14155_v13  ;;  %5788 = vmatpush.msrb.mxu3 %v4102_v37  ;;  %v14184_v0 = vld [vmem:[#allocation34_spill] sm:$0xff] }
 0x5e9   : > { %14151 = vst [vmem:[#allocation223_spill] sm:$0xff] %v11662_v35  ;;  %v4207_v4 = vrot.slane %v11266_v31, 7  ;;  %v4452_v53 = vmul.f32 %v11579_v62, %v14160_v3  ;;  %v4454_v56 = vmul.f32 %v11477_v44, %v14161_v5 }
 0x5ea   : > { %v11680_v17 = vsel %vm627_vm2, %v4195_v6, %v14153_v63  ;;  %7224 = vrot.lane.b32.xlu2 %v7223_v41, %s7532_s18  ;;  %7219 = vrot.lane.b32.xlu1 %v7218_v26, %s7533_s20  ;;  %v14156_v6 = vld [vmem:[#allocation213_spill] sm:$0xff]  ;;  %v14158_v26 = vld [vmem:[#allocation14_spill] sm:$0xff]  ;;  %v11715_v37 = vsel %vm1203_vm1, %v4353_v50, %v13219_v19 }
 0x5eb   : > { %7244 = vrot.lane.b32.xlu0 %v7243_v32, %s7532_s18  ;;  %6464 = vmatmul.msk.f32.gmra.mxu1 %vm346_vm0, %v4585_v48  ;;  %v4550_v8 = vmul.f32 %v10813_v54, %v14156_v6  ;;  %v4269_v32 = vmul.f32 %v11675_v16, %v14158_v26  ;;  %v4270_v48 = vmul.f32 %v11680_v17, %v14159_v61  ;;  %v4086_v26 = vld [vmem:[%s12758_s6 + $0x10] sm:$0xff]  ;;  %v14165_v50 = vld [vmem:[#allocation101_spill] sm:$0xff] }
 0x5ec   : > { %v7060_v60 = vpop.permute.xlu2 %7059  ;;  %v7025_v41 = vpop.permute.xlu0 %7024  ;;  %5675 = vmatpush.msrb.mxu0 %v4086_v26  ;;  %v7238_v5 = vpack.i.bf16 %v4452_v53, %v4548_v7  ;;  %v4453_v3 = vmul.f32 %v11624_v51, %v14165_v50  ;;  %v14166_v19 = vld [vmem:[#allocation197_spill] sm:$0xff]  ;;  %v14167_v26 = vrot.slane %v11111_v55, 7  ;;  %v14174_v53 = vld [vmem:[#allocation295_spill] sm:$0xff] }
 0x5ed   : > { %v7062_v63 = vunpack.i.h.bf16 %v7060_v60  ;;  %v7061_v58 = vunpack.i.l.bf16 %v7060_v60  ;;  %v7027_v13 = vunpack.i.h.bf16 %v7025_v41  ;;  %v7026_v6 = vunpack.i.l.bf16 %v7025_v41 }
 0x5ee   : > { %v4549_v33 = vmul.f32 %v10810_v25, %v14166_v19  ;;  %v14173_v19 = vld [vmem:[#allocation310_spill] sm:$0xff] }
 0x5ef   : > { %v11721_v60 = vsel %vm346_vm0, %v4259_v38, %v7026_v6  ;;  %v11724_v41 = vsel %vm346_vm0, %v4260_v23, %v7027_v13  ;;  %v11727_v61 = vsel %vm346_vm0, %v4269_v32, %v7061_v58  ;;  %v11730_v44 = vsel %vm346_vm0, %v4270_v48, %v7062_v63  ;;  %v14169_v6 = vld [vmem:[#allocation299_spill] sm:$0xff] }
 0x5f0   : > { %14162 = vst [vmem:[#allocation339_spill] sm:$0xff] %v11724_v41  ;;  %v14168_v38 = vrot.slane %v10813_v54, 7  ;;  %v7258_v13 = vpack.i.bf16 %v4454_v56, %v4550_v8  ;;  %v4586_v32 = vmul.f32 %v11715_v37, %v14169_v6  ;;  %v14170_v48 = vrot.slane %v11260_v14, 7  ;;  %v14176_v8 = vld [vmem:[#allocation147_spill] sm:$0xff]  ;;  %v14183_v54 = vld [vmem:[#allocation20_spill] sm:$0xff] }
 0x5f1   : > { %14163 = vst [vmem:[#allocation254_spill] sm:$0xff] %v11727_v61  ;;  %v14171_v63 = vrot.slane %v11258_v22, 7  ;;  %v14175_v50 = vpack.i.bf16 %v14173_v19, %v14174_v53  ;;  %v4488_v56 = vmul.f32 %v11406_v43, %v14176_v8  ;;  %v14179_v19 = vld [vmem:[#allocation137_spill] sm:$0xff]  ;;  %v14180_v53 = vld [vmem:[#allocation11_spill] sm:$0xff]  ;;  %v14182_v61 = vld [vmem:[#allocation12_spill] sm:$0xff] }
 0x5f2   : > { %14164 = vst [vmem:[#allocation252_spill] sm:$0xff] %v11730_v44  ;;  %v4190_v23 = vsel %vm627_vm2, %v14168_v38, %v14167_v26  ;;  %v11746_v7 = vsel %vm627_vm2, %v4207_v4, %v14170_v48  ;;  %7239 = vrot.lane.b32.xlu2 %v7238_v5, %s7533_s20  ;;  %v14177_v38 = vld [vmem:[#allocation212_spill] sm:$0xff]  ;;  %v14178_v48 = vld [vmem:[#allocation21_spill] sm:$0xff]  ;;  %v4199_v5 = vrot.slane %v11174_v10, 7  ;;  %v4489_v43 = vmul.f32 %v11568_v28, %v14179_v19 }
 0x5f3   : > { %v11751_v58 = vsel %vm627_vm2, %v14171_v63, %v4207_v4  ;;  %7234 = vrot.lane.b32.xlu1 %v14175_v50, %s7531_s9  ;;  %v11763_v6 = vmul.f32 %v11111_v55, %v14177_v38  ;;  %v4265_v4 = vmul.f32 %v11615_v9, %v14178_v48  ;;  %v4191_v63 = vrot.slane %v11204_v29, 7  ;;  %7259 = vrot.lane.b32.xlu0 %v7258_v13, %s7533_s20  ;;  %v14181_v38 = vld [vmem:[#allocation13_spill] sm:$0xff] }
 0x5f4   : > { %14172 = vst [vmem:[#allocation293_spill] sm:$0xff] %v11751_v58  ;;  %6465 = vmatmul.msk.f32.gmra.mxu1 %vm346_vm0, %v4586_v32  ;;  %v4266_v50 = vmul.f32 %v4190_v23, %v14180_v53  ;;  %v7075_v8 = vpop.permute.xlu2 %7074  ;;  %v7030_v26 = vpop.permute.xlu1 %7029  ;;  %v4255_v44 = vmul.f32 %v11428_v59, %v14181_v38  ;;  %v4256_v48 = vmul.f32 %v11492_v15, %v14182_v61  ;;  %v14185_v59 = vrot.slane %v11174_v10, 1 }
 0x5f5   : > { %v4275_v25 = vmul.f32 %v11751_v58, %v14183_v54  ;;  %v4276_v13 = vmul.f32 %v11746_v7, %v14184_v0  ;;  %v7077_v32 = vunpack.i.h.bf16 %v7075_v8  ;;  %v7076_v18 = vunpack.i.l.bf16 %v7075_v8  ;;  %v7045_v40 = vpop.permute.xlu0 %7044  ;;  %v4101_v0 = vld [vmem:[%s12758_s6 + $0x88] sm:$0xff] }
 0x5f6   : > { %v7032_v35 = vunpack.i.h.bf16 %v7030_v26  ;;  %v7031_v19 = vunpack.i.l.bf16 %v7030_v26  ;;  %v7047_v52 = vunpack.i.h.bf16 %v7045_v40  ;;  %v7046_v41 = vunpack.i.l.bf16 %v7045_v40  ;;  %5789 = vmatpush.msrb.mxu3 %v4101_v0 }
 0x5f7   : > { %v14186_v38 = vrot.slane %v11197_v1, 1  ;;  %v11800_v26 = vsel %vm346_vm0, %v4275_v25, %v7076_v18  ;;  %v11803_v40 = vsel %vm346_vm0, %v4276_v13, %v7077_v32  ;;  %v7248_v8 = vpack.i.bf16 %v4453_v3, %v4549_v33  ;;  %v14193_v25 = vld [vmem:[#allocation114_spill] sm:$0xff]  ;;  %v14196_v3 = vld [vmem:[#allocation261_spill] sm:$0xff] }
 0x5f8   : > { %v11794_v54 = vsel %vm346_vm0, %v4255_v44, %v7031_v19  ;;  %v11797_v61 = vsel %vm346_vm0, %v4256_v48, %v7032_v35  ;;  %14187 = vst [vmem:[#allocation329_spill] sm:$0xff] %v11800_v26  ;;  %v11808_v53 = vsel %vm346_vm0, %v4265_v4, %v7046_v41  ;;  %v11811_v44 = vsel %vm346_vm0, %v4266_v50, %v7047_v52  ;;  %v14192_v35 = vld [vmem:[#allocation298_spill] sm:$0xff] }
 0x5f9   : > { %v11788_v15 = vsel %vm1203_vm1, %v14186_v38, %v14185_v59  ;;  %14188 = vst [vmem:[#allocation227_spill] sm:$0xff] %v11803_v40  ;;  %v14189_v59 = vld [vmem:[#allocation19_spill] sm:$0xff]  ;;  %v7273_v19 = vpack.i.bf16 %v4489_v43, %v4488_v56  ;;  %v4455_v18 = vmul.f32 %v11487_v47, %v14193_v25  ;;  %v14194_v13 = vrot.slane %v11111_v55, 7  ;;  %v14198_v56 = vld [vmem:[#allocation104_spill] sm:$0xff]  ;;  %v14200_v50 = vld [vmem:[#allocation18_spill] sm:$0xff] }
 0x5fa   : > { %v4261_v38 = vmul.f32 %v11579_v62, %v14189_v59  ;;  %14190 = vst [vmem:[#allocation250_spill] sm:$0xff] %v11808_v53  ;;  %v4587_v48 = vmul.f32 %v11788_v15, %v14192_v35  ;;  %v14195_v62 = vld [vmem:[#allocation262_spill] sm:$0xff]  ;;  %v4359_v52 = vrot.slane %v11162_v21, 1  ;;  %v11830_v4 = vmul.f32 %v11615_v9, %v14198_v56  ;;  %v4085_v9 = vld [vmem:[%s12758_s6 + $0x8] sm:$0xff] }
 0x5fb   : > { %14191 = vst [vmem:[#allocation255_spill] sm:$0xff] %v11811_v44  ;;  %v11820_v33 = vsel %vm627_vm2, %v14194_v13, %v4191_v63  ;;  %v14197_v41 = vpack.i.bf16 %v14195_v62, %v14196_v3  ;;  %7249 = vrot.lane.b32.xlu1 %v7248_v8, %s7533_s20  ;;  %v14199_v47 = vrot.slane %v11197_v1, 7  ;;  %v4262_v32 = vmul.f32 %v11624_v51, %v14200_v50  ;;  %v14201_v8 = vld [vmem:[#allocation167_spill] sm:$0xff]  ;;  %v14203_v62 = vld [vmem:[#allocation181_spill] sm:$0xff] }
 0x5fc   : > { %7274 = vrot.lane.b32.xlu0 %v7273_v19, %s7531_s9  ;;  %6466 = vmatmul.msk.f32.gmra.mxu1 %vm346_vm0, %v4587_v48  ;;  %v7268_v0 = vpack.i.bf16 %v4455_v18, %v11763_v6  ;;  %v4519_v59 = vmul.f32 %v4190_v23, %v14201_v8  ;;  %v14202_v35 = vrot.slane %v11162_v21, 7  ;;  %v11851_v13 = vpop.permute.xlu2 %7089  ;;  %v7035_v51 = vpop.permute.xlu1 %7034  ;;  %v4520_v19 = vmul.f32 %v11820_v33, %v14203_v62  ;;  %v14204_v48 = vld [vmem:[#allocation118_spill] sm:$0xff]  ;;  %v14205_v6 = vld [vmem:[#allocation216_spill] sm:$0xff]  ;;  %v14208_v40 = vld [vmem:[#allocation27_spill] sm:$0xff] }
 0x5fd   : > { %7254 = vrot.lane.b32.xlu2 %v14197_v41, %s7531_s9  ;;  %v11835_v43 = vsel %vm627_vm2, %v14199_v47, %v4199_v5  ;;  %v4457_v3 = vmul.f32 %v4190_v23, %v14204_v48  ;;  %v4553_v18 = vmul.f32 %v11195_v34, %v14205_v6  ;;  %v14206_v41 = vld [vmem:[#allocation200_spill] sm:$0xff]  ;;  %5676 = vmatpush.msrb.mxu0 %v4085_v9  ;;  %v7037_v47 = vunpack.i.h.bf16 %v7035_v51 }
 0x5fe   : > { %v11849_v25 = vsel %vm627_vm2, %v4199_v5, %v14202_v35  ;;  %v11860_v56 = vmul.f32 %v11204_v29, %v14206_v41  ;;  %v7036_v50 = vunpack.i.l.bf16 %v7035_v51  ;;  %v7065_v5 = vpop.permute.xlu0 %7064  ;;  %v14207_v8 = vrot.slane %v11195_v34, 7  ;;  %v14210_v41 = vld [vmem:[#allocation17_spill] sm:$0xff]  ;;  %v14213_v29 = vld [vmem:[#allocation278_spill] sm:$0xff] }
 0x5ff   : > { %v4271_v62 = vmul.f32 %v11835_v43, %v14208_v40  ;;  %v7067_v23 = vunpack.i.h.bf16 %v7065_v5  ;;  %v7066_v48 = vunpack.i.l.bf16 %v7065_v5  ;;  %v14209_v6 = vrot.slane %v11174_v10, 1 }
 0x600   : > { %v11865_v35 = vsel %vm627_vm2, %v4191_v63, %v14207_v8  ;;  %v4272_v9 = vmul.f32 %v11849_v25, %v14210_v41  ;;  %v4211_v51 = vrot.slane %v11218_v42, 7  ;;  %v13229_v44 = vrot.slane %v11211_v45, 7 }
 0x601   : > { %v11872_v26 = vsel %vm1203_vm1, %v14209_v6, %v4359_v52  ;;  %v11879_v63 = vsel %vm346_vm0, %v4261_v38, %v7036_v50  ;;  %v11882_v8 = vsel %vm346_vm0, %v4262_v32, %v7037_v47  ;;  %v7263_v40 = vpack.i.bf16 %v4520_v19, %v4519_v59  ;;  %v14214_v32 = vld [vmem:[#allocation180_spill] sm:$0xff]  ;;  %v14216_v50 = vld [vmem:[#allocation25_spill] sm:$0xff] }
 0x602   : > { %v13230_v5 = vrot.slane %v11264_v2, 1  ;;  %v11886_v34 = vsel %vm346_vm0, %v4271_v62, %v7066_v48  ;;  %v11889_v6 = vsel %vm346_vm0, %v4272_v9, %v7067_v23  ;;  %v7288_v41 = vpack.i.bf16 %v4457_v3, %v4553_v18  ;;  %v14215_v19 = vld [vmem:[#allocation88_spill] sm:$0xff]  ;;  %v14219_v48 = vld [vmem:[#allocation170_spill] sm:$0xff] }
 0x603   : > { %14211 = vst [vmem:[#allocation234_spill] sm:$0xff] %v11886_v34  ;;  %v4588_v55 = vmul.f32 %v11872_v26, %v14213_v29  ;;  %v7278_v38 = vpack.i.bf16 %v11830_v4, %v11860_v56  ;;  %7264 = vrot.lane.b32.xlu1 %v7263_v40, %s7532_s18  ;;  %v4521_v59 = vmul.f32 %v11865_v35, %v14214_v32  ;;  %v14217_v29 = vrot.slane %v11260_v14, 7  ;;  %v14218_v3 = vld [vmem:[#allocation24_spill] sm:$0xff] }
 0x604   : > { %14212 = vst [vmem:[#allocation203_spill] sm:$0xff] %v11889_v6  ;;  %v4427_v47 = vmul.f32 %v11568_v28, %v14215_v19  ;;  %v4267_v62 = vmul.f32 %v11820_v33, %v14216_v50  ;;  %7289 = vrot.lane.b32.xlu0 %v7288_v41, %s7533_s20  ;;  %v4268_v28 = vmul.f32 %v11865_v35, %v14218_v3  ;;  %v4203_v18 = vrot.slane %v11264_v2, 7  ;;  %v7105_v56 = vpop.permute.xlu2 %7104  ;;  %v7050_v23 = vpop.permute.xlu1 %7049  ;;  %v14220_v9 = vld [vmem:[#allocation184_spill] sm:$0xff]  ;;  %v4100_v6 = vld [vmem:[%s12758_s6 + $0x80] sm:$0xff] }
 0x605   : > { %7269 = vrot.lane.b32.xlu2 %v7268_v0, %s7533_s20  ;;  %6467 = vmatmul.msk.f32.gmra.mxu1 %vm346_vm0, %v4588_v55  ;;  %v11908_v4 = vsel %vm627_vm2, %v14217_v29, %v4211_v51  ;;  %v11913_v0 = vsel %vm627_vm2, %v4211_v51, %v13229_v44  ;;  %v4522_v55 = vmul.f32 %v11675_v16, %v14219_v48  ;;  %v7107_v51 = vunpack.i.h.bf16 %v7105_v56  ;;  %v4084_v48 = vld [vmem:[%s12758_s6] sm:$0xff] }
 0x606   : > { %v4523_v40 = vmul.f32 %v11680_v17, %v14220_v9  ;;  %v11925_v41 = vsel %vm1203_vm1, %v4359_v52, %v13230_v5  ;;  %v7106_v32 = vunpack.i.l.bf16 %v7105_v56  ;;  %v7052_v19 = vunpack.i.h.bf16 %v7050_v23  ;;  %v7080_v29 = vpop.permute.xlu0 %7079  ;;  %v14221_v9 = vld [vmem:[#allocation33_spill] sm:$0xff]  ;;  %v14222_v52 = vld [vmem:[#allocation23_spill] sm:$0xff]  ;;  %5790 = vmatpush.msrb.mxu3 %v4100_v6  ;;  %5677 = vmatpush.msrb.mxu0 %v4084_v48 }
 0x607   : > { %v7051_v50 = vunpack.i.l.bf16 %v7050_v23  ;;  %v7082_v3 = vunpack.i.h.bf16 %v7080_v29  ;;  %v7081_v44 = vunpack.i.l.bf16 %v7080_v29  ;;  %v4277_v34 = vmul.f32 %v11908_v4, %v14221_v9 }
 0x608   : > { %v4278_v5 = vmul.f32 %v11913_v0, %v14222_v52  ;;  %v11939_v56 = vsel %vm3451_vm3, %v11794_v54, %v7106_v32  ;;  %v11943_v23 = vsel %vm3451_vm3, %v11797_v61, %v7107_v51  ;;  %v7283_v58 = vpack.i.bf16 %v4522_v55, %v4521_v59  ;;  %v14227_v54 = vld [vmem:[#allocation306_spill] sm:$0xff]  ;;  %v14232_v55 = vld [vmem:[#allocation151_spill] sm:$0xff] }
 0x609   : > { %v11946_v29 = vsel %vm346_vm0, %v4267_v62, %v7051_v50  ;;  %v11949_v53 = vsel %vm346_vm0, %v4268_v28, %v7052_v19  ;;  %v11952_v9 = vsel %vm346_vm0, %v4277_v34, %v7081_v44  ;;  %v7303_v48 = vpack.i.bf16 %v4427_v47, %v4523_v40  ;;  %v14230_v44 = vld [vmem:[#allocation117_spill] sm:$0xff]  ;;  %v14231_v47 = vld [vmem:[#allocation215_spill] sm:$0xff] }
 0x60a   : > { %14223 = vst [vmem:[#allocation259_spill] sm:$0xff] %v11946_v29  ;;  %v11955_v6 = vsel %vm346_vm0, %v4278_v5, %v7082_v3  ;;  %v4589_v32 = vmul.f32 %v11925_v41, %v14227_v54  ;;  %v14228_v61 = vrot.slane %v11162_v21, 7  ;;  %v14229_v59 = vrot.slane %v11258_v22, 7  ;;  %v14234_v50 = vld [vmem:[#allocation183_spill] sm:$0xff]  ;;  %v14236_v54 = vld [vmem:[#allocation30_spill] sm:$0xff]  ;;  %v14272_v29 = vld [vmem:[#allocation312_spill] sm:$0xff] }
 0x60b   : > { %14224 = vst [vmem:[#allocation233_spill] sm:$0xff] %v11949_v53  ;;  %7279 = vrot.lane.b32.xlu1 %v7278_v38, %s7533_s20  ;;  %v4363_v34 = vrot.slane %v11258_v22, 1  ;;  %v4458_v5 = vmul.f32 %v11820_v33, %v14230_v44  ;;  %v4554_v28 = vmul.f32 %v11209_v30, %v14231_v47  ;;  %v4524_v3 = vmul.f32 %v11835_v43, %v14234_v50  ;;  %v14235_v52 = vld [vmem:[#allocation31_spill] sm:$0xff]  ;;  %v14241_v30 = vld [vmem:[#allocation305_spill] sm:$0xff] }
 0x60c   : > { %14225 = vst [vmem:[#allocation235_spill] sm:$0xff] %v11952_v9  ;;  %v11962_v51 = vsel %vm627_vm2, %v14228_v61, %v4203_v18  ;;  %v11967_v62 = vsel %vm627_vm2, %v4203_v18, %v14229_v59  ;;  %7304 = vrot.lane.b32.xlu0 %v7303_v48, %s7532_s18  ;;  %v4490_v18 = vmul.f32 %v11603_v57, %v14232_v55  ;;  %v7120_v40 = vpop.permute.xlu2 %7119  ;;  %v7070_v19 = vpop.permute.xlu1 %7069  ;;  %v4215_v55 = vrot.slane %v11305_v27, 7 }
 0x60d   : > { %14226 = vst [vmem:[#allocation325_spill] sm:$0xff] %v11955_v6  ;;  %7284 = vrot.lane.b32.xlu2 %v7283_v58, %s7532_s18  ;;  %6468 = vmatmul.msk.f32.gmra.mxu1 %vm346_vm0, %v4589_v32  ;;  %v14233_v58 = vld [vmem:[#allocation150_spill] sm:$0xff]  ;;  %v4273_v48 = vmul.f32 %v11962_v51, %v14235_v52  ;;  %v4274_v33 = vmul.f32 %v11967_v62, %v14236_v54  ;;  %v7122_v32 = vunpack.i.h.bf16 %v7120_v40  ;;  %v7121_v61 = vunpack.i.l.bf16 %v7120_v40 }
 0x60e   : > { %v4491_v38 = vmul.f32 %v11656_v24, %v14233_v58  ;;  %v7072_v59 = vunpack.i.h.bf16 %v7070_v19  ;;  %v7071_v44 = vunpack.i.l.bf16 %v7070_v19  ;;  %v11988_v47 = vpop.permute.xlu0 %7094  ;;  %v14237_v58 = vld [vmem:[#allocation87_spill] sm:$0xff]  ;;  %v14238_v50 = vrot.slane %v11264_v2, 1 }
 0x60f   : > { %v4428_v9 = vmul.f32 %v11603_v57, %v14237_v58  ;;  %v12001_v54 = vsel %vm3451_vm3, %v11879_v63, %v7121_v61  ;;  %v12005_v40 = vsel %vm3451_vm3, %v11882_v8, %v7122_v32  ;;  %v7298_v57 = vpack.i.bf16 %v4458_v5, %v4554_v28  ;;  %v14247_v61 = vld [vmem:[#allocation221_spill] sm:$0xff] }
 0x610   : > { %v11997_v52 = vsel %vm1203_vm1, %v14238_v50, %v4363_v34  ;;  %v12008_v19 = vsel %vm346_vm0, %v4273_v48, %v7071_v44  ;;  %v12011_v6 = vsel %vm346_vm0, %v4274_v33, %v7072_v59  ;;  %v7293_v58 = vpack.i.bf16 %v4491_v38, %v4490_v18  ;;  %v14245_v18 = vld [vmem:[#allocation107_spill] sm:$0xff] }
 0x611   : > { %14239 = vst [vmem:[#allocation338_spill] sm:$0xff] %v12008_v19  ;;  %v7318_v53 = vpack.i.bf16 %v4428_v9, %v4524_v3  ;;  %v4590_v50 = vmul.f32 %v11997_v52, %v14241_v30  ;;  %v4365_v63 = vrot.slane %v11266_v31, 1  ;;  %v14242_v8 = vrot.slane %v11211_v45, 7  ;;  %v14244_v9 = vld [vmem:[#allocation154_spill] sm:$0xff]  ;;  %v14246_v3 = vld [vmem:[#allocation204_spill] sm:$0xff] }
 0x612   : > { %14240 = vst [vmem:[#allocation286_spill] sm:$0xff] %v12011_v6  ;;  %v14243_v33 = vrot.slane %v10981_v39, 7  ;;  %v4493_v28 = vmul.f32 %v11788_v15, %v14244_v9  ;;  %v4459_v38 = vmul.f32 %v11865_v35, %v14245_v18  ;;  %v4555_v32 = vmul.f32 %v11197_v1, %v14246_v3  ;;  %v14250_v6 = vld [vmem:[#allocation140_spill] sm:$0xff] }
 0x613   : > { %7294 = vrot.lane.b32.xlu1 %v7293_v58, %s7531_s9  ;;  %v12021_v48 = vsel %vm627_vm2, %v14242_v8, %v4215_v55  ;;  %v4557_v59 = vmul.f32 %v11162_v21, %v14247_v61  ;;  %v14248_v58 = vld [vmem:[#allocation37_spill] sm:$0xff]  ;;  %v4492_v35 = vmul.f32 %v11715_v37, %v14250_v6  ;;  %v12045_v18 = vsel %vm1203_vm1, %v4363_v34, %v4365_v63  ;;  %v14251_v3 = vld [vmem:[#allocation120_spill] sm:$0xff] }
 0x614   : > { %v12026_v5 = vsel %vm627_vm2, %v4215_v55, %v14243_v33  ;;  %7319 = vrot.lane.b32.xlu0 %v7318_v53, %s7532_s18  ;;  %v7085_v30 = vpop.permute.xlu1 %7084  ;;  %v4279_v53 = vmul.f32 %v12021_v48, %v14248_v58  ;;  %v4461_v61 = vmul.f32 %v11680_v17, %v14251_v3  ;;  %v7308_v21 = vpack.i.bf16 %v4459_v38, %v4555_v32  ;;  %v14256_v38 = vld [vmem:[#allocation222_spill] sm:$0xff]  ;;  %v14259_v3 = vld [vmem:[#allocation121_spill] sm:$0xff] }
 0x615   : > { %7299 = vrot.lane.b32.xlu2 %v7298_v57, %s7533_s20  ;;  %6469 = vmatmul.msk.f32.gmra.mxu1 %vm346_vm0, %v4590_v50  ;;  %v7087_v44 = vunpack.i.h.bf16 %v7085_v30  ;;  %v7086_v55 = vunpack.i.l.bf16 %v7085_v30  ;;  %v14249_v50 = vld [vmem:[#allocation36_spill] sm:$0xff]  ;;  %v7313_v58 = vpack.i.bf16 %v4493_v28, %v4492_v35  ;;  %v14255_v28 = vld [vmem:[#allocation173_spill] sm:$0xff]  ;;  %v4556_v32 = vmul.f32 %v11174_v10, %v14256_v38 }
 0x616   : > { %v7110_v57 = vpop.permute.xlu0 %7109  ;;  %v4280_v8 = vmul.f32 %v12026_v5, %v14249_v50  ;;  %v7333_v34 = vpack.i.bf16 %v4461_v61, %v4557_v59  ;;  %v14254_v50 = vld [vmem:[#allocation281_spill] sm:$0xff]  ;;  %v4124_v59 = vrot.slane %v10942_v12, 7  ;;  %v4460_v61 = vmul.f32 %v11675_v16, %v14259_v3 }
 0x617   : > { %v7112_v33 = vunpack.i.h.bf16 %v7110_v57  ;;  %v7111_v9 = vunpack.i.l.bf16 %v7110_v57  ;;  %v12050_v30 = vsel %vm346_vm0, %v4279_v53, %v7086_v55  ;;  %v4591_v17 = vmul.f32 %v12045_v18, %v14254_v50  ;;  %v14257_v53 = vld [vmem:[#allocation77_spill] sm:$0xff]  ;;  %v14260_v50 = vld [vmem:[#allocation110_spill] sm:$0xff] }
 0x618   : > { %14252 = vst [vmem:[#allocation335_spill] sm:$0xff] %v12050_v30  ;;  %v12053_v19 = vsel %vm346_vm0, %v4280_v8, %v7087_v44  ;;  %v4367_v44 = vrot.slane %v11260_v14, 1  ;;  %v14258_v8 = vld [vmem:[#allocation208_spill] sm:$0xff]  ;;  %v7323_v38 = vpack.i.bf16 %v4460_v61, %v4556_v32  ;;  %v14261_v16 = vrot.slane %v10981_v39, 7 }
 0x619   : > { %14253 = vst [vmem:[#allocation334_spill] sm:$0xff] %v12053_v19  ;;  %v12057_v57 = vsel %vm3451_vm3, %v11665_v46, %v7111_v9  ;;  %v12061_v6 = vsel %vm3451_vm3, %v11668_v11, %v7112_v33  ;;  %v4525_v11 = vmul.f32 %v11849_v25, %v14255_v28  ;;  %v4558_v33 = vmul.f32 %v11264_v2, %v14258_v8  ;;  %v14262_v8 = vld [vmem:[#allocation313_spill] sm:$0xff]  ;;  %v12128_v2 = vpop.f32.mrf.mxu1 }
 0x61a   : > { %14269 = vst [vmem:[#allocation344_spill] sm:$0xff] %v12128_v2 }
 0x61b   : > { %7309 = vrot.lane.b32.xlu1 %v7308_v21, %s7533_s20  ;;  %v4429_v21 = vmul.f32 %v11656_v24, %v14257_v53 }
 0x61c   : > { %7334 = vrot.lane.b32.xlu0 %v7333_v34, %s7533_s20  ;;  %v12070_v46 = vpop.permute.xlu1 %7099  ;;  %v12086_v34 = vpop.permute.xlu2 %7134 }
 0x61d   : > { %7314 = vrot.lane.b32.xlu2 %v7313_v58, %s7531_s9  ;;  %6470 = vmatmul.msk.f32.gmra.mxu1 %vm346_vm0, %v4591_v17  ;;  %v12084_v58 = vsel %vm1203_vm1, %v4365_v63, %v4367_v44  ;;  %v4462_v17 = vmul.f32 %v11835_v43, %v14260_v50  ;;  %v7328_v28 = vpack.i.bf16 %v4429_v21, %v4525_v11  ;;  %v7011_v43 = vunpack.i.l.bf16 %v11687_v20  ;;  %v14263_v11 = vld [vmem:[#allocation7_spill] sm:$0xff] }
 0x61e   : > { %v7125_v55 = vpop.permute.xlu0 %7124  ;;  %v12101_v63 = vsel %vm627_vm2, %v14261_v16, %v4124_v59  ;;  %v4592_v3 = vmul.f32 %v12084_v58, %v14262_v8  ;;  %v14267_v8 = vld [vmem:[#allocation156_spill] sm:$0xff] }
 0x61f   : > { %v7127_v9 = vunpack.i.h.bf16 %v7125_v55  ;;  %v7126_v35 = vunpack.i.l.bf16 %v7125_v55  ;;  %v7348_v53 = vpack.i.bf16 %v4462_v17, %v4558_v33  ;;  %v4249_v32 = vmul.f32 %v12101_v63, %v14263_v11  ;;  %v14264_v33 = vld [vmem:[#allocation187_spill] sm:$0xff]  ;;  %v14268_v11 = vld [vmem:[#allocation153_spill] sm:$0xff] }
 0x620   : > { %v4494_v30 = vmul.f32 %v11872_v26, %v14268_v11 }
 0x621   : > { %v12092_v24 = vsel %vm3451_vm3, %v11522_v36, %v7126_v35  ;;  %v12096_v55 = vsel %vm3451_vm3, %v11525_v49, %v7127_v9  ;;  %v4369_v36 = vrot.slane %v11218_v42, 1  ;;  %v7091_v49 = vunpack.i.l.bf16 %v11851_v13  ;;  %v14265_v35 = vld [vmem:[#allocation143_spill] sm:$0xff] }
 0x622   : > { %v4526_v9 = vmul.f32 %v11962_v51, %v14264_v33  ;;  %v4495_v61 = vmul.f32 %v11925_v41, %v14265_v35  ;;  %v14270_v35 = vld [vmem:[#allocation157_spill] sm:$0xff] }
 0x623   : > { %7324 = vrot.lane.b32.xlu1 %v7323_v38, %s7533_s20  ;;  %v14266_v38 = vld [vmem:[#allocation91_spill] sm:$0xff]  ;;  %v12126_v33 = vsel %vm1203_vm1, %v4367_v44, %v4369_v36  ;;  %v4496_v10 = vmul.f32 %v11997_v52, %v14270_v35 }
 0x624   : > { %7349 = vrot.lane.b32.xlu0 %v7348_v53, %s7533_s20  ;;  %v7115_v21 = vpop.permute.xlu1 %7114  ;;  %v4430_v16 = vmul.f32 %v11715_v37, %v14266_v38  ;;  %v4497_v53 = vmul.f32 %v12045_v18, %v14267_v8  ;;  %v14271_v38 = vld [vmem:[#allocation339_spill] sm:$0xff]  ;;  %v7338_v44 = vpack.i.bf16 %v4495_v61, %v4494_v30  ;;  %v7150_v11 = vpop.permute.xlu2 %7149 }
 0x625   : > { %7329 = vrot.lane.b32.xlu2 %v7328_v28, %s7532_s18  ;;  %6471 = vmatmul.msk.f32.gmra.mxu1 %vm346_vm0, %v4592_v3  ;;  %v7117_v50 = vunpack.i.h.bf16 %v7115_v21  ;;  %v7116_v17 = vunpack.i.l.bf16 %v7115_v21  ;;  %v5370_v3 = vsel %vm346_vm0, %v4249_v32, %v7011_v43 }
 0x626   : > { %v7140_v28 = vpop.permute.xlu0 %7139  ;;  %v5402_v21 = vsel %vm3451_vm3, %v5370_v3, %v7091_v49  ;;  %v7343_v8 = vpack.i.bf16 %v4430_v16, %v4526_v9  ;;  %v7363_v1 = vpack.i.bf16 %v4497_v53, %v4496_v10  ;;  %v4593_v49 = vmul.f32 %v12126_v33, %v14272_v29  ;;  %v14273_v3 = vld [vmem:[#allocation315_spill] sm:$0xff]  ;;  %v14275_v29 = vld [vmem:[#allocation90_spill] sm:$0xff] }
 0x627   : > { %v7142_v19 = vunpack.i.h.bf16 %v7140_v28  ;;  %v12135_v37 = vsel %vm3451_vm3, %v11721_v60, %v7116_v17  ;;  %v12139_v43 = vsel %vm3451_vm3, %v14271_v38, %v7117_v50  ;;  %v14274_v35 = vrot.slane %v14273_v3, 7  ;;  %v14277_v17 = vld [vmem:[#allocation231_spill] sm:$0xff]  ;;  %v14278_v53 = vld [vmem:[#allocation186_spill] sm:$0xff] }
 0x628   : > { %v7012_v60 = vunpack.i.h.bf16 %v11687_v20  ;;  %v7136_v50 = vunpack.i.l.bf16 %v12086_v34  ;;  %v7092_v10 = vunpack.i.h.bf16 %v11851_v13  ;;  %v4431_v30 = vmul.f32 %v11788_v15, %v14275_v29  ;;  %v14276_v20 = vld [vmem:[#allocation10_spill] sm:$0xff]  ;;  %v14281_v15 = vld [vmem:[#allocation311_spill] sm:$0xff] }
 0x629   : > { %v5434_v32 = vsel %vm3484_vm4, %v5402_v21, %v7142_v19  ;;  %v12147_v2 = vsel %vm627_vm2, %v4124_v59, %v14274_v35  ;;  %v4371_v19 = vrot.slane %v11211_v45, 1  ;;  %v7152_v59 = vunpack.i.h.bf16 %v7150_v11 }
 0x62a   : > { %5678 = vmatmul.f32.vlgmr.msrb.gmra.mxu0 %v5434_v32  ;;  %v4250_v61 = vmul.f32 %v12147_v2, %v14276_v20  ;;  %v4559_v16 = vmul.f32 %v11258_v22, %v14277_v17  ;;  %v4527_v21 = vmul.f32 %v11967_v62, %v14278_v53  ;;  %v14279_v32 = vld [vmem:[#allocation124_spill] sm:$0xff]  ;;  %v7141_v35 = vunpack.i.l.bf16 %v7140_v28 }
 0x62b   : > { %7339 = vrot.lane.b32.xlu1 %v7338_v44, %s7531_s9  ;;  %v12173_v20 = vsel %vm1203_vm1, %v4369_v36, %v4371_v19 }
 0x62c   : > { %7364 = vrot.lane.b32.xlu0 %v7363_v1, %s7531_s9  ;;  %v7130_v9 = vpop.permute.xlu1 %7129  ;;  %v4463_v1 = vmul.f32 %v11849_v25, %v14279_v32  ;;  %v5371_v29 = vsel %vm346_vm0, %v4250_v61, %v7012_v60  ;;  %v14283_v25 = vld [vmem:[#allocation250_spill] sm:$0xff]  ;;  %v7353_v60 = vpack.i.bf16 %v4431_v30, %v4527_v21  ;;  %v12185_v61 = vpop.f32.mrf.mxu1 }
 0x62d   : > { %7344 = vrot.lane.b32.xlu2 %v7343_v8, %s7532_s18  ;;  %6472 = vmatmul.msk.f32.gmra.mxu1 %vm346_vm0, %v4593_v49  ;;  %v7132_v38 = vunpack.i.h.bf16 %v7130_v9  ;;  %v7131_v13 = vunpack.i.l.bf16 %v7130_v9  ;;  %v14280_v8 = vld [vmem:[#allocation190_spill] sm:$0xff]  ;;  %v5466_v49 = vsel %vm346_vm0, %v14281_v15, %v7136_v50  ;;  %v5403_v17 = vsel %vm3451_vm3, %v5371_v29, %v7092_v10  ;;  %v14284_v10 = vld [vmem:[#allocation288_spill] sm:$0xff] }
 0x62e   : > { %v4529_v44 = vmul.f32 %v11746_v7, %v14280_v8  ;;  %v14282_v9 = vld [vmem:[#allocation94_spill] sm:$0xff]  ;;  %v5435_v8 = vsel %vm3484_vm4, %v5403_v17, %v7152_v59  ;;  %v7358_v50 = vpack.i.bf16 %v4463_v1, %v4559_v16  ;;  %v4373_v59 = vrot.slane %v11305_v27, 1 }
 0x62f   : > { %v5498_v53 = vsel %vm3451_vm3, %v5466_v49, %v7132_v38  ;;  %v4433_v22 = vmul.f32 %v11925_v41, %v14282_v9  ;;  %v12181_v32 = vsel %vm3451_vm3, %v14283_v25, %v7131_v13  ;;  %v4594_v38 = vmul.f32 %v12173_v20, %v14284_v10  ;;  %v14285_v16 = vld [vmem:[#allocation230_spill] sm:$0xff]  ;;  %v14287_v13 = vld [vmem:[#allocation293_spill] sm:$0xff]  ;;  %v14288_v49 = vld [vmem:[#allocation80_spill] sm:$0xff] }
 0x630   : > { %v5530_v28 = vsel %vm3484_vm4, %v5498_v53, %v7141_v35  ;;  %v7137_v41 = vunpack.i.h.bf16 %v12086_v34  ;;  %v4560_v21 = vmul.f32 %v11266_v31, %v14285_v16  ;;  %v4432_v34 = vmul.f32 %v11872_v26, %v14288_v49  ;;  %v14289_v35 = vld [vmem:[#allocation189_spill] sm:$0xff]  ;;  %v7155_v53 = vpop.permute.xlu0 %7154  ;;  %v14290_v9 = vld [vmem:[#allocation324_spill] sm:$0xff]  ;;  %v14293_v49 = vld [vmem:[#allocation323_spill] sm:$0xff] }
 0x631   : > { %5791 = vmatmul.f32.vlgmr.msrb.gmra.mxu3 %v5530_v28  ;;  %v7378_v36 = vpack.i.bf16 %v4433_v22, %v4529_v44  ;;  %v14286_v22 = vld [vmem:[#allocation176_spill] sm:$0xff]  ;;  %v4530_v29 = vmul.f32 %v11908_v4, %v14289_v35  ;;  %v7151_v17 = vunpack.i.l.bf16 %v7150_v11  ;;  %v7156_v11 = vunpack.i.l.bf16 %v7155_v53 }
 0x632   : > { %5681 = vmatmul.f32.gmra.mxu0 %v5435_v8  ;;  %v4528_v1 = vmul.f32 %v14287_v13, %v14286_v22  ;;  %v5467_v25 = vsel %vm346_vm0, %v14290_v9, %v7137_v41  ;;  %v14291_v8 = vld [vmem:[#allocation123_spill] sm:$0xff] }
 0x633   : > { %7354 = vrot.lane.b32.xlu1 %v7353_v60, %s7532_s18  ;;  %v4464_v28 = vmul.f32 %v11962_v51, %v14291_v8  ;;  %v7096_v51 = vunpack.i.l.bf16 %v11988_v47  ;;  %v14297_v8 = vld [vmem:[#allocation224_spill] sm:$0xff] }
 0x634   : > { %7379 = vrot.lane.b32.xlu0 %v7378_v36, %s7532_s18  ;;  %v7145_v30 = vpop.permute.xlu1 %7144  ;;  %v14292_v36 = vld [vmem:[#allocation93_spill] sm:$0xff]  ;;  %v7368_v16 = vpack.i.bf16 %v4432_v34, %v4528_v1 }
 0x635   : > { %7359 = vrot.lane.b32.xlu2 %v7358_v50, %s7533_s20  ;;  %6473 = vmatmul.msk.f32.gmra.mxu1 %vm346_vm0, %v4594_v38  ;;  %v7146_v44 = vunpack.i.l.bf16 %v7145_v30  ;;  %v12208_v50 = vsel %vm1203_vm1, %v4371_v19, %v4373_v59  ;;  %v4434_v10 = vmul.f32 %v11997_v52, %v14292_v36  ;;  %v7373_v38 = vpack.i.bf16 %v4464_v28, %v4560_v21  ;;  %v12219_v19 = vpop.f32.mrf.mxu1  ;;  %v14294_v21 = vld [vmem:[#allocation160_spill] sm:$0xff] }
 0x636   : > { %v4595_v41 = vmul.f32 %v12208_v50, %v14293_v49  ;;  %v7147_v35 = vunpack.i.h.bf16 %v7145_v30  ;;  %v4499_v1 = vmul.f32 %v12126_v33, %v14294_v21  ;;  %v5468_v28 = vsel %vm346_vm0, %v14297_v8, %v7156_v11  ;;  %v14302_v21 = vld [vmem:[#allocation126_spill] sm:$0xff] }
 0x637   : > { %v5499_v60 = vsel %vm3451_vm3, %v5467_v25, %v7146_v44  ;;  %v7393_v22 = vpack.i.bf16 %v4434_v10, %v4530_v29  ;;  %v14295_v44 = vld [vmem:[#allocation113_spill] sm:$0xff]  ;;  %v14296_v29 = vld [vmem:[#allocation211_spill] sm:$0xff]  ;;  %v7165_v10 = vpop.permute.xlu2 %7164  ;;  %v14301_v49 = vrot.slane %v10981_v39, 1 }
 0x638   : > { %v5531_v26 = vsel %vm3484_vm4, %v5499_v60, %v7151_v17  ;;  %v4465_v34 = vmul.f32 %v11967_v62, %v14295_v44  ;;  %v4561_v30 = vmul.f32 %v11260_v14, %v14296_v29  ;;  %v14298_v60 = vld [vmem:[#allocation239_spill] sm:$0xff]  ;;  %v4467_v44 = vmul.f32 %v11746_v7, %v14302_v21  ;;  %v7170_v8 = vpop.permute.xlu0 %7169 }
 0x639   : > { %5794 = vmatmul.f32.gmra.mxu3 %v5531_v26  ;;  %v4563_v36 = vmul.f32 %v11211_v45, %v14298_v60  ;;  %v14299_v26 = vld [vmem:[#allocation253_spill] sm:$0xff]  ;;  %v7157_v29 = vunpack.i.h.bf16 %v7155_v53  ;;  %v14303_v60 = vld [vmem:[#allocation322_spill] sm:$0xff]  ;;  %v7171_v7 = vunpack.i.l.bf16 %v7170_v8  ;;  %v14309_v21 = vld [vmem:[#allocation83_spill] sm:$0xff] }
 0x63b   : > { %7369 = vrot.lane.b32.xlu1 %v7368_v16, %s7532_s18  ;;  %v5500_v16 = vsel %vm3451_vm3, %v5468_v28, %v7147_v35  ;;  %v7383_v35 = vpack.i.bf16 %v4465_v34, %v4561_v30  ;;  %v7408_v28 = vpack.i.bf16 %v4467_v44, %v4563_v36  ;;  %v14305_v30 = vld [vmem:[#allocation179_spill] sm:$0xff]  ;;  %v14306_v36 = vld [vmem:[#allocation240_spill] sm:$0xff]  ;;  %v4435_v44 = vmul.f32 %v12045_v18, %v14309_v21  ;;  %v14313_v18 = vld [vmem:[#allocation237_spill] sm:$0xff] }
 0x63c   : > { %7394 = vrot.lane.b32.xlu0 %v7393_v22, %s7532_s18  ;;  %v7160_v52 = vpop.permute.xlu1 %7159  ;;  %v14300_v22 = vld [vmem:[#allocation146_spill] sm:$0xff] }
 0x63d   : > { %7374 = vrot.lane.b32.xlu2 %v7373_v38, %s7533_s20  ;;  %6474 = vmatmul.msk.f32.gmra.mxu1 %vm346_vm0, %v4595_v41  ;;  %v7162_v17 = vunpack.i.h.bf16 %v7160_v52  ;;  %v7161_v25 = vunpack.i.l.bf16 %v7160_v52  ;;  %v5404_v38 = vsel %vm3451_vm3, %v14299_v26, %v7096_v51  ;;  %v4498_v62 = vmul.f32 %v12084_v58, %v14300_v22  ;;  %v14307_v22 = vld [vmem:[#allocation214_spill] sm:$0xff] }
 0x63e   : > { %v12241_v41 = vsel %vm1203_vm1, %v4373_v59, %v14301_v49  ;;  %v7097_v59 = vunpack.i.h.bf16 %v11988_v47  ;;  %v4562_v47 = vmul.f32 %v11218_v42, %v14306_v36  ;;  %v14317_v21 = vld [vmem:[#allocation162_spill] sm:$0xff] }
 0x63f   : > { %v5436_v52 = vsel %vm3484_vm4, %v5404_v38, %v7162_v17  ;;  %v5532_v11 = vsel %vm3484_vm4, %v5500_v16, %v7161_v25  ;;  %v7388_v51 = vpack.i.bf16 %v4499_v1, %v4498_v62  ;;  %v4596_v26 = vmul.f32 %v12241_v41, %v14303_v60  ;;  %v14304_v1 = vld [vmem:[#allocation336_spill] sm:$0xff]  ;;  %v12260_v38 = vpop.f32.mrf.mxu1 }
 0x640   : > { %5684 = vmatmul.f32.gmra.mxu0 %v5436_v52  ;;  %v7172_v17 = vunpack.i.h.bf16 %v7170_v8  ;;  %v5469_v34 = vsel %vm346_vm0, %v14304_v1, %v7157_v29  ;;  %v4531_v25 = vmul.f32 %v11913_v0, %v14305_v30  ;;  %v7166_v16 = vunpack.i.l.bf16 %v7165_v10  ;;  %v14308_v52 = vld [vmem:[#allocation251_spill] sm:$0xff] }
 0x641   : > { %5797 = vmatmul.f32.gmra.mxu3 %v5532_v11  ;;  %v4564_v62 = vmul.f32 %v11305_v27, %v14307_v22  ;;  %v5405_v11 = vsel %vm3451_vm3, %v14308_v52, %v7097_v59  ;;  %v14310_v29 = vld [vmem:[#allocation127_spill] sm:$0xff]  ;;  %v14312_v22 = vld [vmem:[#allocation297_spill] sm:$0xff] }
 0x642   : > { %v4466_v8 = vmul.f32 %v14287_v13, %v14310_v29  ;;  %v7403_v30 = vpack.i.bf16 %v4435_v44, %v4531_v25  ;;  %v4597_v52 = vmul.f32 %v14313_v18, %v14312_v22  ;;  %v7101_v13 = vunpack.i.l.bf16 %v12070_v46 }
 0x643   : > { %7384 = vrot.lane.b32.xlu1 %v7383_v35, %s7533_s20  ;;  %v5501_v35 = vsel %vm3451_vm3, %v5469_v34, %v7166_v16  ;;  %v7167_v34 = vunpack.i.h.bf16 %v7165_v10  ;;  %v4503_v44 = vmul.f32 %v14313_v18, %v14317_v21  ;;  %v14326_v21 = vld [vmem:[#allocation192_spill] sm:$0xff] }
 0x644   : > { %7409 = vrot.lane.b32.xlu0 %v7408_v28, %s7533_s20  ;;  %v7175_v53 = vpop.permute.xlu1 %7174  ;;  %v14311_v28 = vld [vmem:[#allocation116_spill] sm:$0xff]  ;;  %v5533_v1 = vsel %vm3484_vm4, %v5501_v35, %v7171_v7  ;;  %v7398_v36 = vpack.i.bf16 %v4466_v8, %v4562_v47  ;;  %v14315_v7 = vld [vmem:[#allocation193_spill] sm:$0xff]  ;;  %v7185_v8 = vpop.permute.xlu0 %7184 }
 0x645   : > { %7389 = vrot.lane.b32.xlu2 %v7388_v51, %s7531_s9  ;;  %6475 = vmatmul.msk.f32.gmra.mxu1 %vm346_vm0, %v4596_v26  ;;  %v7176_v49 = vunpack.i.l.bf16 %v7175_v53  ;;  %v5437_v51 = vsel %vm3484_vm4, %v5405_v11, %v7172_v17  ;;  %v4468_v60 = vmul.f32 %v11908_v4, %v14311_v28  ;;  %v7180_v26 = vpop.permute.xlu2 %7179  ;;  %v14314_v17 = vld [vmem:[#allocation242_spill] sm:$0xff]  ;;  %v4532_v25 = vmul.f32 %v12021_v48, %v14315_v7  ;;  %v14316_v47 = vld [vmem:[#allocation149_spill] sm:$0xff]  ;;  %v14320_v28 = vld [vmem:[#allocation159_spill] sm:$0xff] }
 0x646   : > { %v7182_v16 = vunpack.i.h.bf16 %v7180_v26  ;;  %v7181_v29 = vunpack.i.l.bf16 %v7180_v26  ;;  %v7177_v22 = vunpack.i.h.bf16 %v7175_v53  ;;  %v7102_v7 = vunpack.i.h.bf16 %v12070_v46 }
 0x647   : > { %v7423_v59 = vpack.i.bf16 %v4468_v60, %v4564_v62  ;;  %v5470_v4 = vsel %vm346_vm0, %v14314_v17, %v7176_v49  ;;  %v4501_v62 = vmul.f32 %v12208_v50, %v14316_v47  ;;  %v14318_v49 = vld [vmem:[#allocation332_spill] sm:$0xff]  ;;  %v4500_v60 = vmul.f32 %v12173_v20, %v14320_v28  ;;  %v14324_v47 = vld [vmem:[#allocation318_spill] sm:$0xff] }
 0x648   : > { %5687 = vmatmul.f32.gmra.mxu0 %v5437_v51  ;;  %v5502_v11 = vsel %vm3451_vm3, %v5470_v4, %v7167_v34  ;;  %v5406_v10 = vsel %vm3451_vm3, %v14318_v49, %v7101_v13  ;;  %v14319_v51 = vld [vmem:[#allocation97_spill] sm:$0xff]  ;;  %v14323_v4 = vld [vmem:[#allocation303_spill] sm:$0xff]  ;;  %v7186_v46 = vunpack.i.l.bf16 %v7185_v8  ;;  %v14329_v28 = vld [vmem:[#allocation130_spill] sm:$0xff] }
 0x649   : > { %5800 = vmatmul.f32.gmra.mxu3 %v5533_v1  ;;  %v4436_v35 = vmul.f32 %v12084_v58, %v14319_v51  ;;  %v12297_v1 = vpop.f32.mrf.mxu1  ;;  %v5534_v26 = vsel %vm3484_vm4, %v5502_v11, %v7181_v29  ;;  %v7413_v13 = vpack.i.bf16 %v4501_v62, %v4500_v60  ;;  %v14322_v58 = vld [vmem:[#allocation331_spill] sm:$0xff]  ;;  %v14325_v62 = vld [vmem:[#allocation249_spill] sm:$0xff]  ;;  %v14327_v29 = vld [vmem:[#allocation196_spill] sm:$0xff]  ;;  %v4469_v60 = vmul.f32 %v11913_v0, %v14329_v28 }
 0x64a   : > { %v4598_v34 = vmul.f32 %v14323_v4, %v14322_v58  ;;  %v4565_v11 = vmul.f32 %v10981_v39, %v14325_v62  ;;  %v4535_v49 = vmul.f32 %v12147_v2, %v14327_v29  ;;  %v14328_v51 = vld [vmem:[#allocation223_spill] sm:$0xff] }
 0x64b   : > { %7399 = vrot.lane.b32.xlu1 %v7398_v36, %s7533_s20  ;;  %v14321_v36 = vld [vmem:[#allocation163_spill] sm:$0xff] }
 0x64c   : > { %7424 = vrot.lane.b32.xlu0 %v7423_v59, %s7533_s20  ;;  %v4502_v59 = vmul.f32 %v12241_v41, %v14321_v36  ;;  %v7190_v18 = vpop.permute.xlu1 %7189 }
 0x64d   : > { %7404 = vrot.lane.b32.xlu2 %v7403_v30, %s7532_s18  ;;  %6476 = vmatmul.msk.f32.gmra.mxu1 %vm346_vm0, %v4597_v52  ;;  %v5438_v30 = vsel %vm3484_vm4, %v5406_v10, %v7182_v16  ;;  %v7418_v52 = vpack.i.bf16 %v4436_v35, %v4532_v25  ;;  %v7192_v16 = vunpack.i.h.bf16 %v7190_v18  ;;  %v7191_v53 = vunpack.i.l.bf16 %v7190_v18  ;;  %v7195_v10 = vpop.permute.xlu2 %7194  ;;  %v14331_v18 = vld [vmem:[#allocation100_spill] sm:$0xff] }
 0x64e   : > { %v7438_v17 = vpack.i.bf16 %v4503_v44, %v4502_v59  ;;  %v5471_v25 = vsel %vm346_vm0, %v14324_v47, %v7177_v22  ;;  %v4533_v44 = vmul.f32 %v12026_v5, %v14326_v21  ;;  %v5407_v35 = vsel %vm3451_vm3, %v14328_v51, %v7102_v7  ;;  %v14333_v7 = vld [vmem:[#allocation236_spill] sm:$0xff]  ;;  %v14338_v51 = vld [vmem:[#allocation321_spill] sm:$0xff] }
 0x64f   : > { %v5439_v59 = vsel %vm3484_vm4, %v5407_v35, %v7192_v16  ;;  %v5503_v22 = vsel %vm3451_vm3, %v5471_v25, %v7186_v46  ;;  %v7196_v47 = vunpack.i.l.bf16 %v7195_v10  ;;  %v7187_v16 = vunpack.i.h.bf16 %v7185_v8  ;;  %v14334_v25 = vld [vmem:[#allocation248_spill] sm:$0xff]  ;;  %v14339_v8 = vld [vmem:[#allocation129_spill] sm:$0xff] }
 0x650   : > { %5690 = vmatmul.f32.gmra.mxu0 %v5438_v30  ;;  %v14330_v30 = vld [vmem:[#allocation96_spill] sm:$0xff]  ;;  %v4566_v62 = vmul.f32 %v10942_v12, %v14334_v25  ;;  %v4470_v28 = vmul.f32 %v12021_v48, %v14339_v8 }
 0x651   : > { %5803 = vmatmul.f32.gmra.mxu3 %v5534_v26  ;;  %v4437_v36 = vmul.f32 %v12126_v33, %v14330_v30  ;;  %v4439_v26 = vmul.f32 %v12208_v50, %v14331_v18  ;;  %v12329_v4 = vpop.f32.mrf.mxu1  ;;  %v14337_v46 = vld [vmem:[#allocation296_spill] sm:$0xff]  ;;  %v5472_v35 = vsel %vm346_vm0, %v14338_v51, %v7196_v47  ;;  %v14347_v51 = vld [vmem:[#allocation257_spill] sm:$0xff] }
 0x652   : > { %v14345_v47 = vld [vmem:[#allocation220_spill] sm:$0xff] }
 0x653   : > { %7414 = vrot.lane.b32.xlu1 %v7413_v13, %s7531_s9  ;;  %v5535_v13 = vsel %vm3484_vm4, %v5503_v22, %v7191_v53  ;;  %v7428_v58 = vpack.i.bf16 %v4437_v36, %v4533_v44  ;;  %v7453_v0 = vpack.i.bf16 %v4439_v26, %v4535_v49  ;;  %v14336_v44 = vld [vmem:[#allocation195_spill] sm:$0xff]  ;;  %v7197_v26 = vunpack.i.h.bf16 %v7195_v10  ;;  %v14344_v10 = vld [vmem:[#allocation246_spill] sm:$0xff] }
 0x654   : > { %7439 = vrot.lane.b32.xlu0 %v7438_v17, %s7531_s9  ;;  %v7433_v17 = vpack.i.bf16 %v4469_v60, %v4565_v11  ;;  %v14335_v11 = vld [vmem:[#allocation182_spill] sm:$0xff]  ;;  %v4536_v29 = vmul.f32 %v14337_v46, %v14336_v44  ;;  %v7205_v49 = vpop.permute.xlu1 %7204  ;;  %v14341_v22 = vld [vmem:[#allocation99_spill] sm:$0xff] }
 0x655   : > { %7419 = vrot.lane.b32.xlu2 %v7418_v52, %s7532_s18  ;;  %6477 = vmatmul.msk.f32.gmra.mxu1 %vm346_vm0, %v4598_v34  ;;  %v7200_v52 = vpop.permute.xlu0 %7199  ;;  %v14332_v34 = vld [vmem:[#allocation330_spill] sm:$0xff]  ;;  %v4534_v21 = vmul.f32 %v12101_v63, %v14335_v11  ;;  %v4440_v18 = vmul.f32 %v12241_v41, %v14341_v22 }
 0x656   : > { %v4599_v33 = vmul.f32 %v14333_v7, %v14332_v34  ;;  %v7202_v50 = vunpack.i.h.bf16 %v7200_v52  ;;  %v7201_v53 = vunpack.i.l.bf16 %v7200_v52  ;;  %v14340_v60 = vld [vmem:[#allocation86_spill] sm:$0xff]  ;;  %v7210_v52 = vpop.permute.xlu2 %7209  ;;  %v14342_v34 = vld [vmem:[#allocation304_spill] sm:$0xff] }
 0x657   : > { %v4438_v30 = vmul.f32 %v12173_v20, %v14340_v60  ;;  %v7468_v48 = vpack.i.bf16 %v4440_v18, %v4536_v29  ;;  %v14343_v20 = vld [vmem:[#allocation226_spill] sm:$0xff]  ;;  %v7212_v41 = vunpack.i.h.bf16 %v7210_v52  ;;  %v14349_v60 = vld [vmem:[#allocation337_spill] sm:$0xff] }
 0x658   : > { %5693 = vmatmul.f32.gmra.mxu0 %v5439_v59  ;;  %v5440_v36 = vsel %vm3484_vm4, %v11939_v56, %v7202_v50  ;;  %v5504_v59 = vsel %vm3451_vm3, %v5472_v35, %v7187_v16  ;;  %v4600_v7 = vmul.f32 %v14343_v20, %v14342_v34  ;;  %v4567_v16 = vmul.f32 %v14273_v3, %v14345_v47  ;;  %v14355_v20 = vld [vmem:[#allocation319_spill] sm:$0xff] }
 0x659   : > { %5806 = vmatmul.f32.gmra.mxu3 %v5535_v13  ;;  %v5536_v13 = vsel %vm3484_vm4, %v5504_v59, %v7201_v53  ;;  %v12359_v56 = vpop.f32.mrf.mxu1  ;;  %v7211_v53 = vunpack.i.l.bf16 %v7210_v52  ;;  %v4569_v35 = vmul.f32 %v14290_v9, %v14347_v51  ;;  %v14351_v59 = vld [vmem:[#allocation258_spill] sm:$0xff]  ;;  %v14353_v52 = vld [vmem:[#allocation133_spill] sm:$0xff] }
 0x65a   : > { %v4568_v22 = vmul.f32 %v14281_v15, %v14351_v59  ;;  %v14354_v15 = vld [vmem:[#allocation232_spill] sm:$0xff] }
 0x65b   : > { %7429 = vrot.lane.b32.xlu1 %v7428_v58, %s7532_s18  ;;  %v7443_v58 = vpack.i.bf16 %v4438_v30, %v4534_v21  ;;  %v5441_v21 = vsel %vm3484_vm4, %v11943_v23, %v7212_v41 }
 0x65c   : > { %7454 = vrot.lane.b32.xlu0 %v7453_v0, %s7532_s18  ;;  %v7206_v0 = vunpack.i.l.bf16 %v7205_v49  ;;  %v7220_v44 = vpop.permute.xlu1 %7219 }
 0x65d   : > { %7434 = vrot.lane.b32.xlu2 %v7433_v17, %s7533_s20  ;;  %6478 = vmatmul.msk.f32.gmra.mxu1 %vm346_vm0, %v4599_v33  ;;  %v7448_v17 = vpack.i.bf16 %v4470_v28, %v4566_v62  ;;  %v5473_v33 = vsel %vm346_vm0, %v14344_v10, %v7197_v26  ;;  %v7215_v25 = vpop.permute.xlu0 %7214  ;;  %v14346_v62 = vld [vmem:[#allocation119_spill] sm:$0xff]  ;;  %v14348_v28 = vld [vmem:[#allocation284_spill] sm:$0xff]  ;;  %v7221_v23 = vunpack.i.l.bf16 %v7220_v44  ;;  %v14352_v26 = vld [vmem:[#allocation245_spill] sm:$0xff] }
 0x65e   : > { %v5505_v50 = vsel %vm3451_vm3, %v5473_v33, %v7206_v0  ;;  %v4471_v11 = vmul.f32 %v12026_v5, %v14346_v62  ;;  %v7216_v8 = vunpack.i.l.bf16 %v7215_v25  ;;  %v14350_v30 = vpack.i.bf16 %v14348_v28, %v14349_v60  ;;  %v7225_v18 = vpop.permute.xlu2 %7224 }
 0x65f   : > { %v5537_v46 = vsel %vm3484_vm4, %v5505_v50, %v7211_v53  ;;  %v7207_v5 = vunpack.i.h.bf16 %v7205_v49  ;;  %v7217_v49 = vunpack.i.h.bf16 %v7215_v25  ;;  %v7226_v47 = vunpack.i.l.bf16 %v7225_v18 }
 0x660   : > { %5696 = vmatmul.f32.gmra.mxu0 %v5440_v36  ;;  %v7458_v29 = vpack.i.bf16 %v4471_v11, %v4567_v16  ;;  %v7222_v36 = vunpack.i.h.bf16 %v7220_v44  ;;  %v5474_v9 = vsel %vm346_vm0, %v14352_v26, %v7216_v8  ;;  %v14358_v11 = vld [vmem:[#allocation132_spill] sm:$0xff]  ;;  %v14359_v44 = vld [vmem:[#allocation309_spill] sm:$0xff] }
 0x661   : > { %5809 = vmatmul.f32.gmra.mxu3 %v5536_v13  ;;  %v4472_v13 = vmul.f32 %v12101_v63, %v14353_v52 }
 0x663   : > { %7444 = vrot.lane.b32.xlu1 %v7443_v58, %s7532_s18  ;;  %v5506_v58 = vsel %vm3451_vm3, %v5474_v9, %v7207_v5  ;;  %v7473_v34 = vpack.i.bf16 %v4472_v13, %v4568_v22 }
 0x664   : > { %7469 = vrot.lane.b32.xlu0 %v7468_v48, %s7532_s18  ;;  %v5538_v48 = vsel %vm3484_vm4, %v5506_v58, %v7221_v23  ;;  %v14360_v23 = vld [vmem:[#allocation327_spill] sm:$0xff] }
 0x665   : > { %7449 = vrot.lane.b32.xlu2 %v7448_v17, %s7533_s20  ;;  %6479 = vmatmul.msk.f32.gmra.mxu1 %vm346_vm0, %v4600_v7  ;;  %v5442_v17 = vsel %vm3484_vm4, %v12057_v57, %v7222_v36  ;;  %v7230_v0 = vpop.permute.xlu0 %7229  ;;  %v14356_v7 = vpack.i.bf16 %v14354_v15, %v14355_v20  ;;  %v7235_v41 = vpop.permute.xlu1 %7234  ;;  %v14357_v57 = vld [vmem:[#allocation294_spill] sm:$0xff] }
 0x666   : > { %v7232_v63 = vunpack.i.h.bf16 %v7230_v0  ;;  %v7231_v10 = vunpack.i.l.bf16 %v7230_v0  ;;  %v5475_v33 = vsel %vm346_vm0, %v14357_v57, %v7217_v49  ;;  %v7236_v16 = vunpack.i.l.bf16 %v7235_v41  ;;  %v7240_v25 = vpop.permute.xlu2 %7239 }
 0x667   : > { %v5507_v53 = vsel %vm3451_vm3, %v5475_v33, %v7226_v47  ;;  %v7242_v51 = vunpack.i.h.bf16 %v7240_v25  ;;  %v7237_v60 = vunpack.i.h.bf16 %v7235_v41  ;;  %v14362_v33 = vld [vmem:[#allocation326_spill] sm:$0xff] }
 0x668   : > { %5699 = vmatmul.f32.gmra.mxu0 %v5441_v21  ;;  %v5443_v50 = vsel %vm3484_vm4, %v12061_v6, %v7232_v63  ;;  %v5539_v62 = vsel %vm3484_vm4, %v5507_v53, %v7231_v10  ;;  %v4473_v21 = vmul.f32 %v12147_v2, %v14358_v11  ;;  %v7241_v6 = vunpack.i.l.bf16 %v7240_v25 }
 0x669   : > { %5812 = vmatmul.f32.gmra.mxu3 %v5537_v46  ;;  %v5476_v46 = vsel %vm346_vm0, %v14359_v44, %v7236_v16  ;;  %v5444_v28 = vsel %vm3484_vm4, %v12135_v37, %v7242_v51  ;;  %v5477_v59 = vsel %vm346_vm0, %v14360_v23, %v7237_v60  ;;  %v14363_v51 = vld [vmem:[#allocation316_spill] sm:$0xff] }
 0x66b   : > { %7459 = vrot.lane.b32.xlu1 %v7458_v29, %s7533_s20  ;;  %v7227_v29 = vunpack.i.h.bf16 %v7225_v18 }
 0x66c   : > { %5336 = vrot.lane.b32.xlu0 %v4569_v35, %s7533_s20 }
 0x66d   : > { %7464 = vrot.lane.b32.xlu2 %v14350_v30, %s7531_s9  ;;  %v5508_v35 = vsel %vm3451_vm3, %v5476_v46, %v7227_v29  ;;  %v7245_v8 = vpop.permute.xlu0 %7244  ;;  %v7250_v30 = vpop.permute.xlu1 %7249 }
 0x66e   : > { %v5540_v2 = vsel %vm3484_vm4, %v5508_v35, %v7241_v6  ;;  %v7252_v5 = vunpack.i.h.bf16 %v7250_v30  ;;  %v7251_v36 = vunpack.i.l.bf16 %v7250_v30  ;;  %v7246_v22 = vunpack.i.l.bf16 %v7245_v8  ;;  %v7255_v18 = vpop.permute.xlu2 %7254 }
 0x66f   : > { %v7256_v13 = vunpack.i.l.bf16 %v7255_v18  ;;  %v7257_v20 = vunpack.i.h.bf16 %v7255_v18 }
 0x670   : > { %5702 = vmatmul.f32.gmra.mxu0 %v5442_v17  ;;  %v5445_v26 = vsel %vm3484_vm4, %v12139_v43, %v7252_v5  ;;  %v5509_v9 = vsel %vm3451_vm3, %v5477_v59, %v7246_v22  ;;  %v7247_v17 = vunpack.i.h.bf16 %v7245_v8  ;;  %v14364_v5 = vld [vmem:[#allocation340_spill] sm:$0xff] }
 0x671   : > { %5815 = vmatmul.f32.gmra.mxu3 %v5538_v48  ;;  %v5541_v37 = vsel %vm3484_vm4, %v5509_v9, %v7251_v36  ;;  %v14361_v48 = vld [vmem:[#allocation291_spill] sm:$0xff]  ;;  %v5479_v47 = vsel %vm346_vm0, %v14362_v33, %v7257_v20 }
 0x673   : > { %7474 = vrot.lane.b32.xlu1 %v7473_v34, %s7533_s20  ;;  %v5478_v34 = vsel %vm346_vm0, %v14361_v48, %v7256_v13 }
 0x674   : > { %v5510_v43 = vsel %vm3451_vm3, %v5478_v34, %v7247_v17 }
 0x675   : > { %7479 = vrot.lane.b32.xlu2 %v14356_v7, %s7532_s18  ;;  %v7260_v52 = vpop.permute.xlu0 %7259  ;;  %v7265_v0 = vpop.permute.xlu1 %7264 }
 0x676   : > { %v7262_v58 = vunpack.i.h.bf16 %v7260_v52  ;;  %v7261_v49 = vunpack.i.l.bf16 %v7260_v52  ;;  %v7270_v7 = vpop.permute.xlu2 %7269  ;;  %v7266_v41 = vunpack.i.l.bf16 %v7265_v0  ;;  %v7267_v11 = vunpack.i.h.bf16 %v7265_v0 }
 0x677   : > { %v7272_v10 = vunpack.i.h.bf16 %v7270_v7 }
 0x678   : > { %5705 = vmatmul.f32.gmra.mxu0 %v5443_v50  ;;  %v5446_v15 = vsel %vm3484_vm4, %v12001_v54, %v7262_v58  ;;  %v5542_v63 = vsel %vm3484_vm4, %v5510_v43, %v7261_v49  ;;  %v5511_v16 = vsel %vm3451_vm3, %v5479_v47, %v7266_v41  ;;  %v7271_v50 = vunpack.i.l.bf16 %v7270_v7 }
 0x679   : > { %5818 = vmatmul.f32.gmra.mxu3 %v5539_v62  ;;  %v5447_v54 = vsel %vm3484_vm4, %v12005_v40, %v7272_v10 }
 0x67a   : > { %v5543_v25 = vsel %vm3484_vm4, %v5511_v16, %v7271_v50  ;;  %v14366_v16 = vld [vmem:[#allocation229_spill] sm:$0xff] }
 0x67b   : > { %4952 = vrot.lane.b32.xlu1 %v4473_v21, %s7533_s20 }
 0x67d   : > { %v7275_v57 = vpop.permute.xlu0 %7274  ;;  %v7280_v53 = vpop.permute.xlu1 %7279 }
 0x67e   : > { %v7276_v62 = vunpack.i.l.bf16 %v7275_v57  ;;  %v7282_v21 = vunpack.i.h.bf16 %v7280_v53  ;;  %v7285_v44 = vpop.permute.xlu2 %7284  ;;  %v7281_v46 = vunpack.i.l.bf16 %v7280_v53 }
 0x67f   : > { %v7286_v23 = vunpack.i.l.bf16 %v7285_v44  ;;  %v7287_v17 = vunpack.i.h.bf16 %v7285_v44 }
 0x680   : > { %5708 = vmatmul.f32.gmra.mxu0 %v5444_v28  ;;  %v5480_v35 = vsel %vm346_vm0, %v14363_v51, %v7276_v62  ;;  %v5448_v6 = vsel %vm3484_vm4, %v12092_v24, %v7282_v21  ;;  %v7277_v28 = vunpack.i.h.bf16 %v7275_v57  ;;  %v7490_v51 = vld [vmem:[%s7613_s22] sm:$0xff] }
 0x681   : > { %5821 = vmatmul.f32.gmra.mxu3 %v5540_v2  ;;  %v5512_v8 = vsel %vm3451_vm3, %v5480_v35, %v7267_v11  ;;  %v14368_v11 = vld [vmem:[#allocation344_spill] sm:$0xff] }
 0x682   : > { %v5544_v60 = vsel %vm3484_vm4, %v5512_v8, %v7281_v46  ;;  %v5481_v36 = vsel %vm346_vm0, %v14364_v5, %v7277_v28 }
 0x683   : > { %v5513_v24 = vsel %vm3451_vm3, %v5481_v36, %v7286_v23 }
 0x685   : > { %v7290_v29 = vpop.permute.xlu0 %7289  ;;  %v7295_v40 = vpop.permute.xlu1 %7294 }
 0x686   : > { %v7292_v30 = vunpack.i.h.bf16 %v7290_v29  ;;  %v7291_v2 = vunpack.i.l.bf16 %v7290_v29  ;;  %v7300_v59 = vpop.permute.xlu2 %7299  ;;  %v7296_v22 = vunpack.i.l.bf16 %v7295_v40  ;;  %v7297_v43 = vunpack.i.h.bf16 %v7295_v40 }
 0x687   : > { %v7302_v58 = vunpack.i.h.bf16 %v7300_v59  ;;  %v7301_v48 = vunpack.i.l.bf16 %v7300_v59 }
 0x688   : > { %5711 = vmatmul.f32.gmra.mxu0 %v5445_v26  ;;  %v5449_v18 = vsel %vm3484_vm4, %v12096_v55, %v7292_v30  ;;  %v5545_v9 = vsel %vm3484_vm4, %v5513_v24, %v7291_v2  ;;  %v12447_v55 = vld [vmem:[%s12759_s7] ss:$0 sm:$0xff]  ;;  %v5483_v50 = vsel %vm346_vm0, %v14366_v16, %v7297_v43  ;;  %v14369_v24 = vld [vmem:[#allocation259_spill] sm:$0xff] }
 0x689   : > { %5824 = vmatmul.f32.gmra.mxu3 %v5541_v37  ;;  %v14365_v37 = vld [vmem:[#allocation244_spill] sm:$0xff]  ;;  %v5450_v34 = vsel %vm3484_vm4, %v12181_v32, %v7302_v58 }
 0x68a   : > { %v5482_v13 = vsel %vm346_vm0, %v14365_v37, %v7296_v22  ;;  %v12481_v37 = vpop.f32.mrf.mxu1 }
 0x68b   : > { %v5514_v0 = vsel %vm3451_vm3, %v5482_v13, %v7287_v17 }
 0x68c   : > { %v5546_v20 = vsel %vm3484_vm4, %v5514_v0, %v7301_v48  ;;  %v7491_v0 = vld [vmem:[%s7613_s22 + $0x8] sm:$0xff] }
 0x68d   : > { %v7305_v26 = vpop.permute.xlu0 %7304  ;;  %v7310_v52 = vpop.permute.xlu1 %7309 }
 0x68e   : > { %v7307_v7 = vunpack.i.h.bf16 %v7305_v26  ;;  %v7312_v41 = vunpack.i.h.bf16 %v7310_v52  ;;  %v7311_v57 = vunpack.i.l.bf16 %v7310_v52  ;;  %v7306_v32 = vunpack.i.l.bf16 %v7305_v26 }
 0x690   : > { %5714 = vmatmul.f32.gmra.mxu0 %v5446_v15  ;;  %v12451_v15 = vpop.permute.xlu2 %7314  ;;  %v5515_v46 = vsel %vm3451_vm3, %v5483_v50, %v7306_v32  ;;  %v14371_v32 = vld [vmem:[#allocation233_spill] sm:$0xff] }
 0x691   : > { %5827 = vmatmul.f32.gmra.mxu3 %v5542_v63  ;;  %v5547_v29 = vsel %vm3484_vm4, %v5515_v46, %v7311_v57 }
 0x692   : > { %v12501_v46 = vpop.f32.mrf.mxu1 }
 0x695   : > { %v7320_v63 = vpop.permute.xlu0 %7319  ;;  %v7325_v33 = vpop.permute.xlu1 %7324 }
 0x696   : > { %v7322_v28 = vunpack.i.h.bf16 %v7320_v63  ;;  %v7321_v40 = vunpack.i.l.bf16 %v7320_v63  ;;  %v7326_v36 = vunpack.i.l.bf16 %v7325_v33 }
 0x698   : > { %5717 = vmatmul.f32.gmra.mxu0 %v5447_v54  ;;  %v7330_v8 = vpop.permute.xlu2 %7329  ;;  %v5420_v26 = vsel %vm3451_vm3, %v14369_v24, %v7322_v28 }
 0x699   : > { %5830 = vmatmul.f32.gmra.mxu3 %v5543_v25  ;;  %v14367_v25 = vld [vmem:[#allocation255_spill] sm:$0xff]  ;;  %v7332_v43 = vunpack.i.h.bf16 %v7330_v8 }
 0x69a   : > { %v5419_v62 = vsel %vm3451_vm3, %v14367_v25, %v7307_v7 }
 0x69b   : > { %v5451_v44 = vsel %vm3484_vm4, %v5419_v62, %v7312_v41 }
 0x69d   : > { %v7335_v5 = vpop.permute.xlu0 %7334  ;;  %v12475_v22 = vpop.permute.xlu1 %7339 }
 0x69e   : > { %v7337_v7 = vunpack.i.h.bf16 %v7335_v5  ;;  %v7341_v16 = vunpack.i.l.bf16 %v12475_v22 }
 0x6a0   : > { %5720 = vmatmul.f32.gmra.mxu0 %v5448_v6  ;;  %v7316_v6 = vunpack.i.l.bf16 %v12451_v15 }
 0x6a1   : > { %5833 = vmatmul.f32.gmra.mxu3 %v5544_v60  ;;  %v7327_v60 = vunpack.i.h.bf16 %v7325_v33 }
 0x6a3   : > { %v5452_v17 = vsel %vm3484_vm4, %v5420_v26, %v7327_v60 }
 0x6a7   : > { %v5679_v49 = vpop.f32.mrf.mxu0 }
 0x6a8   : > { %5723 = vmatmul.f32.gmra.mxu0 %v5449_v18  ;;  %v5680_v10 = vadd.f32 %v12447_v55, %v5679_v49 }
 0x6a9   : > { %5836 = vmatmul.f32.gmra.mxu3 %v5545_v9  ;;  %v14370_v9 = vld [vmem:[#allocation241_spill] sm:$0xff] }
 0x6aa   : > { %v5484_v52 = vsel %vm346_vm0, %v14370_v9, %v7316_v6  ;;  %v14373_v6 = vld [vmem:[#allocation243_spill] sm:$0xff] }
 0x6ab   : > { %v5516_v58 = vsel %vm3451_vm3, %v5484_v52, %v7321_v40  ;;  %v7342_v52 = vunpack.i.h.bf16 %v12475_v22 }
 0x6ac   : > { %v5548_v49 = vsel %vm3484_vm4, %v5516_v58, %v7326_v36 }
 0x6af   : > { %v5682_v54 = vpop.f32.mrf.mxu0 }
 0x6b0   : > { %5726 = vmatmul.f32.gmra.mxu0 %v5450_v34  ;;  %v5683_v30 = vadd.f32 %v12447_v55, %v5682_v54  ;;  %v7317_v34 = vunpack.i.h.bf16 %v12451_v15  ;;  %v5421_v15 = vsel %vm3451_vm3, %v14371_v32, %v7332_v43  ;;  %v12519_v43 = vpop.f32.mrf.mxu1 }
 0x6b1   : > { %5839 = vmatmul.f32.gmra.mxu3 %v5546_v20  ;;  %v7331_v20 = vunpack.i.l.bf16 %v7330_v8  ;;  %v5453_v62 = vsel %vm3484_vm4, %v5421_v15, %v7337_v7  ;;  %v5486_v8 = vsel %vm346_vm0, %v14373_v6, %v7341_v16  ;;  %v14377_v6 = vld [vmem:[#allocation234_spill] sm:$0xff] }
 0x6b4   : > { %v5792_v47 = vpop.f32.mrf.mxu3 }
 0x6b5   : > { %v5793_v53 = vadd.f32 %v5792_v47, %v5680_v10  ;;  %v7336_v10 = vunpack.i.l.bf16 %v7335_v5  ;;  %v7350_v47 = vpop.permute.xlu0 %7349 }
 0x6b7   : > { %v5906_v21 = vadd.f32 %v14368_v11, %v5793_v53  ;;  %v14372_v53 = vld [vmem:[#allocation328_spill] sm:$0xff] }
 0x6b8   : > { %5729 = vmatmul.f32.gmra.mxu0 %v5451_v44  ;;  %v5485_v54 = vsel %vm346_vm0, %v14372_v53, %v7317_v34 }
 0x6b9   : > { %v6001_v35 = vadd.f32 %v7490_v51, %v5906_v21  ;;  %5842 = vmatmul.f32.gmra.mxu3 %v5547_v29  ;;  %v5517_v11 = vsel %vm3451_vm3, %v5485_v54, %v7331_v20  ;;  %v7355_v21 = vpop.permute.xlu1 %7354  ;;  %v7492_v29 = vld [vmem:[%s7613_s22 + $0x10] sm:$0xff] }
 0x6ba   : > { %v5549_v44 = vsel %vm3484_vm4, %v5517_v11, %v7336_v10  ;;  %v7494_v11 = vld [vmem:[%s7613_s22 + $0x20] sm:$0xff] }
 0x6bb   : > { %v6033_v2 = vmax.f32 %v6001_v35, 0.0 }
 0x6bc   : > { %v5795_v23 = vpop.f32.mrf.mxu3 }
 0x6bd   : > { %6065 = vst.msk [vmem:[%s12470_s15] sm:$0xff] %vm346_vm0, %v6033_v2  ;;  %v5796_v59 = vadd.f32 %v5795_v23, %v5683_v30  ;;  %v5685_v18 = vpop.f32.mrf.mxu0  ;;  %v7351_v23 = vunpack.i.l.bf16 %v7350_v47 }
 0x6be   : > { %v5686_v41 = vadd.f32 %v12447_v55, %v5685_v18  ;;  %v14374_v18 = vld [vmem:[#allocation254_spill] sm:$0xff] }
 0x6bf   : > { %v5909_v13 = vadd.f32 %v12185_v61, %v5796_v59  ;;  %v7345_v61 = vpop.permute.xlu2 %7344 }
 0x6c0   : > { %5732 = vmatmul.f32.gmra.mxu0 %v5452_v17  ;;  %v7347_v35 = vunpack.i.h.bf16 %v7345_v61  ;;  %v7346_v28 = vunpack.i.l.bf16 %v7345_v61  ;;  %v7357_v17 = vunpack.i.h.bf16 %v7355_v21 }
 0x6c1   : > { %v6002_v48 = vadd.f32 %v7491_v0, %v5909_v13  ;;  %5845 = vmatmul.f32.gmra.mxu3 %v5548_v49  ;;  %v12515_v13 = vpop.permute.xlu0 %7364  ;;  %v7356_v49 = vunpack.i.l.bf16 %v7355_v21  ;;  %v7493_v0 = vld [vmem:[%s7613_s22 + $0x18] sm:$0xff]  ;;  %v7370_v34 = vpop.permute.xlu1 %7369 }
 0x6c2   : > { %v5518_v5 = vsel %vm3451_vm3, %v5486_v8, %v7346_v28  ;;  %v5422_v24 = vsel %vm3451_vm3, %v14374_v18, %v7347_v35  ;;  %v7366_v53 = vunpack.i.l.bf16 %v12515_v13  ;;  %v7372_v54 = vunpack.i.h.bf16 %v7370_v34  ;;  %v14378_v28 = vld [vmem:[#allocation333_spill] sm:$0xff] }
 0x6c3   : > { %v6034_v63 = vmax.f32 %v6002_v48, 0.0  ;;  %v5550_v58 = vsel %vm3484_vm4, %v5518_v5, %v7351_v23 }
 0x6c4   : > { %v5798_v57 = vpop.f32.mrf.mxu3  ;;  %v5424_v8 = vsel %vm3451_vm3, %v14377_v6, %v7372_v54 }
 0x6c5   : > { %6066 = vst.msk [vmem:[%s12470_s15 + $0x8] sm:$0xff] %vm346_vm0, %v6034_v63  ;;  %v5799_v33 = vadd.f32 %v5798_v57, %v5686_v41  ;;  %v5688_v50 = vpop.f32.mrf.mxu0  ;;  %v14375_v63 = vld [vmem:[#allocation252_spill] sm:$0xff]  ;;  %v14376_v41 = vld [vmem:[#allocation225_spill] sm:$0xff] }
 0x6c6   : > { %v5689_v60 = vadd.f32 %v12447_v55, %v5688_v50  ;;  %v5423_v22 = vsel %vm3451_vm3, %v14375_v63, %v7357_v17  ;;  %v5487_v61 = vsel %vm346_vm0, %v14376_v41, %v7342_v52  ;;  %v7367_v52 = vunpack.i.h.bf16 %v12515_v13 }
 0x6c7   : > { %v5912_v25 = vadd.f32 %v12219_v19, %v5799_v33  ;;  %v7352_v19 = vunpack.i.h.bf16 %v7350_v47  ;;  %v7360_v36 = vpop.permute.xlu2 %7359  ;;  %v5519_v33 = vsel %vm3451_vm3, %v5487_v61, %v7356_v49  ;;  %v14380_v61 = vld [vmem:[#allocation342_spill] sm:$0xff] }
 0x6c8   : > { %5735 = vmatmul.f32.gmra.mxu0 %v5453_v62  ;;  %v7362_v10 = vunpack.i.h.bf16 %v7360_v36  ;;  %v7361_v47 = vunpack.i.l.bf16 %v7360_v36  ;;  %v7371_v62 = vunpack.i.l.bf16 %v7370_v34  ;;  %v5489_v13 = vsel %vm346_vm0, %v14380_v61, %v7367_v52 }
 0x6c9   : > { %v6003_v51 = vadd.f32 %v7492_v29, %v5912_v25  ;;  %5848 = vmatmul.f32.gmra.mxu3 %v5549_v44  ;;  %v5454_v9 = vsel %vm3484_vm4, %v5422_v24, %v7352_v19  ;;  %v7380_v44 = vpop.permute.xlu0 %7379  ;;  %v5488_v19 = vsel %vm346_vm0, %v14378_v28, %v7366_v53  ;;  %v7495_v24 = vld [vmem:[%s7613_s22 + $0x28] sm:$0xff] }
 0x6ca   : > { %v5455_v32 = vsel %vm3484_vm4, %v5423_v22, %v7362_v10  ;;  %v5551_v25 = vsel %vm3484_vm4, %v5519_v33, %v7361_v47  ;;  %v7382_v17 = vunpack.i.h.bf16 %v7380_v44  ;;  %v14379_v22 = vld [vmem:[#allocation203_spill] sm:$0xff] }
 0x6cb   : > { %v6035_v40 = vmax.f32 %v6003_v51, 0.0 }
 0x6cc   : > { %v5801_v30 = vpop.f32.mrf.mxu3  ;;  %v5425_v41 = vsel %vm3451_vm3, %v14379_v22, %v7382_v17 }
 0x6cd   : > { %6067 = vst.msk [vmem:[%s12470_s15 + $0x10] sm:$0xff] %vm346_vm0, %v6035_v40  ;;  %v5802_v2 = vadd.f32 %v5801_v30, %v5689_v60  ;;  %v5691_v59 = vpop.f32.mrf.mxu0  ;;  %v12539_v40 = vpop.f32.mrf.mxu1 }
 0x6cf   : > { %v5915_v26 = vadd.f32 %v12260_v38, %v5802_v2  ;;  %v5692_v38 = vadd.f32 %v12447_v55, %v5691_v59  ;;  %v7375_v15 = vpop.permute.xlu2 %7374  ;;  %v5520_v2 = vsel %vm3451_vm3, %v5488_v19, %v7371_v62 }
 0x6d0   : > { %5738 = vmatmul.f32.gmra.mxu0 %v5454_v9  ;;  %v7377_v60 = vunpack.i.h.bf16 %v7375_v15  ;;  %v7376_v5 = vunpack.i.l.bf16 %v7375_v15 }
 0x6d1   : > { %v6004_v48 = vadd.f32 %v7493_v0, %v5915_v26  ;;  %5851 = vmatmul.f32.gmra.mxu3 %v5550_v58  ;;  %v7381_v58 = vunpack.i.l.bf16 %v7380_v44 }
 0x6d2   : > { %v5456_v59 = vsel %vm3484_vm4, %v5424_v8, %v7377_v60  ;;  %v5552_v18 = vsel %vm3484_vm4, %v5520_v2, %v7376_v5 }
 0x6d3   : > { %v6036_v20 = vmax.f32 %v6004_v48, 0.0  ;;  %v5521_v47 = vsel %vm3451_vm3, %v5489_v13, %v7381_v58 }
 0x6d4   : > { %v5804_v7 = vpop.f32.mrf.mxu3 }
 0x6d5   : > { %6068 = vst.msk [vmem:[%s12470_s15 + $0x18] sm:$0xff] %vm346_vm0, %v6036_v20  ;;  %v5805_v57 = vadd.f32 %v5804_v7, %v5692_v38  ;;  %v5694_v16 = vpop.f32.mrf.mxu0  ;;  %v12558_v10 = vpop.f32.mrf.mxu1 }
 0x6d6   : > { %v5695_v51 = vadd.f32 %v12447_v55, %v5694_v16 }
 0x6d7   : > { %v5918_v50 = vadd.f32 %v12297_v1, %v5805_v57  ;;  %v7385_v1 = vpop.permute.xlu1 %7384  ;;  %v12548_v9 = vpop.permute.xlu2 %7389 }
 0x6d8   : > { %5741 = vmatmul.f32.gmra.mxu0 %v5455_v32  ;;  %v7387_v49 = vunpack.i.h.bf16 %v7385_v1  ;;  %v7386_v34 = vunpack.i.l.bf16 %v7385_v1  ;;  %v7391_v15 = vunpack.i.l.bf16 %v12548_v9 }
 0x6d9   : > { %v6005_v21 = vadd.f32 %v7494_v11, %v5918_v50  ;;  %5854 = vmatmul.f32.gmra.mxu3 %v5551_v25  ;;  %v7496_v50 = vld [vmem:[%s7613_s22 + $0x30] sm:$0xff] }
 0x6da   : > { %v5457_v33 = vsel %vm3484_vm4, %v5425_v41, %v7387_v49  ;;  %v5553_v16 = vsel %vm3484_vm4, %v5521_v47, %v7386_v34  ;;  %v5490_v8 = vsel %vm346_vm0, %v11266_v31, %v7391_v15  ;;  %v7498_v41 = vld [vmem:[%s7613_s22 + $0x40] sm:$0xff] }
 0x6db   : > { %v6037_v29 = vmax.f32 %v6005_v21, 0.0 }
 0x6dc   : > { %v5807_v35 = vpop.f32.mrf.mxu3 }
 0x6dd   : > { %6069 = vst.msk [vmem:[%s12470_s15 + $0x20] sm:$0xff] %vm346_vm0, %v6037_v29  ;;  %v5808_v30 = vadd.f32 %v5807_v35, %v5695_v51  ;;  %v5697_v36 = vpop.f32.mrf.mxu0  ;;  %v14381_v35 = vld [vmem:[#allocation338_spill] sm:$0xff]  ;;  %v12579_v5 = vpop.f32.mrf.mxu1 }
 0x6de   : > { %v5698_v48 = vadd.f32 %v12447_v55, %v5697_v36  ;;  %v7497_v36 = vld [vmem:[%s7613_s22 + $0x38] sm:$0xff] }
 0x6df   : > { %v5921_v23 = vadd.f32 %v12329_v4, %v5808_v30  ;;  %v7395_v4 = vpop.permute.xlu0 %7394  ;;  %v7400_v7 = vpop.permute.xlu1 %7399 }
 0x6e0   : > { %5744 = vmatmul.f32.gmra.mxu0 %v5456_v59  ;;  %v7397_v53 = vunpack.i.h.bf16 %v7395_v4  ;;  %v7396_v54 = vunpack.i.l.bf16 %v7395_v4  ;;  %v7402_v25 = vunpack.i.h.bf16 %v7400_v7  ;;  %v7401_v21 = vunpack.i.l.bf16 %v7400_v7  ;;  %v14382_v4 = vld [vmem:[#allocation286_spill] sm:$0xff] }
 0x6e1   : > { %v6006_v26 = vadd.f32 %v7495_v24, %v5921_v23  ;;  %5857 = vmatmul.f32.gmra.mxu3 %v5552_v18  ;;  %v7392_v59 = vunpack.i.h.bf16 %v12548_v9 }
 0x6e2   : > { %v5426_v6 = vsel %vm3451_vm3, %v14381_v35, %v7397_v53  ;;  %v5522_v60 = vsel %vm3451_vm3, %v5490_v8, %v7396_v54  ;;  %v7499_v35 = vld [vmem:[%s7613_s22 + $0x48] sm:$0xff] }
 0x6e3   : > { %v6038_v0 = vmax.f32 %v6006_v26, 0.0  ;;  %v5458_v19 = vsel %vm3484_vm4, %v5426_v6, %v7402_v25  ;;  %v5554_v2 = vsel %vm3484_vm4, %v5522_v60, %v7401_v21  ;;  %v5491_v9 = vsel %vm346_vm0, %v11260_v14, %v7392_v59 }
 0x6e4   : > { %v5810_v20 = vpop.f32.mrf.mxu3 }
 0x6e5   : > { %6070 = vst.msk [vmem:[%s12470_s15 + $0x28] sm:$0xff] %vm346_vm0, %v6038_v0  ;;  %v5811_v38 = vadd.f32 %v5810_v20, %v5698_v48  ;;  %v5700_v63 = vpop.f32.mrf.mxu0  ;;  %v12598_v14 = vpop.f32.mrf.mxu1 }
 0x6e6   : > { %v5701_v11 = vadd.f32 %v12447_v55, %v5700_v63 }
 0x6e7   : > { %v5924_v57 = vadd.f32 %v12359_v56, %v5811_v38  ;;  %v7405_v56 = vpop.permute.xlu2 %7404  ;;  %v7410_v51 = vpop.permute.xlu0 %7409 }
 0x6e8   : > { %5747 = vmatmul.f32.gmra.mxu0 %v5457_v33  ;;  %v12576_v30 = vpop.permute.xlu1 %7414  ;;  %v7407_v31 = vunpack.i.h.bf16 %v7405_v56  ;;  %v7406_v18 = vunpack.i.l.bf16 %v7405_v56  ;;  %v7411_v52 = vunpack.i.l.bf16 %v7410_v51 }
 0x6e9   : > { %v6007_v32 = vadd.f32 %v7496_v50, %v5924_v57  ;;  %5860 = vmatmul.f32.gmra.mxu3 %v5553_v16  ;;  %v7416_v0 = vunpack.i.l.bf16 %v12576_v30 }
 0x6ea   : > { %v5427_v34 = vsel %vm3451_vm3, %v14382_v4, %v7407_v31  ;;  %v5523_v7 = vsel %vm3451_vm3, %v5491_v9, %v7406_v18 }
 0x6eb   : > { %v6039_v62 = vmax.f32 %v6007_v32, 0.0  ;;  %v5555_v22 = vsel %vm3484_vm4, %v5523_v7, %v7411_v52  ;;  %v5492_v33 = vsel %vm346_vm0, %v11218_v42, %v7416_v0  ;;  %v7500_v0 = vld [vmem:[%s7613_s22 + $0x50] sm:$0xff] }
 0x6ec   : > { %v5813_v44 = vpop.f32.mrf.mxu3 }
 0x6ed   : > { %6071 = vst.msk [vmem:[%s12470_s15 + $0x30] sm:$0xff] %vm346_vm0, %v6039_v62  ;;  %v5814_v29 = vadd.f32 %v5813_v44, %v5701_v11  ;;  %v5703_v1 = vpop.f32.mrf.mxu0  ;;  %v14383_v62 = vld [vmem:[#allocation329_spill] sm:$0xff]  ;;  %v7417_v44 = vunpack.i.h.bf16 %v12576_v30 }
 0x6ee   : > { %v5704_v26 = vadd.f32 %v12447_v55, %v5703_v1 }
 0x6ef   : > { %v5927_v28 = vadd.f32 %v12481_v37, %v5814_v29  ;;  %v7412_v37 = vunpack.i.h.bf16 %v7410_v51  ;;  %v7420_v49 = vpop.permute.xlu2 %7419  ;;  %v7425_v63 = vpop.permute.xlu0 %7424  ;;  %v5493_v30 = vsel %vm346_vm0, %v11211_v45, %v7417_v44 }
 0x6f0   : > { %5750 = vmatmul.f32.gmra.mxu0 %v5458_v19  ;;  %v7422_v13 = vunpack.i.h.bf16 %v7420_v49  ;;  %v7430_v57 = vpop.permute.xlu1 %7429  ;;  %v7427_v47 = vunpack.i.h.bf16 %v7425_v63  ;;  %v7426_v54 = vunpack.i.l.bf16 %v7425_v63 }
 0x6f1   : > { %v6008_v23 = vadd.f32 %v7497_v36, %v5927_v28  ;;  %5863 = vmatmul.f32.gmra.mxu3 %v5554_v2  ;;  %v5459_v38 = vsel %vm3484_vm4, %v5427_v34, %v7412_v37  ;;  %v7432_v29 = vunpack.i.h.bf16 %v7430_v57  ;;  %v7431_v1 = vunpack.i.l.bf16 %v7430_v57  ;;  %v14384_v2 = vld [vmem:[#allocation227_spill] sm:$0xff] }
 0x6f2   : > { %v5428_v11 = vsel %vm3451_vm3, %v14383_v62, %v7422_v13 }
 0x6f3   : > { %v6040_v24 = vmax.f32 %v6008_v23, 0.0  ;;  %v5460_v56 = vsel %vm3484_vm4, %v5428_v11, %v7427_v47  ;;  %v5429_v36 = vsel %vm3451_vm3, %v14384_v2, %v7432_v29  ;;  %v12616_v23 = vpop.f32.mrf.mxu1  ;;  %v5525_v18 = vsel %vm3451_vm3, %v5493_v30, %v7431_v1  ;;  %v14386_v29 = vld [vmem:[#allocation325_spill] sm:$0xff]  ;;  %v7502_v2 = vld [vmem:[%s7613_s22 + $0x60] sm:$0xff] }
 0x6f4   : > { %v5816_v17 = vpop.f32.mrf.mxu3 }
 0x6f5   : > { %6072 = vst.msk [vmem:[%s12470_s15 + $0x38] sm:$0xff] %vm346_vm0, %v6040_v24  ;;  %v5817_v58 = vadd.f32 %v5816_v17, %v5704_v26  ;;  %v5706_v48 = vpop.f32.mrf.mxu0 }
 0x6f6   : > { %v5707_v50 = vadd.f32 %v12447_v55, %v5706_v48 }
 0x6f7   : > { %v5930_v20 = vadd.f32 %v12501_v46, %v5817_v58  ;;  %v7421_v46 = vunpack.i.l.bf16 %v7420_v49  ;;  %v7435_v21 = vpop.permute.xlu2 %7434  ;;  %v7440_v8 = vpop.permute.xlu0 %7439 }
 0x6f8   : > { %5753 = vmatmul.f32.gmra.mxu0 %v5459_v38  ;;  %v7445_v60 = vpop.permute.xlu1 %7444  ;;  %v7437_v59 = vunpack.i.h.bf16 %v7435_v21  ;;  %v7436_v37 = vunpack.i.l.bf16 %v7435_v21  ;;  %v7441_v17 = vunpack.i.l.bf16 %v7440_v8  ;;  %v14385_v38 = vld [vmem:[#allocation235_spill] sm:$0xff] }
 0x6f9   : > { %v6009_v61 = vadd.f32 %v7498_v41, %v5930_v20  ;;  %5866 = vmatmul.f32.gmra.mxu3 %v5555_v22  ;;  %v5524_v53 = vsel %vm3451_vm3, %v5492_v33, %v7421_v46  ;;  %v7447_v58 = vunpack.i.h.bf16 %v7445_v60  ;;  %v7446_v49 = vunpack.i.l.bf16 %v7445_v60 }
 0x6fa   : > { %v5556_v51 = vsel %vm3484_vm4, %v5524_v53, %v7426_v54  ;;  %v5461_v52 = vsel %vm3484_vm4, %v5429_v36, %v7437_v59  ;;  %v5557_v45 = vsel %vm3484_vm4, %v5525_v18, %v7436_v37  ;;  %v5494_v7 = vsel %vm346_vm0, %v11305_v27, %v7441_v17  ;;  %v14387_v17 = vld [vmem:[#allocation335_spill] sm:$0xff] }
 0x6fb   : > { %v6041_v16 = vmax.f32 %v6009_v61, 0.0  ;;  %v5526_v61 = vsel %vm3451_vm3, %v5494_v7, %v7446_v49  ;;  %v12633_v46 = vpop.f32.mrf.mxu1 }
 0x6fc   : > { %v5819_v32 = vpop.f32.mrf.mxu3 }
 0x6fd   : > { %6073 = vst.msk [vmem:[%s12470_s15 + $0x40] sm:$0xff] %vm346_vm0, %v6041_v16  ;;  %v5820_v15 = vadd.f32 %v5819_v32, %v5707_v50  ;;  %v5709_v25 = vpop.f32.mrf.mxu0  ;;  %v7501_v50 = vld [vmem:[%s7613_s22 + $0x58] sm:$0xff] }
 0x6fe   : > { %v5710_v19 = vadd.f32 %v12447_v55, %v5709_v25 }
 0x6ff   : > { %v5933_v42 = vadd.f32 %v12519_v43, %v5820_v15  ;;  %v7450_v4 = vpop.permute.xlu2 %7449  ;;  %v7455_v22 = vpop.permute.xlu0 %7454  ;;  %v7442_v15 = vunpack.i.h.bf16 %v7440_v8 }
 0x700   : > { %5756 = vmatmul.f32.gmra.mxu0 %v5460_v56  ;;  %v7452_v63 = vunpack.i.h.bf16 %v7450_v4  ;;  %v7451_v13 = vunpack.i.l.bf16 %v7450_v4  ;;  %v7460_v57 = vpop.permute.xlu1 %7459  ;;  %v7457_v53 = vunpack.i.h.bf16 %v7455_v22  ;;  %v7456_v54 = vunpack.i.l.bf16 %v7455_v22 }
 0x701   : > { %v6010_v6 = vadd.f32 %v7499_v35, %v5933_v42  ;;  %5869 = vmatmul.f32.gmra.mxu3 %v5556_v51  ;;  %v7462_v25 = vunpack.i.h.bf16 %v7460_v57  ;;  %v7461_v42 = vunpack.i.l.bf16 %v7460_v57  ;;  %v5495_v1 = vsel %vm346_vm0, %v10981_v39, %v7442_v15 }
 0x702   : > { %v5558_v27 = vsel %vm3484_vm4, %v5526_v61, %v7451_v13  ;;  %v5431_v51 = vsel %vm3451_vm3, %v14386_v29, %v7457_v53  ;;  %v7504_v53 = vld [vmem:[%s7613_s22 + $0x70] sm:$0xff] }
 0x703   : > { %v6042_v28 = vmax.f32 %v6010_v6, 0.0  ;;  %v5463_v8 = vsel %vm3484_vm4, %v5431_v51, %v7462_v25 }
 0x704   : > { %v5822_v43 = vpop.f32.mrf.mxu3 }
 0x705   : > { %6074 = vst.msk [vmem:[%s12470_s15 + $0x48] sm:$0xff] %vm346_vm0, %v6042_v28  ;;  %v5823_v31 = vadd.f32 %v5822_v43, %v5710_v19  ;;  %v5712_v24 = vpop.f32.mrf.mxu0  ;;  %v5527_v28 = vsel %vm3451_vm3, %v5495_v1, %v7456_v54  ;;  %v12650_v43 = vpop.f32.mrf.mxu1 }
 0x706   : > { %v5713_v9 = vadd.f32 %v12447_v55, %v5712_v24  ;;  %v5559_v60 = vsel %vm3484_vm4, %v5527_v28, %v7461_v42  ;;  %v7506_v28 = vld [vmem:[%s7613_s22 + $0x80] sm:$0xff] }
 0x707   : > { %v5936_v26 = vadd.f32 %v12539_v40, %v5823_v31  ;;  %v5430_v40 = vsel %vm3451_vm3, %v14385_v38, %v7447_v58  ;;  %v7470_v35 = vpop.permute.xlu0 %7469 }
 0x708   : > { %5759 = vmatmul.f32.gmra.mxu0 %v5461_v52  ;;  %v5462_v16 = vsel %vm3484_vm4, %v5430_v40, %v7452_v63  ;;  %v7475_v19 = vpop.permute.xlu1 %7474  ;;  %v7472_v59 = vunpack.i.h.bf16 %v7470_v35  ;;  %v7471_v39 = vunpack.i.l.bf16 %v7470_v35 }
 0x709   : > { %v6011_v48 = vadd.f32 %v7500_v0, %v5936_v26  ;;  %5872 = vmatmul.f32.gmra.mxu3 %v5557_v45  ;;  %v7477_v31 = vunpack.i.h.bf16 %v7475_v19  ;;  %v7476_v37 = vunpack.i.l.bf16 %v7475_v19 }
 0x70a   : > { %v5432_v58 = vsel %vm3451_vm3, %v14387_v17, %v7472_v59  ;;  %v7508_v17 = vld [vmem:[%s7613_s22 + $0x90] sm:$0xff] }
 0x70b   : > { %v6043_v34 = vmax.f32 %v6011_v48, 0.0  ;;  %v5464_v48 = vsel %vm3484_vm4, %v5432_v58, %v7477_v31 }
 0x70c   : > { %v5825_v20 = vpop.f32.mrf.mxu3 }
 0x70d   : > { %6075 = vst.msk [vmem:[%s12470_s15 + $0x50] sm:$0xff] %vm346_vm0, %v6043_v34  ;;  %v5826_v41 = vadd.f32 %v5825_v20, %v5713_v9  ;;  %v5715_v33 = vpop.f32.mrf.mxu0  ;;  %v7503_v9 = vld [vmem:[%s7613_s22 + $0x68] sm:$0xff]  ;;  %v5956_v7 = vpop.f32.mrf.mxu1 }
 0x70e   : > { %v5716_v11 = vadd.f32 %v12447_v55, %v5715_v33  ;;  %v14388_v33 = vld [vmem:[#allocation334_spill] sm:$0xff] }
 0x70f   : > { %v5939_v47 = vadd.f32 %v12558_v10, %v5826_v41  ;;  %v7465_v10 = vpop.permute.xlu2 %7464  ;;  %v5337_v61 = vpop.permute.xlu0 %5336 }
 0x710   : > { %5762 = vmatmul.f32.gmra.mxu0 %v5462_v16  ;;  %v7466_v30 = vunpack.i.l.bf16 %v7465_v10  ;;  %v7467_v38 = vunpack.i.h.bf16 %v7465_v10  ;;  %v7505_v10 = vld [vmem:[%s7613_s22 + $0x78] sm:$0xff] }
 0x711   : > { %v6012_v32 = vadd.f32 %v7501_v50, %v5939_v47  ;;  %5875 = vmatmul.f32.gmra.mxu3 %v5558_v27 }
 0x712   : > { %v5496_v45 = vsel %vm346_vm0, %v10942_v12, %v7466_v30  ;;  %v5497_v16 = vsel %vm346_vm0, %v14273_v3, %v7467_v38 }
 0x713   : > { %v6044_v62 = vmax.f32 %v6012_v32, 0.0  ;;  %v5528_v4 = vsel %vm3451_vm3, %v5496_v45, %v7471_v39  ;;  %v7507_v39 = vld [vmem:[%s7613_s22 + $0x88] sm:$0xff] }
 0x714   : > { %v5828_v56 = vpop.f32.mrf.mxu3  ;;  %v5560_v34 = vsel %vm3484_vm4, %v5528_v4, %v7476_v37 }
 0x715   : > { %6076 = vst.msk [vmem:[%s12470_s15 + $0x58] sm:$0xff] %vm346_vm0, %v6044_v62  ;;  %v5829_v21 = vadd.f32 %v5828_v56, %v5716_v11  ;;  %v5718_v44 = vpop.f32.mrf.mxu0 }
 0x716   : > { %v5719_v18 = vadd.f32 %v12447_v55, %v5718_v44 }
 0x717   : > { %v5942_v6 = vadd.f32 %v12579_v5, %v5829_v21  ;;  %v7480_v49 = vpop.permute.xlu2 %7479 }
 0x718   : > { %5765 = vmatmul.f32.gmra.mxu0 %v5463_v8  ;;  %v7482_v40 = vunpack.i.h.bf16 %v7480_v49  ;;  %v7481_v63 = vunpack.i.l.bf16 %v7480_v49 }
 0x719   : > { %v6013_v36 = vadd.f32 %v7502_v2, %v5942_v6  ;;  %5878 = vmatmul.f32.gmra.mxu3 %v5559_v60 }
 0x71a   : > { %v5433_v47 = vsel %vm3451_vm3, %v14388_v33, %v7482_v40  ;;  %v5529_v32 = vsel %vm3451_vm3, %v5497_v16, %v7481_v63 }
 0x71b   : > { %v6045_v5 = vmax.f32 %v6013_v36, 0.0  ;;  %v5561_v15 = vsel %vm3484_vm4, %v5529_v32, %v5337_v61  ;;  %v7510_v61 = vld [vmem:[%s7613_s22 + $0xa0] sm:$0xff] }
 0x71c   : > { %v5831_v24 = vpop.f32.mrf.mxu3 }
 0x71d   : > { %6077 = vst.msk [vmem:[%s12470_s15 + $0x60] sm:$0xff] %vm346_vm0, %v6045_v5  ;;  %v5832_v26 = vadd.f32 %v5831_v24, %v5719_v18  ;;  %v5721_v52 = vpop.f32.mrf.mxu0 }
 0x71e   : > { %v5722_v22 = vadd.f32 %v12447_v55, %v5721_v52 }
 0x71f   : > { %v5945_v0 = vadd.f32 %v12598_v14, %v5832_v26  ;;  %v4953_v14 = vpop.permute.xlu1 %4952 }
 0x720   : > { %5768 = vmatmul.f32.gmra.mxu0 %v5464_v48  ;;  %v5465_v50 = vsel %vm3484_vm4, %v5433_v47, %v4953_v14 }
 0x721   : > { %v6014_v20 = vadd.f32 %v7503_v9, %v5945_v0  ;;  %5881 = vmatmul.f32.gmra.mxu3 %v5560_v34 }
 0x723   : > { %v6046_v12 = vmax.f32 %v6014_v20, 0.0  ;;  %v7509_v20 = vld [vmem:[%s7613_s22 + $0x98] sm:$0xff] }
 0x724   : > { %v5834_v41 = vpop.f32.mrf.mxu3 }
 0x725   : > { %6078 = vst.msk [vmem:[%s12470_s15 + $0x68] sm:$0xff] %vm346_vm0, %v6046_v12  ;;  %v5835_v13 = vadd.f32 %v5834_v41, %v5722_v22  ;;  %v5724_v57 = vpop.f32.mrf.mxu0 }
 0x726   : > { %v5725_v62 = vadd.f32 %v12447_v55, %v5724_v57 }
 0x727   : > { %v5948_v27 = vadd.f32 %v12616_v23, %v5835_v13  ;;  %v5959_v23 = vpop.f32.mrf.mxu1 }
 0x728   : > { %5771 = vmatmul.f32.gmra.mxu0 %v5465_v50 }
 0x729   : > { %v6015_v54 = vadd.f32 %v7504_v53, %v5948_v27  ;;  %5884 = vmatmul.f32.gmra.mxu3 %v5561_v15  ;;  %v7511_v15 = vld [vmem:[%s7613_s22 + $0xa8] sm:$0xff] }
 0x72b   : > { %v6047_v25 = vmax.f32 %v6015_v54, 0.0 }
 0x72c   : > { %v5837_v11 = vpop.f32.mrf.mxu3 }
 0x72d   : > { %6079 = vst.msk [vmem:[%s12470_s15 + $0x70] sm:$0xff] %vm346_vm0, %v6047_v25  ;;  %v5838_v3 = vadd.f32 %v5837_v11, %v5725_v62  ;;  %v5727_v42 = vpop.f32.mrf.mxu0 }
 0x72e   : > { %v5728_v29 = vadd.f32 %v12447_v55, %v5727_v42  ;;  %v7512_v42 = vld [vmem:[%s7613_s22 + $0xb0] sm:$0xff] }
 0x72f   : > { %v5951_v56 = vadd.f32 %v12633_v46, %v5838_v3  ;;  %v5962_v8 = vpop.f32.mrf.mxu1 }
 0x731   : > { %v6016_v21 = vadd.f32 %v7505_v10, %v5951_v56 }
 0x733   : > { %v6048_v44 = vmax.f32 %v6016_v21, 0.0 }
 0x734   : > { %v5840_v51 = vpop.f32.mrf.mxu3 }
 0x735   : > { %6080 = vst.msk [vmem:[%s12470_s15 + $0x78] sm:$0xff] %vm346_vm0, %v6048_v44  ;;  %v5841_v1 = vadd.f32 %v5840_v51, %v5728_v29  ;;  %v5730_v35 = vpop.f32.mrf.mxu0 }
 0x736   : > { %v5731_v46 = vadd.f32 %v12447_v55, %v5730_v35 }
 0x737   : > { %v5954_v6 = vadd.f32 %v12650_v43, %v5841_v1  ;;  %v5965_v5 = vpop.f32.mrf.mxu1 }
 0x739   : > { %v6017_v19 = vadd.f32 %v7506_v28, %v5954_v6  ;;  %v7513_v6 = vld [vmem:[%s7613_s22 + $0xb8] sm:$0xff] }
 0x73b   : > { %v6049_v60 = vmax.f32 %v6017_v19, 0.0 }
 0x73c   : > { %v5843_v2 = vpop.f32.mrf.mxu3 }
 0x73d   : > { %6081 = vst.msk [vmem:[%s12470_s15 + $0x80] sm:$0xff] %vm346_vm0, %v6049_v60  ;;  %v5844_v36 = vadd.f32 %v5843_v2, %v5731_v46  ;;  %v5733_v30 = vpop.f32.mrf.mxu0 }
 0x73e   : > { %v5734_v43 = vadd.f32 %v12447_v55, %v5733_v30 }
 0x73f   : > { %v5957_v59 = vadd.f32 %v5956_v7, %v5844_v36  ;;  %v5968_v0 = vpop.f32.mrf.mxu1 }
 0x741   : > { %v6018_v31 = vadd.f32 %v7507_v39, %v5957_v59  ;;  %v7514_v59 = vld [vmem:[%s7613_s22 + $0xc0] sm:$0xff] }
 0x743   : > { %v6050_v18 = vmax.f32 %v6018_v31, 0.0 }
 0x744   : > { %v5846_v37 = vpop.f32.mrf.mxu3 }
 0x745   : > { %6082 = vst.msk [vmem:[%s12470_s15 + $0x88] sm:$0xff] %vm346_vm0, %v6050_v18  ;;  %v5847_v24 = vadd.f32 %v5846_v37, %v5734_v43  ;;  %v5736_v26 = vpop.f32.mrf.mxu0 }
 0x746   : > { %v5737_v49 = vadd.f32 %v12447_v55, %v5736_v26 }
 0x747   : > { %v5960_v52 = vadd.f32 %v5959_v23, %v5847_v24  ;;  %v5971_v22 = vpop.f32.mrf.mxu1 }
 0x749   : > { %v6019_v58 = vadd.f32 %v7508_v17, %v5960_v52  ;;  %v7515_v52 = vld [vmem:[%s7613_s22 + $0xc8] sm:$0xff] }
 0x74b   : > { %v6051_v45 = vmax.f32 %v6019_v58, 0.0 }
 0x74c   : > { %v5849_v48 = vpop.f32.mrf.mxu3 }
 0x74d   : > { %6083 = vst.msk [vmem:[%s12470_s15 + $0x90] sm:$0xff] %vm346_vm0, %v6051_v45  ;;  %v5850_v4 = vadd.f32 %v5849_v48, %v5737_v49  ;;  %v5739_v34 = vpop.f32.mrf.mxu0 }
 0x74e   : > { %v5740_v7 = vadd.f32 %v12447_v55, %v5739_v34 }
 0x74f   : > { %v5963_v9 = vadd.f32 %v5962_v8, %v5850_v4  ;;  %v5974_v32 = vpop.f32.mrf.mxu1 }
 0x751   : > { %v6020_v38 = vadd.f32 %v7509_v20, %v5963_v9  ;;  %v7516_v9 = vld [vmem:[%s7613_s22 + $0xd0] sm:$0xff] }
 0x753   : > { %v6052_v40 = vmax.f32 %v6020_v38, 0.0 }
 0x754   : > { %v5852_v63 = vpop.f32.mrf.mxu3 }
 0x755   : > { %6084 = vst.msk [vmem:[%s12470_s15 + $0x98] sm:$0xff] %vm346_vm0, %v6052_v40  ;;  %v5853_v12 = vadd.f32 %v5852_v63, %v5740_v7  ;;  %v5742_v14 = vpop.f32.mrf.mxu0 }
 0x756   : > { %v5743_v33 = vadd.f32 %v12447_v55, %v5742_v14  ;;  %v7517_v14 = vld [vmem:[%s7613_s22 + $0xd8] sm:$0xff] }
 0x757   : > { %v5966_v41 = vadd.f32 %v5965_v5, %v5853_v12  ;;  %v5977_v10 = vpop.f32.mrf.mxu1 }
 0x759   : > { %v6021_v13 = vadd.f32 %v7510_v61, %v5966_v41 }
 0x75b   : > { %v6053_v57 = vmax.f32 %v6021_v13, 0.0 }
 0x75c   : > { %v5855_v47 = vpop.f32.mrf.mxu3 }
 0x75d   : > { %6085 = vst.msk [vmem:[%s12470_s15 + $0xa0] sm:$0xff] %vm346_vm0, %v6053_v57  ;;  %v5856_v16 = vadd.f32 %v5855_v47, %v5743_v33  ;;  %v5745_v27 = vpop.f32.mrf.mxu0 }
 0x75e   : > { %v5746_v25 = vadd.f32 %v12447_v55, %v5745_v27 }
 0x75f   : > { %v5969_v50 = vadd.f32 %v5968_v0, %v5856_v16  ;;  %v5980_v60 = vpop.f32.mrf.mxu1 }
 0x761   : > { %v6022_v53 = vadd.f32 %v7511_v15, %v5969_v50  ;;  %v7518_v50 = vld [vmem:[%s7613_s22 + $0xe0] sm:$0xff] }
 0x763   : > { %v6054_v54 = vmax.f32 %v6022_v53, 0.0 }
 0x764   : > { %v5858_v62 = vpop.f32.mrf.mxu3 }
 0x765   : > { %6086 = vst.msk [vmem:[%s12470_s15 + $0xa8] sm:$0xff] %vm346_vm0, %v6054_v54  ;;  %v5859_v11 = vadd.f32 %v5858_v62, %v5746_v25  ;;  %v5748_v3 = vpop.f32.mrf.mxu0 }
 0x766   : > { %v5749_v44 = vadd.f32 %v12447_v55, %v5748_v3 }
 0x767   : > { %v5972_v23 = vadd.f32 %v5971_v22, %v5859_v11  ;;  %v5983_v37 = vpop.f32.mrf.mxu1 }
 0x769   : > { %v6023_v56 = vadd.f32 %v7512_v42, %v5972_v23  ;;  %v7519_v23 = vld [vmem:[%s7613_s22 + $0xe8] sm:$0xff] }
 0x76b   : > { %v6055_v21 = vmax.f32 %v6023_v56, 0.0 }
 0x76c   : > { %v5861_v29 = vpop.f32.mrf.mxu3 }
 0x76d   : > { %6087 = vst.msk [vmem:[%s12470_s15 + $0xb0] sm:$0xff] %vm346_vm0, %v6055_v21  ;;  %v5862_v51 = vadd.f32 %v5861_v29, %v5749_v44  ;;  %v5751_v1 = vpop.f32.mrf.mxu0 }
 0x76e   : > { %v5752_v19 = vadd.f32 %v12447_v55, %v5751_v1 }
 0x76f   : > { %v5975_v35 = vadd.f32 %v5974_v32, %v5862_v51  ;;  %v5986_v34 = vpop.f32.mrf.mxu1 }
 0x771   : > { %v6024_v8 = vadd.f32 %v7513_v6, %v5975_v35  ;;  %v7520_v35 = vld [vmem:[%s7613_s22 + $0xf0] sm:$0xff] }
 0x773   : > { %v6056_v28 = vmax.f32 %v6024_v8, 0.0 }
 0x774   : > { %v5864_v46 = vpop.f32.mrf.mxu3 }
 0x775   : > { %6088 = vst.msk [vmem:[%s12470_s15 + $0xb8] sm:$0xff] %vm346_vm0, %v6056_v28  ;;  %v5865_v2 = vadd.f32 %v5864_v46, %v5752_v19  ;;  %v5754_v36 = vpop.f32.mrf.mxu0  ;;  %v5998_v46 = vpop.f32.mrf.mxu2 }
 0x776   : > { %v5755_v5 = vadd.f32 %v12447_v55, %v5754_v36  ;;  %v7521_v36 = vld [vmem:[%s7613_s22 + $0xf8] sm:$0xff] }
 0x777   : > { %v5978_v30 = vadd.f32 %v5977_v10, %v5865_v2  ;;  %v5989_v61 = vpop.f32.mrf.mxu1 }
 0x779   : > { %v6025_v39 = vadd.f32 %v7514_v59, %v5978_v30 }
 0x77b   : > { %v6057_v31 = vmax.f32 %v6025_v39, 0.0 }
 0x77c   : > { %v5867_v18 = vpop.f32.mrf.mxu3 }
 0x77d   : > { %6089 = vst.msk [vmem:[%s12470_s15 + $0xc0] sm:$0xff] %vm346_vm0, %v6057_v31  ;;  %v5868_v43 = vadd.f32 %v5867_v18, %v5755_v5  ;;  %v5757_v24 = vpop.f32.mrf.mxu0 }
 0x77e   : > { %v5758_v45 = vadd.f32 %v12447_v55, %v5757_v24 }
 0x77f   : > { %v5981_v26 = vadd.f32 %v5980_v60, %v5868_v43  ;;  %v5992_v54 = vpop.f32.mrf.mxu1 }
 0x781   : > { %v6026_v17 = vadd.f32 %v7515_v52, %v5981_v26 }
 0x783   : > { %v6058_v58 = vmax.f32 %v6026_v17, 0.0 }
 0x784   : > { %v5870_v49 = vpop.f32.mrf.mxu3 }
 0x785   : > { %6090 = vst.msk [vmem:[%s12470_s15 + $0xc8] sm:$0xff] %vm346_vm0, %v6058_v58  ;;  %v5871_v0 = vadd.f32 %v5870_v49, %v5758_v45  ;;  %v5760_v48 = vpop.f32.mrf.mxu0 }
 0x786   : > { %v5761_v40 = vadd.f32 %v12447_v55, %v5760_v48 }
 0x787   : > { %v5984_v4 = vadd.f32 %v5983_v37, %v5871_v0  ;;  %v5995_v29 = vpop.f32.mrf.mxu1 }
 0x789   : > { %v6027_v20 = vadd.f32 %v7516_v9, %v5984_v4 }
 0x78b   : > { %v6059_v38 = vmax.f32 %v6027_v20, 0.0 }
 0x78c   : > { %v5873_v7 = vpop.f32.mrf.mxu3 }
 0x78d   : > { %6091 = vst.msk [vmem:[%s12470_s15 + $0xd0] sm:$0xff] %vm346_vm0, %v6059_v38  ;;  %v5874_v63 = vadd.f32 %v5873_v7, %v5761_v40  ;;  %v5763_v12 = vpop.f32.mrf.mxu0 }
 0x78e   : > { %v5764_v57 = vadd.f32 %v12447_v55, %v5763_v12 }
 0x78f   : > { %v5987_v22 = vadd.f32 %v5986_v34, %v5874_v63 }
 0x791   : > { %v6028_v41 = vadd.f32 %v7517_v14, %v5987_v22 }
 0x793   : > { %v6060_v13 = vmax.f32 %v6028_v41, 0.0 }
 0x794   : > { %v5876_v33 = vpop.f32.mrf.mxu3 }
 0x795   : > { %6092 = vst.msk [vmem:[%s12470_s15 + $0xd8] sm:$0xff] %vm346_vm0, %v6060_v13  ;;  %v5877_v47 = vadd.f32 %v5876_v33, %v5764_v57  ;;  %v5766_v16 = vpop.f32.mrf.mxu0 }
 0x796   : > { %v5767_v53 = vadd.f32 %v12447_v55, %v5766_v16 }
 0x797   : > { %v5990_v27 = vadd.f32 %v5989_v61, %v5877_v47 }
 0x799   : > { %v6029_v32 = vadd.f32 %v7518_v50, %v5990_v27 }
 0x79b   : > { %v6061_v15 = vmax.f32 %v6029_v32, 0.0 }
 0x79c   : > { %v5879_v25 = vpop.f32.mrf.mxu3 }
 0x79d   : > { %6093 = vst.msk [vmem:[%s12470_s15 + $0xe0] sm:$0xff] %vm346_vm0, %v6061_v15  ;;  %v5880_v62 = vadd.f32 %v5879_v25, %v5767_v53  ;;  %v5769_v11 = vpop.f32.mrf.mxu0 }
 0x79e   : > { %v5770_v10 = vadd.f32 %v12447_v55, %v5769_v11 }
 0x79f   : > { %v5993_v3 = vadd.f32 %v5992_v54, %v5880_v62 }
 0x7a1   : > { %v6030_v42 = vadd.f32 %v7519_v23, %v5993_v3 }
 0x7a3   : > { %v6062_v56 = vmax.f32 %v6030_v42, 0.0 }
 0x7a4   : > { %v5882_v21 = vpop.f32.mrf.mxu3 }
 0x7a5   : > { %6094 = vst.msk [vmem:[%s12470_s15 + $0xe8] sm:$0xff] %vm346_vm0, %v6062_v56  ;;  %v5883_v44 = vadd.f32 %v5882_v21, %v5770_v10  ;;  %v5772_v1 = vpop.f32.mrf.mxu0 }
 0x7a6   : > { %v5773_v28 = vadd.f32 %v12447_v55, %v5772_v1 }
 0x7a7   : > { %v5996_v51 = vadd.f32 %v5995_v29, %v5883_v44 }
 0x7a9   : > { %v6031_v6 = vadd.f32 %v7520_v35, %v5996_v51 }
 0x7ab   : > { %v6063_v8 = vmax.f32 %v6031_v6, 0.0 }
 0x7ac   : > { %v5885_v19 = vpop.f32.mrf.mxu3 }
 0x7ad   : > { %6095 = vst.msk [vmem:[%s12470_s15 + $0xf0] sm:$0xff] %vm346_vm0, %v6063_v8  ;;  %v5886_v60 = vadd.f32 %v5885_v19, %v5773_v28 }
 0x7af   : > { %v5999_v2 = vadd.f32 %v5998_v46, %v5886_v60 }
 0x7b1   : > { %v6032_v30 = vadd.f32 %v7521_v36, %v5999_v2 }
 0x7b3   : > { %v6064_v59 = vmax.f32 %v6032_v30, 0.0 }
 0x7b5   : > { %6096 = vst.msk [vmem:[%s12470_s15 + $0xf8] sm:$0xff] %vm346_vm0, %v6064_v59 }
 0x7b6 PF: > { %s18_s27 = sadd.s32 1, %s7528_s27  }
 0x7b7   : > { %p15_p4 = scmp.ge.s32.totalorder %s18_s27, 4  }
 0x7b9   :  { %17 = sbr.rel (!%p15_p4) target bundleno = 1 (0x1), region = 89 }

</bundles_post_ra>
